<compile_context>
chip_gen: v7x
topology: tpu7x:2x2x1
jax: 0.10.0
libtpu: 0.0.40
codegen_flags: <defaults>
</compile_context>

<pallas_src>
import random
from functools import partial

import jax
import jax.numpy as jnp
from jax.experimental import pallas as pl
from jax.experimental.pallas import tpu as pltpu


# ----------------------------------------------------------------------------
# Fused forward kernel factory
# ----------------------------------------------------------------------------
def _make_fused_kernel(n_layers, hid, out_dim):
    def kernel(src_ref, trg_ref, tf_ref,          # SMEM (scalar prefetch)
               enc_emb_ref, dec_emb_ref, *refs):  # VMEM weights + output
        # refs = enc (wih, whh, b)*L, dec (wih, whh, b)*L, fc_w, fc_b, out
        enc_w = refs[0:3 * n_layers]
        dec_w = refs[3 * n_layers:6 * n_layers]
        fc_w_ref = refs[6 * n_layers]
        fc_b_ref = refs[6 * n_layers + 1]
        out_ref = refs[6 * n_layers + 2]

        S, Bp = src_ref.shape
        T = trg_ref.shape[0]
        Vin = enc_emb_ref.shape[0]
        Vout = dec_emb_ref.shape[0]
        f32, bf16 = jnp.float32, jnp.bfloat16

        # --- iotas / masks hoisted out of every loop (no CSE of broadcasts) --
        row_col = jax.lax.broadcasted_iota(jnp.int32, (Bp, 1), 0)
        lane_in = jax.lax.broadcasted_iota(jnp.int32, (Bp, Vin), 1)
        lane_out = jax.lax.broadcasted_iota(jnp.int32, (Bp, Vout), 1)
        lane_4h = jax.lax.broadcasted_iota(jnp.int32, (Bp, 4 * hid), 1)
        is_g = jnp.logical_and(lane_4h >= 2 * hid, lane_4h < 3 * hid)

        def token_onehot(tok_ref, step, lane):
            # Build a [Bp, V] one-hot from SMEM token ids: replaces the
            # jnp.take / jax.nn.one_hot glue that previously ran outside.
            col = jnp.zeros((Bp, 1), jnp.int32)
            for b in range(Bp):                       # Bp static (=8)
                col = jnp.where(row_col == b, tok_ref[step, b], col)
            return (lane == col).astype(f32)

        def lstm_cell(x, h, c, wih_ref, whh_ref, b_ref):
            # bf16 operands into the MXU, f32 accumulation + f32 elementwise.
            gates = (jnp.dot(x.astype(bf16), wih_ref[...],
                             preferred_element_type=f32)
                     + jnp.dot(h.astype(bf16), whh_ref[...],
                               preferred_element_type=f32)
                     + b_ref[...])                              # [Bp, 4H]
            # One EUP push per gate tile: sigmoid(x) = 0.5*(1 + tanh(x/2)).
            pre = jnp.where(is_g, gates, 0.5 * gates)
            th = jnp.tanh(pre)
            act = jnp.where(is_g, th, 0.5 + 0.5 * th)
            i = act[:, 0 * hid:1 * hid]
            f = act[:, 1 * hid:2 * hid]
            g = act[:, 2 * hid:3 * hid]
            o = act[:, 3 * hid:4 * hid]
            c_new = f * c + i * g
            h_new = o * jnp.tanh(c_new)
            return h_new, c_new

        # ----------------- Encoder: all timesteps, unrolled in-kernel --------
        h = [jnp.zeros((Bp, hid), f32) for _ in range(n_layers)]
        c = [jnp.zeros((Bp, hid), f32) for _ in range(n_layers)]
        for t in range(S):
            oh = token_onehot(src_ref, t, lane_in)
            x = jnp.dot(oh.astype(bf16), enc_emb_ref[...],
                        preferred_element_type=f32)             # [Bp, E]
            for l in range(n_layers):
                h[l], c[l] = lstm_cell(x, h[l], c[l],
                                       enc_w[3 * l], enc_w[3 * l + 1],
                                       enc_w[3 * l + 2])
                x = h[l]

        # ----------------- Decoder: enc state handed over in registers -------
        out_ref[0] = jnp.zeros((Bp, Vout), f32)    # outputs[0] stays zero
        prev_oh = jnp.zeros((Bp, Vout), f32)
        for s in range(T - 1):
            trg_oh = token_onehot(trg_ref, s, lane_out)
            if s == 0:                              # first step always trg[0]
                oh = trg_oh
            else:                                   # teacher forcing select
                oh = jnp.where(tf_ref[s] != 0, trg_oh, prev_oh)
            x = jnp.dot(oh.astype(bf16), dec_emb_ref[...],
                        preferred_element_type=f32)             # [Bp, E]
            for l in range(n_layers):
                h[l], c[l] = lstm_cell(x, h[l], c[l],
                                       dec_w[3 * l], dec_w[3 * l + 1],
                                       dec_w[3 * l + 2])
                x = h[l]
            logits = (jnp.dot(x.astype(bf16), fc_w_ref[...],
                              preferred_element_type=f32)
                      + fc_b_ref[...])                           # [Bp, Vp]
            out_ref[s + 1] = logits
            # argmax over the UNPADDED vocab (first-max tie-break), kept as a
            # one-hot so the next step's embedding is a plain MXU matmul.
            masked = jnp.where(lane_out < out_dim, logits, jnp.float32(-1e30))
            row_max = jnp.max(masked, axis=1, keepdims=True)
            cand = jnp.where(masked >= row_max, lane_out, jnp.int32(Vout))
            top1 = jnp.min(cand, axis=1, keepdims=True)          # [Bp, 1]
            prev_oh = (lane_out == top1).astype(f32)

    return kernel


# ----------------------------------------------------------------------------
# Wrapper: single pallas_call, scalar-prefetched tokens, resident weights
# ----------------------------------------------------------------------------
@partial(jax.jit, static_argnames=("hid_dim", "n_layers", "output_dim",
                                   "batch_real"))
def seq2seq_forward(params, src, trg, use_trg, *, hid_dim, n_layers,
                    output_dim, batch_real):
    """src: [S, Bp] int32, trg: [T, Bp] int32, use_trg: [T-1] int32.
    Returns [T, batch_real, output_dim] f32 logits (row 0 zeros)."""
    S, Bp = src.shape
    T = trg.shape[0]
    Vout = params["dec_emb_p"].shape[0]

    def w2d(i, src_r, trg_r, tf_r):
        return (0, 0)

    def o3d(i, src_r, trg_r, tf_r):
        return (0, 0, 0)

    inputs = [params["enc_emb_p"], params["dec_emb_p"]]
    in_specs = [pl.BlockSpec(params["enc_emb_p"].shape, w2d),
                pl.BlockSpec(params["dec_emb_p"].shape, w2d)]
    for which in ("enc_lstm", "dec_lstm"):
        for (wih_t, whh_t, b) in params[which]:
            for w in (wih_t, whh_t, b):
                inputs.append(w)
                in_specs.append(pl.BlockSpec(w.shape, w2d))
    inputs += [params["fc_w_p"], params["fc_b_p"]]
    in_specs += [pl.BlockSpec(params["fc_w_p"].shape, w2d),
                 pl.BlockSpec(params["fc_b_p"].shape, w2d)]

    out = pl.pallas_call(
        _make_fused_kernel(n_layers, hid_dim, output_dim),
        out_shape=jax.ShapeDtypeStruct((T, Bp, Vout), jnp.float32),
        grid_spec=pltpu.PrefetchScalarGridSpec(
            num_scalar_prefetch=3,            # src, trg, use_trg -> SMEM
            grid=(1,),                        # single launch, loops in-kernel
            in_specs=in_specs,
            out_specs=pl.BlockSpec((T, Bp, Vout), o3d),
            scratch_shapes=[]),
        compiler_params=pltpu.CompilerParams(
            dimension_semantics=("arbitrary",)),
    )(src, trg, use_trg, *inputs)

    # Strip batch / vocab padding (outputs[0] is already zero, as in PyTorch).
    return out[:, :batch_real, :output_dim]


# ----------------------------------------------------------------------------
# Parameter construction (deterministic, synthetic); bf16 MXU operands,
# f32 biases.  LSTM/FC weights stored pre-transposed [in_features, out].
# ----------------------------------------------------------------------------
def _init(key, shape, scale=0.1):
    return scale * jax.random.normal(key, shape, dtype=jnp.float32)


def make_params(key, input_dim, output_dim, emb_dim, hid_dim, n_layers,
                in_vocab_pad, out_vocab_pad):
    keys = iter(jax.random.split(key, 4 + 8 * n_layers))
    enc_emb = _init(next(keys), (input_dim, emb_dim))
    dec_emb = _init(next(keys), (output_dim, emb_dim))
    fc_w = _init(next(keys), (hid_dim, output_dim))
    fc_b = _init(next(keys), (1, output_dim))
    params = {
        "enc_emb_p": jnp.zeros((in_vocab_pad, emb_dim), jnp.float32)
                        .at[:input_dim].set(enc_emb).astype(jnp.bfloat16),
        "dec_emb_p": jnp.zeros((out_vocab_pad, emb_dim), jnp.float32)
                        .at[:output_dim].set(dec_emb).astype(jnp.bfloat16),
        "fc_w_p": jnp.zeros((hid_dim, out_vocab_pad), jnp.float32)
                        .at[:, :output_dim].set(fc_w).astype(jnp.bfloat16),
        "fc_b_p": jnp.zeros((1, out_vocab_pad), jnp.float32)
                        .at[:, :output_dim].set(fc_b),       # bias stays f32
        "enc_lstm": [],
        "dec_lstm": [],
    }
    for which in ("enc_lstm", "dec_lstm"):
        for layer in range(n_layers):
            in_dim = emb_dim if layer == 0 else hid_dim
            wih_t = _init(next(keys), (in_dim, 4 * hid_dim)).astype(jnp.bfloat16)
            whh_t = _init(next(keys), (hid_dim, 4 * hid_dim)).astype(jnp.bfloat16)
            bih = _init(next(keys), (1, 4 * hid_dim))
            bhh = _init(next(keys), (1, 4 * hid_dim))
            params[which].append((wih_t, whh_t, bih + bhh))   # bias pre-summed, f32
    return params


# ----------------------------------------------------------------------------
if __name__ == "__main__":
    random.seed(0)  # deterministic host-side teacher-forcing coin flips
    key = jax.random.PRNGKey(0)

    INPUT_DIM = 10    # encoder vocab
    OUTPUT_DIM = 12   # decoder vocab
    EMB_DIM = 16
    HID_DIM = 32
    N_LAYERS = 2
    SRC_LEN, TRG_LEN, BATCH = 6, 7, 2

    IN_VOCAB_PAD = 128    # full lane width for the encoder one-hot embedding
    OUT_VOCAB_PAD = 128   # full lane width for FC / argmax / decoder one-hot
    BATCH_PAD = 8         # full sublane group (padded rows sliced away)

    kp, ks, kt = jax.random.split(key, 3)
    params = make_params(kp, INPUT_DIM, OUTPUT_DIM, EMB_DIM, HID_DIM,
                         N_LAYERS, IN_VOCAB_PAD, OUT_VOCAB_PAD)
    src = jax.random.randint(ks, (SRC_LEN, BATCH), 0, INPUT_DIM, dtype=jnp.int32)
    trg = jax.random.randint(kt, (TRG_LEN, BATCH), 0, OUTPUT_DIM, dtype=jnp.int32)

    src_p = jnp.pad(src, ((0, 0), (0, BATCH_PAD - BATCH)))
    trg_p = jnp.pad(trg, ((0, 0), (0, BATCH_PAD - BATCH)))

    # Teacher-forcing decisions precomputed on the host (one coin per PyTorch
    # decode iteration); step 0 always consumes trg[0].
    ratio = 0.5
    coins = [int(random.random() < ratio) for _ in range(1, TRG_LEN)]
    use_trg = jnp.asarray([1] + coins[:TRG_LEN - 2], dtype=jnp.int32)  # [T-1]

    out = seq2seq_forward(params, src_p, trg_p, use_trg,
                          hid_dim=HID_DIM, n_layers=N_LAYERS,
                          output_dim=OUTPUT_DIM, batch_real=BATCH)
    out = jax.block_until_ready(out)
    assert out.shape == (TRG_LEN, BATCH, OUTPUT_DIM)
    assert bool(jnp.all(out[0] == 0.0))
    assert bool(jnp.all(jnp.isfinite(out)))
    print("KERNEL_OK")
</pallas_src>

<mosaic_0001>
module attributes {stable_mosaic.version = 11 : i64} {
  func.func @kernel(%arg0: i32, %arg1: memref<6x8xi32, #tpu.memory_space<smem>>, %arg2: memref<7x8xi32, #tpu.memory_space<smem>>, %arg3: memref<6xi32, #tpu.memory_space<smem>>, %arg4: memref<128x16xbf16, #tpu.memory_space<vmem>>, %arg5: memref<128x16xbf16, #tpu.memory_space<vmem>>, %arg6: memref<16x128xbf16, #tpu.memory_space<vmem>>, %arg7: memref<32x128xbf16, #tpu.memory_space<vmem>>, %arg8: memref<1x128xf32, #tpu.memory_space<vmem>>, %arg9: memref<32x128xbf16, #tpu.memory_space<vmem>>, %arg10: memref<32x128xbf16, #tpu.memory_space<vmem>>, %arg11: memref<1x128xf32, #tpu.memory_space<vmem>>, %arg12: memref<16x128xbf16, #tpu.memory_space<vmem>>, %arg13: memref<32x128xbf16, #tpu.memory_space<vmem>>, %arg14: memref<1x128xf32, #tpu.memory_space<vmem>>, %arg15: memref<32x128xbf16, #tpu.memory_space<vmem>>, %arg16: memref<32x128xbf16, #tpu.memory_space<vmem>>, %arg17: memref<1x128xf32, #tpu.memory_space<vmem>>, %arg18: memref<32x128xbf16, #tpu.memory_space<vmem>>, %arg19: memref<1x128xf32, #tpu.memory_space<vmem>>, %arg20: memref<7x8x128xf32, #tpu.memory_space<vmem>>) attributes {dimension_semantics = [#tpu.dimension_semantics<arbitrary>], iteration_bounds = array<i64: 1>, scalar_prefetch = 3 : i64, scratch_operands = 0 : i64, tpu.core_type = #tpu.core_type<tc>, window_params = [{pipeline_mode = #tpu.pipeline_mode<synchronous>, transform_indices = @transform_0, window_bounds = array<i64: 128, 16>}, {pipeline_mode = #tpu.pipeline_mode<synchronous>, transform_indices = @transform_1, window_bounds = array<i64: 128, 16>}, {pipeline_mode = #tpu.pipeline_mode<synchronous>, transform_indices = @transform_2, window_bounds = array<i64: 16, 128>}, {pipeline_mode = #tpu.pipeline_mode<synchronous>, transform_indices = @transform_3, window_bounds = array<i64: 32, 128>}, {pipeline_mode = #tpu.pipeline_mode<synchronous>, transform_indices = @transform_4, window_bounds = array<i64: 1, 128>}, {pipeline_mode = #tpu.pipeline_mode<synchronous>, transform_indices = @transform_5, window_bounds = array<i64: 32, 128>}, {pipeline_mode = #tpu.pipeline_mode<synchronous>, transform_indices = @transform_6, window_bounds = array<i64: 32, 128>}, {pipeline_mode = #tpu.pipeline_mode<synchronous>, transform_indices = @transform_7, window_bounds = array<i64: 1, 128>}, {pipeline_mode = #tpu.pipeline_mode<synchronous>, transform_indices = @transform_8, window_bounds = array<i64: 16, 128>}, {pipeline_mode = #tpu.pipeline_mode<synchronous>, transform_indices = @transform_9, window_bounds = array<i64: 32, 128>}, {pipeline_mode = #tpu.pipeline_mode<synchronous>, transform_indices = @transform_10, window_bounds = array<i64: 1, 128>}, {pipeline_mode = #tpu.pipeline_mode<synchronous>, transform_indices = @transform_11, window_bounds = array<i64: 32, 128>}, {pipeline_mode = #tpu.pipeline_mode<synchronous>, transform_indices = @transform_12, window_bounds = array<i64: 32, 128>}, {pipeline_mode = #tpu.pipeline_mode<synchronous>, transform_indices = @transform_13, window_bounds = array<i64: 1, 128>}, {pipeline_mode = #tpu.pipeline_mode<synchronous>, transform_indices = @transform_14, window_bounds = array<i64: 32, 128>}, {pipeline_mode = #tpu.pipeline_mode<synchronous>, transform_indices = @transform_15, window_bounds = array<i64: 1, 128>}, {pipeline_mode = #tpu.pipeline_mode<synchronous>, transform_indices = @transform_16, window_bounds = array<i64: 7, 8, 128>}]} {
    %0 = tpu.iota {dimensions = array<i32: 0>} : vector<8x1xi32>
    %1 = tpu.iota {dimensions = array<i32: 1>} : vector<8x128xi32>
    %2 = tpu.iota {dimensions = array<i32: 1>} : vector<8x128xi32>
    %3 = tpu.iota {dimensions = array<i32: 1>} : vector<8x128xi32>
    %c64_i32 = arith.constant 64 : i32
    %4 = vector.broadcast %c64_i32 : i32 to vector<8x128xi32>
    %5 = arith.cmpi sge, %3, %4 : vector<8x128xi32>
    %c96_i32 = arith.constant 96 : i32
    %6 = vector.broadcast %c96_i32 : i32 to vector<8x128xi32>
    %7 = arith.cmpi slt, %3, %6 : vector<8x128xi32>
    %8 = arith.andi %5, %7 : vector<8x128xi1>
    %cst = arith.constant 0.000000e+00 : f32
    %9 = vector.broadcast %cst : f32 to vector<8x32xf32>
    %cst_0 = arith.constant 0.000000e+00 : f32
    %10 = vector.broadcast %cst_0 : f32 to vector<8x32xf32>
    %cst_1 = arith.constant 0.000000e+00 : f32
    %11 = vector.broadcast %cst_1 : f32 to vector<8x32xf32>
    %cst_2 = arith.constant 0.000000e+00 : f32
    %12 = vector.broadcast %cst_2 : f32 to vector<8x32xf32>
    %c0_i32 = arith.constant 0 : i32
    %13 = vector.broadcast %c0_i32 : i32 to vector<8x1xi32>
    %c0_i32_3 = arith.constant 0 : i32
    %14 = vector.broadcast %c0_i32_3 : i32 to vector<8x1xi32>
    %15 = arith.cmpi eq, %0, %14 : vector<8x1xi32>
    %c0 = arith.constant 0 : index
    %c0_4 = arith.constant 0 : index
    %16 = memref.load %arg1[%c0, %c0_4] : memref<6x8xi32, #tpu.memory_space<smem>>
    %17 = vector.broadcast %16 : i32 to vector<8x1xi32>
    %18 = arith.select %15, %17, %13 : vector<8x1xi1>, vector<8x1xi32>
    %c1_i32 = arith.constant 1 : i32
    %19 = vector.broadcast %c1_i32 : i32 to vector<8x1xi32>
    %20 = arith.cmpi eq, %0, %19 : vector<8x1xi32>
    %c0_5 = arith.constant 0 : index
    %c1 = arith.constant 1 : index
    %21 = memref.load %arg1[%c0_5, %c1] : memref<6x8xi32, #tpu.memory_space<smem>>
    %22 = vector.broadcast %21 : i32 to vector<8x1xi32>
    %23 = arith.select %20, %22, %18 : vector<8x1xi1>, vector<8x1xi32>
    %c2_i32 = arith.constant 2 : i32
    %24 = vector.broadcast %c2_i32 : i32 to vector<8x1xi32>
    %25 = arith.cmpi eq, %0, %24 : vector<8x1xi32>
    %c0_6 = arith.constant 0 : index
    %c2 = arith.constant 2 : index
    %26 = memref.load %arg1[%c0_6, %c2] : memref<6x8xi32, #tpu.memory_space<smem>>
    %27 = vector.broadcast %26 : i32 to vector<8x1xi32>
    %28 = arith.select %25, %27, %23 : vector<8x1xi1>, vector<8x1xi32>
    %c3_i32 = arith.constant 3 : i32
    %29 = vector.broadcast %c3_i32 : i32 to vector<8x1xi32>
    %30 = arith.cmpi eq, %0, %29 : vector<8x1xi32>
    %c0_7 = arith.constant 0 : index
    %c3 = arith.constant 3 : index
    %31 = memref.load %arg1[%c0_7, %c3] : memref<6x8xi32, #tpu.memory_space<smem>>
    %32 = vector.broadcast %31 : i32 to vector<8x1xi32>
    %33 = arith.select %30, %32, %28 : vector<8x1xi1>, vector<8x1xi32>
    %c4_i32 = arith.constant 4 : i32
    %34 = vector.broadcast %c4_i32 : i32 to vector<8x1xi32>
    %35 = arith.cmpi eq, %0, %34 : vector<8x1xi32>
    %c0_8 = arith.constant 0 : index
    %c4 = arith.constant 4 : index
    %36 = memref.load %arg1[%c0_8, %c4] : memref<6x8xi32, #tpu.memory_space<smem>>
    %37 = vector.broadcast %36 : i32 to vector<8x1xi32>
    %38 = arith.select %35, %37, %33 : vector<8x1xi1>, vector<8x1xi32>
    %c5_i32 = arith.constant 5 : i32
    %39 = vector.broadcast %c5_i32 : i32 to vector<8x1xi32>
    %40 = arith.cmpi eq, %0, %39 : vector<8x1xi32>
    %c0_9 = arith.constant 0 : index
    %c5 = arith.constant 5 : index
    %41 = memref.load %arg1[%c0_9, %c5] : memref<6x8xi32, #tpu.memory_space<smem>>
    %42 = vector.broadcast %41 : i32 to vector<8x1xi32>
    %43 = arith.select %40, %42, %38 : vector<8x1xi1>, vector<8x1xi32>
    %c6_i32 = arith.constant 6 : i32
    %44 = vector.broadcast %c6_i32 : i32 to vector<8x1xi32>
    %45 = arith.cmpi eq, %0, %44 : vector<8x1xi32>
    %c0_10 = arith.constant 0 : index
    %c6 = arith.constant 6 : index
    %46 = memref.load %arg1[%c0_10, %c6] : memref<6x8xi32, #tpu.memory_space<smem>>
    %47 = vector.broadcast %46 : i32 to vector<8x1xi32>
    %48 = arith.select %45, %47, %43 : vector<8x1xi1>, vector<8x1xi32>
    %c7_i32 = arith.constant 7 : i32
    %49 = vector.broadcast %c7_i32 : i32 to vector<8x1xi32>
    %50 = arith.cmpi eq, %0, %49 : vector<8x1xi32>
    %c0_11 = arith.constant 0 : index
    %c7 = arith.constant 7 : index
    %51 = memref.load %arg1[%c0_11, %c7] : memref<6x8xi32, #tpu.memory_space<smem>>
    %52 = vector.broadcast %51 : i32 to vector<8x1xi32>
    %53 = arith.select %50, %52, %48 : vector<8x1xi1>, vector<8x1xi32>
    %54 = vector.broadcast %53 : vector<8x1xi32> to vector<8x128xi32>
    %55 = arith.cmpi eq, %1, %54 : vector<8x128xi32>
    %56 = arith.extui %55 : vector<8x128xi1> to vector<8x128xi32>
    %57 = arith.sitofp %56 : vector<8x128xi32> to vector<8x128xf32>
    %58 = arith.truncf %57 : vector<8x128xf32> to vector<8x128xbf16>
    %c0_12 = arith.constant 0 : index
    %c0_13 = arith.constant 0 : index
    %59 = vector.load %arg4[%c0_12, %c0_13] : memref<128x16xbf16, #tpu.memory_space<vmem>>, vector<128x16xbf16>
    %cst_14 = arith.constant dense<0.000000e+00> : vector<8x16xf32>
    %60 = tpu.matmul %58, %59, %cst_14 {dimension_numbers = #tpu.dot_dimension_numbers<[1], [0], [0], [1], [0, 0, 1, 1], [], []>} : vector<8x128xbf16>, vector<128x16xbf16>, vector<8x16xf32> -> vector<8x16xf32>
    %61 = arith.truncf %60 : vector<8x16xf32> to vector<8x16xbf16>
    %c0_15 = arith.constant 0 : index
    %c0_16 = arith.constant 0 : index
    %62 = vector.load %arg6[%c0_15, %c0_16] : memref<16x128xbf16, #tpu.memory_space<vmem>>, vector<16x128xbf16>
    %cst_17 = arith.constant dense<0.000000e+00> : vector<8x128xf32>
    %63 = tpu.matmul %61, %62, %cst_17 {dimension_numbers = #tpu.dot_dimension_numbers<[1], [0], [0], [1], [0, 0, 1, 1], [], []>} : vector<8x16xbf16>, vector<16x128xbf16>, vector<8x128xf32> -> vector<8x128xf32>
    %64 = arith.truncf %9 : vector<8x32xf32> to vector<8x32xbf16>
    %c0_18 = arith.constant 0 : index
    %c0_19 = arith.constant 0 : index
    %65 = vector.load %arg7[%c0_18, %c0_19] : memref<32x128xbf16, #tpu.memory_space<vmem>>, vector<32x128xbf16>
    %cst_20 = arith.constant dense<0.000000e+00> : vector<8x128xf32>
    %66 = tpu.matmul %64, %65, %cst_20 {dimension_numbers = #tpu.dot_dimension_numbers<[1], [0], [0], [1], [0, 0, 1, 1], [], []>} : vector<8x32xbf16>, vector<32x128xbf16>, vector<8x128xf32> -> vector<8x128xf32>
    %67 = arith.addf %63, %66 : vector<8x128xf32>
    %c0_21 = arith.constant 0 : index
    %c0_22 = arith.constant 0 : index
    %68 = vector.load %arg8[%c0_21, %c0_22] : memref<1x128xf32, #tpu.memory_space<vmem>>, vector<1x128xf32>
    %69 = vector.broadcast %68 : vector<1x128xf32> to vector<8x128xf32>
    %70 = arith.addf %67, %69 : vector<8x128xf32>
    %cst_23 = arith.constant 5.000000e-01 : f32
    %71 = vector.broadcast %cst_23 : f32 to vector<8x128xf32>
    %72 = arith.mulf %71, %70 : vector<8x128xf32>
    %73 = arith.select %8, %70, %72 : vector<8x128xi1>, vector<8x128xf32>
    %74 = math.tanh %73 : vector<8x128xf32>
    %cst_24 = arith.constant 5.000000e-01 : f32
    %75 = vector.broadcast %cst_24 : f32 to vector<8x128xf32>
    %76 = arith.mulf %75, %74 : vector<8x128xf32>
    %cst_25 = arith.constant 5.000000e-01 : f32
    %77 = vector.broadcast %cst_25 : f32 to vector<8x128xf32>
    %78 = arith.addf %77, %76 : vector<8x128xf32>
    %79 = arith.select %8, %74, %78 : vector<8x128xi1>, vector<8x128xf32>
    %80 = vector.extract_strided_slice %79 {offsets = [0, 0], sizes = [8, 32], strides = [1, 1]} : vector<8x128xf32> to vector<8x32xf32>
    %81 = vector.extract_strided_slice %79 {offsets = [0, 32], sizes = [8, 32], strides = [1, 1]} : vector<8x128xf32> to vector<8x32xf32>
    %82 = vector.extract_strided_slice %79 {offsets = [0, 64], sizes = [8, 32], strides = [1, 1]} : vector<8x128xf32> to vector<8x32xf32>
    %83 = vector.extract_strided_slice %79 {offsets = [0, 96], sizes = [8, 32], strides = [1, 1]} : vector<8x128xf32> to vector<8x32xf32>
    %84 = arith.mulf %81, %11 : vector<8x32xf32>
    %85 = arith.mulf %80, %82 : vector<8x32xf32>
    %86 = arith.addf %84, %85 : vector<8x32xf32>
    %87 = math.tanh %86 : vector<8x32xf32>
    %88 = arith.mulf %83, %87 : vector<8x32xf32>
    %89 = arith.truncf %88 : vector<8x32xf32> to vector<8x32xbf16>
    %c0_26 = arith.constant 0 : index
    %c0_27 = arith.constant 0 : index
    %90 = vector.load %arg9[%c0_26, %c0_27] : memref<32x128xbf16, #tpu.memory_space<vmem>>, vector<32x128xbf16>
    %cst_28 = arith.constant dense<0.000000e+00> : vector<8x128xf32>
    %91 = tpu.matmul %89, %90, %cst_28 {dimension_numbers = #tpu.dot_dimension_numbers<[1], [0], [0], [1], [0, 0, 1, 1], [], []>} : vector<8x32xbf16>, vector<32x128xbf16>, vector<8x128xf32> -> vector<8x128xf32>
    %92 = arith.truncf %10 : vector<8x32xf32> to vector<8x32xbf16>
    %c0_29 = arith.constant 0 : index
    %c0_30 = arith.constant 0 : index
    %93 = vector.load %arg10[%c0_29, %c0_30] : memref<32x128xbf16, #tpu.memory_space<vmem>>, vector<32x128xbf16>
    %cst_31 = arith.constant dense<0.000000e+00> : vector<8x128xf32>
    %94 = tpu.matmul %92, %93, %cst_31 {dimension_numbers = #tpu.dot_dimension_numbers<[1], [0], [0], [1], [0, 0, 1, 1], [], []>} : vector<8x32xbf16>, vector<32x128xbf16>, vector<8x128xf32> -> vector<8x128xf32>
    %95 = arith.addf %91, %94 : vector<8x128xf32>
    %c0_32 = arith.constant 0 : index
    %c0_33 = arith.constant 0 : index
    %96 = vector.load %arg11[%c0_32, %c0_33] : memref<1x128xf32, #tpu.memory_space<vmem>>, vector<1x128xf32>
    %97 = vector.broadcast %96 : vector<1x128xf32> to vector<8x128xf32>
    %98 = arith.addf %95, %97 : vector<8x128xf32>
    %cst_34 = arith.constant 5.000000e-01 : f32
    %99 = vector.broadcast %cst_34 : f32 to vector<8x128xf32>
    %100 = arith.mulf %99, %98 : vector<8x128xf32>
    %101 = arith.select %8, %98, %100 : vector<8x128xi1>, vector<8x128xf32>
    %102 = math.tanh %101 : vector<8x128xf32>
    %cst_35 = arith.constant 5.000000e-01 : f32
    %103 = vector.broadcast %cst_35 : f32 to vector<8x128xf32>
    %104 = arith.mulf %103, %102 : vector<8x128xf32>
    %cst_36 = arith.constant 5.000000e-01 : f32
    %105 = vector.broadcast %cst_36 : f32 to vector<8x128xf32>
    %106 = arith.addf %105, %104 : vector<8x128xf32>
    %107 = arith.select %8, %102, %106 : vector<8x128xi1>, vector<8x128xf32>
    %108 = vector.extract_strided_slice %107 {offsets = [0, 0], sizes = [8, 32], strides = [1, 1]} : vector<8x128xf32> to vector<8x32xf32>
    %109 = vector.extract_strided_slice %107 {offsets = [0, 32], sizes = [8, 32], strides = [1, 1]} : vector<8x128xf32> to vector<8x32xf32>
    %110 = vector.extract_strided_slice %107 {offsets = [0, 64], sizes = [8, 32], strides = [1, 1]} : vector<8x128xf32> to vector<8x32xf32>
    %111 = vector.extract_strided_slice %107 {offsets = [0, 96], sizes = [8, 32], strides = [1, 1]} : vector<8x128xf32> to vector<8x32xf32>
    %112 = arith.mulf %109, %12 : vector<8x32xf32>
    %113 = arith.mulf %108, %110 : vector<8x32xf32>
    %114 = arith.addf %112, %113 : vector<8x32xf32>
    %115 = math.tanh %114 : vector<8x32xf32>
    %116 = arith.mulf %111, %115 : vector<8x32xf32>
    %c0_i32_37 = arith.constant 0 : i32
    %117 = vector.broadcast %c0_i32_37 : i32 to vector<8x1xi32>
    %c0_i32_38 = arith.constant 0 : i32
    %118 = vector.broadcast %c0_i32_38 : i32 to vector<8x1xi32>
    %119 = arith.cmpi eq, %0, %118 : vector<8x1xi32>
    %c1_39 = arith.constant 1 : index
    %c0_40 = arith.constant 0 : index
    %120 = memref.load %arg1[%c1_39, %c0_40] : memref<6x8xi32, #tpu.memory_space<smem>>
    %121 = vector.broadcast %120 : i32 to vector<8x1xi32>
    %122 = arith.select %119, %121, %117 : vector<8x1xi1>, vector<8x1xi32>
    %c1_i32_41 = arith.constant 1 : i32
    %123 = vector.broadcast %c1_i32_41 : i32 to vector<8x1xi32>
    %124 = arith.cmpi eq, %0, %123 : vector<8x1xi32>
    %c1_42 = arith.constant 1 : index
    %c1_43 = arith.constant 1 : index
    %125 = memref.load %arg1[%c1_42, %c1_43] : memref<6x8xi32, #tpu.memory_space<smem>>
    %126 = vector.broadcast %125 : i32 to vector<8x1xi32>
    %127 = arith.select %124, %126, %122 : vector<8x1xi1>, vector<8x1xi32>
    %c2_i32_44 = arith.constant 2 : i32
    %128 = vector.broadcast %c2_i32_44 : i32 to vector<8x1xi32>
    %129 = arith.cmpi eq, %0, %128 : vector<8x1xi32>
    %c1_45 = arith.constant 1 : index
    %c2_46 = arith.constant 2 : index
    %130 = memref.load %arg1[%c1_45, %c2_46] : memref<6x8xi32, #tpu.memory_space<smem>>
    %131 = vector.broadcast %130 : i32 to vector<8x1xi32>
    %132 = arith.select %129, %131, %127 : vector<8x1xi1>, vector<8x1xi32>
    %c3_i32_47 = arith.constant 3 : i32
    %133 = vector.broadcast %c3_i32_47 : i32 to vector<8x1xi32>
    %134 = arith.cmpi eq, %0, %133 : vector<8x1xi32>
    %c1_48 = arith.constant 1 : index
    %c3_49 = arith.constant 3 : index
    %135 = memref.load %arg1[%c1_48, %c3_49] : memref<6x8xi32, #tpu.memory_space<smem>>
    %136 = vector.broadcast %135 : i32 to vector<8x1xi32>
    %137 = arith.select %134, %136, %132 : vector<8x1xi1>, vector<8x1xi32>
    %c4_i32_50 = arith.constant 4 : i32
    %138 = vector.broadcast %c4_i32_50 : i32 to vector<8x1xi32>
    %139 = arith.cmpi eq, %0, %138 : vector<8x1xi32>
    %c1_51 = arith.constant 1 : index
    %c4_52 = arith.constant 4 : index
    %140 = memref.load %arg1[%c1_51, %c4_52] : memref<6x8xi32, #tpu.memory_space<smem>>
    %141 = vector.broadcast %140 : i32 to vector<8x1xi32>
    %142 = arith.select %139, %141, %137 : vector<8x1xi1>, vector<8x1xi32>
    %c5_i32_53 = arith.constant 5 : i32
    %143 = vector.broadcast %c5_i32_53 : i32 to vector<8x1xi32>
    %144 = arith.cmpi eq, %0, %143 : vector<8x1xi32>
    %c1_54 = arith.constant 1 : index
    %c5_55 = arith.constant 5 : index
    %145 = memref.load %arg1[%c1_54, %c5_55] : memref<6x8xi32, #tpu.memory_space<smem>>
    %146 = vector.broadcast %145 : i32 to vector<8x1xi32>
    %147 = arith.select %144, %146, %142 : vector<8x1xi1>, vector<8x1xi32>
    %c6_i32_56 = arith.constant 6 : i32
    %148 = vector.broadcast %c6_i32_56 : i32 to vector<8x1xi32>
    %149 = arith.cmpi eq, %0, %148 : vector<8x1xi32>
    %c1_57 = arith.constant 1 : index
    %c6_58 = arith.constant 6 : index
    %150 = memref.load %arg1[%c1_57, %c6_58] : memref<6x8xi32, #tpu.memory_space<smem>>
    %151 = vector.broadcast %150 : i32 to vector<8x1xi32>
    %152 = arith.select %149, %151, %147 : vector<8x1xi1>, vector<8x1xi32>
    %c7_i32_59 = arith.constant 7 : i32
    %153 = vector.broadcast %c7_i32_59 : i32 to vector<8x1xi32>
    %154 = arith.cmpi eq, %0, %153 : vector<8x1xi32>
    %c1_60 = arith.constant 1 : index
    %c7_61 = arith.constant 7 : index
    %155 = memref.load %arg1[%c1_60, %c7_61] : memref<6x8xi32, #tpu.memory_space<smem>>
    %156 = vector.broadcast %155 : i32 to vector<8x1xi32>
    %157 = arith.select %154, %156, %152 : vector<8x1xi1>, vector<8x1xi32>
    %158 = vector.broadcast %157 : vector<8x1xi32> to vector<8x128xi32>
    %159 = arith.cmpi eq, %1, %158 : vector<8x128xi32>
    %160 = arith.extui %159 : vector<8x128xi1> to vector<8x128xi32>
    %161 = arith.sitofp %160 : vector<8x128xi32> to vector<8x128xf32>
    %162 = arith.truncf %161 : vector<8x128xf32> to vector<8x128xbf16>
    %c0_62 = arith.constant 0 : index
    %c0_63 = arith.constant 0 : index
    %163 = vector.load %arg4[%c0_62, %c0_63] : memref<128x16xbf16, #tpu.memory_space<vmem>>, vector<128x16xbf16>
    %cst_64 = arith.constant dense<0.000000e+00> : vector<8x16xf32>
    %164 = tpu.matmul %162, %163, %cst_64 {dimension_numbers = #tpu.dot_dimension_numbers<[1], [0], [0], [1], [0, 0, 1, 1], [], []>} : vector<8x128xbf16>, vector<128x16xbf16>, vector<8x16xf32> -> vector<8x16xf32>
    %165 = arith.truncf %164 : vector<8x16xf32> to vector<8x16xbf16>
    %c0_65 = arith.constant 0 : index
    %c0_66 = arith.constant 0 : index
    %166 = vector.load %arg6[%c0_65, %c0_66] : memref<16x128xbf16, #tpu.memory_space<vmem>>, vector<16x128xbf16>
    %cst_67 = arith.constant dense<0.000000e+00> : vector<8x128xf32>
    %167 = tpu.matmul %165, %166, %cst_67 {dimension_numbers = #tpu.dot_dimension_numbers<[1], [0], [0], [1], [0, 0, 1, 1], [], []>} : vector<8x16xbf16>, vector<16x128xbf16>, vector<8x128xf32> -> vector<8x128xf32>
    %168 = arith.truncf %88 : vector<8x32xf32> to vector<8x32xbf16>
    %c0_68 = arith.constant 0 : index
    %c0_69 = arith.constant 0 : index
    %169 = vector.load %arg7[%c0_68, %c0_69] : memref<32x128xbf16, #tpu.memory_space<vmem>>, vector<32x128xbf16>
    %cst_70 = arith.constant dense<0.000000e+00> : vector<8x128xf32>
    %170 = tpu.matmul %168, %169, %cst_70 {dimension_numbers = #tpu.dot_dimension_numbers<[1], [0], [0], [1], [0, 0, 1, 1], [], []>} : vector<8x32xbf16>, vector<32x128xbf16>, vector<8x128xf32> -> vector<8x128xf32>
    %171 = arith.addf %167, %170 : vector<8x128xf32>
    %c0_71 = arith.constant 0 : index
    %c0_72 = arith.constant 0 : index
    %172 = vector.load %arg8[%c0_71, %c0_72] : memref<1x128xf32, #tpu.memory_space<vmem>>, vector<1x128xf32>
    %173 = vector.broadcast %172 : vector<1x128xf32> to vector<8x128xf32>
    %174 = arith.addf %171, %173 : vector<8x128xf32>
    %cst_73 = arith.constant 5.000000e-01 : f32
    %175 = vector.broadcast %cst_73 : f32 to vector<8x128xf32>
    %176 = arith.mulf %175, %174 : vector<8x128xf32>
    %177 = arith.select %8, %174, %176 : vector<8x128xi1>, vector<8x128xf32>
    %178 = math.tanh %177 : vector<8x128xf32>
    %cst_74 = arith.constant 5.000000e-01 : f32
    %179 = vector.broadcast %cst_74 : f32 to vector<8x128xf32>
    %180 = arith.mulf %179, %178 : vector<8x128xf32>
    %cst_75 = arith.constant 5.000000e-01 : f32
    %181 = vector.broadcast %cst_75 : f32 to vector<8x128xf32>
    %182 = arith.addf %181, %180 : vector<8x128xf32>
    %183 = arith.select %8, %178, %182 : vector<8x128xi1>, vector<8x128xf32>
    %184 = vector.extract_strided_slice %183 {offsets = [0, 0], sizes = [8, 32], strides = [1, 1]} : vector<8x128xf32> to vector<8x32xf32>
    %185 = vector.extract_strided_slice %183 {offsets = [0, 32], sizes = [8, 32], strides = [1, 1]} : vector<8x128xf32> to vector<8x32xf32>
    %186 = vector.extract_strided_slice %183 {offsets = [0, 64], sizes = [8, 32], strides = [1, 1]} : vector<8x128xf32> to vector<8x32xf32>
    %187 = vector.extract_strided_slice %183 {offsets = [0, 96], sizes = [8, 32], strides = [1, 1]} : vector<8x128xf32> to vector<8x32xf32>
    %188 = arith.mulf %185, %86 : vector<8x32xf32>
    %189 = arith.mulf %184, %186 : vector<8x32xf32>
    %190 = arith.addf %188, %189 : vector<8x32xf32>
    %191 = math.tanh %190 : vector<8x32xf32>
    %192 = arith.mulf %187, %191 : vector<8x32xf32>
    %193 = arith.truncf %192 : vector<8x32xf32> to vector<8x32xbf16>
    %c0_76 = arith.constant 0 : index
    %c0_77 = arith.constant 0 : index
    %194 = vector.load %arg9[%c0_76, %c0_77] : memref<32x128xbf16, #tpu.memory_space<vmem>>, vector<32x128xbf16>
    %cst_78 = arith.constant dense<0.000000e+00> : vector<8x128xf32>
    %195 = tpu.matmul %193, %194, %cst_78 {dimension_numbers = #tpu.dot_dimension_numbers<[1], [0], [0], [1], [0, 0, 1, 1], [], []>} : vector<8x32xbf16>, vector<32x128xbf16>, vector<8x128xf32> -> vector<8x128xf32>
    %196 = arith.truncf %116 : vector<8x32xf32> to vector<8x32xbf16>
    %c0_79 = arith.constant 0 : index
    %c0_80 = arith.constant 0 : index
    %197 = vector.load %arg10[%c0_79, %c0_80] : memref<32x128xbf16, #tpu.memory_space<vmem>>, vector<32x128xbf16>
    %cst_81 = arith.constant dense<0.000000e+00> : vector<8x128xf32>
    %198 = tpu.matmul %196, %197, %cst_81 {dimension_numbers = #tpu.dot_dimension_numbers<[1], [0], [0], [1], [0, 0, 1, 1], [], []>} : vector<8x32xbf16>, vector<32x128xbf16>, vector<8x128xf32> -> vector<8x128xf32>
    %199 = arith.addf %195, %198 : vector<8x128xf32>
    %c0_82 = arith.constant 0 : index
    %c0_83 = arith.constant 0 : index
    %200 = vector.load %arg11[%c0_82, %c0_83] : memref<1x128xf32, #tpu.memory_space<vmem>>, vector<1x128xf32>
    %201 = vector.broadcast %200 : vector<1x128xf32> to vector<8x128xf32>
    %202 = arith.addf %199, %201 : vector<8x128xf32>
    %cst_84 = arith.constant 5.000000e-01 : f32
    %203 = vector.broadcast %cst_84 : f32 to vector<8x128xf32>
    %204 = arith.mulf %203, %202 : vector<8x128xf32>
    %205 = arith.select %8, %202, %204 : vector<8x128xi1>, vector<8x128xf32>
    %206 = math.tanh %205 : vector<8x128xf32>
    %cst_85 = arith.constant 5.000000e-01 : f32
    %207 = vector.broadcast %cst_85 : f32 to vector<8x128xf32>
    %208 = arith.mulf %207, %206 : vector<8x128xf32>
    %cst_86 = arith.constant 5.000000e-01 : f32
    %209 = vector.broadcast %cst_86 : f32 to vector<8x128xf32>
    %210 = arith.addf %209, %208 : vector<8x128xf32>
    %211 = arith.select %8, %206, %210 : vector<8x128xi1>, vector<8x128xf32>
    %212 = vector.extract_strided_slice %211 {offsets = [0, 0], sizes = [8, 32], strides = [1, 1]} : vector<8x128xf32> to vector<8x32xf32>
    %213 = vector.extract_strided_slice %211 {offsets = [0, 32], sizes = [8, 32], strides = [1, 1]} : vector<8x128xf32> to vector<8x32xf32>
    %214 = vector.extract_strided_slice %211 {offsets = [0, 64], sizes = [8, 32], strides = [1, 1]} : vector<8x128xf32> to vector<8x32xf32>
    %215 = vector.extract_strided_slice %211 {offsets = [0, 96], sizes = [8, 32], strides = [1, 1]} : vector<8x128xf32> to vector<8x32xf32>
    %216 = arith.mulf %213, %114 : vector<8x32xf32>
    %217 = arith.mulf %212, %214 : vector<8x32xf32>
    %218 = arith.addf %216, %217 : vector<8x32xf32>
    %219 = math.tanh %218 : vector<8x32xf32>
    %220 = arith.mulf %215, %219 : vector<8x32xf32>
    %c0_i32_87 = arith.constant 0 : i32
    %221 = vector.broadcast %c0_i32_87 : i32 to vector<8x1xi32>
    %c0_i32_88 = arith.constant 0 : i32
    %222 = vector.broadcast %c0_i32_88 : i32 to vector<8x1xi32>
    %223 = arith.cmpi eq, %0, %222 : vector<8x1xi32>
    %c2_89 = arith.constant 2 : index
    %c0_90 = arith.constant 0 : index
    %224 = memref.load %arg1[%c2_89, %c0_90] : memref<6x8xi32, #tpu.memory_space<smem>>
    %225 = vector.broadcast %224 : i32 to vector<8x1xi32>
    %226 = arith.select %223, %225, %221 : vector<8x1xi1>, vector<8x1xi32>
    %c1_i32_91 = arith.constant 1 : i32
    %227 = vector.broadcast %c1_i32_91 : i32 to vector<8x1xi32>
    %228 = arith.cmpi eq, %0, %227 : vector<8x1xi32>
    %c2_92 = arith.constant 2 : index
    %c1_93 = arith.constant 1 : index
    %229 = memref.load %arg1[%c2_92, %c1_93] : memref<6x8xi32, #tpu.memory_space<smem>>
    %230 = vector.broadcast %229 : i32 to vector<8x1xi32>
    %231 = arith.select %228, %230, %226 : vector<8x1xi1>, vector<8x1xi32>
    %c2_i32_94 = arith.constant 2 : i32
    %232 = vector.broadcast %c2_i32_94 : i32 to vector<8x1xi32>
    %233 = arith.cmpi eq, %0, %232 : vector<8x1xi32>
    %c2_95 = arith.constant 2 : index
    %c2_96 = arith.constant 2 : index
    %234 = memref.load %arg1[%c2_95, %c2_96] : memref<6x8xi32, #tpu.memory_space<smem>>
    %235 = vector.broadcast %234 : i32 to vector<8x1xi32>
    %236 = arith.select %233, %235, %231 : vector<8x1xi1>, vector<8x1xi32>
    %c3_i32_97 = arith.constant 3 : i32
    %237 = vector.broadcast %c3_i32_97 : i32 to vector<8x1xi32>
    %238 = arith.cmpi eq, %0, %237 : vector<8x1xi32>
    %c2_98 = arith.constant 2 : index
    %c3_99 = arith.constant 3 : index
    %239 = memref.load %arg1[%c2_98, %c3_99] : memref<6x8xi32, #tpu.memory_space<smem>>
    %240 = vector.broadcast %239 : i32 to vector<8x1xi32>
    %241 = arith.select %238, %240, %236 : vector<8x1xi1>, vector<8x1xi32>
    %c4_i32_100 = arith.constant 4 : i32
    %242 = vector.broadcast %c4_i32_100 : i32 to vector<8x1xi32>
    %243 = arith.cmpi eq, %0, %242 : vector<8x1xi32>
    %c2_101 = arith.constant 2 : index
    %c4_102 = arith.constant 4 : index
    %244 = memref.load %arg1[%c2_101, %c4_102] : memref<6x8xi32, #tpu.memory_space<smem>>
    %245 = vector.broadcast %244 : i32 to vector<8x1xi32>
    %246 = arith.select %243, %245, %241 : vector<8x1xi1>, vector<8x1xi32>
    %c5_i32_103 = arith.constant 5 : i32
    %247 = vector.broadcast %c5_i32_103 : i32 to vector<8x1xi32>
    %248 = arith.cmpi eq, %0, %247 : vector<8x1xi32>
    %c2_104 = arith.constant 2 : index
    %c5_105 = arith.constant 5 : index
    %249 = memref.load %arg1[%c2_104, %c5_105] : memref<6x8xi32, #tpu.memory_space<smem>>
    %250 = vector.broadcast %249 : i32 to vector<8x1xi32>
    %251 = arith.select %248, %250, %246 : vector<8x1xi1>, vector<8x1xi32>
    %c6_i32_106 = arith.constant 6 : i32
    %252 = vector.broadcast %c6_i32_106 : i32 to vector<8x1xi32>
    %253 = arith.cmpi eq, %0, %252 : vector<8x1xi32>
    %c2_107 = arith.constant 2 : index
    %c6_108 = arith.constant 6 : index
    %254 = memref.load %arg1[%c2_107, %c6_108] : memref<6x8xi32, #tpu.memory_space<smem>>
    %255 = vector.broadcast %254 : i32 to vector<8x1xi32>
    %256 = arith.select %253, %255, %251 : vector<8x1xi1>, vector<8x1xi32>
    %c7_i32_109 = arith.constant 7 : i32
    %257 = vector.broadcast %c7_i32_109 : i32 to vector<8x1xi32>
    %258 = arith.cmpi eq, %0, %257 : vector<8x1xi32>
    %c2_110 = arith.constant 2 : index
    %c7_111 = arith.constant 7 : index
    %259 = memref.load %arg1[%c2_110, %c7_111] : memref<6x8xi32, #tpu.memory_space<smem>>
    %260 = vector.broadcast %259 : i32 to vector<8x1xi32>
    %261 = arith.select %258, %260, %256 : vector<8x1xi1>, vector<8x1xi32>
    %262 = vector.broadcast %261 : vector<8x1xi32> to vector<8x128xi32>
    %263 = arith.cmpi eq, %1, %262 : vector<8x128xi32>
    %264 = arith.extui %263 : vector<8x128xi1> to vector<8x128xi32>
    %265 = arith.sitofp %264 : vector<8x128xi32> to vector<8x128xf32>
    %266 = arith.truncf %265 : vector<8x128xf32> to vector<8x128xbf16>
    %c0_112 = arith.constant 0 : index
    %c0_113 = arith.constant 0 : index
    %267 = vector.load %arg4[%c0_112, %c0_113] : memref<128x16xbf16, #tpu.memory_space<vmem>>, vector<128x16xbf16>
    %cst_114 = arith.constant dense<0.000000e+00> : vector<8x16xf32>
    %268 = tpu.matmul %266, %267, %cst_114 {dimension_numbers = #tpu.dot_dimension_numbers<[1], [0], [0], [1], [0, 0, 1, 1], [], []>} : vector<8x128xbf16>, vector<128x16xbf16>, vector<8x16xf32> -> vector<8x16xf32>
    %269 = arith.truncf %268 : vector<8x16xf32> to vector<8x16xbf16>
    %c0_115 = arith.constant 0 : index
    %c0_116 = arith.constant 0 : index
    %270 = vector.load %arg6[%c0_115, %c0_116] : memref<16x128xbf16, #tpu.memory_space<vmem>>, vector<16x128xbf16>
    %cst_117 = arith.constant dense<0.000000e+00> : vector<8x128xf32>
    %271 = tpu.matmul %269, %270, %cst_117 {dimension_numbers = #tpu.dot_dimension_numbers<[1], [0], [0], [1], [0, 0, 1, 1], [], []>} : vector<8x16xbf16>, vector<16x128xbf16>, vector<8x128xf32> -> vector<8x128xf32>
    %272 = arith.truncf %192 : vector<8x32xf32> to vector<8x32xbf16>
    %c0_118 = arith.constant 0 : index
    %c0_119 = arith.constant 0 : index
    %273 = vector.load %arg7[%c0_118, %c0_119] : memref<32x128xbf16, #tpu.memory_space<vmem>>, vector<32x128xbf16>
    %cst_120 = arith.constant dense<0.000000e+00> : vector<8x128xf32>
    %274 = tpu.matmul %272, %273, %cst_120 {dimension_numbers = #tpu.dot_dimension_numbers<[1], [0], [0], [1], [0, 0, 1, 1], [], []>} : vector<8x32xbf16>, vector<32x128xbf16>, vector<8x128xf32> -> vector<8x128xf32>
    %275 = arith.addf %271, %274 : vector<8x128xf32>
    %c0_121 = arith.constant 0 : index
    %c0_122 = arith.constant 0 : index
    %276 = vector.load %arg8[%c0_121, %c0_122] : memref<1x128xf32, #tpu.memory_space<vmem>>, vector<1x128xf32>
    %277 = vector.broadcast %276 : vector<1x128xf32> to vector<8x128xf32>
    %278 = arith.addf %275, %277 : vector<8x128xf32>
    %cst_123 = arith.constant 5.000000e-01 : f32
    %279 = vector.broadcast %cst_123 : f32 to vector<8x128xf32>
    %280 = arith.mulf %279, %278 : vector<8x128xf32>
    %281 = arith.select %8, %278, %280 : vector<8x128xi1>, vector<8x128xf32>
    %282 = math.tanh %281 : vector<8x128xf32>
    %cst_124 = arith.constant 5.000000e-01 : f32
    %283 = vector.broadcast %cst_124 : f32 to vector<8x128xf32>
    %284 = arith.mulf %283, %282 : vector<8x128xf32>
    %cst_125 = arith.constant 5.000000e-01 : f32
    %285 = vector.broadcast %cst_125 : f32 to vector<8x128xf32>
    %286 = arith.addf %285, %284 : vector<8x128xf32>
    %287 = arith.select %8, %282, %286 : vector<8x128xi1>, vector<8x128xf32>
    %288 = vector.extract_strided_slice %287 {offsets = [0, 0], sizes = [8, 32], strides = [1, 1]} : vector<8x128xf32> to vector<8x32xf32>
    %289 = vector.extract_strided_slice %287 {offsets = [0, 32], sizes = [8, 32], strides = [1, 1]} : vector<8x128xf32> to vector<8x32xf32>
    %290 = vector.extract_strided_slice %287 {offsets = [0, 64], sizes = [8, 32], strides = [1, 1]} : vector<8x128xf32> to vector<8x32xf32>
    %291 = vector.extract_strided_slice %287 {offsets = [0, 96], sizes = [8, 32], strides = [1, 1]} : vector<8x128xf32> to vector<8x32xf32>
    %292 = arith.mulf %289, %190 : vector<8x32xf32>
    %293 = arith.mulf %288, %290 : vector<8x32xf32>
    %294 = arith.addf %292, %293 : vector<8x32xf32>
    %295 = math.tanh %294 : vector<8x32xf32>
    %296 = arith.mulf %291, %295 : vector<8x32xf32>
    %297 = arith.truncf %296 : vector<8x32xf32> to vector<8x32xbf16>
    %c0_126 = arith.constant 0 : index
    %c0_127 = arith.constant 0 : index
    %298 = vector.load %arg9[%c0_126, %c0_127] : memref<32x128xbf16, #tpu.memory_space<vmem>>, vector<32x128xbf16>
    %cst_128 = arith.constant dense<0.000000e+00> : vector<8x128xf32>
    %299 = tpu.matmul %297, %298, %cst_128 {dimension_numbers = #tpu.dot_dimension_numbers<[1], [0], [0], [1], [0, 0, 1, 1], [], []>} : vector<8x32xbf16>, vector<32x128xbf16>, vector<8x128xf32> -> vector<8x128xf32>
    %300 = arith.truncf %220 : vector<8x32xf32> to vector<8x32xbf16>
    %c0_129 = arith.constant 0 : index
    %c0_130 = arith.constant 0 : index
    %301 = vector.load %arg10[%c0_129, %c0_130] : memref<32x128xbf16, #tpu.memory_space<vmem>>, vector<32x128xbf16>
    %cst_131 = arith.constant dense<0.000000e+00> : vector<8x128xf32>
    %302 = tpu.matmul %300, %301, %cst_131 {dimension_numbers = #tpu.dot_dimension_numbers<[1], [0], [0], [1], [0, 0, 1, 1], [], []>} : vector<8x32xbf16>, vector<32x128xbf16>, vector<8x128xf32> -> vector<8x128xf32>
    %303 = arith.addf %299, %302 : vector<8x128xf32>
    %c0_132 = arith.constant 0 : index
    %c0_133 = arith.constant 0 : index
    %304 = vector.load %arg11[%c0_132, %c0_133] : memref<1x128xf32, #tpu.memory_space<vmem>>, vector<1x128xf32>
    %305 = vector.broadcast %304 : vector<1x128xf32> to vector<8x128xf32>
    %306 = arith.addf %303, %305 : vector<8x128xf32>
    %cst_134 = arith.constant 5.000000e-01 : f32
    %307 = vector.broadcast %cst_134 : f32 to vector<8x128xf32>
    %308 = arith.mulf %307, %306 : vector<8x128xf32>
    %309 = arith.select %8, %306, %308 : vector<8x128xi1>, vector<8x128xf32>
    %310 = math.tanh %309 : vector<8x128xf32>
    %cst_135 = arith.constant 5.000000e-01 : f32
    %311 = vector.broadcast %cst_135 : f32 to vector<8x128xf32>
    %312 = arith.mulf %311, %310 : vector<8x128xf32>
    %cst_136 = arith.constant 5.000000e-01 : f32
    %313 = vector.broadcast %cst_136 : f32 to vector<8x128xf32>
    %314 = arith.addf %313, %312 : vector<8x128xf32>
    %315 = arith.select %8, %310, %314 : vector<8x128xi1>, vector<8x128xf32>
    %316 = vector.extract_strided_slice %315 {offsets = [0, 0], sizes = [8, 32], strides = [1, 1]} : vector<8x128xf32> to vector<8x32xf32>
    %317 = vector.extract_strided_slice %315 {offsets = [0, 32], sizes = [8, 32], strides = [1, 1]} : vector<8x128xf32> to vector<8x32xf32>
    %318 = vector.extract_strided_slice %315 {offsets = [0, 64], sizes = [8, 32], strides = [1, 1]} : vector<8x128xf32> to vector<8x32xf32>
    %319 = vector.extract_strided_slice %315 {offsets = [0, 96], sizes = [8, 32], strides = [1, 1]} : vector<8x128xf32> to vector<8x32xf32>
    %320 = arith.mulf %317, %218 : vector<8x32xf32>
    %321 = arith.mulf %316, %318 : vector<8x32xf32>
    %322 = arith.addf %320, %321 : vector<8x32xf32>
    %323 = math.tanh %322 : vector<8x32xf32>
    %324 = arith.mulf %319, %323 : vector<8x32xf32>
    %c0_i32_137 = arith.constant 0 : i32
    %325 = vector.broadcast %c0_i32_137 : i32 to vector<8x1xi32>
    %c0_i32_138 = arith.constant 0 : i32
    %326 = vector.broadcast %c0_i32_138 : i32 to vector<8x1xi32>
    %327 = arith.cmpi eq, %0, %326 : vector<8x1xi32>
    %c3_139 = arith.constant 3 : index
    %c0_140 = arith.constant 0 : index
    %328 = memref.load %arg1[%c3_139, %c0_140] : memref<6x8xi32, #tpu.memory_space<smem>>
    %329 = vector.broadcast %328 : i32 to vector<8x1xi32>
    %330 = arith.select %327, %329, %325 : vector<8x1xi1>, vector<8x1xi32>
    %c1_i32_141 = arith.constant 1 : i32
    %331 = vector.broadcast %c1_i32_141 : i32 to vector<8x1xi32>
    %332 = arith.cmpi eq, %0, %331 : vector<8x1xi32>
    %c3_142 = arith.constant 3 : index
    %c1_143 = arith.constant 1 : index
    %333 = memref.load %arg1[%c3_142, %c1_143] : memref<6x8xi32, #tpu.memory_space<smem>>
    %334 = vector.broadcast %333 : i32 to vector<8x1xi32>
    %335 = arith.select %332, %334, %330 : vector<8x1xi1>, vector<8x1xi32>
    %c2_i32_144 = arith.constant 2 : i32
    %336 = vector.broadcast %c2_i32_144 : i32 to vector<8x1xi32>
    %337 = arith.cmpi eq, %0, %336 : vector<8x1xi32>
    %c3_145 = arith.constant 3 : index
    %c2_146 = arith.constant 2 : index
    %338 = memref.load %arg1[%c3_145, %c2_146] : memref<6x8xi32, #tpu.memory_space<smem>>
    %339 = vector.broadcast %338 : i32 to vector<8x1xi32>
    %340 = arith.select %337, %339, %335 : vector<8x1xi1>, vector<8x1xi32>
    %c3_i32_147 = arith.constant 3 : i32
    %341 = vector.broadcast %c3_i32_147 : i32 to vector<8x1xi32>
    %342 = arith.cmpi eq, %0, %341 : vector<8x1xi32>
    %c3_148 = arith.constant 3 : index
    %c3_149 = arith.constant 3 : index
    %343 = memref.load %arg1[%c3_148, %c3_149] : memref<6x8xi32, #tpu.memory_space<smem>>
    %344 = vector.broadcast %343 : i32 to vector<8x1xi32>
    %345 = arith.select %342, %344, %340 : vector<8x1xi1>, vector<8x1xi32>
    %c4_i32_150 = arith.constant 4 : i32
    %346 = vector.broadcast %c4_i32_150 : i32 to vector<8x1xi32>
    %347 = arith.cmpi eq, %0, %346 : vector<8x1xi32>
    %c3_151 = arith.constant 3 : index
    %c4_152 = arith.constant 4 : index
    %348 = memref.load %arg1[%c3_151, %c4_152] : memref<6x8xi32, #tpu.memory_space<smem>>
    %349 = vector.broadcast %348 : i32 to vector<8x1xi32>
    %350 = arith.select %347, %349, %345 : vector<8x1xi1>, vector<8x1xi32>
    %c5_i32_153 = arith.constant 5 : i32
    %351 = vector.broadcast %c5_i32_153 : i32 to vector<8x1xi32>
    %352 = arith.cmpi eq, %0, %351 : vector<8x1xi32>
    %c3_154 = arith.constant 3 : index
    %c5_155 = arith.constant 5 : index
    %353 = memref.load %arg1[%c3_154, %c5_155] : memref<6x8xi32, #tpu.memory_space<smem>>
    %354 = vector.broadcast %353 : i32 to vector<8x1xi32>
    %355 = arith.select %352, %354, %350 : vector<8x1xi1>, vector<8x1xi32>
    %c6_i32_156 = arith.constant 6 : i32
    %356 = vector.broadcast %c6_i32_156 : i32 to vector<8x1xi32>
    %357 = arith.cmpi eq, %0, %356 : vector<8x1xi32>
    %c3_157 = arith.constant 3 : index
    %c6_158 = arith.constant 6 : index
    %358 = memref.load %arg1[%c3_157, %c6_158] : memref<6x8xi32, #tpu.memory_space<smem>>
    %359 = vector.broadcast %358 : i32 to vector<8x1xi32>
    %360 = arith.select %357, %359, %355 : vector<8x1xi1>, vector<8x1xi32>
    %c7_i32_159 = arith.constant 7 : i32
    %361 = vector.broadcast %c7_i32_159 : i32 to vector<8x1xi32>
    %362 = arith.cmpi eq, %0, %361 : vector<8x1xi32>
    %c3_160 = arith.constant 3 : index
    %c7_161 = arith.constant 7 : index
    %363 = memref.load %arg1[%c3_160, %c7_161] : memref<6x8xi32, #tpu.memory_space<smem>>
    %364 = vector.broadcast %363 : i32 to vector<8x1xi32>
    %365 = arith.select %362, %364, %360 : vector<8x1xi1>, vector<8x1xi32>
    %366 = vector.broadcast %365 : vector<8x1xi32> to vector<8x128xi32>
    %367 = arith.cmpi eq, %1, %366 : vector<8x128xi32>
    %368 = arith.extui %367 : vector<8x128xi1> to vector<8x128xi32>
    %369 = arith.sitofp %368 : vector<8x128xi32> to vector<8x128xf32>
    %370 = arith.truncf %369 : vector<8x128xf32> to vector<8x128xbf16>
    %c0_162 = arith.constant 0 : index
    %c0_163 = arith.constant 0 : index
    %371 = vector.load %arg4[%c0_162, %c0_163] : memref<128x16xbf16, #tpu.memory_space<vmem>>, vector<128x16xbf16>
    %cst_164 = arith.constant dense<0.000000e+00> : vector<8x16xf32>
    %372 = tpu.matmul %370, %371, %cst_164 {dimension_numbers = #tpu.dot_dimension_numbers<[1], [0], [0], [1], [0, 0, 1, 1], [], []>} : vector<8x128xbf16>, vector<128x16xbf16>, vector<8x16xf32> -> vector<8x16xf32>
    %373 = arith.truncf %372 : vector<8x16xf32> to vector<8x16xbf16>
    %c0_165 = arith.constant 0 : index
    %c0_166 = arith.constant 0 : index
    %374 = vector.load %arg6[%c0_165, %c0_166] : memref<16x128xbf16, #tpu.memory_space<vmem>>, vector<16x128xbf16>
    %cst_167 = arith.constant dense<0.000000e+00> : vector<8x128xf32>
    %375 = tpu.matmul %373, %374, %cst_167 {dimension_numbers = #tpu.dot_dimension_numbers<[1], [0], [0], [1], [0, 0, 1, 1], [], []>} : vector<8x16xbf16>, vector<16x128xbf16>, vector<8x128xf32> -> vector<8x128xf32>
    %376 = arith.truncf %296 : vector<8x32xf32> to vector<8x32xbf16>
    %c0_168 = arith.constant 0 : index
    %c0_169 = arith.constant 0 : index
    %377 = vector.load %arg7[%c0_168, %c0_169] : memref<32x128xbf16, #tpu.memory_space<vmem>>, vector<32x128xbf16>
    %cst_170 = arith.constant dense<0.000000e+00> : vector<8x128xf32>
    %378 = tpu.matmul %376, %377, %cst_170 {dimension_numbers = #tpu.dot_dimension_numbers<[1], [0], [0], [1], [0, 0, 1, 1], [], []>} : vector<8x32xbf16>, vector<32x128xbf16>, vector<8x128xf32> -> vector<8x128xf32>
    %379 = arith.addf %375, %378 : vector<8x128xf32>
    %c0_171 = arith.constant 0 : index
    %c0_172 = arith.constant 0 : index
    %380 = vector.load %arg8[%c0_171, %c0_172] : memref<1x128xf32, #tpu.memory_space<vmem>>, vector<1x128xf32>
    %381 = vector.broadcast %380 : vector<1x128xf32> to vector<8x128xf32>
    %382 = arith.addf %379, %381 : vector<8x128xf32>
    %cst_173 = arith.constant 5.000000e-01 : f32
    %383 = vector.broadcast %cst_173 : f32 to vector<8x128xf32>
    %384 = arith.mulf %383, %382 : vector<8x128xf32>
    %385 = arith.select %8, %382, %384 : vector<8x128xi1>, vector<8x128xf32>
    %386 = math.tanh %385 : vector<8x128xf32>
    %cst_174 = arith.constant 5.000000e-01 : f32
    %387 = vector.broadcast %cst_174 : f32 to vector<8x128xf32>
    %388 = arith.mulf %387, %386 : vector<8x128xf32>
    %cst_175 = arith.constant 5.000000e-01 : f32
    %389 = vector.broadcast %cst_175 : f32 to vector<8x128xf32>
    %390 = arith.addf %389, %388 : vector<8x128xf32>
    %391 = arith.select %8, %386, %390 : vector<8x128xi1>, vector<8x128xf32>
    %392 = vector.extract_strided_slice %391 {offsets = [0, 0], sizes = [8, 32], strides = [1, 1]} : vector<8x128xf32> to vector<8x32xf32>
    %393 = vector.extract_strided_slice %391 {offsets = [0, 32], sizes = [8, 32], strides = [1, 1]} : vector<8x128xf32> to vector<8x32xf32>
    %394 = vector.extract_strided_slice %391 {offsets = [0, 64], sizes = [8, 32], strides = [1, 1]} : vector<8x128xf32> to vector<8x32xf32>
    %395 = vector.extract_strided_slice %391 {offsets = [0, 96], sizes = [8, 32], strides = [1, 1]} : vector<8x128xf32> to vector<8x32xf32>
    %396 = arith.mulf %393, %294 : vector<8x32xf32>
    %397 = arith.mulf %392, %394 : vector<8x32xf32>
    %398 = arith.addf %396, %397 : vector<8x32xf32>
    %399 = math.tanh %398 : vector<8x32xf32>
    %400 = arith.mulf %395, %399 : vector<8x32xf32>
    %401 = arith.truncf %400 : vector<8x32xf32> to vector<8x32xbf16>
    %c0_176 = arith.constant 0 : index
    %c0_177 = arith.constant 0 : index
    %402 = vector.load %arg9[%c0_176, %c0_177] : memref<32x128xbf16, #tpu.memory_space<vmem>>, vector<32x128xbf16>
    %cst_178 = arith.constant dense<0.000000e+00> : vector<8x128xf32>
    %403 = tpu.matmul %401, %402, %cst_178 {dimension_numbers = #tpu.dot_dimension_numbers<[1], [0], [0], [1], [0, 0, 1, 1], [], []>} : vector<8x32xbf16>, vector<32x128xbf16>, vector<8x128xf32> -> vector<8x128xf32>
    %404 = arith.truncf %324 : vector<8x32xf32> to vector<8x32xbf16>
    %c0_179 = arith.constant 0 : index
    %c0_180 = arith.constant 0 : index
    %405 = vector.load %arg10[%c0_179, %c0_180] : memref<32x128xbf16, #tpu.memory_space<vmem>>, vector<32x128xbf16>
    %cst_181 = arith.constant dense<0.000000e+00> : vector<8x128xf32>
    %406 = tpu.matmul %404, %405, %cst_181 {dimension_numbers = #tpu.dot_dimension_numbers<[1], [0], [0], [1], [0, 0, 1, 1], [], []>} : vector<8x32xbf16>, vector<32x128xbf16>, vector<8x128xf32> -> vector<8x128xf32>
    %407 = arith.addf %403, %406 : vector<8x128xf32>
    %c0_182 = arith.constant 0 : index
    %c0_183 = arith.constant 0 : index
    %408 = vector.load %arg11[%c0_182, %c0_183] : memref<1x128xf32, #tpu.memory_space<vmem>>, vector<1x128xf32>
    %409 = vector.broadcast %408 : vector<1x128xf32> to vector<8x128xf32>
    %410 = arith.addf %407, %409 : vector<8x128xf32>
    %cst_184 = arith.constant 5.000000e-01 : f32
    %411 = vector.broadcast %cst_184 : f32 to vector<8x128xf32>
    %412 = arith.mulf %411, %410 : vector<8x128xf32>
    %413 = arith.select %8, %410, %412 : vector<8x128xi1>, vector<8x128xf32>
    %414 = math.tanh %413 : vector<8x128xf32>
    %cst_185 = arith.constant 5.000000e-01 : f32
    %415 = vector.broadcast %cst_185 : f32 to vector<8x128xf32>
    %416 = arith.mulf %415, %414 : vector<8x128xf32>
    %cst_186 = arith.constant 5.000000e-01 : f32
    %417 = vector.broadcast %cst_186 : f32 to vector<8x128xf32>
    %418 = arith.addf %417, %416 : vector<8x128xf32>
    %419 = arith.select %8, %414, %418 : vector<8x128xi1>, vector<8x128xf32>
    %420 = vector.extract_strided_slice %419 {offsets = [0, 0], sizes = [8, 32], strides = [1, 1]} : vector<8x128xf32> to vector<8x32xf32>
    %421 = vector.extract_strided_slice %419 {offsets = [0, 32], sizes = [8, 32], strides = [1, 1]} : vector<8x128xf32> to vector<8x32xf32>
    %422 = vector.extract_strided_slice %419 {offsets = [0, 64], sizes = [8, 32], strides = [1, 1]} : vector<8x128xf32> to vector<8x32xf32>
    %423 = vector.extract_strided_slice %419 {offsets = [0, 96], sizes = [8, 32], strides = [1, 1]} : vector<8x128xf32> to vector<8x32xf32>
    %424 = arith.mulf %421, %322 : vector<8x32xf32>
    %425 = arith.mulf %420, %422 : vector<8x32xf32>
    %426 = arith.addf %424, %425 : vector<8x32xf32>
    %427 = math.tanh %426 : vector<8x32xf32>
    %428 = arith.mulf %423, %427 : vector<8x32xf32>
    %c0_i32_187 = arith.constant 0 : i32
    %429 = vector.broadcast %c0_i32_187 : i32 to vector<8x1xi32>
    %c0_i32_188 = arith.constant 0 : i32
    %430 = vector.broadcast %c0_i32_188 : i32 to vector<8x1xi32>
    %431 = arith.cmpi eq, %0, %430 : vector<8x1xi32>
    %c4_189 = arith.constant 4 : index
    %c0_190 = arith.constant 0 : index
    %432 = memref.load %arg1[%c4_189, %c0_190] : memref<6x8xi32, #tpu.memory_space<smem>>
    %433 = vector.broadcast %432 : i32 to vector<8x1xi32>
    %434 = arith.select %431, %433, %429 : vector<8x1xi1>, vector<8x1xi32>
    %c1_i32_191 = arith.constant 1 : i32
    %435 = vector.broadcast %c1_i32_191 : i32 to vector<8x1xi32>
    %436 = arith.cmpi eq, %0, %435 : vector<8x1xi32>
    %c4_192 = arith.constant 4 : index
    %c1_193 = arith.constant 1 : index
    %437 = memref.load %arg1[%c4_192, %c1_193] : memref<6x8xi32, #tpu.memory_space<smem>>
    %438 = vector.broadcast %437 : i32 to vector<8x1xi32>
    %439 = arith.select %436, %438, %434 : vector<8x1xi1>, vector<8x1xi32>
    %c2_i32_194 = arith.constant 2 : i32
    %440 = vector.broadcast %c2_i32_194 : i32 to vector<8x1xi32>
    %441 = arith.cmpi eq, %0, %440 : vector<8x1xi32>
    %c4_195 = arith.constant 4 : index
    %c2_196 = arith.constant 2 : index
    %442 = memref.load %arg1[%c4_195, %c2_196] : memref<6x8xi32, #tpu.memory_space<smem>>
    %443 = vector.broadcast %442 : i32 to vector<8x1xi32>
    %444 = arith.select %441, %443, %439 : vector<8x1xi1>, vector<8x1xi32>
    %c3_i32_197 = arith.constant 3 : i32
    %445 = vector.broadcast %c3_i32_197 : i32 to vector<8x1xi32>
    %446 = arith.cmpi eq, %0, %445 : vector<8x1xi32>
    %c4_198 = arith.constant 4 : index
    %c3_199 = arith.constant 3 : index
    %447 = memref.load %arg1[%c4_198, %c3_199] : memref<6x8xi32, #tpu.memory_space<smem>>
    %448 = vector.broadcast %447 : i32 to vector<8x1xi32>
    %449 = arith.select %446, %448, %444 : vector<8x1xi1>, vector<8x1xi32>
    %c4_i32_200 = arith.constant 4 : i32
    %450 = vector.broadcast %c4_i32_200 : i32 to vector<8x1xi32>
    %451 = arith.cmpi eq, %0, %450 : vector<8x1xi32>
    %c4_201 = arith.constant 4 : index
    %c4_202 = arith.constant 4 : index
    %452 = memref.load %arg1[%c4_201, %c4_202] : memref<6x8xi32, #tpu.memory_space<smem>>
    %453 = vector.broadcast %452 : i32 to vector<8x1xi32>
    %454 = arith.select %451, %453, %449 : vector<8x1xi1>, vector<8x1xi32>
    %c5_i32_203 = arith.constant 5 : i32
    %455 = vector.broadcast %c5_i32_203 : i32 to vector<8x1xi32>
    %456 = arith.cmpi eq, %0, %455 : vector<8x1xi32>
    %c4_204 = arith.constant 4 : index
    %c5_205 = arith.constant 5 : index
    %457 = memref.load %arg1[%c4_204, %c5_205] : memref<6x8xi32, #tpu.memory_space<smem>>
    %458 = vector.broadcast %457 : i32 to vector<8x1xi32>
    %459 = arith.select %456, %458, %454 : vector<8x1xi1>, vector<8x1xi32>
    %c6_i32_206 = arith.constant 6 : i32
    %460 = vector.broadcast %c6_i32_206 : i32 to vector<8x1xi32>
    %461 = arith.cmpi eq, %0, %460 : vector<8x1xi32>
    %c4_207 = arith.constant 4 : index
    %c6_208 = arith.constant 6 : index
    %462 = memref.load %arg1[%c4_207, %c6_208] : memref<6x8xi32, #tpu.memory_space<smem>>
    %463 = vector.broadcast %462 : i32 to vector<8x1xi32>
    %464 = arith.select %461, %463, %459 : vector<8x1xi1>, vector<8x1xi32>
    %c7_i32_209 = arith.constant 7 : i32
    %465 = vector.broadcast %c7_i32_209 : i32 to vector<8x1xi32>
    %466 = arith.cmpi eq, %0, %465 : vector<8x1xi32>
    %c4_210 = arith.constant 4 : index
    %c7_211 = arith.constant 7 : index
    %467 = memref.load %arg1[%c4_210, %c7_211] : memref<6x8xi32, #tpu.memory_space<smem>>
    %468 = vector.broadcast %467 : i32 to vector<8x1xi32>
    %469 = arith.select %466, %468, %464 : vector<8x1xi1>, vector<8x1xi32>
    %470 = vector.broadcast %469 : vector<8x1xi32> to vector<8x128xi32>
    %471 = arith.cmpi eq, %1, %470 : vector<8x128xi32>
    %472 = arith.extui %471 : vector<8x128xi1> to vector<8x128xi32>
    %473 = arith.sitofp %472 : vector<8x128xi32> to vector<8x128xf32>
    %474 = arith.truncf %473 : vector<8x128xf32> to vector<8x128xbf16>
    %c0_212 = arith.constant 0 : index
    %c0_213 = arith.constant 0 : index
    %475 = vector.load %arg4[%c0_212, %c0_213] : memref<128x16xbf16, #tpu.memory_space<vmem>>, vector<128x16xbf16>
    %cst_214 = arith.constant dense<0.000000e+00> : vector<8x16xf32>
    %476 = tpu.matmul %474, %475, %cst_214 {dimension_numbers = #tpu.dot_dimension_numbers<[1], [0], [0], [1], [0, 0, 1, 1], [], []>} : vector<8x128xbf16>, vector<128x16xbf16>, vector<8x16xf32> -> vector<8x16xf32>
    %477 = arith.truncf %476 : vector<8x16xf32> to vector<8x16xbf16>
    %c0_215 = arith.constant 0 : index
    %c0_216 = arith.constant 0 : index
    %478 = vector.load %arg6[%c0_215, %c0_216] : memref<16x128xbf16, #tpu.memory_space<vmem>>, vector<16x128xbf16>
    %cst_217 = arith.constant dense<0.000000e+00> : vector<8x128xf32>
    %479 = tpu.matmul %477, %478, %cst_217 {dimension_numbers = #tpu.dot_dimension_numbers<[1], [0], [0], [1], [0, 0, 1, 1], [], []>} : vector<8x16xbf16>, vector<16x128xbf16>, vector<8x128xf32> -> vector<8x128xf32>
    %480 = arith.truncf %400 : vector<8x32xf32> to vector<8x32xbf16>
    %c0_218 = arith.constant 0 : index
    %c0_219 = arith.constant 0 : index
    %481 = vector.load %arg7[%c0_218, %c0_219] : memref<32x128xbf16, #tpu.memory_space<vmem>>, vector<32x128xbf16>
    %cst_220 = arith.constant dense<0.000000e+00> : vector<8x128xf32>
    %482 = tpu.matmul %480, %481, %cst_220 {dimension_numbers = #tpu.dot_dimension_numbers<[1], [0], [0], [1], [0, 0, 1, 1], [], []>} : vector<8x32xbf16>, vector<32x128xbf16>, vector<8x128xf32> -> vector<8x128xf32>
    %483 = arith.addf %479, %482 : vector<8x128xf32>
    %c0_221 = arith.constant 0 : index
    %c0_222 = arith.constant 0 : index
    %484 = vector.load %arg8[%c0_221, %c0_222] : memref<1x128xf32, #tpu.memory_space<vmem>>, vector<1x128xf32>
    %485 = vector.broadcast %484 : vector<1x128xf32> to vector<8x128xf32>
    %486 = arith.addf %483, %485 : vector<8x128xf32>
    %cst_223 = arith.constant 5.000000e-01 : f32
    %487 = vector.broadcast %cst_223 : f32 to vector<8x128xf32>
    %488 = arith.mulf %487, %486 : vector<8x128xf32>
    %489 = arith.select %8, %486, %488 : vector<8x128xi1>, vector<8x128xf32>
    %490 = math.tanh %489 : vector<8x128xf32>
    %cst_224 = arith.constant 5.000000e-01 : f32
    %491 = vector.broadcast %cst_224 : f32 to vector<8x128xf32>
    %492 = arith.mulf %491, %490 : vector<8x128xf32>
    %cst_225 = arith.constant 5.000000e-01 : f32
    %493 = vector.broadcast %cst_225 : f32 to vector<8x128xf32>
    %494 = arith.addf %493, %492 : vector<8x128xf32>
    %495 = arith.select %8, %490, %494 : vector<8x128xi1>, vector<8x128xf32>
    %496 = vector.extract_strided_slice %495 {offsets = [0, 0], sizes = [8, 32], strides = [1, 1]} : vector<8x128xf32> to vector<8x32xf32>
    %497 = vector.extract_strided_slice %495 {offsets = [0, 32], sizes = [8, 32], strides = [1, 1]} : vector<8x128xf32> to vector<8x32xf32>
    %498 = vector.extract_strided_slice %495 {offsets = [0, 64], sizes = [8, 32], strides = [1, 1]} : vector<8x128xf32> to vector<8x32xf32>
    %499 = vector.extract_strided_slice %495 {offsets = [0, 96], sizes = [8, 32], strides = [1, 1]} : vector<8x128xf32> to vector<8x32xf32>
    %500 = arith.mulf %497, %398 : vector<8x32xf32>
    %501 = arith.mulf %496, %498 : vector<8x32xf32>
    %502 = arith.addf %500, %501 : vector<8x32xf32>
    %503 = math.tanh %502 : vector<8x32xf32>
    %504 = arith.mulf %499, %503 : vector<8x32xf32>
    %505 = arith.truncf %504 : vector<8x32xf32> to vector<8x32xbf16>
    %c0_226 = arith.constant 0 : index
    %c0_227 = arith.constant 0 : index
    %506 = vector.load %arg9[%c0_226, %c0_227] : memref<32x128xbf16, #tpu.memory_space<vmem>>, vector<32x128xbf16>
    %cst_228 = arith.constant dense<0.000000e+00> : vector<8x128xf32>
    %507 = tpu.matmul %505, %506, %cst_228 {dimension_numbers = #tpu.dot_dimension_numbers<[1], [0], [0], [1], [0, 0, 1, 1], [], []>} : vector<8x32xbf16>, vector<32x128xbf16>, vector<8x128xf32> -> vector<8x128xf32>
    %508 = arith.truncf %428 : vector<8x32xf32> to vector<8x32xbf16>
    %c0_229 = arith.constant 0 : index
    %c0_230 = arith.constant 0 : index
    %509 = vector.load %arg10[%c0_229, %c0_230] : memref<32x128xbf16, #tpu.memory_space<vmem>>, vector<32x128xbf16>
    %cst_231 = arith.constant dense<0.000000e+00> : vector<8x128xf32>
    %510 = tpu.matmul %508, %509, %cst_231 {dimension_numbers = #tpu.dot_dimension_numbers<[1], [0], [0], [1], [0, 0, 1, 1], [], []>} : vector<8x32xbf16>, vector<32x128xbf16>, vector<8x128xf32> -> vector<8x128xf32>
    %511 = arith.addf %507, %510 : vector<8x128xf32>
    %c0_232 = arith.constant 0 : index
    %c0_233 = arith.constant 0 : index
    %512 = vector.load %arg11[%c0_232, %c0_233] : memref<1x128xf32, #tpu.memory_space<vmem>>, vector<1x128xf32>
    %513 = vector.broadcast %512 : vector<1x128xf32> to vector<8x128xf32>
    %514 = arith.addf %511, %513 : vector<8x128xf32>
    %cst_234 = arith.constant 5.000000e-01 : f32
    %515 = vector.broadcast %cst_234 : f32 to vector<8x128xf32>
    %516 = arith.mulf %515, %514 : vector<8x128xf32>
    %517 = arith.select %8, %514, %516 : vector<8x128xi1>, vector<8x128xf32>
    %518 = math.tanh %517 : vector<8x128xf32>
    %cst_235 = arith.constant 5.000000e-01 : f32
    %519 = vector.broadcast %cst_235 : f32 to vector<8x128xf32>
    %520 = arith.mulf %519, %518 : vector<8x128xf32>
    %cst_236 = arith.constant 5.000000e-01 : f32
    %521 = vector.broadcast %cst_236 : f32 to vector<8x128xf32>
    %522 = arith.addf %521, %520 : vector<8x128xf32>
    %523 = arith.select %8, %518, %522 : vector<8x128xi1>, vector<8x128xf32>
    %524 = vector.extract_strided_slice %523 {offsets = [0, 0], sizes = [8, 32], strides = [1, 1]} : vector<8x128xf32> to vector<8x32xf32>
    %525 = vector.extract_strided_slice %523 {offsets = [0, 32], sizes = [8, 32], strides = [1, 1]} : vector<8x128xf32> to vector<8x32xf32>
    %526 = vector.extract_strided_slice %523 {offsets = [0, 64], sizes = [8, 32], strides = [1, 1]} : vector<8x128xf32> to vector<8x32xf32>
    %527 = vector.extract_strided_slice %523 {offsets = [0, 96], sizes = [8, 32], strides = [1, 1]} : vector<8x128xf32> to vector<8x32xf32>
    %528 = arith.mulf %525, %426 : vector<8x32xf32>
    %529 = arith.mulf %524, %526 : vector<8x32xf32>
    %530 = arith.addf %528, %529 : vector<8x32xf32>
    %531 = math.tanh %530 : vector<8x32xf32>
    %532 = arith.mulf %527, %531 : vector<8x32xf32>
    %c0_i32_237 = arith.constant 0 : i32
    %533 = vector.broadcast %c0_i32_237 : i32 to vector<8x1xi32>
    %c0_i32_238 = arith.constant 0 : i32
    %534 = vector.broadcast %c0_i32_238 : i32 to vector<8x1xi32>
    %535 = arith.cmpi eq, %0, %534 : vector<8x1xi32>
    %c5_239 = arith.constant 5 : index
    %c0_240 = arith.constant 0 : index
    %536 = memref.load %arg1[%c5_239, %c0_240] : memref<6x8xi32, #tpu.memory_space<smem>>
    %537 = vector.broadcast %536 : i32 to vector<8x1xi32>
    %538 = arith.select %535, %537, %533 : vector<8x1xi1>, vector<8x1xi32>
    %c1_i32_241 = arith.constant 1 : i32
    %539 = vector.broadcast %c1_i32_241 : i32 to vector<8x1xi32>
    %540 = arith.cmpi eq, %0, %539 : vector<8x1xi32>
    %c5_242 = arith.constant 5 : index
    %c1_243 = arith.constant 1 : index
    %541 = memref.load %arg1[%c5_242, %c1_243] : memref<6x8xi32, #tpu.memory_space<smem>>
    %542 = vector.broadcast %541 : i32 to vector<8x1xi32>
    %543 = arith.select %540, %542, %538 : vector<8x1xi1>, vector<8x1xi32>
    %c2_i32_244 = arith.constant 2 : i32
    %544 = vector.broadcast %c2_i32_244 : i32 to vector<8x1xi32>
    %545 = arith.cmpi eq, %0, %544 : vector<8x1xi32>
    %c5_245 = arith.constant 5 : index
    %c2_246 = arith.constant 2 : index
    %546 = memref.load %arg1[%c5_245, %c2_246] : memref<6x8xi32, #tpu.memory_space<smem>>
    %547 = vector.broadcast %546 : i32 to vector<8x1xi32>
    %548 = arith.select %545, %547, %543 : vector<8x1xi1>, vector<8x1xi32>
    %c3_i32_247 = arith.constant 3 : i32
    %549 = vector.broadcast %c3_i32_247 : i32 to vector<8x1xi32>
    %550 = arith.cmpi eq, %0, %549 : vector<8x1xi32>
    %c5_248 = arith.constant 5 : index
    %c3_249 = arith.constant 3 : index
    %551 = memref.load %arg1[%c5_248, %c3_249] : memref<6x8xi32, #tpu.memory_space<smem>>
    %552 = vector.broadcast %551 : i32 to vector<8x1xi32>
    %553 = arith.select %550, %552, %548 : vector<8x1xi1>, vector<8x1xi32>
    %c4_i32_250 = arith.constant 4 : i32
    %554 = vector.broadcast %c4_i32_250 : i32 to vector<8x1xi32>
    %555 = arith.cmpi eq, %0, %554 : vector<8x1xi32>
    %c5_251 = arith.constant 5 : index
    %c4_252 = arith.constant 4 : index
    %556 = memref.load %arg1[%c5_251, %c4_252] : memref<6x8xi32, #tpu.memory_space<smem>>
    %557 = vector.broadcast %556 : i32 to vector<8x1xi32>
    %558 = arith.select %555, %557, %553 : vector<8x1xi1>, vector<8x1xi32>
    %c5_i32_253 = arith.constant 5 : i32
    %559 = vector.broadcast %c5_i32_253 : i32 to vector<8x1xi32>
    %560 = arith.cmpi eq, %0, %559 : vector<8x1xi32>
    %c5_254 = arith.constant 5 : index
    %c5_255 = arith.constant 5 : index
    %561 = memref.load %arg1[%c5_254, %c5_255] : memref<6x8xi32, #tpu.memory_space<smem>>
    %562 = vector.broadcast %561 : i32 to vector<8x1xi32>
    %563 = arith.select %560, %562, %558 : vector<8x1xi1>, vector<8x1xi32>
    %c6_i32_256 = arith.constant 6 : i32
    %564 = vector.broadcast %c6_i32_256 : i32 to vector<8x1xi32>
    %565 = arith.cmpi eq, %0, %564 : vector<8x1xi32>
    %c5_257 = arith.constant 5 : index
    %c6_258 = arith.constant 6 : index
    %566 = memref.load %arg1[%c5_257, %c6_258] : memref<6x8xi32, #tpu.memory_space<smem>>
    %567 = vector.broadcast %566 : i32 to vector<8x1xi32>
    %568 = arith.select %565, %567, %563 : vector<8x1xi1>, vector<8x1xi32>
    %c7_i32_259 = arith.constant 7 : i32
    %569 = vector.broadcast %c7_i32_259 : i32 to vector<8x1xi32>
    %570 = arith.cmpi eq, %0, %569 : vector<8x1xi32>
    %c5_260 = arith.constant 5 : index
    %c7_261 = arith.constant 7 : index
    %571 = memref.load %arg1[%c5_260, %c7_261] : memref<6x8xi32, #tpu.memory_space<smem>>
    %572 = vector.broadcast %571 : i32 to vector<8x1xi32>
    %573 = arith.select %570, %572, %568 : vector<8x1xi1>, vector<8x1xi32>
    %574 = vector.broadcast %573 : vector<8x1xi32> to vector<8x128xi32>
    %575 = arith.cmpi eq, %1, %574 : vector<8x128xi32>
    %576 = arith.extui %575 : vector<8x128xi1> to vector<8x128xi32>
    %577 = arith.sitofp %576 : vector<8x128xi32> to vector<8x128xf32>
    %578 = arith.truncf %577 : vector<8x128xf32> to vector<8x128xbf16>
    %c0_262 = arith.constant 0 : index
    %c0_263 = arith.constant 0 : index
    %579 = vector.load %arg4[%c0_262, %c0_263] : memref<128x16xbf16, #tpu.memory_space<vmem>>, vector<128x16xbf16>
    %cst_264 = arith.constant dense<0.000000e+00> : vector<8x16xf32>
    %580 = tpu.matmul %578, %579, %cst_264 {dimension_numbers = #tpu.dot_dimension_numbers<[1], [0], [0], [1], [0, 0, 1, 1], [], []>} : vector<8x128xbf16>, vector<128x16xbf16>, vector<8x16xf32> -> vector<8x16xf32>
    %581 = arith.truncf %580 : vector<8x16xf32> to vector<8x16xbf16>
    %c0_265 = arith.constant 0 : index
    %c0_266 = arith.constant 0 : index
    %582 = vector.load %arg6[%c0_265, %c0_266] : memref<16x128xbf16, #tpu.memory_space<vmem>>, vector<16x128xbf16>
    %cst_267 = arith.constant dense<0.000000e+00> : vector<8x128xf32>
    %583 = tpu.matmul %581, %582, %cst_267 {dimension_numbers = #tpu.dot_dimension_numbers<[1], [0], [0], [1], [0, 0, 1, 1], [], []>} : vector<8x16xbf16>, vector<16x128xbf16>, vector<8x128xf32> -> vector<8x128xf32>
    %584 = arith.truncf %504 : vector<8x32xf32> to vector<8x32xbf16>
    %c0_268 = arith.constant 0 : index
    %c0_269 = arith.constant 0 : index
    %585 = vector.load %arg7[%c0_268, %c0_269] : memref<32x128xbf16, #tpu.memory_space<vmem>>, vector<32x128xbf16>
    %cst_270 = arith.constant dense<0.000000e+00> : vector<8x128xf32>
    %586 = tpu.matmul %584, %585, %cst_270 {dimension_numbers = #tpu.dot_dimension_numbers<[1], [0], [0], [1], [0, 0, 1, 1], [], []>} : vector<8x32xbf16>, vector<32x128xbf16>, vector<8x128xf32> -> vector<8x128xf32>
    %587 = arith.addf %583, %586 : vector<8x128xf32>
    %c0_271 = arith.constant 0 : index
    %c0_272 = arith.constant 0 : index
    %588 = vector.load %arg8[%c0_271, %c0_272] : memref<1x128xf32, #tpu.memory_space<vmem>>, vector<1x128xf32>
    %589 = vector.broadcast %588 : vector<1x128xf32> to vector<8x128xf32>
    %590 = arith.addf %587, %589 : vector<8x128xf32>
    %cst_273 = arith.constant 5.000000e-01 : f32
    %591 = vector.broadcast %cst_273 : f32 to vector<8x128xf32>
    %592 = arith.mulf %591, %590 : vector<8x128xf32>
    %593 = arith.select %8, %590, %592 : vector<8x128xi1>, vector<8x128xf32>
    %594 = math.tanh %593 : vector<8x128xf32>
    %cst_274 = arith.constant 5.000000e-01 : f32
    %595 = vector.broadcast %cst_274 : f32 to vector<8x128xf32>
    %596 = arith.mulf %595, %594 : vector<8x128xf32>
    %cst_275 = arith.constant 5.000000e-01 : f32
    %597 = vector.broadcast %cst_275 : f32 to vector<8x128xf32>
    %598 = arith.addf %597, %596 : vector<8x128xf32>
    %599 = arith.select %8, %594, %598 : vector<8x128xi1>, vector<8x128xf32>
    %600 = vector.extract_strided_slice %599 {offsets = [0, 0], sizes = [8, 32], strides = [1, 1]} : vector<8x128xf32> to vector<8x32xf32>
    %601 = vector.extract_strided_slice %599 {offsets = [0, 32], sizes = [8, 32], strides = [1, 1]} : vector<8x128xf32> to vector<8x32xf32>
    %602 = vector.extract_strided_slice %599 {offsets = [0, 64], sizes = [8, 32], strides = [1, 1]} : vector<8x128xf32> to vector<8x32xf32>
    %603 = vector.extract_strided_slice %599 {offsets = [0, 96], sizes = [8, 32], strides = [1, 1]} : vector<8x128xf32> to vector<8x32xf32>
    %604 = arith.mulf %601, %502 : vector<8x32xf32>
    %605 = arith.mulf %600, %602 : vector<8x32xf32>
    %606 = arith.addf %604, %605 : vector<8x32xf32>
    %607 = math.tanh %606 : vector<8x32xf32>
    %608 = arith.mulf %603, %607 : vector<8x32xf32>
    %609 = arith.truncf %608 : vector<8x32xf32> to vector<8x32xbf16>
    %c0_276 = arith.constant 0 : index
    %c0_277 = arith.constant 0 : index
    %610 = vector.load %arg9[%c0_276, %c0_277] : memref<32x128xbf16, #tpu.memory_space<vmem>>, vector<32x128xbf16>
    %cst_278 = arith.constant dense<0.000000e+00> : vector<8x128xf32>
    %611 = tpu.matmul %609, %610, %cst_278 {dimension_numbers = #tpu.dot_dimension_numbers<[1], [0], [0], [1], [0, 0, 1, 1], [], []>} : vector<8x32xbf16>, vector<32x128xbf16>, vector<8x128xf32> -> vector<8x128xf32>
    %612 = arith.truncf %532 : vector<8x32xf32> to vector<8x32xbf16>
    %c0_279 = arith.constant 0 : index
    %c0_280 = arith.constant 0 : index
    %613 = vector.load %arg10[%c0_279, %c0_280] : memref<32x128xbf16, #tpu.memory_space<vmem>>, vector<32x128xbf16>
    %cst_281 = arith.constant dense<0.000000e+00> : vector<8x128xf32>
    %614 = tpu.matmul %612, %613, %cst_281 {dimension_numbers = #tpu.dot_dimension_numbers<[1], [0], [0], [1], [0, 0, 1, 1], [], []>} : vector<8x32xbf16>, vector<32x128xbf16>, vector<8x128xf32> -> vector<8x128xf32>
    %615 = arith.addf %611, %614 : vector<8x128xf32>
    %c0_282 = arith.constant 0 : index
    %c0_283 = arith.constant 0 : index
    %616 = vector.load %arg11[%c0_282, %c0_283] : memref<1x128xf32, #tpu.memory_space<vmem>>, vector<1x128xf32>
    %617 = vector.broadcast %616 : vector<1x128xf32> to vector<8x128xf32>
    %618 = arith.addf %615, %617 : vector<8x128xf32>
    %cst_284 = arith.constant 5.000000e-01 : f32
    %619 = vector.broadcast %cst_284 : f32 to vector<8x128xf32>
    %620 = arith.mulf %619, %618 : vector<8x128xf32>
    %621 = arith.select %8, %618, %620 : vector<8x128xi1>, vector<8x128xf32>
    %622 = math.tanh %621 : vector<8x128xf32>
    %cst_285 = arith.constant 5.000000e-01 : f32
    %623 = vector.broadcast %cst_285 : f32 to vector<8x128xf32>
    %624 = arith.mulf %623, %622 : vector<8x128xf32>
    %cst_286 = arith.constant 5.000000e-01 : f32
    %625 = vector.broadcast %cst_286 : f32 to vector<8x128xf32>
    %626 = arith.addf %625, %624 : vector<8x128xf32>
    %627 = arith.select %8, %622, %626 : vector<8x128xi1>, vector<8x128xf32>
    %628 = vector.extract_strided_slice %627 {offsets = [0, 0], sizes = [8, 32], strides = [1, 1]} : vector<8x128xf32> to vector<8x32xf32>
    %629 = vector.extract_strided_slice %627 {offsets = [0, 32], sizes = [8, 32], strides = [1, 1]} : vector<8x128xf32> to vector<8x32xf32>
    %630 = vector.extract_strided_slice %627 {offsets = [0, 64], sizes = [8, 32], strides = [1, 1]} : vector<8x128xf32> to vector<8x32xf32>
    %631 = vector.extract_strided_slice %627 {offsets = [0, 96], sizes = [8, 32], strides = [1, 1]} : vector<8x128xf32> to vector<8x32xf32>
    %632 = arith.mulf %629, %530 : vector<8x32xf32>
    %633 = arith.mulf %628, %630 : vector<8x32xf32>
    %634 = arith.addf %632, %633 : vector<8x32xf32>
    %635 = math.tanh %634 : vector<8x32xf32>
    %636 = arith.mulf %631, %635 : vector<8x32xf32>
    %cst_287 = arith.constant 0.000000e+00 : f32
    %637 = vector.broadcast %cst_287 : f32 to vector<8x128xf32>
    %c0_288 = arith.constant 0 : index
    %c0_289 = arith.constant 0 : index
    %c0_290 = arith.constant 0 : index
    %638 = vector.load %arg20[%c0_288, %c0_289, %c0_290] : memref<7x8x128xf32, #tpu.memory_space<vmem>>, vector<1x8x128xf32>
    %639 = vector.shape_cast %638 : vector<1x8x128xf32> to vector<8x128xf32>
    %640 = vector.shape_cast %637 : vector<8x128xf32> to vector<1x8x128xf32>
    tpu.vector_store %arg20[%c0_288, %c0_289, %c0_290], %640 {strides = array<i32>} : memref<7x8x128xf32, #tpu.memory_space<vmem>>, vector<1x8x128xf32>,
    %c0_i32_291 = arith.constant 0 : i32
    %641 = vector.broadcast %c0_i32_291 : i32 to vector<8x1xi32>
    %c0_i32_292 = arith.constant 0 : i32
    %642 = vector.broadcast %c0_i32_292 : i32 to vector<8x1xi32>
    %643 = arith.cmpi eq, %0, %642 : vector<8x1xi32>
    %c0_293 = arith.constant 0 : index
    %c0_294 = arith.constant 0 : index
    %644 = memref.load %arg2[%c0_293, %c0_294] : memref<7x8xi32, #tpu.memory_space<smem>>
    %645 = vector.broadcast %644 : i32 to vector<8x1xi32>
    %646 = arith.select %643, %645, %641 : vector<8x1xi1>, vector<8x1xi32>
    %c1_i32_295 = arith.constant 1 : i32
    %647 = vector.broadcast %c1_i32_295 : i32 to vector<8x1xi32>
    %648 = arith.cmpi eq, %0, %647 : vector<8x1xi32>
    %c0_296 = arith.constant 0 : index
    %c1_297 = arith.constant 1 : index
    %649 = memref.load %arg2[%c0_296, %c1_297] : memref<7x8xi32, #tpu.memory_space<smem>>
    %650 = vector.broadcast %649 : i32 to vector<8x1xi32>
    %651 = arith.select %648, %650, %646 : vector<8x1xi1>, vector<8x1xi32>
    %c2_i32_298 = arith.constant 2 : i32
    %652 = vector.broadcast %c2_i32_298 : i32 to vector<8x1xi32>
    %653 = arith.cmpi eq, %0, %652 : vector<8x1xi32>
    %c0_299 = arith.constant 0 : index
    %c2_300 = arith.constant 2 : index
    %654 = memref.load %arg2[%c0_299, %c2_300] : memref<7x8xi32, #tpu.memory_space<smem>>
    %655 = vector.broadcast %654 : i32 to vector<8x1xi32>
    %656 = arith.select %653, %655, %651 : vector<8x1xi1>, vector<8x1xi32>
    %c3_i32_301 = arith.constant 3 : i32
    %657 = vector.broadcast %c3_i32_301 : i32 to vector<8x1xi32>
    %658 = arith.cmpi eq, %0, %657 : vector<8x1xi32>
    %c0_302 = arith.constant 0 : index
    %c3_303 = arith.constant 3 : index
    %659 = memref.load %arg2[%c0_302, %c3_303] : memref<7x8xi32, #tpu.memory_space<smem>>
    %660 = vector.broadcast %659 : i32 to vector<8x1xi32>
    %661 = arith.select %658, %660, %656 : vector<8x1xi1>, vector<8x1xi32>
    %c4_i32_304 = arith.constant 4 : i32
    %662 = vector.broadcast %c4_i32_304 : i32 to vector<8x1xi32>
    %663 = arith.cmpi eq, %0, %662 : vector<8x1xi32>
    %c0_305 = arith.constant 0 : index
    %c4_306 = arith.constant 4 : index
    %664 = memref.load %arg2[%c0_305, %c4_306] : memref<7x8xi32, #tpu.memory_space<smem>>
    %665 = vector.broadcast %664 : i32 to vector<8x1xi32>
    %666 = arith.select %663, %665, %661 : vector<8x1xi1>, vector<8x1xi32>
    %c5_i32_307 = arith.constant 5 : i32
    %667 = vector.broadcast %c5_i32_307 : i32 to vector<8x1xi32>
    %668 = arith.cmpi eq, %0, %667 : vector<8x1xi32>
    %c0_308 = arith.constant 0 : index
    %c5_309 = arith.constant 5 : index
    %669 = memref.load %arg2[%c0_308, %c5_309] : memref<7x8xi32, #tpu.memory_space<smem>>
    %670 = vector.broadcast %669 : i32 to vector<8x1xi32>
    %671 = arith.select %668, %670, %666 : vector<8x1xi1>, vector<8x1xi32>
    %c6_i32_310 = arith.constant 6 : i32
    %672 = vector.broadcast %c6_i32_310 : i32 to vector<8x1xi32>
    %673 = arith.cmpi eq, %0, %672 : vector<8x1xi32>
    %c0_311 = arith.constant 0 : index
    %c6_312 = arith.constant 6 : index
    %674 = memref.load %arg2[%c0_311, %c6_312] : memref<7x8xi32, #tpu.memory_space<smem>>
    %675 = vector.broadcast %674 : i32 to vector<8x1xi32>
    %676 = arith.select %673, %675, %671 : vector<8x1xi1>, vector<8x1xi32>
    %c7_i32_313 = arith.constant 7 : i32
    %677 = vector.broadcast %c7_i32_313 : i32 to vector<8x1xi32>
    %678 = arith.cmpi eq, %0, %677 : vector<8x1xi32>
    %c0_314 = arith.constant 0 : index
    %c7_315 = arith.constant 7 : index
    %679 = memref.load %arg2[%c0_314, %c7_315] : memref<7x8xi32, #tpu.memory_space<smem>>
    %680 = vector.broadcast %679 : i32 to vector<8x1xi32>
    %681 = arith.select %678, %680, %676 : vector<8x1xi1>, vector<8x1xi32>
    %682 = vector.broadcast %681 : vector<8x1xi32> to vector<8x128xi32>
    %683 = arith.cmpi eq, %2, %682 : vector<8x128xi32>
    %684 = arith.extui %683 : vector<8x128xi1> to vector<8x128xi32>
    %685 = arith.sitofp %684 : vector<8x128xi32> to vector<8x128xf32>
    %686 = arith.truncf %685 : vector<8x128xf32> to vector<8x128xbf16>
    %c0_316 = arith.constant 0 : index
    %c0_317 = arith.constant 0 : index
    %687 = vector.load %arg5[%c0_316, %c0_317] : memref<128x16xbf16, #tpu.memory_space<vmem>>, vector<128x16xbf16>
    %cst_318 = arith.constant dense<0.000000e+00> : vector<8x16xf32>
    %688 = tpu.matmul %686, %687, %cst_318 {dimension_numbers = #tpu.dot_dimension_numbers<[1], [0], [0], [1], [0, 0, 1, 1], [], []>} : vector<8x128xbf16>, vector<128x16xbf16>, vector<8x16xf32> -> vector<8x16xf32>
    %689 = arith.truncf %688 : vector<8x16xf32> to vector<8x16xbf16>
    %c0_319 = arith.constant 0 : index
    %c0_320 = arith.constant 0 : index
    %690 = vector.load %arg12[%c0_319, %c0_320] : memref<16x128xbf16, #tpu.memory_space<vmem>>, vector<16x128xbf16>
    %cst_321 = arith.constant dense<0.000000e+00> : vector<8x128xf32>
    %691 = tpu.matmul %689, %690, %cst_321 {dimension_numbers = #tpu.dot_dimension_numbers<[1], [0], [0], [1], [0, 0, 1, 1], [], []>} : vector<8x16xbf16>, vector<16x128xbf16>, vector<8x128xf32> -> vector<8x128xf32>
    %692 = arith.truncf %608 : vector<8x32xf32> to vector<8x32xbf16>
    %c0_322 = arith.constant 0 : index
    %c0_323 = arith.constant 0 : index
    %693 = vector.load %arg13[%c0_322, %c0_323] : memref<32x128xbf16, #tpu.memory_space<vmem>>, vector<32x128xbf16>
    %cst_324 = arith.constant dense<0.000000e+00> : vector<8x128xf32>
    %694 = tpu.matmul %692, %693, %cst_324 {dimension_numbers = #tpu.dot_dimension_numbers<[1], [0], [0], [1], [0, 0, 1, 1], [], []>} : vector<8x32xbf16>, vector<32x128xbf16>, vector<8x128xf32> -> vector<8x128xf32>
    %695 = arith.addf %691, %694 : vector<8x128xf32>
    %c0_325 = arith.constant 0 : index
    %c0_326 = arith.constant 0 : index
    %696 = vector.load %arg14[%c0_325, %c0_326] : memref<1x128xf32, #tpu.memory_space<vmem>>, vector<1x128xf32>
    %697 = vector.broadcast %696 : vector<1x128xf32> to vector<8x128xf32>
    %698 = arith.addf %695, %697 : vector<8x128xf32>
    %cst_327 = arith.constant 5.000000e-01 : f32
    %699 = vector.broadcast %cst_327 : f32 to vector<8x128xf32>
    %700 = arith.mulf %699, %698 : vector<8x128xf32>
    %701 = arith.select %8, %698, %700 : vector<8x128xi1>, vector<8x128xf32>
    %702 = math.tanh %701 : vector<8x128xf32>
    %cst_328 = arith.constant 5.000000e-01 : f32
    %703 = vector.broadcast %cst_328 : f32 to vector<8x128xf32>
    %704 = arith.mulf %703, %702 : vector<8x128xf32>
    %cst_329 = arith.constant 5.000000e-01 : f32
    %705 = vector.broadcast %cst_329 : f32 to vector<8x128xf32>
    %706 = arith.addf %705, %704 : vector<8x128xf32>
    %707 = arith.select %8, %702, %706 : vector<8x128xi1>, vector<8x128xf32>
    %708 = vector.extract_strided_slice %707 {offsets = [0, 0], sizes = [8, 32], strides = [1, 1]} : vector<8x128xf32> to vector<8x32xf32>
    %709 = vector.extract_strided_slice %707 {offsets = [0, 32], sizes = [8, 32], strides = [1, 1]} : vector<8x128xf32> to vector<8x32xf32>
    %710 = vector.extract_strided_slice %707 {offsets = [0, 64], sizes = [8, 32], strides = [1, 1]} : vector<8x128xf32> to vector<8x32xf32>
    %711 = vector.extract_strided_slice %707 {offsets = [0, 96], sizes = [8, 32], strides = [1, 1]} : vector<8x128xf32> to vector<8x32xf32>
    %712 = arith.mulf %709, %606 : vector<8x32xf32>
    %713 = arith.mulf %708, %710 : vector<8x32xf32>
    %714 = arith.addf %712, %713 : vector<8x32xf32>
    %715 = math.tanh %714 : vector<8x32xf32>
    %716 = arith.mulf %711, %715 : vector<8x32xf32>
    %717 = arith.truncf %716 : vector<8x32xf32> to vector<8x32xbf16>
    %c0_330 = arith.constant 0 : index
    %c0_331 = arith.constant 0 : index
    %718 = vector.load %arg15[%c0_330, %c0_331] : memref<32x128xbf16, #tpu.memory_space<vmem>>, vector<32x128xbf16>
    %cst_332 = arith.constant dense<0.000000e+00> : vector<8x128xf32>
    %719 = tpu.matmul %717, %718, %cst_332 {dimension_numbers = #tpu.dot_dimension_numbers<[1], [0], [0], [1], [0, 0, 1, 1], [], []>} : vector<8x32xbf16>, vector<32x128xbf16>, vector<8x128xf32> -> vector<8x128xf32>
    %720 = arith.truncf %636 : vector<8x32xf32> to vector<8x32xbf16>
    %c0_333 = arith.constant 0 : index
    %c0_334 = arith.constant 0 : index
    %721 = vector.load %arg16[%c0_333, %c0_334] : memref<32x128xbf16, #tpu.memory_space<vmem>>, vector<32x128xbf16>
    %cst_335 = arith.constant dense<0.000000e+00> : vector<8x128xf32>
    %722 = tpu.matmul %720, %721, %cst_335 {dimension_numbers = #tpu.dot_dimension_numbers<[1], [0], [0], [1], [0, 0, 1, 1], [], []>} : vector<8x32xbf16>, vector<32x128xbf16>, vector<8x128xf32> -> vector<8x128xf32>
    %723 = arith.addf %719, %722 : vector<8x128xf32>
    %c0_336 = arith.constant 0 : index
    %c0_337 = arith.constant 0 : index
    %724 = vector.load %arg17[%c0_336, %c0_337] : memref<1x128xf32, #tpu.memory_space<vmem>>, vector<1x128xf32>
    %725 = vector.broadcast %724 : vector<1x128xf32> to vector<8x128xf32>
    %726 = arith.addf %723, %725 : vector<8x128xf32>
    %cst_338 = arith.constant 5.000000e-01 : f32
    %727 = vector.broadcast %cst_338 : f32 to vector<8x128xf32>
    %728 = arith.mulf %727, %726 : vector<8x128xf32>
    %729 = arith.select %8, %726, %728 : vector<8x128xi1>, vector<8x128xf32>
    %730 = math.tanh %729 : vector<8x128xf32>
    %cst_339 = arith.constant 5.000000e-01 : f32
    %731 = vector.broadcast %cst_339 : f32 to vector<8x128xf32>
    %732 = arith.mulf %731, %730 : vector<8x128xf32>
    %cst_340 = arith.constant 5.000000e-01 : f32
    %733 = vector.broadcast %cst_340 : f32 to vector<8x128xf32>
    %734 = arith.addf %733, %732 : vector<8x128xf32>
    %735 = arith.select %8, %730, %734 : vector<8x128xi1>, vector<8x128xf32>
    %736 = vector.extract_strided_slice %735 {offsets = [0, 0], sizes = [8, 32], strides = [1, 1]} : vector<8x128xf32> to vector<8x32xf32>
    %737 = vector.extract_strided_slice %735 {offsets = [0, 32], sizes = [8, 32], strides = [1, 1]} : vector<8x128xf32> to vector<8x32xf32>
    %738 = vector.extract_strided_slice %735 {offsets = [0, 64], sizes = [8, 32], strides = [1, 1]} : vector<8x128xf32> to vector<8x32xf32>
    %739 = vector.extract_strided_slice %735 {offsets = [0, 96], sizes = [8, 32], strides = [1, 1]} : vector<8x128xf32> to vector<8x32xf32>
    %740 = arith.mulf %737, %634 : vector<8x32xf32>
    %741 = arith.mulf %736, %738 : vector<8x32xf32>
    %742 = arith.addf %740, %741 : vector<8x32xf32>
    %743 = math.tanh %742 : vector<8x32xf32>
    %744 = arith.mulf %739, %743 : vector<8x32xf32>
    %745 = arith.truncf %744 : vector<8x32xf32> to vector<8x32xbf16>
    %c0_341 = arith.constant 0 : index
    %c0_342 = arith.constant 0 : index
    %746 = vector.load %arg18[%c0_341, %c0_342] : memref<32x128xbf16, #tpu.memory_space<vmem>>, vector<32x128xbf16>
    %cst_343 = arith.constant dense<0.000000e+00> : vector<8x128xf32>
    %747 = tpu.matmul %745, %746, %cst_343 {dimension_numbers = #tpu.dot_dimension_numbers<[1], [0], [0], [1], [0, 0, 1, 1], [], []>} : vector<8x32xbf16>, vector<32x128xbf16>, vector<8x128xf32> -> vector<8x128xf32>
    %c0_344 = arith.constant 0 : index
    %c0_345 = arith.constant 0 : index
    %748 = vector.load %arg19[%c0_344, %c0_345] : memref<1x128xf32, #tpu.memory_space<vmem>>, vector<1x128xf32>
    %749 = vector.broadcast %748 : vector<1x128xf32> to vector<8x128xf32>
    %750 = arith.addf %747, %749 : vector<8x128xf32>
    %c1_346 = arith.constant 1 : index
    %c0_347 = arith.constant 0 : index
    %c0_348 = arith.constant 0 : index
    %751 = vector.load %arg20[%c1_346, %c0_347, %c0_348] : memref<7x8x128xf32, #tpu.memory_space<vmem>>, vector<1x8x128xf32>
    %752 = vector.shape_cast %751 : vector<1x8x128xf32> to vector<8x128xf32>
    %753 = vector.shape_cast %750 : vector<8x128xf32> to vector<1x8x128xf32>
    tpu.vector_store %arg20[%c1_346, %c0_347, %c0_348], %753 {strides = array<i32>} : memref<7x8x128xf32, #tpu.memory_space<vmem>>, vector<1x8x128xf32>,
    %c12_i32 = arith.constant 12 : i32
    %754 = vector.broadcast %c12_i32 : i32 to vector<8x128xi32>
    %755 = arith.cmpi slt, %2, %754 : vector<8x128xi32>
    %cst_349 = arith.constant -1.000000e+30 : f32
    %756 = vector.broadcast %cst_349 : f32 to vector<8x128xf32>
    %757 = arith.select %755, %750, %756 : vector<8x128xi1>, vector<8x128xf32>
    %cst_350 = arith.constant dense<0xFF800000> : vector<8xf32>
    %758 = vector.multi_reduction <maximumf>, %757, %cst_350 [1] : vector<8x128xf32> to vector<8xf32>
    %759 = vector.shape_cast %758 : vector<8xf32> to vector<8x1xf32>
    %760 = vector.broadcast %759 : vector<8x1xf32> to vector<8x128xf32>
    %761 = arith.cmpf oge, %757, %760 : vector<8x128xf32>
    %c128_i32 = arith.constant 128 : i32
    %762 = vector.broadcast %c128_i32 : i32 to vector<8x128xi32>
    %763 = arith.select %761, %2, %762 : vector<8x128xi1>, vector<8x128xi32>
    %cst_351 = arith.constant dense<2147483647> : vector<8xi32>
    %764 = vector.multi_reduction <minsi>, %763, %cst_351 [1] : vector<8x128xi32> to vector<8xi32>
    %765 = vector.shape_cast %764 : vector<8xi32> to vector<8x1xi32>
    %766 = vector.broadcast %765 : vector<8x1xi32> to vector<8x128xi32>
    %767 = arith.cmpi eq, %2, %766 : vector<8x128xi32>
    %768 = arith.extui %767 : vector<8x128xi1> to vector<8x128xi32>
    %769 = arith.sitofp %768 : vector<8x128xi32> to vector<8x128xf32>
    %c0_i32_352 = arith.constant 0 : i32
    %770 = vector.broadcast %c0_i32_352 : i32 to vector<8x1xi32>
    %c0_i32_353 = arith.constant 0 : i32
    %771 = vector.broadcast %c0_i32_353 : i32 to vector<8x1xi32>
    %772 = arith.cmpi eq, %0, %771 : vector<8x1xi32>
    %c1_354 = arith.constant 1 : index
    %c0_355 = arith.constant 0 : index
    %773 = memref.load %arg2[%c1_354, %c0_355] : memref<7x8xi32, #tpu.memory_space<smem>>
    %774 = vector.broadcast %773 : i32 to vector<8x1xi32>
    %775 = arith.select %772, %774, %770 : vector<8x1xi1>, vector<8x1xi32>
    %c1_i32_356 = arith.constant 1 : i32
    %776 = vector.broadcast %c1_i32_356 : i32 to vector<8x1xi32>
    %777 = arith.cmpi eq, %0, %776 : vector<8x1xi32>
    %c1_357 = arith.constant 1 : index
    %c1_358 = arith.constant 1 : index
    %778 = memref.load %arg2[%c1_357, %c1_358] : memref<7x8xi32, #tpu.memory_space<smem>>
    %779 = vector.broadcast %778 : i32 to vector<8x1xi32>
    %780 = arith.select %777, %779, %775 : vector<8x1xi1>, vector<8x1xi32>
    %c2_i32_359 = arith.constant 2 : i32
    %781 = vector.broadcast %c2_i32_359 : i32 to vector<8x1xi32>
    %782 = arith.cmpi eq, %0, %781 : vector<8x1xi32>
    %c1_360 = arith.constant 1 : index
    %c2_361 = arith.constant 2 : index
    %783 = memref.load %arg2[%c1_360, %c2_361] : memref<7x8xi32, #tpu.memory_space<smem>>
    %784 = vector.broadcast %783 : i32 to vector<8x1xi32>
    %785 = arith.select %782, %784, %780 : vector<8x1xi1>, vector<8x1xi32>
    %c3_i32_362 = arith.constant 3 : i32
    %786 = vector.broadcast %c3_i32_362 : i32 to vector<8x1xi32>
    %787 = arith.cmpi eq, %0, %786 : vector<8x1xi32>
    %c1_363 = arith.constant 1 : index
    %c3_364 = arith.constant 3 : index
    %788 = memref.load %arg2[%c1_363, %c3_364] : memref<7x8xi32, #tpu.memory_space<smem>>
    %789 = vector.broadcast %788 : i32 to vector<8x1xi32>
    %790 = arith.select %787, %789, %785 : vector<8x1xi1>, vector<8x1xi32>
    %c4_i32_365 = arith.constant 4 : i32
    %791 = vector.broadcast %c4_i32_365 : i32 to vector<8x1xi32>
    %792 = arith.cmpi eq, %0, %791 : vector<8x1xi32>
    %c1_366 = arith.constant 1 : index
    %c4_367 = arith.constant 4 : index
    %793 = memref.load %arg2[%c1_366, %c4_367] : memref<7x8xi32, #tpu.memory_space<smem>>
    %794 = vector.broadcast %793 : i32 to vector<8x1xi32>
    %795 = arith.select %792, %794, %790 : vector<8x1xi1>, vector<8x1xi32>
    %c5_i32_368 = arith.constant 5 : i32
    %796 = vector.broadcast %c5_i32_368 : i32 to vector<8x1xi32>
    %797 = arith.cmpi eq, %0, %796 : vector<8x1xi32>
    %c1_369 = arith.constant 1 : index
    %c5_370 = arith.constant 5 : index
    %798 = memref.load %arg2[%c1_369, %c5_370] : memref<7x8xi32, #tpu.memory_space<smem>>
    %799 = vector.broadcast %798 : i32 to vector<8x1xi32>
    %800 = arith.select %797, %799, %795 : vector<8x1xi1>, vector<8x1xi32>
    %c6_i32_371 = arith.constant 6 : i32
    %801 = vector.broadcast %c6_i32_371 : i32 to vector<8x1xi32>
    %802 = arith.cmpi eq, %0, %801 : vector<8x1xi32>
    %c1_372 = arith.constant 1 : index
    %c6_373 = arith.constant 6 : index
    %803 = memref.load %arg2[%c1_372, %c6_373] : memref<7x8xi32, #tpu.memory_space<smem>>
    %804 = vector.broadcast %803 : i32 to vector<8x1xi32>
    %805 = arith.select %802, %804, %800 : vector<8x1xi1>, vector<8x1xi32>
    %c7_i32_374 = arith.constant 7 : i32
    %806 = vector.broadcast %c7_i32_374 : i32 to vector<8x1xi32>
    %807 = arith.cmpi eq, %0, %806 : vector<8x1xi32>
    %c1_375 = arith.constant 1 : index
    %c7_376 = arith.constant 7 : index
    %808 = memref.load %arg2[%c1_375, %c7_376] : memref<7x8xi32, #tpu.memory_space<smem>>
    %809 = vector.broadcast %808 : i32 to vector<8x1xi32>
    %810 = arith.select %807, %809, %805 : vector<8x1xi1>, vector<8x1xi32>
    %811 = vector.broadcast %810 : vector<8x1xi32> to vector<8x128xi32>
    %812 = arith.cmpi eq, %2, %811 : vector<8x128xi32>
    %813 = arith.extui %812 : vector<8x128xi1> to vector<8x128xi32>
    %814 = arith.sitofp %813 : vector<8x128xi32> to vector<8x128xf32>
    %c1_377 = arith.constant 1 : index
    %815 = memref.load %arg3[%c1_377] : memref<6xi32, #tpu.memory_space<smem>>
    %c0_i32_378 = arith.constant 0 : i32
    %816 = arith.cmpi ne, %815, %c0_i32_378 : i32
    %817 = arith.select %816, %814, %769 : vector<8x128xf32>
    %818 = arith.truncf %817 : vector<8x128xf32> to vector<8x128xbf16>
    %c0_379 = arith.constant 0 : index
    %c0_380 = arith.constant 0 : index
    %819 = vector.load %arg5[%c0_379, %c0_380] : memref<128x16xbf16, #tpu.memory_space<vmem>>, vector<128x16xbf16>
    %cst_381 = arith.constant dense<0.000000e+00> : vector<8x16xf32>
    %820 = tpu.matmul %818, %819, %cst_381 {dimension_numbers = #tpu.dot_dimension_numbers<[1], [0], [0], [1], [0, 0, 1, 1], [], []>} : vector<8x128xbf16>, vector<128x16xbf16>, vector<8x16xf32> -> vector<8x16xf32>
    %821 = arith.truncf %820 : vector<8x16xf32> to vector<8x16xbf16>
    %c0_382 = arith.constant 0 : index
    %c0_383 = arith.constant 0 : index
    %822 = vector.load %arg12[%c0_382, %c0_383] : memref<16x128xbf16, #tpu.memory_space<vmem>>, vector<16x128xbf16>
    %cst_384 = arith.constant dense<0.000000e+00> : vector<8x128xf32>
    %823 = tpu.matmul %821, %822, %cst_384 {dimension_numbers = #tpu.dot_dimension_numbers<[1], [0], [0], [1], [0, 0, 1, 1], [], []>} : vector<8x16xbf16>, vector<16x128xbf16>, vector<8x128xf32> -> vector<8x128xf32>
    %824 = arith.truncf %716 : vector<8x32xf32> to vector<8x32xbf16>
    %c0_385 = arith.constant 0 : index
    %c0_386 = arith.constant 0 : index
    %825 = vector.load %arg13[%c0_385, %c0_386] : memref<32x128xbf16, #tpu.memory_space<vmem>>, vector<32x128xbf16>
    %cst_387 = arith.constant dense<0.000000e+00> : vector<8x128xf32>
    %826 = tpu.matmul %824, %825, %cst_387 {dimension_numbers = #tpu.dot_dimension_numbers<[1], [0], [0], [1], [0, 0, 1, 1], [], []>} : vector<8x32xbf16>, vector<32x128xbf16>, vector<8x128xf32> -> vector<8x128xf32>
    %827 = arith.addf %823, %826 : vector<8x128xf32>
    %c0_388 = arith.constant 0 : index
    %c0_389 = arith.constant 0 : index
    %828 = vector.load %arg14[%c0_388, %c0_389] : memref<1x128xf32, #tpu.memory_space<vmem>>, vector<1x128xf32>
    %829 = vector.broadcast %828 : vector<1x128xf32> to vector<8x128xf32>
    %830 = arith.addf %827, %829 : vector<8x128xf32>
    %cst_390 = arith.constant 5.000000e-01 : f32
    %831 = vector.broadcast %cst_390 : f32 to vector<8x128xf32>
    %832 = arith.mulf %831, %830 : vector<8x128xf32>
    %833 = arith.select %8, %830, %832 : vector<8x128xi1>, vector<8x128xf32>
    %834 = math.tanh %833 : vector<8x128xf32>
    %cst_391 = arith.constant 5.000000e-01 : f32
    %835 = vector.broadcast %cst_391 : f32 to vector<8x128xf32>
    %836 = arith.mulf %835, %834 : vector<8x128xf32>
    %cst_392 = arith.constant 5.000000e-01 : f32
    %837 = vector.broadcast %cst_392 : f32 to vector<8x128xf32>
    %838 = arith.addf %837, %836 : vector<8x128xf32>
    %839 = arith.select %8, %834, %838 : vector<8x128xi1>, vector<8x128xf32>
    %840 = vector.extract_strided_slice %839 {offsets = [0, 0], sizes = [8, 32], strides = [1, 1]} : vector<8x128xf32> to vector<8x32xf32>
    %841 = vector.extract_strided_slice %839 {offsets = [0, 32], sizes = [8, 32], strides = [1, 1]} : vector<8x128xf32> to vector<8x32xf32>
    %842 = vector.extract_strided_slice %839 {offsets = [0, 64], sizes = [8, 32], strides = [1, 1]} : vector<8x128xf32> to vector<8x32xf32>
    %843 = vector.extract_strided_slice %839 {offsets = [0, 96], sizes = [8, 32], strides = [1, 1]} : vector<8x128xf32> to vector<8x32xf32>
    %844 = arith.mulf %841, %714 : vector<8x32xf32>
    %845 = arith.mulf %840, %842 : vector<8x32xf32>
    %846 = arith.addf %844, %845 : vector<8x32xf32>
    %847 = math.tanh %846 : vector<8x32xf32>
    %848 = arith.mulf %843, %847 : vector<8x32xf32>
    %849 = arith.truncf %848 : vector<8x32xf32> to vector<8x32xbf16>
    %c0_393 = arith.constant 0 : index
    %c0_394 = arith.constant 0 : index
    %850 = vector.load %arg15[%c0_393, %c0_394] : memref<32x128xbf16, #tpu.memory_space<vmem>>, vector<32x128xbf16>
    %cst_395 = arith.constant dense<0.000000e+00> : vector<8x128xf32>
    %851 = tpu.matmul %849, %850, %cst_395 {dimension_numbers = #tpu.dot_dimension_numbers<[1], [0], [0], [1], [0, 0, 1, 1], [], []>} : vector<8x32xbf16>, vector<32x128xbf16>, vector<8x128xf32> -> vector<8x128xf32>
    %852 = arith.truncf %744 : vector<8x32xf32> to vector<8x32xbf16>
    %c0_396 = arith.constant 0 : index
    %c0_397 = arith.constant 0 : index
    %853 = vector.load %arg16[%c0_396, %c0_397] : memref<32x128xbf16, #tpu.memory_space<vmem>>, vector<32x128xbf16>
    %cst_398 = arith.constant dense<0.000000e+00> : vector<8x128xf32>
    %854 = tpu.matmul %852, %853, %cst_398 {dimension_numbers = #tpu.dot_dimension_numbers<[1], [0], [0], [1], [0, 0, 1, 1], [], []>} : vector<8x32xbf16>, vector<32x128xbf16>, vector<8x128xf32> -> vector<8x128xf32>
    %855 = arith.addf %851, %854 : vector<8x128xf32>
    %c0_399 = arith.constant 0 : index
    %c0_400 = arith.constant 0 : index
    %856 = vector.load %arg17[%c0_399, %c0_400] : memref<1x128xf32, #tpu.memory_space<vmem>>, vector<1x128xf32>
    %857 = vector.broadcast %856 : vector<1x128xf32> to vector<8x128xf32>
    %858 = arith.addf %855, %857 : vector<8x128xf32>
    %cst_401 = arith.constant 5.000000e-01 : f32
    %859 = vector.broadcast %cst_401 : f32 to vector<8x128xf32>
    %860 = arith.mulf %859, %858 : vector<8x128xf32>
    %861 = arith.select %8, %858, %860 : vector<8x128xi1>, vector<8x128xf32>
    %862 = math.tanh %861 : vector<8x128xf32>
    %cst_402 = arith.constant 5.000000e-01 : f32
    %863 = vector.broadcast %cst_402 : f32 to vector<8x128xf32>
    %864 = arith.mulf %863, %862 : vector<8x128xf32>
    %cst_403 = arith.constant 5.000000e-01 : f32
    %865 = vector.broadcast %cst_403 : f32 to vector<8x128xf32>
    %866 = arith.addf %865, %864 : vector<8x128xf32>
    %867 = arith.select %8, %862, %866 : vector<8x128xi1>, vector<8x128xf32>
    %868 = vector.extract_strided_slice %867 {offsets = [0, 0], sizes = [8, 32], strides = [1, 1]} : vector<8x128xf32> to vector<8x32xf32>
    %869 = vector.extract_strided_slice %867 {offsets = [0, 32], sizes = [8, 32], strides = [1, 1]} : vector<8x128xf32> to vector<8x32xf32>
    %870 = vector.extract_strided_slice %867 {offsets = [0, 64], sizes = [8, 32], strides = [1, 1]} : vector<8x128xf32> to vector<8x32xf32>
    %871 = vector.extract_strided_slice %867 {offsets = [0, 96], sizes = [8, 32], strides = [1, 1]} : vector<8x128xf32> to vector<8x32xf32>
    %872 = arith.mulf %869, %742 : vector<8x32xf32>
    %873 = arith.mulf %868, %870 : vector<8x32xf32>
    %874 = arith.addf %872, %873 : vector<8x32xf32>
    %875 = math.tanh %874 : vector<8x32xf32>
    %876 = arith.mulf %871, %875 : vector<8x32xf32>
    %877 = arith.truncf %876 : vector<8x32xf32> to vector<8x32xbf16>
    %c0_404 = arith.constant 0 : index
    %c0_405 = arith.constant 0 : index
    %878 = vector.load %arg18[%c0_404, %c0_405] : memref<32x128xbf16, #tpu.memory_space<vmem>>, vector<32x128xbf16>
    %cst_406 = arith.constant dense<0.000000e+00> : vector<8x128xf32>
    %879 = tpu.matmul %877, %878, %cst_406 {dimension_numbers = #tpu.dot_dimension_numbers<[1], [0], [0], [1], [0, 0, 1, 1], [], []>} : vector<8x32xbf16>, vector<32x128xbf16>, vector<8x128xf32> -> vector<8x128xf32>
    %c0_407 = arith.constant 0 : index
    %c0_408 = arith.constant 0 : index
    %880 = vector.load %arg19[%c0_407, %c0_408] : memref<1x128xf32, #tpu.memory_space<vmem>>, vector<1x128xf32>
    %881 = vector.broadcast %880 : vector<1x128xf32> to vector<8x128xf32>
    %882 = arith.addf %879, %881 : vector<8x128xf32>
    %c2_409 = arith.constant 2 : index
    %c0_410 = arith.constant 0 : index
    %c0_411 = arith.constant 0 : index
    %883 = vector.load %arg20[%c2_409, %c0_410, %c0_411] : memref<7x8x128xf32, #tpu.memory_space<vmem>>, vector<1x8x128xf32>
    %884 = vector.shape_cast %883 : vector<1x8x128xf32> to vector<8x128xf32>
    %885 = vector.shape_cast %882 : vector<8x128xf32> to vector<1x8x128xf32>
    tpu.vector_store %arg20[%c2_409, %c0_410, %c0_411], %885 {strides = array<i32>} : memref<7x8x128xf32, #tpu.memory_space<vmem>>, vector<1x8x128xf32>,
    %c12_i32_412 = arith.constant 12 : i32
    %886 = vector.broadcast %c12_i32_412 : i32 to vector<8x128xi32>
    %887 = arith.cmpi slt, %2, %886 : vector<8x128xi32>
    %cst_413 = arith.constant -1.000000e+30 : f32
    %888 = vector.broadcast %cst_413 : f32 to vector<8x128xf32>
    %889 = arith.select %887, %882, %888 : vector<8x128xi1>, vector<8x128xf32>
    %cst_414 = arith.constant dense<0xFF800000> : vector<8xf32>
    %890 = vector.multi_reduction <maximumf>, %889, %cst_414 [1] : vector<8x128xf32> to vector<8xf32>
    %891 = vector.shape_cast %890 : vector<8xf32> to vector<8x1xf32>
    %892 = vector.broadcast %891 : vector<8x1xf32> to vector<8x128xf32>
    %893 = arith.cmpf oge, %889, %892 : vector<8x128xf32>
    %c128_i32_415 = arith.constant 128 : i32
    %894 = vector.broadcast %c128_i32_415 : i32 to vector<8x128xi32>
    %895 = arith.select %893, %2, %894 : vector<8x128xi1>, vector<8x128xi32>
    %cst_416 = arith.constant dense<2147483647> : vector<8xi32>
    %896 = vector.multi_reduction <minsi>, %895, %cst_416 [1] : vector<8x128xi32> to vector<8xi32>
    %897 = vector.shape_cast %896 : vector<8xi32> to vector<8x1xi32>
    %898 = vector.broadcast %897 : vector<8x1xi32> to vector<8x128xi32>
    %899 = arith.cmpi eq, %2, %898 : vector<8x128xi32>
    %900 = arith.extui %899 : vector<8x128xi1> to vector<8x128xi32>
    %901 = arith.sitofp %900 : vector<8x128xi32> to vector<8x128xf32>
    %c0_i32_417 = arith.constant 0 : i32
    %902 = vector.broadcast %c0_i32_417 : i32 to vector<8x1xi32>
    %c0_i32_418 = arith.constant 0 : i32
    %903 = vector.broadcast %c0_i32_418 : i32 to vector<8x1xi32>
    %904 = arith.cmpi eq, %0, %903 : vector<8x1xi32>
    %c2_419 = arith.constant 2 : index
    %c0_420 = arith.constant 0 : index
    %905 = memref.load %arg2[%c2_419, %c0_420] : memref<7x8xi32, #tpu.memory_space<smem>>
    %906 = vector.broadcast %905 : i32 to vector<8x1xi32>
    %907 = arith.select %904, %906, %902 : vector<8x1xi1>, vector<8x1xi32>
    %c1_i32_421 = arith.constant 1 : i32
    %908 = vector.broadcast %c1_i32_421 : i32 to vector<8x1xi32>
    %909 = arith.cmpi eq, %0, %908 : vector<8x1xi32>
    %c2_422 = arith.constant 2 : index
    %c1_423 = arith.constant 1 : index
    %910 = memref.load %arg2[%c2_422, %c1_423] : memref<7x8xi32, #tpu.memory_space<smem>>
    %911 = vector.broadcast %910 : i32 to vector<8x1xi32>
    %912 = arith.select %909, %911, %907 : vector<8x1xi1>, vector<8x1xi32>
    %c2_i32_424 = arith.constant 2 : i32
    %913 = vector.broadcast %c2_i32_424 : i32 to vector<8x1xi32>
    %914 = arith.cmpi eq, %0, %913 : vector<8x1xi32>
    %c2_425 = arith.constant 2 : index
    %c2_426 = arith.constant 2 : index
    %915 = memref.load %arg2[%c2_425, %c2_426] : memref<7x8xi32, #tpu.memory_space<smem>>
    %916 = vector.broadcast %915 : i32 to vector<8x1xi32>
    %917 = arith.select %914, %916, %912 : vector<8x1xi1>, vector<8x1xi32>
    %c3_i32_427 = arith.constant 3 : i32
    %918 = vector.broadcast %c3_i32_427 : i32 to vector<8x1xi32>
    %919 = arith.cmpi eq, %0, %918 : vector<8x1xi32>
    %c2_428 = arith.constant 2 : index
    %c3_429 = arith.constant 3 : index
    %920 = memref.load %arg2[%c2_428, %c3_429] : memref<7x8xi32, #tpu.memory_space<smem>>
    %921 = vector.broadcast %920 : i32 to vector<8x1xi32>
    %922 = arith.select %919, %921, %917 : vector<8x1xi1>, vector<8x1xi32>
    %c4_i32_430 = arith.constant 4 : i32
    %923 = vector.broadcast %c4_i32_430 : i32 to vector<8x1xi32>
    %924 = arith.cmpi eq, %0, %923 : vector<8x1xi32>
    %c2_431 = arith.constant 2 : index
    %c4_432 = arith.constant 4 : index
    %925 = memref.load %arg2[%c2_431, %c4_432] : memref<7x8xi32, #tpu.memory_space<smem>>
    %926 = vector.broadcast %925 : i32 to vector<8x1xi32>
    %927 = arith.select %924, %926, %922 : vector<8x1xi1>, vector<8x1xi32>
    %c5_i32_433 = arith.constant 5 : i32
    %928 = vector.broadcast %c5_i32_433 : i32 to vector<8x1xi32>
    %929 = arith.cmpi eq, %0, %928 : vector<8x1xi32>
    %c2_434 = arith.constant 2 : index
    %c5_435 = arith.constant 5 : index
    %930 = memref.load %arg2[%c2_434, %c5_435] : memref<7x8xi32, #tpu.memory_space<smem>>
    %931 = vector.broadcast %930 : i32 to vector<8x1xi32>
    %932 = arith.select %929, %931, %927 : vector<8x1xi1>, vector<8x1xi32>
    %c6_i32_436 = arith.constant 6 : i32
    %933 = vector.broadcast %c6_i32_436 : i32 to vector<8x1xi32>
    %934 = arith.cmpi eq, %0, %933 : vector<8x1xi32>
    %c2_437 = arith.constant 2 : index
    %c6_438 = arith.constant 6 : index
    %935 = memref.load %arg2[%c2_437, %c6_438] : memref<7x8xi32, #tpu.memory_space<smem>>
    %936 = vector.broadcast %935 : i32 to vector<8x1xi32>
    %937 = arith.select %934, %936, %932 : vector<8x1xi1>, vector<8x1xi32>
    %c7_i32_439 = arith.constant 7 : i32
    %938 = vector.broadcast %c7_i32_439 : i32 to vector<8x1xi32>
    %939 = arith.cmpi eq, %0, %938 : vector<8x1xi32>
    %c2_440 = arith.constant 2 : index
    %c7_441 = arith.constant 7 : index
    %940 = memref.load %arg2[%c2_440, %c7_441] : memref<7x8xi32, #tpu.memory_space<smem>>
    %941 = vector.broadcast %940 : i32 to vector<8x1xi32>
    %942 = arith.select %939, %941, %937 : vector<8x1xi1>, vector<8x1xi32>
    %943 = vector.broadcast %942 : vector<8x1xi32> to vector<8x128xi32>
    %944 = arith.cmpi eq, %2, %943 : vector<8x128xi32>
    %945 = arith.extui %944 : vector<8x128xi1> to vector<8x128xi32>
    %946 = arith.sitofp %945 : vector<8x128xi32> to vector<8x128xf32>
    %c2_442 = arith.constant 2 : index
    %947 = memref.load %arg3[%c2_442] : memref<6xi32, #tpu.memory_space<smem>>
    %c0_i32_443 = arith.constant 0 : i32
    %948 = arith.cmpi ne, %947, %c0_i32_443 : i32
    %949 = arith.select %948, %946, %901 : vector<8x128xf32>
    %950 = arith.truncf %949 : vector<8x128xf32> to vector<8x128xbf16>
    %c0_444 = arith.constant 0 : index
    %c0_445 = arith.constant 0 : index
    %951 = vector.load %arg5[%c0_444, %c0_445] : memref<128x16xbf16, #tpu.memory_space<vmem>>, vector<128x16xbf16>
    %cst_446 = arith.constant dense<0.000000e+00> : vector<8x16xf32>
    %952 = tpu.matmul %950, %951, %cst_446 {dimension_numbers = #tpu.dot_dimension_numbers<[1], [0], [0], [1], [0, 0, 1, 1], [], []>} : vector<8x128xbf16>, vector<128x16xbf16>, vector<8x16xf32> -> vector<8x16xf32>
    %953 = arith.truncf %952 : vector<8x16xf32> to vector<8x16xbf16>
    %c0_447 = arith.constant 0 : index
    %c0_448 = arith.constant 0 : index
    %954 = vector.load %arg12[%c0_447, %c0_448] : memref<16x128xbf16, #tpu.memory_space<vmem>>, vector<16x128xbf16>
    %cst_449 = arith.constant dense<0.000000e+00> : vector<8x128xf32>
    %955 = tpu.matmul %953, %954, %cst_449 {dimension_numbers = #tpu.dot_dimension_numbers<[1], [0], [0], [1], [0, 0, 1, 1], [], []>} : vector<8x16xbf16>, vector<16x128xbf16>, vector<8x128xf32> -> vector<8x128xf32>
    %956 = arith.truncf %848 : vector<8x32xf32> to vector<8x32xbf16>
    %c0_450 = arith.constant 0 : index
    %c0_451 = arith.constant 0 : index
    %957 = vector.load %arg13[%c0_450, %c0_451] : memref<32x128xbf16, #tpu.memory_space<vmem>>, vector<32x128xbf16>
    %cst_452 = arith.constant dense<0.000000e+00> : vector<8x128xf32>
    %958 = tpu.matmul %956, %957, %cst_452 {dimension_numbers = #tpu.dot_dimension_numbers<[1], [0], [0], [1], [0, 0, 1, 1], [], []>} : vector<8x32xbf16>, vector<32x128xbf16>, vector<8x128xf32> -> vector<8x128xf32>
    %959 = arith.addf %955, %958 : vector<8x128xf32>
    %c0_453 = arith.constant 0 : index
    %c0_454 = arith.constant 0 : index
    %960 = vector.load %arg14[%c0_453, %c0_454] : memref<1x128xf32, #tpu.memory_space<vmem>>, vector<1x128xf32>
    %961 = vector.broadcast %960 : vector<1x128xf32> to vector<8x128xf32>
    %962 = arith.addf %959, %961 : vector<8x128xf32>
    %cst_455 = arith.constant 5.000000e-01 : f32
    %963 = vector.broadcast %cst_455 : f32 to vector<8x128xf32>
    %964 = arith.mulf %963, %962 : vector<8x128xf32>
    %965 = arith.select %8, %962, %964 : vector<8x128xi1>, vector<8x128xf32>
    %966 = math.tanh %965 : vector<8x128xf32>
    %cst_456 = arith.constant 5.000000e-01 : f32
    %967 = vector.broadcast %cst_456 : f32 to vector<8x128xf32>
    %968 = arith.mulf %967, %966 : vector<8x128xf32>
    %cst_457 = arith.constant 5.000000e-01 : f32
    %969 = vector.broadcast %cst_457 : f32 to vector<8x128xf32>
    %970 = arith.addf %969, %968 : vector<8x128xf32>
    %971 = arith.select %8, %966, %970 : vector<8x128xi1>, vector<8x128xf32>
    %972 = vector.extract_strided_slice %971 {offsets = [0, 0], sizes = [8, 32], strides = [1, 1]} : vector<8x128xf32> to vector<8x32xf32>
    %973 = vector.extract_strided_slice %971 {offsets = [0, 32], sizes = [8, 32], strides = [1, 1]} : vector<8x128xf32> to vector<8x32xf32>
    %974 = vector.extract_strided_slice %971 {offsets = [0, 64], sizes = [8, 32], strides = [1, 1]} : vector<8x128xf32> to vector<8x32xf32>
    %975 = vector.extract_strided_slice %971 {offsets = [0, 96], sizes = [8, 32], strides = [1, 1]} : vector<8x128xf32> to vector<8x32xf32>
    %976 = arith.mulf %973, %846 : vector<8x32xf32>
    %977 = arith.mulf %972, %974 : vector<8x32xf32>
    %978 = arith.addf %976, %977 : vector<8x32xf32>
    %979 = math.tanh %978 : vector<8x32xf32>
    %980 = arith.mulf %975, %979 : vector<8x32xf32>
    %981 = arith.truncf %980 : vector<8x32xf32> to vector<8x32xbf16>
    %c0_458 = arith.constant 0 : index
    %c0_459 = arith.constant 0 : index
    %982 = vector.load %arg15[%c0_458, %c0_459] : memref<32x128xbf16, #tpu.memory_space<vmem>>, vector<32x128xbf16>
    %cst_460 = arith.constant dense<0.000000e+00> : vector<8x128xf32>
    %983 = tpu.matmul %981, %982, %cst_460 {dimension_numbers = #tpu.dot_dimension_numbers<[1], [0], [0], [1], [0, 0, 1, 1], [], []>} : vector<8x32xbf16>, vector<32x128xbf16>, vector<8x128xf32> -> vector<8x128xf32>
    %984 = arith.truncf %876 : vector<8x32xf32> to vector<8x32xbf16>
    %c0_461 = arith.constant 0 : index
    %c0_462 = arith.constant 0 : index
    %985 = vector.load %arg16[%c0_461, %c0_462] : memref<32x128xbf16, #tpu.memory_space<vmem>>, vector<32x128xbf16>
    %cst_463 = arith.constant dense<0.000000e+00> : vector<8x128xf32>
    %986 = tpu.matmul %984, %985, %cst_463 {dimension_numbers = #tpu.dot_dimension_numbers<[1], [0], [0], [1], [0, 0, 1, 1], [], []>} : vector<8x32xbf16>, vector<32x128xbf16>, vector<8x128xf32> -> vector<8x128xf32>
    %987 = arith.addf %983, %986 : vector<8x128xf32>
    %c0_464 = arith.constant 0 : index
    %c0_465 = arith.constant 0 : index
    %988 = vector.load %arg17[%c0_464, %c0_465] : memref<1x128xf32, #tpu.memory_space<vmem>>, vector<1x128xf32>
    %989 = vector.broadcast %988 : vector<1x128xf32> to vector<8x128xf32>
    %990 = arith.addf %987, %989 : vector<8x128xf32>
    %cst_466 = arith.constant 5.000000e-01 : f32
    %991 = vector.broadcast %cst_466 : f32 to vector<8x128xf32>
    %992 = arith.mulf %991, %990 : vector<8x128xf32>
    %993 = arith.select %8, %990, %992 : vector<8x128xi1>, vector<8x128xf32>
    %994 = math.tanh %993 : vector<8x128xf32>
    %cst_467 = arith.constant 5.000000e-01 : f32
    %995 = vector.broadcast %cst_467 : f32 to vector<8x128xf32>
    %996 = arith.mulf %995, %994 : vector<8x128xf32>
    %cst_468 = arith.constant 5.000000e-01 : f32
    %997 = vector.broadcast %cst_468 : f32 to vector<8x128xf32>
    %998 = arith.addf %997, %996 : vector<8x128xf32>
    %999 = arith.select %8, %994, %998 : vector<8x128xi1>, vector<8x128xf32>
    %1000 = vector.extract_strided_slice %999 {offsets = [0, 0], sizes = [8, 32], strides = [1, 1]} : vector<8x128xf32> to vector<8x32xf32>
    %1001 = vector.extract_strided_slice %999 {offsets = [0, 32], sizes = [8, 32], strides = [1, 1]} : vector<8x128xf32> to vector<8x32xf32>
    %1002 = vector.extract_strided_slice %999 {offsets = [0, 64], sizes = [8, 32], strides = [1, 1]} : vector<8x128xf32> to vector<8x32xf32>
    %1003 = vector.extract_strided_slice %999 {offsets = [0, 96], sizes = [8, 32], strides = [1, 1]} : vector<8x128xf32> to vector<8x32xf32>
    %1004 = arith.mulf %1001, %874 : vector<8x32xf32>
    %1005 = arith.mulf %1000, %1002 : vector<8x32xf32>
    %1006 = arith.addf %1004, %1005 : vector<8x32xf32>
    %1007 = math.tanh %1006 : vector<8x32xf32>
    %1008 = arith.mulf %1003, %1007 : vector<8x32xf32>
    %1009 = arith.truncf %1008 : vector<8x32xf32> to vector<8x32xbf16>
    %c0_469 = arith.constant 0 : index
    %c0_470 = arith.constant 0 : index
    %1010 = vector.load %arg18[%c0_469, %c0_470] : memref<32x128xbf16, #tpu.memory_space<vmem>>, vector<32x128xbf16>
    %cst_471 = arith.constant dense<0.000000e+00> : vector<8x128xf32>
    %1011 = tpu.matmul %1009, %1010, %cst_471 {dimension_numbers = #tpu.dot_dimension_numbers<[1], [0], [0], [1], [0, 0, 1, 1], [], []>} : vector<8x32xbf16>, vector<32x128xbf16>, vector<8x128xf32> -> vector<8x128xf32>
    %c0_472 = arith.constant 0 : index
    %c0_473 = arith.constant 0 : index
    %1012 = vector.load %arg19[%c0_472, %c0_473] : memref<1x128xf32, #tpu.memory_space<vmem>>, vector<1x128xf32>
    %1013 = vector.broadcast %1012 : vector<1x128xf32> to vector<8x128xf32>
    %1014 = arith.addf %1011, %1013 : vector<8x128xf32>
    %c3_474 = arith.constant 3 : index
    %c0_475 = arith.constant 0 : index
    %c0_476 = arith.constant 0 : index
    %1015 = vector.load %arg20[%c3_474, %c0_475, %c0_476] : memref<7x8x128xf32, #tpu.memory_space<vmem>>, vector<1x8x128xf32>
    %1016 = vector.shape_cast %1015 : vector<1x8x128xf32> to vector<8x128xf32>
    %1017 = vector.shape_cast %1014 : vector<8x128xf32> to vector<1x8x128xf32>
    tpu.vector_store %arg20[%c3_474, %c0_475, %c0_476], %1017 {strides = array<i32>} : memref<7x8x128xf32, #tpu.memory_space<vmem>>, vector<1x8x128xf32>,
    %c12_i32_477 = arith.constant 12 : i32
    %1018 = vector.broadcast %c12_i32_477 : i32 to vector<8x128xi32>
    %1019 = arith.cmpi slt, %2, %1018 : vector<8x128xi32>
    %cst_478 = arith.constant -1.000000e+30 : f32
    %1020 = vector.broadcast %cst_478 : f32 to vector<8x128xf32>
    %1021 = arith.select %1019, %1014, %1020 : vector<8x128xi1>, vector<8x128xf32>
    %cst_479 = arith.constant dense<0xFF800000> : vector<8xf32>
    %1022 = vector.multi_reduction <maximumf>, %1021, %cst_479 [1] : vector<8x128xf32> to vector<8xf32>
    %1023 = vector.shape_cast %1022 : vector<8xf32> to vector<8x1xf32>
    %1024 = vector.broadcast %1023 : vector<8x1xf32> to vector<8x128xf32>
    %1025 = arith.cmpf oge, %1021, %1024 : vector<8x128xf32>
    %c128_i32_480 = arith.constant 128 : i32
    %1026 = vector.broadcast %c128_i32_480 : i32 to vector<8x128xi32>
    %1027 = arith.select %1025, %2, %1026 : vector<8x128xi1>, vector<8x128xi32>
    %cst_481 = arith.constant dense<2147483647> : vector<8xi32>
    %1028 = vector.multi_reduction <minsi>, %1027, %cst_481 [1] : vector<8x128xi32> to vector<8xi32>
    %1029 = vector.shape_cast %1028 : vector<8xi32> to vector<8x1xi32>
    %1030 = vector.broadcast %1029 : vector<8x1xi32> to vector<8x128xi32>
    %1031 = arith.cmpi eq, %2, %1030 : vector<8x128xi32>
    %1032 = arith.extui %1031 : vector<8x128xi1> to vector<8x128xi32>
    %1033 = arith.sitofp %1032 : vector<8x128xi32> to vector<8x128xf32>
    %c0_i32_482 = arith.constant 0 : i32
    %1034 = vector.broadcast %c0_i32_482 : i32 to vector<8x1xi32>
    %c0_i32_483 = arith.constant 0 : i32
    %1035 = vector.broadcast %c0_i32_483 : i32 to vector<8x1xi32>
    %1036 = arith.cmpi eq, %0, %1035 : vector<8x1xi32>
    %c3_484 = arith.constant 3 : index
    %c0_485 = arith.constant 0 : index
    %1037 = memref.load %arg2[%c3_484, %c0_485] : memref<7x8xi32, #tpu.memory_space<smem>>
    %1038 = vector.broadcast %1037 : i32 to vector<8x1xi32>
    %1039 = arith.select %1036, %1038, %1034 : vector<8x1xi1>, vector<8x1xi32>
    %c1_i32_486 = arith.constant 1 : i32
    %1040 = vector.broadcast %c1_i32_486 : i32 to vector<8x1xi32>
    %1041 = arith.cmpi eq, %0, %1040 : vector<8x1xi32>
    %c3_487 = arith.constant 3 : index
    %c1_488 = arith.constant 1 : index
    %1042 = memref.load %arg2[%c3_487, %c1_488] : memref<7x8xi32, #tpu.memory_space<smem>>
    %1043 = vector.broadcast %1042 : i32 to vector<8x1xi32>
    %1044 = arith.select %1041, %1043, %1039 : vector<8x1xi1>, vector<8x1xi32>
    %c2_i32_489 = arith.constant 2 : i32
    %1045 = vector.broadcast %c2_i32_489 : i32 to vector<8x1xi32>
    %1046 = arith.cmpi eq, %0, %1045 : vector<8x1xi32>
    %c3_490 = arith.constant 3 : index
    %c2_491 = arith.constant 2 : index
    %1047 = memref.load %arg2[%c3_490, %c2_491] : memref<7x8xi32, #tpu.memory_space<smem>>
    %1048 = vector.broadcast %1047 : i32 to vector<8x1xi32>
    %1049 = arith.select %1046, %1048, %1044 : vector<8x1xi1>, vector<8x1xi32>
    %c3_i32_492 = arith.constant 3 : i32
    %1050 = vector.broadcast %c3_i32_492 : i32 to vector<8x1xi32>
    %1051 = arith.cmpi eq, %0, %1050 : vector<8x1xi32>
    %c3_493 = arith.constant 3 : index
    %c3_494 = arith.constant 3 : index
    %1052 = memref.load %arg2[%c3_493, %c3_494] : memref<7x8xi32, #tpu.memory_space<smem>>
    %1053 = vector.broadcast %1052 : i32 to vector<8x1xi32>
    %1054 = arith.select %1051, %1053, %1049 : vector<8x1xi1>, vector<8x1xi32>
    %c4_i32_495 = arith.constant 4 : i32
    %1055 = vector.broadcast %c4_i32_495 : i32 to vector<8x1xi32>
    %1056 = arith.cmpi eq, %0, %1055 : vector<8x1xi32>
    %c3_496 = arith.constant 3 : index
    %c4_497 = arith.constant 4 : index
    %1057 = memref.load %arg2[%c3_496, %c4_497] : memref<7x8xi32, #tpu.memory_space<smem>>
    %1058 = vector.broadcast %1057 : i32 to vector<8x1xi32>
    %1059 = arith.select %1056, %1058, %1054 : vector<8x1xi1>, vector<8x1xi32>
    %c5_i32_498 = arith.constant 5 : i32
    %1060 = vector.broadcast %c5_i32_498 : i32 to vector<8x1xi32>
    %1061 = arith.cmpi eq, %0, %1060 : vector<8x1xi32>
    %c3_499 = arith.constant 3 : index
    %c5_500 = arith.constant 5 : index
    %1062 = memref.load %arg2[%c3_499, %c5_500] : memref<7x8xi32, #tpu.memory_space<smem>>
    %1063 = vector.broadcast %1062 : i32 to vector<8x1xi32>
    %1064 = arith.select %1061, %1063, %1059 : vector<8x1xi1>, vector<8x1xi32>
    %c6_i32_501 = arith.constant 6 : i32
    %1065 = vector.broadcast %c6_i32_501 : i32 to vector<8x1xi32>
    %1066 = arith.cmpi eq, %0, %1065 : vector<8x1xi32>
    %c3_502 = arith.constant 3 : index
    %c6_503 = arith.constant 6 : index
    %1067 = memref.load %arg2[%c3_502, %c6_503] : memref<7x8xi32, #tpu.memory_space<smem>>
    %1068 = vector.broadcast %1067 : i32 to vector<8x1xi32>
    %1069 = arith.select %1066, %1068, %1064 : vector<8x1xi1>, vector<8x1xi32>
    %c7_i32_504 = arith.constant 7 : i32
    %1070 = vector.broadcast %c7_i32_504 : i32 to vector<8x1xi32>
    %1071 = arith.cmpi eq, %0, %1070 : vector<8x1xi32>
    %c3_505 = arith.constant 3 : index
    %c7_506 = arith.constant 7 : index
    %1072 = memref.load %arg2[%c3_505, %c7_506] : memref<7x8xi32, #tpu.memory_space<smem>>
    %1073 = vector.broadcast %1072 : i32 to vector<8x1xi32>
    %1074 = arith.select %1071, %1073, %1069 : vector<8x1xi1>, vector<8x1xi32>
    %1075 = vector.broadcast %1074 : vector<8x1xi32> to vector<8x128xi32>
    %1076 = arith.cmpi eq, %2, %1075 : vector<8x128xi32>
    %1077 = arith.extui %1076 : vector<8x128xi1> to vector<8x128xi32>
    %1078 = arith.sitofp %1077 : vector<8x128xi32> to vector<8x128xf32>
    %c3_507 = arith.constant 3 : index
    %1079 = memref.load %arg3[%c3_507] : memref<6xi32, #tpu.memory_space<smem>>
    %c0_i32_508 = arith.constant 0 : i32
    %1080 = arith.cmpi ne, %1079, %c0_i32_508 : i32
    %1081 = arith.select %1080, %1078, %1033 : vector<8x128xf32>
    %1082 = arith.truncf %1081 : vector<8x128xf32> to vector<8x128xbf16>
    %c0_509 = arith.constant 0 : index
    %c0_510 = arith.constant 0 : index
    %1083 = vector.load %arg5[%c0_509, %c0_510] : memref<128x16xbf16, #tpu.memory_space<vmem>>, vector<128x16xbf16>
    %cst_511 = arith.constant dense<0.000000e+00> : vector<8x16xf32>
    %1084 = tpu.matmul %1082, %1083, %cst_511 {dimension_numbers = #tpu.dot_dimension_numbers<[1], [0], [0], [1], [0, 0, 1, 1], [], []>} : vector<8x128xbf16>, vector<128x16xbf16>, vector<8x16xf32> -> vector<8x16xf32>
    %1085 = arith.truncf %1084 : vector<8x16xf32> to vector<8x16xbf16>
    %c0_512 = arith.constant 0 : index
    %c0_513 = arith.constant 0 : index
    %1086 = vector.load %arg12[%c0_512, %c0_513] : memref<16x128xbf16, #tpu.memory_space<vmem>>, vector<16x128xbf16>
    %cst_514 = arith.constant dense<0.000000e+00> : vector<8x128xf32>
    %1087 = tpu.matmul %1085, %1086, %cst_514 {dimension_numbers = #tpu.dot_dimension_numbers<[1], [0], [0], [1], [0, 0, 1, 1], [], []>} : vector<8x16xbf16>, vector<16x128xbf16>, vector<8x128xf32> -> vector<8x128xf32>
    %1088 = arith.truncf %980 : vector<8x32xf32> to vector<8x32xbf16>
    %c0_515 = arith.constant 0 : index
    %c0_516 = arith.constant 0 : index
    %1089 = vector.load %arg13[%c0_515, %c0_516] : memref<32x128xbf16, #tpu.memory_space<vmem>>, vector<32x128xbf16>
    %cst_517 = arith.constant dense<0.000000e+00> : vector<8x128xf32>
    %1090 = tpu.matmul %1088, %1089, %cst_517 {dimension_numbers = #tpu.dot_dimension_numbers<[1], [0], [0], [1], [0, 0, 1, 1], [], []>} : vector<8x32xbf16>, vector<32x128xbf16>, vector<8x128xf32> -> vector<8x128xf32>
    %1091 = arith.addf %1087, %1090 : vector<8x128xf32>
    %c0_518 = arith.constant 0 : index
    %c0_519 = arith.constant 0 : index
    %1092 = vector.load %arg14[%c0_518, %c0_519] : memref<1x128xf32, #tpu.memory_space<vmem>>, vector<1x128xf32>
    %1093 = vector.broadcast %1092 : vector<1x128xf32> to vector<8x128xf32>
    %1094 = arith.addf %1091, %1093 : vector<8x128xf32>
    %cst_520 = arith.constant 5.000000e-01 : f32
    %1095 = vector.broadcast %cst_520 : f32 to vector<8x128xf32>
    %1096 = arith.mulf %1095, %1094 : vector<8x128xf32>
    %1097 = arith.select %8, %1094, %1096 : vector<8x128xi1>, vector<8x128xf32>
    %1098 = math.tanh %1097 : vector<8x128xf32>
    %cst_521 = arith.constant 5.000000e-01 : f32
    %1099 = vector.broadcast %cst_521 : f32 to vector<8x128xf32>
    %1100 = arith.mulf %1099, %1098 : vector<8x128xf32>
    %cst_522 = arith.constant 5.000000e-01 : f32
    %1101 = vector.broadcast %cst_522 : f32 to vector<8x128xf32>
    %1102 = arith.addf %1101, %1100 : vector<8x128xf32>
    %1103 = arith.select %8, %1098, %1102 : vector<8x128xi1>, vector<8x128xf32>
    %1104 = vector.extract_strided_slice %1103 {offsets = [0, 0], sizes = [8, 32], strides = [1, 1]} : vector<8x128xf32> to vector<8x32xf32>
    %1105 = vector.extract_strided_slice %1103 {offsets = [0, 32], sizes = [8, 32], strides = [1, 1]} : vector<8x128xf32> to vector<8x32xf32>
    %1106 = vector.extract_strided_slice %1103 {offsets = [0, 64], sizes = [8, 32], strides = [1, 1]} : vector<8x128xf32> to vector<8x32xf32>
    %1107 = vector.extract_strided_slice %1103 {offsets = [0, 96], sizes = [8, 32], strides = [1, 1]} : vector<8x128xf32> to vector<8x32xf32>
    %1108 = arith.mulf %1105, %978 : vector<8x32xf32>
    %1109 = arith.mulf %1104, %1106 : vector<8x32xf32>
    %1110 = arith.addf %1108, %1109 : vector<8x32xf32>
    %1111 = math.tanh %1110 : vector<8x32xf32>
    %1112 = arith.mulf %1107, %1111 : vector<8x32xf32>
    %1113 = arith.truncf %1112 : vector<8x32xf32> to vector<8x32xbf16>
    %c0_523 = arith.constant 0 : index
    %c0_524 = arith.constant 0 : index
    %1114 = vector.load %arg15[%c0_523, %c0_524] : memref<32x128xbf16, #tpu.memory_space<vmem>>, vector<32x128xbf16>
    %cst_525 = arith.constant dense<0.000000e+00> : vector<8x128xf32>
    %1115 = tpu.matmul %1113, %1114, %cst_525 {dimension_numbers = #tpu.dot_dimension_numbers<[1], [0], [0], [1], [0, 0, 1, 1], [], []>} : vector<8x32xbf16>, vector<32x128xbf16>, vector<8x128xf32> -> vector<8x128xf32>
    %1116 = arith.truncf %1008 : vector<8x32xf32> to vector<8x32xbf16>
    %c0_526 = arith.constant 0 : index
    %c0_527 = arith.constant 0 : index
    %1117 = vector.load %arg16[%c0_526, %c0_527] : memref<32x128xbf16, #tpu.memory_space<vmem>>, vector<32x128xbf16>
    %cst_528 = arith.constant dense<0.000000e+00> : vector<8x128xf32>
    %1118 = tpu.matmul %1116, %1117, %cst_528 {dimension_numbers = #tpu.dot_dimension_numbers<[1], [0], [0], [1], [0, 0, 1, 1], [], []>} : vector<8x32xbf16>, vector<32x128xbf16>, vector<8x128xf32> -> vector<8x128xf32>
    %1119 = arith.addf %1115, %1118 : vector<8x128xf32>
    %c0_529 = arith.constant 0 : index
    %c0_530 = arith.constant 0 : index
    %1120 = vector.load %arg17[%c0_529, %c0_530] : memref<1x128xf32, #tpu.memory_space<vmem>>, vector<1x128xf32>
    %1121 = vector.broadcast %1120 : vector<1x128xf32> to vector<8x128xf32>
    %1122 = arith.addf %1119, %1121 : vector<8x128xf32>
    %cst_531 = arith.constant 5.000000e-01 : f32
    %1123 = vector.broadcast %cst_531 : f32 to vector<8x128xf32>
    %1124 = arith.mulf %1123, %1122 : vector<8x128xf32>
    %1125 = arith.select %8, %1122, %1124 : vector<8x128xi1>, vector<8x128xf32>
    %1126 = math.tanh %1125 : vector<8x128xf32>
    %cst_532 = arith.constant 5.000000e-01 : f32
    %1127 = vector.broadcast %cst_532 : f32 to vector<8x128xf32>
    %1128 = arith.mulf %1127, %1126 : vector<8x128xf32>
    %cst_533 = arith.constant 5.000000e-01 : f32
    %1129 = vector.broadcast %cst_533 : f32 to vector<8x128xf32>
    %1130 = arith.addf %1129, %1128 : vector<8x128xf32>
    %1131 = arith.select %8, %1126, %1130 : vector<8x128xi1>, vector<8x128xf32>
    %1132 = vector.extract_strided_slice %1131 {offsets = [0, 0], sizes = [8, 32], strides = [1, 1]} : vector<8x128xf32> to vector<8x32xf32>
    %1133 = vector.extract_strided_slice %1131 {offsets = [0, 32], sizes = [8, 32], strides = [1, 1]} : vector<8x128xf32> to vector<8x32xf32>
    %1134 = vector.extract_strided_slice %1131 {offsets = [0, 64], sizes = [8, 32], strides = [1, 1]} : vector<8x128xf32> to vector<8x32xf32>
    %1135 = vector.extract_strided_slice %1131 {offsets = [0, 96], sizes = [8, 32], strides = [1, 1]} : vector<8x128xf32> to vector<8x32xf32>
    %1136 = arith.mulf %1133, %1006 : vector<8x32xf32>
    %1137 = arith.mulf %1132, %1134 : vector<8x32xf32>
    %1138 = arith.addf %1136, %1137 : vector<8x32xf32>
    %1139 = math.tanh %1138 : vector<8x32xf32>
    %1140 = arith.mulf %1135, %1139 : vector<8x32xf32>
    %1141 = arith.truncf %1140 : vector<8x32xf32> to vector<8x32xbf16>
    %c0_534 = arith.constant 0 : index
    %c0_535 = arith.constant 0 : index
    %1142 = vector.load %arg18[%c0_534, %c0_535] : memref<32x128xbf16, #tpu.memory_space<vmem>>, vector<32x128xbf16>
    %cst_536 = arith.constant dense<0.000000e+00> : vector<8x128xf32>
    %1143 = tpu.matmul %1141, %1142, %cst_536 {dimension_numbers = #tpu.dot_dimension_numbers<[1], [0], [0], [1], [0, 0, 1, 1], [], []>} : vector<8x32xbf16>, vector<32x128xbf16>, vector<8x128xf32> -> vector<8x128xf32>
    %c0_537 = arith.constant 0 : index
    %c0_538 = arith.constant 0 : index
    %1144 = vector.load %arg19[%c0_537, %c0_538] : memref<1x128xf32, #tpu.memory_space<vmem>>, vector<1x128xf32>
    %1145 = vector.broadcast %1144 : vector<1x128xf32> to vector<8x128xf32>
    %1146 = arith.addf %1143, %1145 : vector<8x128xf32>
    %c4_539 = arith.constant 4 : index
    %c0_540 = arith.constant 0 : index
    %c0_541 = arith.constant 0 : index
    %1147 = vector.load %arg20[%c4_539, %c0_540, %c0_541] : memref<7x8x128xf32, #tpu.memory_space<vmem>>, vector<1x8x128xf32>
    %1148 = vector.shape_cast %1147 : vector<1x8x128xf32> to vector<8x128xf32>
    %1149 = vector.shape_cast %1146 : vector<8x128xf32> to vector<1x8x128xf32>
    tpu.vector_store %arg20[%c4_539, %c0_540, %c0_541], %1149 {strides = array<i32>} : memref<7x8x128xf32, #tpu.memory_space<vmem>>, vector<1x8x128xf32>,
    %c12_i32_542 = arith.constant 12 : i32
    %1150 = vector.broadcast %c12_i32_542 : i32 to vector<8x128xi32>
    %1151 = arith.cmpi slt, %2, %1150 : vector<8x128xi32>
    %cst_543 = arith.constant -1.000000e+30 : f32
    %1152 = vector.broadcast %cst_543 : f32 to vector<8x128xf32>
    %1153 = arith.select %1151, %1146, %1152 : vector<8x128xi1>, vector<8x128xf32>
    %cst_544 = arith.constant dense<0xFF800000> : vector<8xf32>
    %1154 = vector.multi_reduction <maximumf>, %1153, %cst_544 [1] : vector<8x128xf32> to vector<8xf32>
    %1155 = vector.shape_cast %1154 : vector<8xf32> to vector<8x1xf32>
    %1156 = vector.broadcast %1155 : vector<8x1xf32> to vector<8x128xf32>
    %1157 = arith.cmpf oge, %1153, %1156 : vector<8x128xf32>
    %c128_i32_545 = arith.constant 128 : i32
    %1158 = vector.broadcast %c128_i32_545 : i32 to vector<8x128xi32>
    %1159 = arith.select %1157, %2, %1158 : vector<8x128xi1>, vector<8x128xi32>
    %cst_546 = arith.constant dense<2147483647> : vector<8xi32>
    %1160 = vector.multi_reduction <minsi>, %1159, %cst_546 [1] : vector<8x128xi32> to vector<8xi32>
    %1161 = vector.shape_cast %1160 : vector<8xi32> to vector<8x1xi32>
    %1162 = vector.broadcast %1161 : vector<8x1xi32> to vector<8x128xi32>
    %1163 = arith.cmpi eq, %2, %1162 : vector<8x128xi32>
    %1164 = arith.extui %1163 : vector<8x128xi1> to vector<8x128xi32>
    %1165 = arith.sitofp %1164 : vector<8x128xi32> to vector<8x128xf32>
    %c0_i32_547 = arith.constant 0 : i32
    %1166 = vector.broadcast %c0_i32_547 : i32 to vector<8x1xi32>
    %c0_i32_548 = arith.constant 0 : i32
    %1167 = vector.broadcast %c0_i32_548 : i32 to vector<8x1xi32>
    %1168 = arith.cmpi eq, %0, %1167 : vector<8x1xi32>
    %c4_549 = arith.constant 4 : index
    %c0_550 = arith.constant 0 : index
    %1169 = memref.load %arg2[%c4_549, %c0_550] : memref<7x8xi32, #tpu.memory_space<smem>>
    %1170 = vector.broadcast %1169 : i32 to vector<8x1xi32>
    %1171 = arith.select %1168, %1170, %1166 : vector<8x1xi1>, vector<8x1xi32>
    %c1_i32_551 = arith.constant 1 : i32
    %1172 = vector.broadcast %c1_i32_551 : i32 to vector<8x1xi32>
    %1173 = arith.cmpi eq, %0, %1172 : vector<8x1xi32>
    %c4_552 = arith.constant 4 : index
    %c1_553 = arith.constant 1 : index
    %1174 = memref.load %arg2[%c4_552, %c1_553] : memref<7x8xi32, #tpu.memory_space<smem>>
    %1175 = vector.broadcast %1174 : i32 to vector<8x1xi32>
    %1176 = arith.select %1173, %1175, %1171 : vector<8x1xi1>, vector<8x1xi32>
    %c2_i32_554 = arith.constant 2 : i32
    %1177 = vector.broadcast %c2_i32_554 : i32 to vector<8x1xi32>
    %1178 = arith.cmpi eq, %0, %1177 : vector<8x1xi32>
    %c4_555 = arith.constant 4 : index
    %c2_556 = arith.constant 2 : index
    %1179 = memref.load %arg2[%c4_555, %c2_556] : memref<7x8xi32, #tpu.memory_space<smem>>
    %1180 = vector.broadcast %1179 : i32 to vector<8x1xi32>
    %1181 = arith.select %1178, %1180, %1176 : vector<8x1xi1>, vector<8x1xi32>
    %c3_i32_557 = arith.constant 3 : i32
    %1182 = vector.broadcast %c3_i32_557 : i32 to vector<8x1xi32>
    %1183 = arith.cmpi eq, %0, %1182 : vector<8x1xi32>
    %c4_558 = arith.constant 4 : index
    %c3_559 = arith.constant 3 : index
    %1184 = memref.load %arg2[%c4_558, %c3_559] : memref<7x8xi32, #tpu.memory_space<smem>>
    %1185 = vector.broadcast %1184 : i32 to vector<8x1xi32>
    %1186 = arith.select %1183, %1185, %1181 : vector<8x1xi1>, vector<8x1xi32>
    %c4_i32_560 = arith.constant 4 : i32
    %1187 = vector.broadcast %c4_i32_560 : i32 to vector<8x1xi32>
    %1188 = arith.cmpi eq, %0, %1187 : vector<8x1xi32>
    %c4_561 = arith.constant 4 : index
    %c4_562 = arith.constant 4 : index
    %1189 = memref.load %arg2[%c4_561, %c4_562] : memref<7x8xi32, #tpu.memory_space<smem>>
    %1190 = vector.broadcast %1189 : i32 to vector<8x1xi32>
    %1191 = arith.select %1188, %1190, %1186 : vector<8x1xi1>, vector<8x1xi32>
    %c5_i32_563 = arith.constant 5 : i32
    %1192 = vector.broadcast %c5_i32_563 : i32 to vector<8x1xi32>
    %1193 = arith.cmpi eq, %0, %1192 : vector<8x1xi32>
    %c4_564 = arith.constant 4 : index
    %c5_565 = arith.constant 5 : index
    %1194 = memref.load %arg2[%c4_564, %c5_565] : memref<7x8xi32, #tpu.memory_space<smem>>
    %1195 = vector.broadcast %1194 : i32 to vector<8x1xi32>
    %1196 = arith.select %1193, %1195, %1191 : vector<8x1xi1>, vector<8x1xi32>
    %c6_i32_566 = arith.constant 6 : i32
    %1197 = vector.broadcast %c6_i32_566 : i32 to vector<8x1xi32>
    %1198 = arith.cmpi eq, %0, %1197 : vector<8x1xi32>
    %c4_567 = arith.constant 4 : index
    %c6_568 = arith.constant 6 : index
    %1199 = memref.load %arg2[%c4_567, %c6_568] : memref<7x8xi32, #tpu.memory_space<smem>>
    %1200 = vector.broadcast %1199 : i32 to vector<8x1xi32>
    %1201 = arith.select %1198, %1200, %1196 : vector<8x1xi1>, vector<8x1xi32>
    %c7_i32_569 = arith.constant 7 : i32
    %1202 = vector.broadcast %c7_i32_569 : i32 to vector<8x1xi32>
    %1203 = arith.cmpi eq, %0, %1202 : vector<8x1xi32>
    %c4_570 = arith.constant 4 : index
    %c7_571 = arith.constant 7 : index
    %1204 = memref.load %arg2[%c4_570, %c7_571] : memref<7x8xi32, #tpu.memory_space<smem>>
    %1205 = vector.broadcast %1204 : i32 to vector<8x1xi32>
    %1206 = arith.select %1203, %1205, %1201 : vector<8x1xi1>, vector<8x1xi32>
    %1207 = vector.broadcast %1206 : vector<8x1xi32> to vector<8x128xi32>
    %1208 = arith.cmpi eq, %2, %1207 : vector<8x128xi32>
    %1209 = arith.extui %1208 : vector<8x128xi1> to vector<8x128xi32>
    %1210 = arith.sitofp %1209 : vector<8x128xi32> to vector<8x128xf32>
    %c4_572 = arith.constant 4 : index
    %1211 = memref.load %arg3[%c4_572] : memref<6xi32, #tpu.memory_space<smem>>
    %c0_i32_573 = arith.constant 0 : i32
    %1212 = arith.cmpi ne, %1211, %c0_i32_573 : i32
    %1213 = arith.select %1212, %1210, %1165 : vector<8x128xf32>
    %1214 = arith.truncf %1213 : vector<8x128xf32> to vector<8x128xbf16>
    %c0_574 = arith.constant 0 : index
    %c0_575 = arith.constant 0 : index
    %1215 = vector.load %arg5[%c0_574, %c0_575] : memref<128x16xbf16, #tpu.memory_space<vmem>>, vector<128x16xbf16>
    %cst_576 = arith.constant dense<0.000000e+00> : vector<8x16xf32>
    %1216 = tpu.matmul %1214, %1215, %cst_576 {dimension_numbers = #tpu.dot_dimension_numbers<[1], [0], [0], [1], [0, 0, 1, 1], [], []>} : vector<8x128xbf16>, vector<128x16xbf16>, vector<8x16xf32> -> vector<8x16xf32>
    %1217 = arith.truncf %1216 : vector<8x16xf32> to vector<8x16xbf16>
    %c0_577 = arith.constant 0 : index
    %c0_578 = arith.constant 0 : index
    %1218 = vector.load %arg12[%c0_577, %c0_578] : memref<16x128xbf16, #tpu.memory_space<vmem>>, vector<16x128xbf16>
    %cst_579 = arith.constant dense<0.000000e+00> : vector<8x128xf32>
    %1219 = tpu.matmul %1217, %1218, %cst_579 {dimension_numbers = #tpu.dot_dimension_numbers<[1], [0], [0], [1], [0, 0, 1, 1], [], []>} : vector<8x16xbf16>, vector<16x128xbf16>, vector<8x128xf32> -> vector<8x128xf32>
    %1220 = arith.truncf %1112 : vector<8x32xf32> to vector<8x32xbf16>
    %c0_580 = arith.constant 0 : index
    %c0_581 = arith.constant 0 : index
    %1221 = vector.load %arg13[%c0_580, %c0_581] : memref<32x128xbf16, #tpu.memory_space<vmem>>, vector<32x128xbf16>
    %cst_582 = arith.constant dense<0.000000e+00> : vector<8x128xf32>
    %1222 = tpu.matmul %1220, %1221, %cst_582 {dimension_numbers = #tpu.dot_dimension_numbers<[1], [0], [0], [1], [0, 0, 1, 1], [], []>} : vector<8x32xbf16>, vector<32x128xbf16>, vector<8x128xf32> -> vector<8x128xf32>
    %1223 = arith.addf %1219, %1222 : vector<8x128xf32>
    %c0_583 = arith.constant 0 : index
    %c0_584 = arith.constant 0 : index
    %1224 = vector.load %arg14[%c0_583, %c0_584] : memref<1x128xf32, #tpu.memory_space<vmem>>, vector<1x128xf32>
    %1225 = vector.broadcast %1224 : vector<1x128xf32> to vector<8x128xf32>
    %1226 = arith.addf %1223, %1225 : vector<8x128xf32>
    %cst_585 = arith.constant 5.000000e-01 : f32
    %1227 = vector.broadcast %cst_585 : f32 to vector<8x128xf32>
    %1228 = arith.mulf %1227, %1226 : vector<8x128xf32>
    %1229 = arith.select %8, %1226, %1228 : vector<8x128xi1>, vector<8x128xf32>
    %1230 = math.tanh %1229 : vector<8x128xf32>
    %cst_586 = arith.constant 5.000000e-01 : f32
    %1231 = vector.broadcast %cst_586 : f32 to vector<8x128xf32>
    %1232 = arith.mulf %1231, %1230 : vector<8x128xf32>
    %cst_587 = arith.constant 5.000000e-01 : f32
    %1233 = vector.broadcast %cst_587 : f32 to vector<8x128xf32>
    %1234 = arith.addf %1233, %1232 : vector<8x128xf32>
    %1235 = arith.select %8, %1230, %1234 : vector<8x128xi1>, vector<8x128xf32>
    %1236 = vector.extract_strided_slice %1235 {offsets = [0, 0], sizes = [8, 32], strides = [1, 1]} : vector<8x128xf32> to vector<8x32xf32>
    %1237 = vector.extract_strided_slice %1235 {offsets = [0, 32], sizes = [8, 32], strides = [1, 1]} : vector<8x128xf32> to vector<8x32xf32>
    %1238 = vector.extract_strided_slice %1235 {offsets = [0, 64], sizes = [8, 32], strides = [1, 1]} : vector<8x128xf32> to vector<8x32xf32>
    %1239 = vector.extract_strided_slice %1235 {offsets = [0, 96], sizes = [8, 32], strides = [1, 1]} : vector<8x128xf32> to vector<8x32xf32>
    %1240 = arith.mulf %1237, %1110 : vector<8x32xf32>
    %1241 = arith.mulf %1236, %1238 : vector<8x32xf32>
    %1242 = arith.addf %1240, %1241 : vector<8x32xf32>
    %1243 = math.tanh %1242 : vector<8x32xf32>
    %1244 = arith.mulf %1239, %1243 : vector<8x32xf32>
    %1245 = arith.truncf %1244 : vector<8x32xf32> to vector<8x32xbf16>
    %c0_588 = arith.constant 0 : index
    %c0_589 = arith.constant 0 : index
    %1246 = vector.load %arg15[%c0_588, %c0_589] : memref<32x128xbf16, #tpu.memory_space<vmem>>, vector<32x128xbf16>
    %cst_590 = arith.constant dense<0.000000e+00> : vector<8x128xf32>
    %1247 = tpu.matmul %1245, %1246, %cst_590 {dimension_numbers = #tpu.dot_dimension_numbers<[1], [0], [0], [1], [0, 0, 1, 1], [], []>} : vector<8x32xbf16>, vector<32x128xbf16>, vector<8x128xf32> -> vector<8x128xf32>
    %1248 = arith.truncf %1140 : vector<8x32xf32> to vector<8x32xbf16>
    %c0_591 = arith.constant 0 : index
    %c0_592 = arith.constant 0 : index
    %1249 = vector.load %arg16[%c0_591, %c0_592] : memref<32x128xbf16, #tpu.memory_space<vmem>>, vector<32x128xbf16>
    %cst_593 = arith.constant dense<0.000000e+00> : vector<8x128xf32>
    %1250 = tpu.matmul %1248, %1249, %cst_593 {dimension_numbers = #tpu.dot_dimension_numbers<[1], [0], [0], [1], [0, 0, 1, 1], [], []>} : vector<8x32xbf16>, vector<32x128xbf16>, vector<8x128xf32> -> vector<8x128xf32>
    %1251 = arith.addf %1247, %1250 : vector<8x128xf32>
    %c0_594 = arith.constant 0 : index
    %c0_595 = arith.constant 0 : index
    %1252 = vector.load %arg17[%c0_594, %c0_595] : memref<1x128xf32, #tpu.memory_space<vmem>>, vector<1x128xf32>
    %1253 = vector.broadcast %1252 : vector<1x128xf32> to vector<8x128xf32>
    %1254 = arith.addf %1251, %1253 : vector<8x128xf32>
    %cst_596 = arith.constant 5.000000e-01 : f32
    %1255 = vector.broadcast %cst_596 : f32 to vector<8x128xf32>
    %1256 = arith.mulf %1255, %1254 : vector<8x128xf32>
    %1257 = arith.select %8, %1254, %1256 : vector<8x128xi1>, vector<8x128xf32>
    %1258 = math.tanh %1257 : vector<8x128xf32>
    %cst_597 = arith.constant 5.000000e-01 : f32
    %1259 = vector.broadcast %cst_597 : f32 to vector<8x128xf32>
    %1260 = arith.mulf %1259, %1258 : vector<8x128xf32>
    %cst_598 = arith.constant 5.000000e-01 : f32
    %1261 = vector.broadcast %cst_598 : f32 to vector<8x128xf32>
    %1262 = arith.addf %1261, %1260 : vector<8x128xf32>
    %1263 = arith.select %8, %1258, %1262 : vector<8x128xi1>, vector<8x128xf32>
    %1264 = vector.extract_strided_slice %1263 {offsets = [0, 0], sizes = [8, 32], strides = [1, 1]} : vector<8x128xf32> to vector<8x32xf32>
    %1265 = vector.extract_strided_slice %1263 {offsets = [0, 32], sizes = [8, 32], strides = [1, 1]} : vector<8x128xf32> to vector<8x32xf32>
    %1266 = vector.extract_strided_slice %1263 {offsets = [0, 64], sizes = [8, 32], strides = [1, 1]} : vector<8x128xf32> to vector<8x32xf32>
    %1267 = vector.extract_strided_slice %1263 {offsets = [0, 96], sizes = [8, 32], strides = [1, 1]} : vector<8x128xf32> to vector<8x32xf32>
    %1268 = arith.mulf %1265, %1138 : vector<8x32xf32>
    %1269 = arith.mulf %1264, %1266 : vector<8x32xf32>
    %1270 = arith.addf %1268, %1269 : vector<8x32xf32>
    %1271 = math.tanh %1270 : vector<8x32xf32>
    %1272 = arith.mulf %1267, %1271 : vector<8x32xf32>
    %1273 = arith.truncf %1272 : vector<8x32xf32> to vector<8x32xbf16>
    %c0_599 = arith.constant 0 : index
    %c0_600 = arith.constant 0 : index
    %1274 = vector.load %arg18[%c0_599, %c0_600] : memref<32x128xbf16, #tpu.memory_space<vmem>>, vector<32x128xbf16>
    %cst_601 = arith.constant dense<0.000000e+00> : vector<8x128xf32>
    %1275 = tpu.matmul %1273, %1274, %cst_601 {dimension_numbers = #tpu.dot_dimension_numbers<[1], [0], [0], [1], [0, 0, 1, 1], [], []>} : vector<8x32xbf16>, vector<32x128xbf16>, vector<8x128xf32> -> vector<8x128xf32>
    %c0_602 = arith.constant 0 : index
    %c0_603 = arith.constant 0 : index
    %1276 = vector.load %arg19[%c0_602, %c0_603] : memref<1x128xf32, #tpu.memory_space<vmem>>, vector<1x128xf32>
    %1277 = vector.broadcast %1276 : vector<1x128xf32> to vector<8x128xf32>
    %1278 = arith.addf %1275, %1277 : vector<8x128xf32>
    %c5_604 = arith.constant 5 : index
    %c0_605 = arith.constant 0 : index
    %c0_606 = arith.constant 0 : index
    %1279 = vector.load %arg20[%c5_604, %c0_605, %c0_606] : memref<7x8x128xf32, #tpu.memory_space<vmem>>, vector<1x8x128xf32>
    %1280 = vector.shape_cast %1279 : vector<1x8x128xf32> to vector<8x128xf32>
    %1281 = vector.shape_cast %1278 : vector<8x128xf32> to vector<1x8x128xf32>
    tpu.vector_store %arg20[%c5_604, %c0_605, %c0_606], %1281 {strides = array<i32>} : memref<7x8x128xf32, #tpu.memory_space<vmem>>, vector<1x8x128xf32>,
    %c12_i32_607 = arith.constant 12 : i32
    %1282 = vector.broadcast %c12_i32_607 : i32 to vector<8x128xi32>
    %1283 = arith.cmpi slt, %2, %1282 : vector<8x128xi32>
    %cst_608 = arith.constant -1.000000e+30 : f32
    %1284 = vector.broadcast %cst_608 : f32 to vector<8x128xf32>
    %1285 = arith.select %1283, %1278, %1284 : vector<8x128xi1>, vector<8x128xf32>
    %cst_609 = arith.constant dense<0xFF800000> : vector<8xf32>
    %1286 = vector.multi_reduction <maximumf>, %1285, %cst_609 [1] : vector<8x128xf32> to vector<8xf32>
    %1287 = vector.shape_cast %1286 : vector<8xf32> to vector<8x1xf32>
    %1288 = vector.broadcast %1287 : vector<8x1xf32> to vector<8x128xf32>
    %1289 = arith.cmpf oge, %1285, %1288 : vector<8x128xf32>
    %c128_i32_610 = arith.constant 128 : i32
    %1290 = vector.broadcast %c128_i32_610 : i32 to vector<8x128xi32>
    %1291 = arith.select %1289, %2, %1290 : vector<8x128xi1>, vector<8x128xi32>
    %cst_611 = arith.constant dense<2147483647> : vector<8xi32>
    %1292 = vector.multi_reduction <minsi>, %1291, %cst_611 [1] : vector<8x128xi32> to vector<8xi32>
    %1293 = vector.shape_cast %1292 : vector<8xi32> to vector<8x1xi32>
    %1294 = vector.broadcast %1293 : vector<8x1xi32> to vector<8x128xi32>
    %1295 = arith.cmpi eq, %2, %1294 : vector<8x128xi32>
    %1296 = arith.extui %1295 : vector<8x128xi1> to vector<8x128xi32>
    %1297 = arith.sitofp %1296 : vector<8x128xi32> to vector<8x128xf32>
    %c0_i32_612 = arith.constant 0 : i32
    %1298 = vector.broadcast %c0_i32_612 : i32 to vector<8x1xi32>
    %c0_i32_613 = arith.constant 0 : i32
    %1299 = vector.broadcast %c0_i32_613 : i32 to vector<8x1xi32>
    %1300 = arith.cmpi eq, %0, %1299 : vector<8x1xi32>
    %c5_614 = arith.constant 5 : index
    %c0_615 = arith.constant 0 : index
    %1301 = memref.load %arg2[%c5_614, %c0_615] : memref<7x8xi32, #tpu.memory_space<smem>>
    %1302 = vector.broadcast %1301 : i32 to vector<8x1xi32>
    %1303 = arith.select %1300, %1302, %1298 : vector<8x1xi1>, vector<8x1xi32>
    %c1_i32_616 = arith.constant 1 : i32
    %1304 = vector.broadcast %c1_i32_616 : i32 to vector<8x1xi32>
    %1305 = arith.cmpi eq, %0, %1304 : vector<8x1xi32>
    %c5_617 = arith.constant 5 : index
    %c1_618 = arith.constant 1 : index
    %1306 = memref.load %arg2[%c5_617, %c1_618] : memref<7x8xi32, #tpu.memory_space<smem>>
    %1307 = vector.broadcast %1306 : i32 to vector<8x1xi32>
    %1308 = arith.select %1305, %1307, %1303 : vector<8x1xi1>, vector<8x1xi32>
    %c2_i32_619 = arith.constant 2 : i32
    %1309 = vector.broadcast %c2_i32_619 : i32 to vector<8x1xi32>
    %1310 = arith.cmpi eq, %0, %1309 : vector<8x1xi32>
    %c5_620 = arith.constant 5 : index
    %c2_621 = arith.constant 2 : index
    %1311 = memref.load %arg2[%c5_620, %c2_621] : memref<7x8xi32, #tpu.memory_space<smem>>
    %1312 = vector.broadcast %1311 : i32 to vector<8x1xi32>
    %1313 = arith.select %1310, %1312, %1308 : vector<8x1xi1>, vector<8x1xi32>
    %c3_i32_622 = arith.constant 3 : i32
    %1314 = vector.broadcast %c3_i32_622 : i32 to vector<8x1xi32>
    %1315 = arith.cmpi eq, %0, %1314 : vector<8x1xi32>
    %c5_623 = arith.constant 5 : index
    %c3_624 = arith.constant 3 : index
    %1316 = memref.load %arg2[%c5_623, %c3_624] : memref<7x8xi32, #tpu.memory_space<smem>>
    %1317 = vector.broadcast %1316 : i32 to vector<8x1xi32>
    %1318 = arith.select %1315, %1317, %1313 : vector<8x1xi1>, vector<8x1xi32>
    %c4_i32_625 = arith.constant 4 : i32
    %1319 = vector.broadcast %c4_i32_625 : i32 to vector<8x1xi32>
    %1320 = arith.cmpi eq, %0, %1319 : vector<8x1xi32>
    %c5_626 = arith.constant 5 : index
    %c4_627 = arith.constant 4 : index
    %1321 = memref.load %arg2[%c5_626, %c4_627] : memref<7x8xi32, #tpu.memory_space<smem>>
    %1322 = vector.broadcast %1321 : i32 to vector<8x1xi32>
    %1323 = arith.select %1320, %1322, %1318 : vector<8x1xi1>, vector<8x1xi32>
    %c5_i32_628 = arith.constant 5 : i32
    %1324 = vector.broadcast %c5_i32_628 : i32 to vector<8x1xi32>
    %1325 = arith.cmpi eq, %0, %1324 : vector<8x1xi32>
    %c5_629 = arith.constant 5 : index
    %c5_630 = arith.constant 5 : index
    %1326 = memref.load %arg2[%c5_629, %c5_630] : memref<7x8xi32, #tpu.memory_space<smem>>
    %1327 = vector.broadcast %1326 : i32 to vector<8x1xi32>
    %1328 = arith.select %1325, %1327, %1323 : vector<8x1xi1>, vector<8x1xi32>
    %c6_i32_631 = arith.constant 6 : i32
    %1329 = vector.broadcast %c6_i32_631 : i32 to vector<8x1xi32>
    %1330 = arith.cmpi eq, %0, %1329 : vector<8x1xi32>
    %c5_632 = arith.constant 5 : index
    %c6_633 = arith.constant 6 : index
    %1331 = memref.load %arg2[%c5_632, %c6_633] : memref<7x8xi32, #tpu.memory_space<smem>>
    %1332 = vector.broadcast %1331 : i32 to vector<8x1xi32>
    %1333 = arith.select %1330, %1332, %1328 : vector<8x1xi1>, vector<8x1xi32>
    %c7_i32_634 = arith.constant 7 : i32
    %1334 = vector.broadcast %c7_i32_634 : i32 to vector<8x1xi32>
    %1335 = arith.cmpi eq, %0, %1334 : vector<8x1xi32>
    %c5_635 = arith.constant 5 : index
    %c7_636 = arith.constant 7 : index
    %1336 = memref.load %arg2[%c5_635, %c7_636] : memref<7x8xi32, #tpu.memory_space<smem>>
    %1337 = vector.broadcast %1336 : i32 to vector<8x1xi32>
    %1338 = arith.select %1335, %1337, %1333 : vector<8x1xi1>, vector<8x1xi32>
    %1339 = vector.broadcast %1338 : vector<8x1xi32> to vector<8x128xi32>
    %1340 = arith.cmpi eq, %2, %1339 : vector<8x128xi32>
    %1341 = arith.extui %1340 : vector<8x128xi1> to vector<8x128xi32>
    %1342 = arith.sitofp %1341 : vector<8x128xi32> to vector<8x128xf32>
    %c5_637 = arith.constant 5 : index
    %1343 = memref.load %arg3[%c5_637] : memref<6xi32, #tpu.memory_space<smem>>
    %c0_i32_638 = arith.constant 0 : i32
    %1344 = arith.cmpi ne, %1343, %c0_i32_638 : i32
    %1345 = arith.select %1344, %1342, %1297 : vector<8x128xf32>
    %1346 = arith.truncf %1345 : vector<8x128xf32> to vector<8x128xbf16>
    %c0_639 = arith.constant 0 : index
    %c0_640 = arith.constant 0 : index
    %1347 = vector.load %arg5[%c0_639, %c0_640] : memref<128x16xbf16, #tpu.memory_space<vmem>>, vector<128x16xbf16>
    %cst_641 = arith.constant dense<0.000000e+00> : vector<8x16xf32>
    %1348 = tpu.matmul %1346, %1347, %cst_641 {dimension_numbers = #tpu.dot_dimension_numbers<[1], [0], [0], [1], [0, 0, 1, 1], [], []>} : vector<8x128xbf16>, vector<128x16xbf16>, vector<8x16xf32> -> vector<8x16xf32>
    %1349 = arith.truncf %1348 : vector<8x16xf32> to vector<8x16xbf16>
    %c0_642 = arith.constant 0 : index
    %c0_643 = arith.constant 0 : index
    %1350 = vector.load %arg12[%c0_642, %c0_643] : memref<16x128xbf16, #tpu.memory_space<vmem>>, vector<16x128xbf16>
    %cst_644 = arith.constant dense<0.000000e+00> : vector<8x128xf32>
    %1351 = tpu.matmul %1349, %1350, %cst_644 {dimension_numbers = #tpu.dot_dimension_numbers<[1], [0], [0], [1], [0, 0, 1, 1], [], []>} : vector<8x16xbf16>, vector<16x128xbf16>, vector<8x128xf32> -> vector<8x128xf32>
    %1352 = arith.truncf %1244 : vector<8x32xf32> to vector<8x32xbf16>
    %c0_645 = arith.constant 0 : index
    %c0_646 = arith.constant 0 : index
    %1353 = vector.load %arg13[%c0_645, %c0_646] : memref<32x128xbf16, #tpu.memory_space<vmem>>, vector<32x128xbf16>
    %cst_647 = arith.constant dense<0.000000e+00> : vector<8x128xf32>
    %1354 = tpu.matmul %1352, %1353, %cst_647 {dimension_numbers = #tpu.dot_dimension_numbers<[1], [0], [0], [1], [0, 0, 1, 1], [], []>} : vector<8x32xbf16>, vector<32x128xbf16>, vector<8x128xf32> -> vector<8x128xf32>
    %1355 = arith.addf %1351, %1354 : vector<8x128xf32>
    %c0_648 = arith.constant 0 : index
    %c0_649 = arith.constant 0 : index
    %1356 = vector.load %arg14[%c0_648, %c0_649] : memref<1x128xf32, #tpu.memory_space<vmem>>, vector<1x128xf32>
    %1357 = vector.broadcast %1356 : vector<1x128xf32> to vector<8x128xf32>
    %1358 = arith.addf %1355, %1357 : vector<8x128xf32>
    %cst_650 = arith.constant 5.000000e-01 : f32
    %1359 = vector.broadcast %cst_650 : f32 to vector<8x128xf32>
    %1360 = arith.mulf %1359, %1358 : vector<8x128xf32>
    %1361 = arith.select %8, %1358, %1360 : vector<8x128xi1>, vector<8x128xf32>
    %1362 = math.tanh %1361 : vector<8x128xf32>
    %cst_651 = arith.constant 5.000000e-01 : f32
    %1363 = vector.broadcast %cst_651 : f32 to vector<8x128xf32>
    %1364 = arith.mulf %1363, %1362 : vector<8x128xf32>
    %cst_652 = arith.constant 5.000000e-01 : f32
    %1365 = vector.broadcast %cst_652 : f32 to vector<8x128xf32>
    %1366 = arith.addf %1365, %1364 : vector<8x128xf32>
    %1367 = arith.select %8, %1362, %1366 : vector<8x128xi1>, vector<8x128xf32>
    %1368 = vector.extract_strided_slice %1367 {offsets = [0, 0], sizes = [8, 32], strides = [1, 1]} : vector<8x128xf32> to vector<8x32xf32>
    %1369 = vector.extract_strided_slice %1367 {offsets = [0, 32], sizes = [8, 32], strides = [1, 1]} : vector<8x128xf32> to vector<8x32xf32>
    %1370 = vector.extract_strided_slice %1367 {offsets = [0, 64], sizes = [8, 32], strides = [1, 1]} : vector<8x128xf32> to vector<8x32xf32>
    %1371 = vector.extract_strided_slice %1367 {offsets = [0, 96], sizes = [8, 32], strides = [1, 1]} : vector<8x128xf32> to vector<8x32xf32>
    %1372 = arith.mulf %1369, %1242 : vector<8x32xf32>
    %1373 = arith.mulf %1368, %1370 : vector<8x32xf32>
    %1374 = arith.addf %1372, %1373 : vector<8x32xf32>
    %1375 = math.tanh %1374 : vector<8x32xf32>
    %1376 = arith.mulf %1371, %1375 : vector<8x32xf32>
    %1377 = arith.truncf %1376 : vector<8x32xf32> to vector<8x32xbf16>
    %c0_653 = arith.constant 0 : index
    %c0_654 = arith.constant 0 : index
    %1378 = vector.load %arg15[%c0_653, %c0_654] : memref<32x128xbf16, #tpu.memory_space<vmem>>, vector<32x128xbf16>
    %cst_655 = arith.constant dense<0.000000e+00> : vector<8x128xf32>
    %1379 = tpu.matmul %1377, %1378, %cst_655 {dimension_numbers = #tpu.dot_dimension_numbers<[1], [0], [0], [1], [0, 0, 1, 1], [], []>} : vector<8x32xbf16>, vector<32x128xbf16>, vector<8x128xf32> -> vector<8x128xf32>
    %1380 = arith.truncf %1272 : vector<8x32xf32> to vector<8x32xbf16>
    %c0_656 = arith.constant 0 : index
    %c0_657 = arith.constant 0 : index
    %1381 = vector.load %arg16[%c0_656, %c0_657] : memref<32x128xbf16, #tpu.memory_space<vmem>>, vector<32x128xbf16>
    %cst_658 = arith.constant dense<0.000000e+00> : vector<8x128xf32>
    %1382 = tpu.matmul %1380, %1381, %cst_658 {dimension_numbers = #tpu.dot_dimension_numbers<[1], [0], [0], [1], [0, 0, 1, 1], [], []>} : vector<8x32xbf16>, vector<32x128xbf16>, vector<8x128xf32> -> vector<8x128xf32>
    %1383 = arith.addf %1379, %1382 : vector<8x128xf32>
    %c0_659 = arith.constant 0 : index
    %c0_660 = arith.constant 0 : index
    %1384 = vector.load %arg17[%c0_659, %c0_660] : memref<1x128xf32, #tpu.memory_space<vmem>>, vector<1x128xf32>
    %1385 = vector.broadcast %1384 : vector<1x128xf32> to vector<8x128xf32>
    %1386 = arith.addf %1383, %1385 : vector<8x128xf32>
    %cst_661 = arith.constant 5.000000e-01 : f32
    %1387 = vector.broadcast %cst_661 : f32 to vector<8x128xf32>
    %1388 = arith.mulf %1387, %1386 : vector<8x128xf32>
    %1389 = arith.select %8, %1386, %1388 : vector<8x128xi1>, vector<8x128xf32>
    %1390 = math.tanh %1389 : vector<8x128xf32>
    %cst_662 = arith.constant 5.000000e-01 : f32
    %1391 = vector.broadcast %cst_662 : f32 to vector<8x128xf32>
    %1392 = arith.mulf %1391, %1390 : vector<8x128xf32>
    %cst_663 = arith.constant 5.000000e-01 : f32
    %1393 = vector.broadcast %cst_663 : f32 to vector<8x128xf32>
    %1394 = arith.addf %1393, %1392 : vector<8x128xf32>
    %1395 = arith.select %8, %1390, %1394 : vector<8x128xi1>, vector<8x128xf32>
    %1396 = vector.extract_strided_slice %1395 {offsets = [0, 0], sizes = [8, 32], strides = [1, 1]} : vector<8x128xf32> to vector<8x32xf32>
    %1397 = vector.extract_strided_slice %1395 {offsets = [0, 32], sizes = [8, 32], strides = [1, 1]} : vector<8x128xf32> to vector<8x32xf32>
    %1398 = vector.extract_strided_slice %1395 {offsets = [0, 64], sizes = [8, 32], strides = [1, 1]} : vector<8x128xf32> to vector<8x32xf32>
    %1399 = vector.extract_strided_slice %1395 {offsets = [0, 96], sizes = [8, 32], strides = [1, 1]} : vector<8x128xf32> to vector<8x32xf32>
    %1400 = arith.mulf %1397, %1270 : vector<8x32xf32>
    %1401 = arith.mulf %1396, %1398 : vector<8x32xf32>
    %1402 = arith.addf %1400, %1401 : vector<8x32xf32>
    %1403 = math.tanh %1402 : vector<8x32xf32>
    %1404 = arith.mulf %1399, %1403 : vector<8x32xf32>
    %1405 = arith.truncf %1404 : vector<8x32xf32> to vector<8x32xbf16>
    %c0_664 = arith.constant 0 : index
    %c0_665 = arith.constant 0 : index
    %1406 = vector.load %arg18[%c0_664, %c0_665] : memref<32x128xbf16, #tpu.memory_space<vmem>>, vector<32x128xbf16>
    %cst_666 = arith.constant dense<0.000000e+00> : vector<8x128xf32>
    %1407 = tpu.matmul %1405, %1406, %cst_666 {dimension_numbers = #tpu.dot_dimension_numbers<[1], [0], [0], [1], [0, 0, 1, 1], [], []>} : vector<8x32xbf16>, vector<32x128xbf16>, vector<8x128xf32> -> vector<8x128xf32>
    %c0_667 = arith.constant 0 : index
    %c0_668 = arith.constant 0 : index
    %1408 = vector.load %arg19[%c0_667, %c0_668] : memref<1x128xf32, #tpu.memory_space<vmem>>, vector<1x128xf32>
    %1409 = vector.broadcast %1408 : vector<1x128xf32> to vector<8x128xf32>
    %1410 = arith.addf %1407, %1409 : vector<8x128xf32>
    %c6_669 = arith.constant 6 : index
    %c0_670 = arith.constant 0 : index
    %c0_671 = arith.constant 0 : index
    %1411 = vector.load %arg20[%c6_669, %c0_670, %c0_671] : memref<7x8x128xf32, #tpu.memory_space<vmem>>, vector<1x8x128xf32>
    %1412 = vector.shape_cast %1411 : vector<1x8x128xf32> to vector<8x128xf32>
    %1413 = vector.shape_cast %1410 : vector<8x128xf32> to vector<1x8x128xf32>
    tpu.vector_store %arg20[%c6_669, %c0_670, %c0_671], %1413 {strides = array<i32>} : memref<7x8x128xf32, #tpu.memory_space<vmem>>, vector<1x8x128xf32>,
    return
  }
  func.func @transform_0(%arg0: i32, %arg1: memref<6x8xi32, #tpu.memory_space<smem>>, %arg2: memref<7x8xi32, #tpu.memory_space<smem>>, %arg3: memref<6xi32, #tpu.memory_space<smem>>) -> (i32, i32) {
    %c0_i32 = arith.constant 0 : i32
    %c0_i32_0 = arith.constant 0 : i32
    %c0_i32_1 = arith.constant 0 : i32
    return %c0_i32, %c0_i32_0 : i32, i32
  }
  func.func @transform_1(%arg0: i32, %arg1: memref<6x8xi32, #tpu.memory_space<smem>>, %arg2: memref<7x8xi32, #tpu.memory_space<smem>>, %arg3: memref<6xi32, #tpu.memory_space<smem>>) -> (i32, i32) {
    %c0_i32 = arith.constant 0 : i32
    %c0_i32_0 = arith.constant 0 : i32
    %c0_i32_1 = arith.constant 0 : i32
    return %c0_i32, %c0_i32_0 : i32, i32
  }
  func.func @transform_2(%arg0: i32, %arg1: memref<6x8xi32, #tpu.memory_space<smem>>, %arg2: memref<7x8xi32, #tpu.memory_space<smem>>, %arg3: memref<6xi32, #tpu.memory_space<smem>>) -> (i32, i32) {
    %c0_i32 = arith.constant 0 : i32
    %c0_i32_0 = arith.constant 0 : i32
    %c0_i32_1 = arith.constant 0 : i32
    return %c0_i32, %c0_i32_0 : i32, i32
  }
  func.func @transform_3(%arg0: i32, %arg1: memref<6x8xi32, #tpu.memory_space<smem>>, %arg2: memref<7x8xi32, #tpu.memory_space<smem>>, %arg3: memref<6xi32, #tpu.memory_space<smem>>) -> (i32, i32) {
    %c0_i32 = arith.constant 0 : i32
    %c0_i32_0 = arith.constant 0 : i32
    %c0_i32_1 = arith.constant 0 : i32
    return %c0_i32, %c0_i32_0 : i32, i32
  }
  func.func @transform_4(%arg0: i32, %arg1: memref<6x8xi32, #tpu.memory_space<smem>>, %arg2: memref<7x8xi32, #tpu.memory_space<smem>>, %arg3: memref<6xi32, #tpu.memory_space<smem>>) -> (i32, i32) {
    %c0_i32 = arith.constant 0 : i32
    %c0_i32_0 = arith.constant 0 : i32
    %c0_i32_1 = arith.constant 0 : i32
    return %c0_i32, %c0_i32_0 : i32, i32
  }
  func.func @transform_5(%arg0: i32, %arg1: memref<6x8xi32, #tpu.memory_space<smem>>, %arg2: memref<7x8xi32, #tpu.memory_space<smem>>, %arg3: memref<6xi32, #tpu.memory_space<smem>>) -> (i32, i32) {
    %c0_i32 = arith.constant 0 : i32
    %c0_i32_0 = arith.constant 0 : i32
    %c0_i32_1 = arith.constant 0 : i32
    return %c0_i32, %c0_i32_0 : i32, i32
  }
  func.func @transform_6(%arg0: i32, %arg1: memref<6x8xi32, #tpu.memory_space<smem>>, %arg2: memref<7x8xi32, #tpu.memory_space<smem>>, %arg3: memref<6xi32, #tpu.memory_space<smem>>) -> (i32, i32) {
    %c0_i32 = arith.constant 0 : i32
    %c0_i32_0 = arith.constant 0 : i32
    %c0_i32_1 = arith.constant 0 : i32
    return %c0_i32, %c0_i32_0 : i32, i32
  }
  func.func @transform_7(%arg0: i32, %arg1: memref<6x8xi32, #tpu.memory_space<smem>>, %arg2: memref<7x8xi32, #tpu.memory_space<smem>>, %arg3: memref<6xi32, #tpu.memory_space<smem>>) -> (i32, i32) {
    %c0_i32 = arith.constant 0 : i32
    %c0_i32_0 = arith.constant 0 : i32
    %c0_i32_1 = arith.constant 0 : i32
    return %c0_i32, %c0_i32_0 : i32, i32
  }
  func.func @transform_8(%arg0: i32, %arg1: memref<6x8xi32, #tpu.memory_space<smem>>, %arg2: memref<7x8xi32, #tpu.memory_space<smem>>, %arg3: memref<6xi32, #tpu.memory_space<smem>>) -> (i32, i32) {
    %c0_i32 = arith.constant 0 : i32
    %c0_i32_0 = arith.constant 0 : i32
    %c0_i32_1 = arith.constant 0 : i32
    return %c0_i32, %c0_i32_0 : i32, i32
  }
  func.func @transform_9(%arg0: i32, %arg1: memref<6x8xi32, #tpu.memory_space<smem>>, %arg2: memref<7x8xi32, #tpu.memory_space<smem>>, %arg3: memref<6xi32, #tpu.memory_space<smem>>) -> (i32, i32) {
    %c0_i32 = arith.constant 0 : i32
    %c0_i32_0 = arith.constant 0 : i32
    %c0_i32_1 = arith.constant 0 : i32
    return %c0_i32, %c0_i32_0 : i32, i32
  }
  func.func @transform_10(%arg0: i32, %arg1: memref<6x8xi32, #tpu.memory_space<smem>>, %arg2: memref<7x8xi32, #tpu.memory_space<smem>>, %arg3: memref<6xi32, #tpu.memory_space<smem>>) -> (i32, i32) {
    %c0_i32 = arith.constant 0 : i32
    %c0_i32_0 = arith.constant 0 : i32
    %c0_i32_1 = arith.constant 0 : i32
    return %c0_i32, %c0_i32_0 : i32, i32
  }
  func.func @transform_11(%arg0: i32, %arg1: memref<6x8xi32, #tpu.memory_space<smem>>, %arg2: memref<7x8xi32, #tpu.memory_space<smem>>, %arg3: memref<6xi32, #tpu.memory_space<smem>>) -> (i32, i32) {
    %c0_i32 = arith.constant 0 : i32
    %c0_i32_0 = arith.constant 0 : i32
    %c0_i32_1 = arith.constant 0 : i32
    return %c0_i32, %c0_i32_0 : i32, i32
  }
  func.func @transform_12(%arg0: i32, %arg1: memref<6x8xi32, #tpu.memory_space<smem>>, %arg2: memref<7x8xi32, #tpu.memory_space<smem>>, %arg3: memref<6xi32, #tpu.memory_space<smem>>) -> (i32, i32) {
    %c0_i32 = arith.constant 0 : i32
    %c0_i32_0 = arith.constant 0 : i32
    %c0_i32_1 = arith.constant 0 : i32
    return %c0_i32, %c0_i32_0 : i32, i32
  }
  func.func @transform_13(%arg0: i32, %arg1: memref<6x8xi32, #tpu.memory_space<smem>>, %arg2: memref<7x8xi32, #tpu.memory_space<smem>>, %arg3: memref<6xi32, #tpu.memory_space<smem>>) -> (i32, i32) {
    %c0_i32 = arith.constant 0 : i32
    %c0_i32_0 = arith.constant 0 : i32
    %c0_i32_1 = arith.constant 0 : i32
    return %c0_i32, %c0_i32_0 : i32, i32
  }
  func.func @transform_14(%arg0: i32, %arg1: memref<6x8xi32, #tpu.memory_space<smem>>, %arg2: memref<7x8xi32, #tpu.memory_space<smem>>, %arg3: memref<6xi32, #tpu.memory_space<smem>>) -> (i32, i32) {
    %c0_i32 = arith.constant 0 : i32
    %c0_i32_0 = arith.constant 0 : i32
    %c0_i32_1 = arith.constant 0 : i32
    return %c0_i32, %c0_i32_0 : i32, i32
  }
  func.func @transform_15(%arg0: i32, %arg1: memref<6x8xi32, #tpu.memory_space<smem>>, %arg2: memref<7x8xi32, #tpu.memory_space<smem>>, %arg3: memref<6xi32, #tpu.memory_space<smem>>) -> (i32, i32) {
    %c0_i32 = arith.constant 0 : i32
    %c0_i32_0 = arith.constant 0 : i32
    %c0_i32_1 = arith.constant 0 : i32
    return %c0_i32, %c0_i32_0 : i32, i32
  }
  func.func @transform_16(%arg0: i32, %arg1: memref<6x8xi32, #tpu.memory_space<smem>>, %arg2: memref<7x8xi32, #tpu.memory_space<smem>>, %arg3: memref<6xi32, #tpu.memory_space<smem>>) -> (i32, i32, i32) {
    %c0_i32 = arith.constant 0 : i32
    %c0_i32_0 = arith.constant 0 : i32
    %c0_i32_1 = arith.constant 0 : i32
    %c0_i32_2 = arith.constant 0 : i32
    return %c0_i32, %c0_i32_0, %c0_i32_1 : i32, i32, i32
  }
}

</mosaic_0001>

<bundles_post_ra>
// kernel: seq2seq_forward.1
= control target key start
LH: loop header
LB: loop body
LE: loop exit
PB: predicated region body
PF: predicated region fallthrough
CT: control target
= control target key end

     0   :  { %s8430_s0 = inlined_call_operand.vmem [shape: s32[6,8], index: 0, kind: input, shape index: {}]   ;;  %s8431_s3 = inlined_call_operand.vmem [shape: bf16[128,16], index: 3, kind: input, shape index: {}]   ;;  %s8432_s4 = inlined_call_operand.vmem [shape: bf16[128,16], index: 4, kind: input, shape index: {}]   ;;  %s8433_s5 = inlined_call_operand.vmem [shape: bf16[16,128], index: 5, kind: input, shape index: {}]   ;;  %s8434_s6 = inlined_call_operand.vmem [shape: bf16[32,128], index: 6, kind: input, shape index: {}]   ;;  %s8435_s7 = inlined_call_operand.vmem [shape: f32[1,128], index: 7, kind: input, shape index: {}]   ;;  %s8436_s8 = inlined_call_operand.vmem [shape: bf16[32,128], index: 8, kind: input, shape index: {}]   ;;  %s8437_s9 = inlined_call_operand.vmem [shape: bf16[32,128], index: 9, kind: input, shape index: {}]   ;;  %s8438_s10 = inlined_call_operand.vmem [shape: f32[1,128], index: 10, kind: input, shape index: {}]   ;;  %s8439_s11 = inlined_call_operand.hbm [shape: bf16[16,128], index: 11, kind: input, shape index: {}]   ;;  %s8440_s12 = inlined_call_operand.vmem [shape: bf16[32,128], index: 12, kind: input, shape index: {}]   ;;  %s8441_s13 = inlined_call_operand.vmem [shape: f32[1,128], index: 13, kind: input, shape index: {}]   ;;  %s8442_s14 = inlined_call_operand.vmem [shape: bf16[32,128], index: 14, kind: input, shape index: {}]   ;;  %s8443_s15 = inlined_call_operand.vmem [shape: bf16[32,128], index: 15, kind: input, shape index: {}]   ;;  %s8444_s16 = inlined_call_operand.vmem [shape: f32[1,128], index: 16, kind: input, shape index: {}]   ;;  %s8445_s17 = inlined_call_operand.vmem [shape: bf16[32,128], index: 17, kind: input, shape index: {}]   ;;  %s8446_s18 = inlined_call_operand.vmem [shape: f32[1,128], index: 18, kind: input, shape index: {}]   ;;  %s8447_s19 = inlined_call_operand.vmem [shape: f32[7,8,128], index: 19, kind: output, shape index: {}]   ;;  %s8448_s1 = inlined_call_operand.vmem [shape: s32[7,8], index: 1, kind: input, shape index: {}]   ;;  %s8449_s2 = inlined_call_operand.vmem [shape: s32[6], index: 2, kind: input, shape index: {}]  }
   0x1   :  { %8454 = sst [smem:[#allocation10_spill]] %s8430_s0  ;;  %s28_s22 = sshll.u32 %s8448_s1, 4  ;;  %s29_s22 = int_to_ptr.vmem [resolvable:$true] %s28_s22 }
   0x2   :  { %8455 = sst [smem:[#allocation11_spill]] %s8431_s3  ;;  %s8459_s20 = sld [smem:[#allocation10_spill]] }
   0x3   :  { %8456 = sst [smem:[#allocation12_spill]] %s8432_s4 }
   0x4   :  { %8457 = sst [smem:[#allocation13_spill]] %s8433_s5 }
   0x5   :  { %8458 = sst [smem:[#allocation14_spill]] %s8442_s14 }
   0x8   :  { %s24_s14 = sshll.u32 %s8459_s20, 4  ;;  %s25_s14 = int_to_ptr.vmem [resolvable:$true] %s24_s14 }
   0x9   :  { %s6584_s4 = scalar_lea.vmem %s25_s14, 128  ;;  %p6589_p1 = scmp.lt.s32.totalorder %s25_s14, %s25_s14 }
   0xa   :  { %p6585_p0 = scmp.ne.s32.totalorder %s25_s14, %s6584_s4  ;;  %p6590_p2 = scmp.lt.s32.totalorder %s6584_s4, %s6584_s4 }
   0xc   :  { %p6591_p3 = por %p6590_p2, %p6589_p1 }
   0xe   :  { %p6592_p4 = pnand %p6591_p3, %p6585_p0 }
  0x10   :  { %6595 = shalt.err (!%p6592_p4)  }
  0x11   :  { %s6646_s23 = smov [#allocation3]   ;;  %s6596_s24 = scalar_lea.vmem %s29_s22, 128 }
  0x12   :  { %27 = dma.vmem_to_smem %s25_s14, 128, %s6646_s23, [#allocation2] }
  0x13   :  { %p6597_p5 = scmp.ne.s32.totalorder %s29_s22, %s6596_s24  ;;  %p6601_p6 = scmp.lt.s32.totalorder %s29_s22, %s29_s22 }
  0x14   :  { %p6602_p7 = scmp.lt.s32.totalorder %s6596_s24, %s6596_s24 }
  0x16   :  { %p6603_p8 = por %p6602_p7, %p6601_p6 }
  0x18   :  { %p6604_p9 = pnand %p6603_p8, %p6597_p5 }
  0x1a   :  { %6607 = shalt.err (!%p6604_p9)  }
  0x1b   :  { %s6647_s25 = smov [#allocation4]   ;;  %s32_s26 = sshll.u32 %s8449_s2, 4  ;;  %s33_s26 = int_to_ptr.vmem [resolvable:$true] %s32_s26 }
  0x1c   :  { %31 = dma.vmem_to_smem %s29_s22, 128, %s6647_s25, [#allocation2] }
  0x1d   :  { %s6608_s27 = scalar_lea.vmem %s33_s26, 16  ;;  %p6613_p11 = scmp.lt.s32.totalorder %s33_s26, %s33_s26 }
  0x1e   :  { %p6609_p10 = scmp.ne.s32.totalorder %s33_s26, %s6608_s27  ;;  %p6614_p12 = scmp.lt.s32.totalorder %s6608_s27, %s6608_s27 }
  0x20   :  { %p6615_p13 = por %p6614_p12, %p6613_p11 }
  0x22   :  { %p6616_p0 = pnand %p6615_p13, %p6609_p10 }
  0x24   :  { %6619 = shalt.err (!%p6616_p0)  }
  0x25   :  { %s6648_s14 = smov [#allocation5]  }
  0x26   :  { %35 = dma.vmem_to_smem %s33_s26, 16, %s6648_s14, [#allocation2] }
  0x27   :  { %6642 = dma.done.wait [#allocation2], 272 }
  0x28   :  { %6643 = vsyncadd [#allocation2], 4294967024 }
  0x29   :  { %37 = sfence }
  0x2a   :  { %38 = vsyncpa [#allocation7], 0  ;;  %s6649_s28 = smov [#allocation6]   ;;  %s6620_s2 = scalar_lea.hbm %s8439_s11, 128 }
  0x2b   :  { %s60_s29 = sshll.u32 %s6649_s28, 4  ;;  %p6621_p1 = scmp.ne.s32.totalorder %s8439_s11, %s6620_s2  ;;  %s61_s29 = int_to_ptr.vmem [resolvable:$true] %s60_s29 }
  0x2c   :  { %p6624_p2 = scmp.lt.u32.totalorder %s6620_s2, %s8439_s11 }
  0x2e   :  { %p6626_p3 = pnand %p6624_p2, %p6621_p1 }
  0x30   :  { %6629 = shalt.err (!%p6626_p3)
}
  0x31   :  { %s6630_s4 = scalar_lea.vmem %s61_s29, 128  ;;  %p6635_p5 = scmp.lt.s32.totalorder %s61_s29, %s61_s29 }
  0x32   :  { %p6631_p4 = scmp.ne.s32.totalorder %s61_s29, %s6630_s4  ;;  %p6636_p6 = scmp.lt.s32.totalorder %s6630_s4, %s6630_s4 }
  0x34   :  { %p6637_p7 = por %p6636_p6, %p6635_p5 }
  0x36   :  { %p6638_p8 = pnand %p6637_p7, %p6631_p4 }
  0x38   :  { %6641 = shalt.err (!%p6638_p8)
}
  0x39   :  { %s6650_s23 = smov 64   ;;  %s6651_s24 = smov 4  }
  0x3a   :  { %66 = dma.hbm_to_vmem [thread:$0]  %s8439_s11, 128, %s61_s29, [#allocation7], %s6650_s23, %s6650_s23, %s6651_s24  }
  0x3b   :  { %6644 = dma.done.wait [#allocation7], 128  }
  0x3c   :  { %6645 = vsyncadd [#allocation7], 4294967168  ;;  %v85_v0 = vlaneseq  ;;  %v6652_v1 = vmov 0.0   ;;  %vm6653_vm0 = vmmov 0   ;;  %s93_s27 = sld [smem:[#allocation3]]  ;;  %s5108_s14 = sld [smem:[#allocation3 + $0x1]] }
  0x3d   :  { %1996 = vst [vmem:[%s8447_s19] sm:$0xff] %v6652_v1  ;;  %5691 = vmatprep.subr.bf16.mxu0 %v6652_v1  ;;  %5707 = vmatprep.mubr.msk.bf16.mxu0 %vm6653_vm0, %v6652_v1  ;;  %s5109_s11 = sld [smem:[#allocation3 + $0x2]]  ;;  %s5110_s28 = sld [smem:[#allocation3 + $0x3]]  ;;  %v6832_v17 = vld [vmem:[%s8434_s6] sm:$0xff]   ;;  %v6848_v21 = vld [vmem:[%s8434_s6 + $0x8] sm:$0xff]   ;;  %v6654_v29 = vmov 0   ;;  %vm301_vm11 = vcmask 130048  }
  0x3e   :  { %v6787_v2 = vshrl.u32 %v85_v0, 7  ;;  %5711 = vmatprep.subr.bf16.mxu1 %v6652_v1  ;;  %5715 = vmatprep.mubr.msk.bf16.mxu1 %vm6653_vm0, %v6652_v1  ;;  %s5111_s29 = sld [smem:[#allocation3 + $0x4]]  ;;  %s5112_s0 = sld [smem:[#allocation3 + $0x5]]  ;;  %v6851_v22 = vand.u32 127, %v85_v0  ;;  %v6655_v32 = vmov 1.0|1.0  }
  0x3f   :  { %s6794_s30 = sld [smem:[#allocation3 + $0x6]]  ;;  %s8460_s21 = sld [smem:[#allocation11_spill]]  ;;  %5712 = vmatpush3.bf16.msra.mxu1 %v6832_v17  ;;  %v6927_v43 = vld [vmem:[%s8435_s7] ss:$0 sm:$0xff]  ;;  %v6466_v49 = vld [vmem:[%s8445_s17 + $0x8] sm:$0xff]  }
  0x40   :  { %vm92_vm1 = vcmp.eq.s32.totalorder %v6787_v2, 0  ;;  %vm96_vm2 = vcmp.eq.s32.totalorder %v6787_v2, 1  ;;  %vm100_vm3 = vcmp.eq.s32.totalorder %v6787_v2, 2  ;;  %vm104_vm4 = vcmp.eq.s32.totalorder %v6787_v2, 3  ;;  %s5114_s4 = sld [smem:[#allocation3 + $0x7]]  ;;  %5713 = vmatprep.subr.bf16.mxu1 %v6652_v1  ;;  %s8461_s2 = sld [smem:[#allocation13_spill]] }
  0x41   :  { %vm108_vm5 = vcmp.eq.s32.totalorder %v6787_v2, 4  ;;  %vm112_vm6 = vcmp.eq.s32.totalorder %v6787_v2, 5  ;;  %vm116_vm7 = vcmp.eq.s32.totalorder %v6787_v2, 6  ;;  %vm120_vm8 = vcmp.eq.s32.totalorder %v6787_v2, 7  ;;  %s6656_s26 = smov 32   ;;  %s5144_s20 = sld [smem:[#allocation3 + $0x87]] }
  0x42   :  { %v94_v4 = vstv %s93_s27  ;;  %v98_v6 = vstv %s5108_s14  ;;  %vm89_vm12 = vcmp.ge.s32.totalorder %v6851_v22, 64  ;;  %vm90_vm13 = vcmp.lt.s32.totalorder %v6851_v22, 96  ;;  %s5137_s27 = sld [smem:[#allocation3 + $0x80]]  ;;  %s5138_s14 = sld [smem:[#allocation3 + $0x81]] }
  0x43   :  { %v95_v5 = vsel %vm92_vm1, %v94_v4, 0  ;;  %v102_v9 = vstv %s5109_s11  ;;  %v106_v11 = vstv %s5110_s28  ;;  %5714 = vmatpush3.bf16.msra.mxu1 %v6848_v21  ;;  %vm6932_vm14 = vmand %vm89_vm12, %vm90_vm13  ;;  %s5139_s11 = sld [smem:[#allocation3 + $0x82]]  ;;  %s5140_s28 = sld [smem:[#allocation3 + $0x83]] }
  0x44   :  { %v99_v8 = vsel %vm96_vm2, %v98_v6, %v95_v5  ;;  %v110_v13 = vstv %s5111_s29  ;;  %v114_v16 = vstv %s5112_s0  ;;  %5719 = vmatprep.subr.bf16.mxu1 %v6652_v1  ;;  %s5141_s29 = sld [smem:[#allocation3 + $0x84]]  ;;  %s5142_s0 = sld [smem:[#allocation3 + $0x85]] }
  0x45   :  { %v6799_v3 = vld [vmem:[%s8460_s21] sm:$0xff]   ;;  %v6809_v7 = vld [vmem:[%s8460_s21 + $0x8] sm:$0xff]   ;;  %v103_v10 = vsel %vm100_vm3, %v102_v9, %v99_v8  ;;  %v6823_v14 = vld [vmem:[%s8460_s21 + $0x10] sm:$0xff]   ;;  %v118_v20 = vstv %s6794_s30  ;;  %s5143_s30 = sld [smem:[#allocation3 + $0x86]]  ;;  %s5157_s3 = sld [smem:[#allocation3 + $0x105]] }
  0x46   :  { %5692 = vmatpush3.bf16.msra.mxu0 %v6799_v3  ;;  %v107_v12 = vsel %vm104_vm4, %v106_v11, %v103_v10  ;;  %v6837_v18 = vld [vmem:[%s8460_s21 + $0x18] sm:$0xff]   ;;  %v6858_v23 = vld [vmem:[%s8460_s21 + $0x20] sm:$0xff]   ;;  %v122_v26 = vstv %s5114_s4  ;;  %v6874_v27 = vld [vmem:[%s8460_s21 + $0x28] sm:$0xff]   ;;  %5716 = vmatmul.mubr.bf16.vlgmr.msra.gmra.mrb[0].mxu1 %v6654_v29  ;;  %s5158_s22 = sld [smem:[#allocation3 + $0x106]]  ;;  %s5159_s4 = sld [smem:[#allocation3 + $0x107]] }
  0x47   :  { %5693 = vmatprep.subr.bf16.mxu0 %v6652_v1  ;;  %v111_v15 = vsel %vm108_vm5, %v110_v13, %v107_v12  ;;  %v6863_v24 = vld [vmem:[%s8461_s2] sm:$0xff]   ;;  %5721 = vmatprep.mubr.msk.bf16.mxu1 %vm6653_vm0, %v6652_v1  ;;  %v6888_v30 = vld [vmem:[%s8460_s21 + $0x30] sm:$0xff]   ;;  %v6896_v31 = vld [vmem:[%s8460_s21 + $0x38] sm:$0xff]   ;;  %v548_v10 = vstv %s5144_s20  ;;  %s5156_s20 = sld [smem:[#allocation3 + $0x104]]  ;;  %s5184_s25 = sld [smem:[#allocation3 + $0x202]] }
  0x48   :  { %v115_v19 = vsel %vm112_vm6, %v114_v16, %v111_v15  ;;  %5720 = vmatpush3.bf16.msra.mxu1 %v6863_v24  ;;  %v527_v58 = vstv %s5137_s27  ;;  %v530_v59 = vstv %s5138_s14  ;;  %s5167_s27 = sld [smem:[#allocation3 + $0x180]]  ;;  %s5168_s14 = sld [smem:[#allocation3 + $0x181]] }
  0x49   :  { %v119_v25 = vsel %vm116_vm7, %v118_v20, %v115_v19  ;;  %5725 = vmatprep.subr.bf16.mxu1 %v6652_v1  ;;  %v528_v60 = vsel %vm92_vm1, %v527_v58, 0  ;;  %v533_v61 = vstv %s5139_s11  ;;  %v536_v62 = vstv %s5140_s28  ;;  %v6989_v20 = vld [vmem:[%s8437_s9] sm:$0xff]   ;;  %s5152_s28 = sld [smem:[#allocation3 + $0x100]]  ;;  %s5169_s11 = sld [smem:[#allocation3 + $0x182]] }
  0x4a   :  { %5694 = vmatpush3.bf16.msra.mxu0 %v6809_v7  ;;  %v123_v28 = vsel %vm120_vm8, %v122_v26, %v119_v25  ;;  %v531_v63 = vsel %vm96_vm2, %v530_v59, %v528_v60  ;;  %v539_v0 = vstv %s5141_s29  ;;  %v542_v5 = vstv %s5142_s0  ;;  %v6995_v25 = vld [vmem:[%s8437_s9 + $0x8] sm:$0xff]   ;;  %v7002_v26 = vld [vmem:[%s8436_s8] sm:$0xff]   ;;  %s5153_s29 = sld [smem:[#allocation3 + $0x101]]  ;;  %s5154_s0 = sld [smem:[#allocation3 + $0x102]] }
  0x4b   :  { %5695 = vmatprep.subr.bf16.mxu0 %v6652_v1  ;;  %vm124_vm9 = vcmp.eq.s32.totalorder %v6851_v22, %v123_v28  ;;  %v534_v4 = vsel %vm100_vm3, %v533_v61, %v531_v63  ;;  %v545_v8 = vstv %s5143_s30  ;;  %s5155_s30 = sld [smem:[#allocation3 + $0x103]]  ;;  %s5186_s5 = sld [smem:[#allocation3 + $0x204]] }
  0x4c   :  { %vm5124_vm10 = vmpackc.low %vm124_vm9, %vm124_vm9  ;;  %v537_v6 = vsel %vm104_vm4, %v536_v62, %v534_v4  ;;  %s5185_s1 = sld [smem:[#allocation3 + $0x203]]  ;;  %s5216_s24 = sld [smem:[#allocation4 + $0x5]] }
  0x4d   :  { %v540_v9 = vsel %vm108_vm5, %v539_v0, %v537_v6 }
  0x4e   :  { %5696 = vmatpush3.bf16.msra.mxu0 %v6823_v14  ;;  %v543_v11 = vsel %vm112_vm6, %v542_v5, %v540_v9 }
  0x4f   :  { %5697 = vmatprep.subr.bf16.mxu0 %v6652_v1  ;;  %v546_v12 = vsel %vm116_vm7, %v545_v8, %v543_v11 }
  0x50   :  { %v549_v13 = vsel %vm120_vm8, %v548_v10, %v546_v12 }
  0x51   :  { %vm550_vm15 = vcmp.eq.s32.totalorder %v6851_v22, %v549_v13 }
  0x52   :  { %5698 = vmatpush3.bf16.msra.mxu0 %v6837_v18  ;;  %vm5146_vm9 = vmpackc.low %vm550_vm15, %vm550_vm15 }
  0x53   :  { %5699 = vmatprep.subr.bf16.mxu0 %v6652_v1 }
  0x56   :  { %5700 = vmatpush3.bf16.msra.mxu0 %v6858_v23 }
  0x57   :  { %5701 = vmatprep.subr.bf16.mxu0 %v6652_v1 }
  0x5a   :  { %5702 = vmatpush3.bf16.msra.mxu0 %v6874_v27 }
  0x5b   :  { %5703 = vmatprep.subr.bf16.mxu0 %v6652_v1 }
  0x5e   :  { %5704 = vmatpush3.bf16.msra.mxu0 %v6888_v30 }
  0x5f   :  { %5705 = vmatprep.subr.bf16.mxu0 %v6652_v1 }
  0x62   :  { %5706 = vmatpush3.bf16.msra.mxu0 %v6896_v31 }
  0x63   :  { %5741 = vmatprep.subr.bf16.mxu0 %v6652_v1 }
  0x65   :  { %5708 = vmatmul.mubr.msk.bf16.vlgmr.msra.gmra.mrb[0].mxu0 %vm5124_vm10, %v6655_v32  ;;  %vm251_vm10 = vcmask 261120  }
  0x66   :  { %5742 = vmatpush3.bf16.msra.mxu0 %v6799_v3  ;;  %5757 = vmatprep.mubr.msk.bf16.mxu0 %vm6653_vm0, %v6652_v1 }
  0x67   :  { %5743 = vmatprep.subr.bf16.mxu0 %v6652_v1 }
  0x6a   :  { %5744 = vmatpush3.bf16.msra.mxu0 %v6809_v7 }
  0x6b   :  { %5745 = vmatprep.subr.bf16.mxu0 %v6652_v1 }
  0x6e   :  { %5746 = vmatpush3.bf16.msra.mxu0 %v6823_v14 }
  0x6f   :  { %5747 = vmatprep.subr.bf16.mxu0 %v6652_v1 }
  0x72   :  { %5748 = vmatpush3.bf16.msra.mxu0 %v6837_v18 }
  0x73   :  { %5749 = vmatprep.subr.bf16.mxu0 %v6652_v1 }
  0x76   :  { %5750 = vmatpush3.bf16.msra.mxu0 %v6858_v23 }
  0x77   :  { %5751 = vmatprep.subr.bf16.mxu0 %v6652_v1 }
  0x7a   :  { %5752 = vmatpush3.bf16.msra.mxu0 %v6874_v27 }
  0x7b   :  { %5753 = vmatprep.subr.bf16.mxu0 %v6652_v1 }
  0x7e   :  { %5754 = vmatpush3.bf16.msra.mxu0 %v6888_v30 }
  0x7f   :  { %5755 = vmatprep.subr.bf16.mxu0 %v6652_v1 }
  0x82   :  { %5756 = vmatpush3.bf16.msra.mxu0 %v6896_v31 }
  0x83   :  { %5791 = vmatprep.subr.bf16.mxu0 %v6652_v1 }
  0x85   :  { %5758 = vmatmul.mubr.msk.bf16.vlgmr.msra.gmra.mrb[4].mxu0 %vm5146_vm9, %v6655_v32 }
  0x86   :  { %5792 = vmatpush3.bf16.msra.mxu0 %v6799_v3  ;;  %5807 = vmatprep.mubr.msk.bf16.mxu0 %vm6653_vm0, %v6652_v1 }
  0x87   :  { %5793 = vmatprep.subr.bf16.mxu0 %v6652_v1 }
  0x8a   :  { %5794 = vmatpush3.bf16.msra.mxu0 %v6809_v7 }
  0x8b   :  { %5795 = vmatprep.subr.bf16.mxu0 %v6652_v1 }
  0x8e   :  { %5796 = vmatpush3.bf16.msra.mxu0 %v6823_v14 }
  0x8f   :  { %5797 = vmatprep.subr.bf16.mxu0 %v6652_v1 }
  0x92   :  { %5798 = vmatpush3.bf16.msra.mxu0 %v6837_v18 }
  0x93   :  { %5799 = vmatprep.subr.bf16.mxu0 %v6652_v1 }
  0x96   :  { %5800 = vmatpush3.bf16.msra.mxu0 %v6858_v23 }
  0x97   :  { %5801 = vmatprep.subr.bf16.mxu0 %v6652_v1 }
  0x9a   :  { %5802 = vmatpush3.bf16.msra.mxu0 %v6874_v27 }
  0x9b   :  { %5803 = vmatprep.subr.bf16.mxu0 %v6652_v1 }
  0x9e   :  { %5804 = vmatpush3.bf16.msra.mxu0 %v6888_v30 }
  0x9f   :  { %5805 = vmatprep.subr.bf16.mxu0 %v6652_v1 }
  0xa2   :  { %5806 = vmatpush3.bf16.msra.mxu0 %v6896_v31 }
  0xa3   :  { %5841 = vmatprep.subr.bf16.mxu0 %v6652_v1 }
 0x119   :  { %v289_v33 = vpop.f32.mrb[0].mxu1 }
 0x11a   :  { %v5717_v34 = vpop.f32.mrb[1].mxu1 }
 0x11b   :  { %v292_v35 = vpop.f32.mrb[2].mxu1 }
 0x11c   :  { %v5718_v36 = vpop.f32.mrb[3].mxu1 }
 0x138   :  { %v226_v37 = vpop.f32.mrb[0].mxu0 }
 0x139   :  { %v232_v38 = vpack.c.bf16 %v226_v37, %v226_v37  ;;  %v5709_v39 = vpop.f32.mrb[1].mxu0 }
 0x13a   :  { %v229_v40 = vpop.f32.mrb[2].mxu0 }
 0x13b   :  { %v5710_v41 = vpop.f32.mrb[3].mxu0  ;;  %5722 = vmatmul.mubr.msk.bf16.vlgmr.msra.gmra.mrb[4].mxu1 %vm301_vm11, %v232_v38 }
 0x13c   :  { %5729 = vmatprep.mubr.msk.bf16.mxu1 %vm6653_vm0, %v6652_v1  ;;  %5726 = vmatpush3.bf16.msra.mxu1 %v6989_v20 }
 0x13d   :  { %5727 = vmatprep.subr.bf16.mxu1 %v6652_v1 }
 0x140   :  { %5728 = vmatpush3.bf16.msra.mxu1 %v6995_v25 }
 0x141   :  { %5733 = vmatprep.subr.bf16.mxu1 %v6652_v1 }
 0x143   :  { %5730 = vmatmul.mubr.bf16.vlgmr.msra.gmra.mrb[8].mxu1 %v6654_v29 }
 0x144   :  { %5734 = vmatpush3.bf16.msra.mxu1 %v7002_v26  ;;  %5737 = vmatprep.mubr.msk.bf16.mxu1 %vm6653_vm0, %v6652_v1 }
 0x145   :  { %5735 = vmatprep.subr.bf16.mxu1 %v6652_v1 }
 0x158   :  { %v588_v29 = vpop.f32.mrb[4].mxu0 }
 0x159   :  { %v5759_v36 = vpop.f32.mrb[5].mxu0 }
 0x15a   :  { %v591_v38 = vpop.f32.mrb[6].mxu0  ;;  %v824_v36 = vstv %s5153_s29  ;;  %s5171_s29 = sld [smem:[#allocation3 + $0x184]] }
 0x15b   :  { %v5760_v39 = vpop.f32.mrb[7].mxu0  ;;  %v827_v38 = vstv %s5154_s0  ;;  %s5172_s0 = sld [smem:[#allocation3 + $0x185]] }
 0x15c   :  { %v830_v39 = vstv %s5155_s30  ;;  %s5173_s30 = sld [smem:[#allocation3 + $0x186]] }
 0x20e   :  { %v339_v42 = vpop.f32.mrb[4].mxu1 }
 0x20f   :  { %v340_v44 = vadd.f32 %v339_v42, %v289_v33  ;;  %v5723_v45 = vpop.f32.mrb[5].mxu1  ;;  %v7011_v33 = vld [vmem:[%s8436_s8 + $0x8] sm:$0xff]  }
 0x210   :  { %v342_v46 = vpop.f32.mrb[6].mxu1  ;;  %5736 = vmatpush3.bf16.msra.mxu1 %v7011_v33 }
 0x211   :  { %v352_v47 = vadd.f32 %v6927_v43, %v340_v44  ;;  %v5724_v48 = vpop.f32.mrb[7].mxu1  ;;  %5761 = vmatprep.subr.bf16.mxu1 %v6652_v1  ;;  %v594_v46 = vpack.c.bf16 %v588_v29, %v588_v29  ;;  %v821_v29 = vstv %s5152_s28  ;;  %s5170_s28 = sld [smem:[#allocation3 + $0x183]] }
 0x213   :  { %v353_v50 = vmul.f32 0.5, %v352_v47 }
 0x215   :  { %v354_v51 = vsel %vm6932_vm14, %v352_v47, %v353_v50  ;;  %v7042_v47 = vld [vmem:[%s8438_s10] ss:$0 sm:$0xff] }
 0x216   :  { %6467 = vtanh.f32 %v354_v51  ;;  %v431_v40 = vpop.f32.mrb[8].mxu1 }
 0x217   :  { %v5731_v41 = vpop.f32.mrb[9].mxu1 }
 0x218   :  { %v434_v42 = vpop.f32.mrb[10].mxu1  ;;  %v833_v41 = vstv %s5156_s20  ;;  %s5174_s20 = sld [smem:[#allocation3 + $0x187]] }
 0x219   :  { %v5732_v44 = vpop.f32.mrb[11].mxu1 }
 0x21a   :  { %v836_v44 = vstv %s5157_s3  ;;  %s5201_s3 = sld [smem:[#allocation3 + $0x284]] }
 0x220   :  { %v6468_v52 = vpop.eup %6467 }
 0x221   :  { %v356_v53 = vmul.f32 0.5, %v6468_v52 }
 0x223   :  { %v357_v54 = vadd.f32 0.5, %v356_v53 }
 0x225   :  { %v6940_v55 = vsel %vm6932_vm14, %v6468_v52, %v357_v54 }
 0x226   :  { %361 = vrot.lane.b32.xlu0 %v6940_v55, %s6650_s23  ;;  %v359_v15 = vmul.f32 0.0, %v6940_v55 }
 0x298   :  { %v362_v56 = vpop.permute.xlu0 %361 }
 0x299   :  { %v364_v57 = vmul.f32 %v362_v56, %v6940_v55 }
 0x29b   :  { %366 = vrot.lane.b32.xlu0 %v364_v57, %s6656_s26 }
 0x30d   :  { %v367_v16 = vpop.permute.xlu0 %366 }
 0x30e   :  { %v6983_v19 = vadd.f32 %v367_v16, %v359_v15 }
 0x310   :  { %6469 = vtanh.f32 %v6983_v19 }
 0x31a   :  { %v6470_v28 = vpop.eup %6469 }
 0x31b   :  { %372 = vrot.lane.b32.xlu1 %v6470_v28, %s6650_s23 }
 0x38d   :  { %v373_v34 = vpop.permute.xlu1 %372 }
 0x38e   :  { %v375_v35 = vmul.f32 %v373_v34, %v6940_v55 }
 0x390   :  { %v376_v37 = vpack.c.bf16 %v375_v35, %v375_v35 }
 0x392   :  { %438 = vrot.lane.b32.xlu1 %v376_v37, %s6656_s26  ;;  %v822_v37 = vsel %vm92_vm1, %v821_v29, 0 }
 0x404   :  { %v439_v45 = vpop.permute.xlu1 %438 }
 0x405   :  { %5738 = vmatmul.mubr.msk.bf16.vlgmr.msra.gmra.mrb[12].mxu1 %vm251_vm10, %v439_v45 }
 0x406   :  { %5762 = vmatpush3.bf16.msra.mxu1 %v6832_v17  ;;  %5765 = vmatprep.mubr.msk.bf16.mxu1 %vm6653_vm0, %v6652_v1 }
 0x407   :  { %5763 = vmatprep.subr.bf16.mxu1 %v6652_v1 }
 0x40a   :  { %5764 = vmatpush3.bf16.msra.mxu1 %v6848_v21 }
 0x40b   :  { %5769 = vmatprep.subr.bf16.mxu1 %v6652_v1 }
 0x40d   :  { %5766 = vmatmul.mubr.msk.bf16.vlgmr.msra.gmra.mrb[16].mxu1 %vm251_vm10, %v439_v45 }
 0x40e   :  { %5770 = vmatpush3.bf16.msra.mxu1 %v6863_v24  ;;  %5771 = vmatprep.mubr.msk.bf16.mxu1 %vm6653_vm0, %v6652_v1 }
 0x40f   :  { %5775 = vmatprep.subr.bf16.mxu1 %v6652_v1 }
 0x415   :  { %5772 = vmatmul.mubr.msk.bf16.vlgmr.msra.gmra.mrb[20].mxu1 %vm301_vm11, %v594_v46  ;;  %v839_v46 = vstv %s5158_s22  ;;  %s5203_s22 = sld [smem:[#allocation3 + $0x286]] }
 0x416   :  { %5776 = vmatpush3.bf16.msra.mxu1 %v6989_v20  ;;  %5779 = vmatprep.mubr.msk.bf16.mxu1 %vm6653_vm0, %v6652_v1 }
 0x417   :  { %5777 = vmatprep.subr.bf16.mxu1 %v6652_v1 }
 0x41a   :  { %5778 = vmatpush3.bf16.msra.mxu1 %v6995_v25 }
 0x41b   :  { %5783 = vmatprep.subr.bf16.mxu1 %v6652_v1 }
 0x4d8   :  { %v489_v17 = vpop.f32.mrb[12].mxu1 }
 0x4d9   :  { %v490_v48 = vadd.f32 %v489_v17, %v431_v40  ;;  %v5739_v50 = vpop.f32.mrb[13].mxu1  ;;  %v825_v40 = vsel %vm96_vm2, %v824_v36, %v822_v37 }
 0x4da   :  { %v492_v51 = vpop.f32.mrb[14].mxu1  ;;  %v828_v42 = vsel %vm100_vm3, %v827_v38, %v825_v40 }
 0x4db   :  { %v502_v52 = vadd.f32 %v7042_v47, %v490_v48  ;;  %v5740_v53 = vpop.f32.mrb[15].mxu1  ;;  %v831_v45 = vsel %vm104_vm4, %v830_v39, %v828_v42  ;;  %v842_v48 = vstv %s5159_s4  ;;  %s5204_s4 = sld [smem:[#allocation3 + $0x287]] }
 0x4dc   :  { %v834_v17 = vsel %vm108_vm5, %v833_v41, %v831_v45  ;;  %v7088_v53 = vld [vmem:[%s8447_s19] sm:$0xff] }
 0x4dd   :  { %v503_v54 = vmul.f32 0.5, %v502_v52  ;;  %v837_v50 = vsel %vm112_vm6, %v836_v44, %v834_v17 }
 0x4de   :  { %v840_v51 = vsel %vm116_vm7, %v839_v46, %v837_v50 }
 0x4df   :  { %v504_v55 = vsel %vm6932_vm14, %v502_v52, %v503_v54  ;;  %v843_v52 = vsel %vm120_vm8, %v842_v48, %v840_v51 }
 0x4e0   :  { %6471 = vtanh.f32 %v504_v55  ;;  %v629_v56 = vpop.f32.mrb[16].mxu1  ;;  %vm844_vm12 = vcmp.eq.s32.totalorder %v6851_v22, %v843_v52 }
 0x4e1   :  { %v5767_v57 = vpop.f32.mrb[17].mxu1  ;;  %vm5161_vm13 = vmpackc.low %vm844_vm12, %vm844_vm12 }
 0x4e2   :  { %v632_v1 = vpop.f32.mrb[18].mxu1  ;;  %5808 = vmatmul.mubr.msk.bf16.vlgmr.msra.gmra.mrb[8].mxu0 %vm5161_vm13, %v6655_v32 }
 0x4e3   :  { %v5768_v58 = vpop.f32.mrb[19].mxu1  ;;  %5842 = vmatpush3.bf16.msra.mxu0 %v6799_v3  ;;  %5857 = vmatprep.mubr.msk.bf16.mxu0 %vm6653_vm0, %v7088_v53 }
 0x4e4   :  { %5843 = vmatprep.subr.bf16.mxu0 %v7088_v53 }
 0x4e7   :  { %5844 = vmatpush3.bf16.msra.mxu0 %v6809_v7 }
 0x4e8   :  { %v672_v59 = vpop.f32.mrb[20].mxu1  ;;  %5845 = vmatprep.subr.bf16.mxu0 %v7088_v53 }
 0x4e9   :  { %v673_v60 = vadd.f32 %v672_v59, %v629_v56  ;;  %v5773_v61 = vpop.f32.mrb[21].mxu1 }
 0x4ea   :  { %v6472_v62 = vpop.eup %6471  ;;  %v675_v63 = vpop.f32.mrb[22].mxu1 }
 0x4eb   :  { %v678_v0 = vadd.f32 %v6927_v43, %v673_v60  ;;  %v5774_v4 = vpop.f32.mrb[23].mxu1  ;;  %v506_v5 = vmul.f32 0.5, %v6472_v62  ;;  %5846 = vmatpush3.bf16.msra.mxu0 %v6823_v14 }
 0x4ec   :  { %5847 = vmatprep.subr.bf16.mxu0 %v7088_v53 }
 0x4ed   :  { %v679_v6 = vmul.f32 0.5, %v678_v0  ;;  %v507_v8 = vadd.f32 0.5, %v506_v5 }
 0x4ef   :  { %v680_v9 = vsel %vm6932_vm14, %v678_v0, %v679_v6  ;;  %v7052_v10 = vsel %vm6932_vm14, %v6472_v62, %v507_v8  ;;  %5848 = vmatpush3.bf16.msra.mxu0 %v6837_v18  ;;  %v7133_v0 = vld [vmem:[%s8434_s6] sm:$0xff]  }
 0x4f0   :  { %6473 = vtanh.f32 %v680_v9  ;;  %511 = vrot.lane.b32.xlu0 %v7052_v10, %s6650_s23  ;;  %5849 = vmatprep.subr.bf16.mxu0 %v7088_v53  ;;  %v509_v3 = vmul.f32 0.0, %v7052_v10 }
 0x4f3   :  { %5850 = vmatpush3.bf16.msra.mxu0 %v6858_v23 }
 0x4f4   :  { %5851 = vmatprep.subr.bf16.mxu0 %v7088_v53 }
 0x4f7   :  { %5852 = vmatpush3.bf16.msra.mxu0 %v6874_v27 }
 0x4f8   :  { %5853 = vmatprep.subr.bf16.mxu0 %v7088_v53 }
 0x4fa   :  { %v6474_v11 = vpop.eup %6473 }
 0x4fb   :  { %v682_v12 = vmul.f32 0.5, %v6474_v11  ;;  %5854 = vmatpush3.bf16.msra.mxu0 %v6888_v30 }
 0x4fc   :  { %5855 = vmatprep.subr.bf16.mxu0 %v7088_v53 }
 0x4fd   :  { %v683_v13 = vadd.f32 0.5, %v682_v12 }
 0x4ff   :  { %v7058_v15 = vsel %vm6932_vm14, %v6474_v11, %v683_v13  ;;  %5856 = vmatpush3.bf16.msra.mxu0 %v6896_v31 }
 0x500   :  { %687 = vrot.lane.b32.xlu1 %v7058_v15, %s6650_s23  ;;  %5891 = vmatprep.subr.bf16.mxu0 %v7088_v53  ;;  %v685_v23 = vmul.f32 %v7058_v15, %v6983_v19 }
 0x562   :  { %v512_v16 = vpop.permute.xlu0 %511 }
 0x563   :  { %v514_v28 = vmul.f32 %v512_v16, %v7052_v10 }
 0x565   :  { %516 = vrot.lane.b32.xlu0 %v514_v28, %s6656_s26 }
 0x572   :  { %v688_v34 = vpop.permute.xlu1 %687 }
 0x573   :  { %v690_v35 = vmul.f32 %v688_v34, %v7058_v15 }
 0x575   :  { %692 = vrot.lane.b32.xlu1 %v690_v35, %s6656_s26 }
 0x5b5   :  { %v882_v58 = vpop.f32.mrb[8].mxu0 }
 0x5b6   :  { %v5809_v59 = vpop.f32.mrb[9].mxu0  ;;  %v888_v4 = vpack.c.bf16 %v882_v58, %v882_v58  ;;  %v1127_v58 = vstv %s5171_s29  ;;  %s1997_s29 = sld [smem:[#allocation4]] }
 0x5b7   :  { %v885_v60 = vpop.f32.mrb[10].mxu0 }
 0x5b8   :  { %v5810_v61 = vpop.f32.mrb[11].mxu0 }
 0x5b9   :  { %v1133_v61 = vstv %s5173_s30  ;;  %s5199_s30 = sld [smem:[#allocation3 + $0x282]] }
 0x5d7   :  { %v517_v7 = vpop.permute.xlu0 %516 }
 0x5d8   :  { %v7108_v14 = vadd.f32 %v517_v7, %v509_v3 }
 0x5da   :  { %6475 = vtanh.f32 %v7108_v14 }
 0x5e4   :  { %v6476_v18 = vpop.eup %6475 }
 0x5e5   :  { %522 = vrot.lane.b32.xlu0 %v6476_v18, %s6650_s23 }
 0x5e7   :  { %v693_v27 = vpop.permute.xlu1 %692 }
 0x5e8   :  { %v7114_v30 = vadd.f32 %v693_v27, %v685_v23 }
 0x5ea   :  { %6477 = vtanh.f32 %v7114_v30 }
 0x5f4   :  { %v6478_v31 = vpop.eup %6477 }
 0x5f5   :  { %698 = vrot.lane.b32.xlu1 %v6478_v31, %s6650_s23  ;;  %v1115_v31 = vstv %s5167_s27  ;;  %s5187_s27 = sld [smem:[#allocation3 + $0x205]] }
 0x657   :  { %v523_v54 = vpop.permute.xlu0 %522 }
 0x658   :  { %v525_v55 = vmul.f32 %v523_v54, %v7052_v10  ;;  %v1118_v54 = vstv %s5168_s14  ;;  %s5188_s14 = sld [smem:[#allocation3 + $0x206]] }
 0x65a   :  { %v703_v56 = vpack.c.bf16 %v525_v55, %v525_v55  ;;  %v1116_v55 = vsel %vm92_vm1, %v1115_v31, 0 }
 0x65c   :  { %705 = vrot.lane.b32.xlu0 %v703_v56, %s6656_s26  ;;  %v1121_v56 = vstv %s5169_s11  ;;  %s5189_s11 = sld [smem:[#allocation3 + $0x207]] }
 0x667   :  { %v699_v57 = vpop.permute.xlu1 %698 }
 0x668   :  { %v701_v1 = vmul.f32 %v699_v57, %v7058_v15  ;;  %v1124_v57 = vstv %s5170_s28  ;;  %s8464_s28 = sld [smem:[#allocation12_spill]] }
 0x66a   :  { %v702_v19 = vpack.c.bf16 %v701_v1, %v701_v1  ;;  %v1119_v1 = vsel %vm96_vm2, %v1118_v54, %v1116_v55 }
 0x66b   :  { %v1122_v59 = vsel %vm100_vm3, %v1121_v56, %v1119_v1 }
 0x66c   :  { %751 = vrot.lane.b32.xlu1 %v702_v19, %s6656_s26  ;;  %v1130_v19 = vstv %s5172_s0  ;;  %v1125_v60 = vsel %vm104_vm4, %v1124_v57, %v1122_v59  ;;  %s5198_s0 = sld [smem:[#allocation3 + $0x281]] }
 0x6ce   :  { %v706_v62 = vpop.permute.xlu0 %705 }
 0x6cf   :  { %5780 = vmatmul.mubr.msk.bf16.vlgmr.msra.gmra.mrb[24].mxu1 %vm251_vm10, %v706_v62  ;;  %v1128_v62 = vsel %vm108_vm5, %v1127_v58, %v1125_v60 }
 0x6d0   :  { %5784 = vmatpush3.bf16.msra.mxu1 %v7002_v26  ;;  %5787 = vmatprep.mubr.msk.bf16.mxu1 %vm6653_vm0, %v7088_v53 }
 0x6d1   :  { %5785 = vmatprep.subr.bf16.mxu1 %v7088_v53 }
 0x6d4   :  { %5786 = vmatpush3.bf16.msra.mxu1 %v7011_v33 }
 0x6d5   :  { %5811 = vmatprep.subr.bf16.mxu1 %v7088_v53 }
 0x6de   :  { %v752_v63 = vpop.permute.xlu1 %751 }
 0x6df   :  { %5788 = vmatmul.mubr.msk.bf16.vlgmr.msra.gmra.mrb[28].mxu1 %vm251_vm10, %v752_v63 }
 0x6e0   :  { %5812 = vmatpush3.bf16.msra.mxu1 %v7133_v0  ;;  %5815 = vmatprep.mubr.msk.bf16.mxu1 %vm6653_vm0, %v7088_v53 }
 0x6e1   :  { %5813 = vmatprep.subr.bf16.mxu1 %v7088_v53 }
 0x6e4   :  { %5814 = vmatpush3.bf16.msra.mxu1 %v6848_v21 }
 0x6e5   :  { %5819 = vmatprep.subr.bf16.mxu1 %v7088_v53 }
 0x6e7   :  { %5816 = vmatmul.mubr.msk.bf16.vlgmr.msra.gmra.mrb[32].mxu1 %vm251_vm10, %v752_v63  ;;  %v1136_v63 = vstv %s5174_s20  ;;  %s5200_s20 = sld [smem:[#allocation3 + $0x283]] }
 0x6e8   :  { %5820 = vmatpush3.bf16.msra.mxu1 %v6863_v24  ;;  %5821 = vmatprep.mubr.msk.bf16.mxu1 %vm6653_vm0, %v7088_v53 }
 0x6e9   :  { %5825 = vmatprep.subr.bf16.mxu1 %v7088_v53 }
 0x6ef   :  { %5822 = vmatmul.mubr.msk.bf16.vlgmr.msra.gmra.mrb[36].mxu1 %vm301_vm11, %v888_v4  ;;  %v1131_v4 = vsel %vm112_vm6, %v1130_v19, %v1128_v62 }
 0x6f0   :  { %5826 = vmatpush3.bf16.msra.mxu1 %v6989_v20  ;;  %5829 = vmatprep.mubr.msk.bf16.mxu1 %vm6653_vm0, %v7088_v53 }
 0x6f1   :  { %5827 = vmatprep.subr.bf16.mxu1 %v7088_v53 }
 0x6f4   :  { %5828 = vmatpush3.bf16.msra.mxu1 %v6995_v25 }
 0x6f5   :  { %5833 = vmatprep.subr.bf16.mxu1 %v7088_v53 }
 0x7a2   :  { %v744_v21 = vpop.f32.mrb[24].mxu1 }
 0x7a3   :  { %v5781_v24 = vpop.f32.mrb[25].mxu1 }
 0x7a4   :  { %v747_v5 = vpop.f32.mrb[26].mxu1 }
 0x7a5   :  { %v5782_v6 = vpop.f32.mrb[27].mxu1  ;;  %v7196_v5 = vld [vmem:[%s8460_s21] sm:$0xff]  }
 0x7a6   :  { %v7205_v6 = vld [vmem:[%s8460_s21 + $0x8] sm:$0xff]  }
 0x7b2   :  { %v790_v8 = vpop.f32.mrb[28].mxu1 }
 0x7b3   :  { %v791_v9 = vadd.f32 %v790_v8, %v744_v21  ;;  %v5789_v10 = vpop.f32.mrb[29].mxu1  ;;  %v1134_v21 = vsel %vm116_vm7, %v1133_v61, %v1131_v4  ;;  %v7212_v8 = vld [vmem:[%s8460_s21 + $0x10] sm:$0xff]  }
 0x7b4   :  { %v793_v11 = vpop.f32.mrb[30].mxu1  ;;  %v1137_v24 = vsel %vm120_vm8, %v1136_v63, %v1134_v21  ;;  %v7226_v10 = vld [vmem:[%s8460_s21 + $0x20] sm:$0xff]  }
 0x7b5   :  { %v796_v12 = vadd.f32 %v7042_v47, %v791_v9  ;;  %v5790_v13 = vpop.f32.mrb[31].mxu1  ;;  %vm1138_vm15 = vcmp.eq.s32.totalorder %v6851_v22, %v1137_v24  ;;  %v7219_v9 = vld [vmem:[%s8460_s21 + $0x18] sm:$0xff]   ;;  %v7233_v11 = vld [vmem:[%s8460_s21 + $0x28] sm:$0xff]  }
 0x7b6   :  { %vm5176_vm9 = vmpackc.low %vm1138_vm15, %vm1138_vm15  ;;  %v7247_v13 = vld [vmem:[%s8460_s21 + $0x38] sm:$0xff]  }
 0x7b7   :  { %v797_v15 = vmul.f32 0.5, %v796_v12  ;;  %5858 = vmatmul.mubr.msk.bf16.vlgmr.msra.gmra.mrb[12].mxu0 %vm5176_vm9, %v6655_v32 }
 0x7b8   :  { %5892 = vmatpush3.bf16.msra.mxu0 %v7196_v5  ;;  %5907 = vmatprep.mubr.msk.bf16.mxu0 %vm6653_vm0, %v7088_v53 }
 0x7b9   :  { %v798_v16 = vsel %vm6932_vm14, %v796_v12, %v797_v15  ;;  %5893 = vmatprep.subr.bf16.mxu0 %v7088_v53  ;;  %v7240_v12 = vld [vmem:[%s8460_s21 + $0x30] sm:$0xff]   ;;  %s5202_s21 = sld [smem:[#allocation3 + $0x285]] }
 0x7ba   :  { %6479 = vtanh.f32 %v798_v16  ;;  %v923_v28 = vpop.f32.mrb[32].mxu1 }
 0x7bb   :  { %v5817_v34 = vpop.f32.mrb[33].mxu1 }
 0x7bc   :  { %v926_v35 = vpop.f32.mrb[34].mxu1  ;;  %5894 = vmatpush3.bf16.msra.mxu0 %v7205_v6 }
 0x7bd   :  { %v5818_v29 = vpop.f32.mrb[35].mxu1  ;;  %5895 = vmatprep.subr.bf16.mxu0 %v7088_v53 }
 0x7c0   :  { %5896 = vmatpush3.bf16.msra.mxu0 %v7212_v8 }
 0x7c1   :  { %5897 = vmatprep.subr.bf16.mxu0 %v7088_v53 }
 0x7c2   :  { %v966_v36 = vpop.f32.mrb[36].mxu1 }
 0x7c3   :  { %v967_v37 = vadd.f32 %v966_v36, %v923_v28  ;;  %v5823_v38 = vpop.f32.mrb[37].mxu1 }
 0x7c4   :  { %v6480_v39 = vpop.eup %6479  ;;  %v969_v40 = vpop.f32.mrb[38].mxu1  ;;  %5898 = vmatpush3.bf16.msra.mxu0 %v7219_v9 }
 0x7c5   :  { %v972_v41 = vadd.f32 %v6927_v43, %v967_v37  ;;  %v5824_v42 = vpop.f32.mrb[39].mxu1  ;;  %v800_v44 = vmul.f32 0.5, %v6480_v39  ;;  %5899 = vmatprep.subr.bf16.mxu0 %v7088_v53 }
 0x7c7   :  { %v973_v45 = vmul.f32 0.5, %v972_v41  ;;  %v801_v46 = vadd.f32 0.5, %v800_v44 }
 0x7c8   :  { %5900 = vmatpush3.bf16.msra.mxu0 %v7226_v10 }
 0x7c9   :  { %v974_v17 = vsel %vm6932_vm14, %v972_v41, %v973_v45  ;;  %v7161_v48 = vsel %vm6932_vm14, %v6480_v39, %v801_v46  ;;  %5901 = vmatprep.subr.bf16.mxu0 %v7088_v53 }
 0x7ca   :  { %6481 = vtanh.f32 %v974_v17  ;;  %805 = vrot.lane.b32.xlu0 %v7161_v48, %s6650_s23  ;;  %v803_v15 = vmul.f32 %v7161_v48, %v7108_v14 }
 0x7cc   :  { %5902 = vmatpush3.bf16.msra.mxu0 %v7233_v11 }
 0x7cd   :  { %5903 = vmatprep.subr.bf16.mxu0 %v7088_v53 }
 0x7d0   :  { %5904 = vmatpush3.bf16.msra.mxu0 %v7240_v12 }
 0x7d1   :  { %5905 = vmatprep.subr.bf16.mxu0 %v7088_v53 }
 0x7d4   :  { %v6482_v50 = vpop.eup %6481  ;;  %5906 = vmatpush3.bf16.msra.mxu0 %v7247_v13 }
 0x7d5   :  { %v976_v51 = vmul.f32 0.5, %v6482_v50  ;;  %5941 = vmatprep.subr.bf16.mxu0 %v7088_v53 }
 0x7d7   :  { %v977_v52 = vadd.f32 0.5, %v976_v51  ;;  %v7290_v51 = vld [vmem:[%s8461_s2] sm:$0xff]   ;;  %s5183_s2 = sld [smem:[#allocation3 + $0x201]] }
 0x7d9   :  { %v7167_v3 = vsel %vm6932_vm14, %v6482_v50, %v977_v52  ;;  %v7282_v50 = vld [vmem:[%s8434_s6 + $0x8] sm:$0xff]   ;;  %s5182_s6 = sld [smem:[#allocation3 + $0x200]] }
 0x7da   :  { %981 = vrot.lane.b32.xlu1 %v7167_v3, %s6650_s23  ;;  %v979_v35 = vmul.f32 %v7167_v3, %v7114_v30 }
 0x83c   :  { %v806_v7 = vpop.permute.xlu0 %805 }
 0x83d   :  { %v808_v18 = vmul.f32 %v806_v7, %v7161_v48 }
 0x83f   :  { %810 = vrot.lane.b32.xlu0 %v808_v18, %s6656_s26 }
 0x84c   :  { %v982_v23 = vpop.permute.xlu1 %981 }
 0x84d   :  { %v984_v27 = vmul.f32 %v982_v23, %v7167_v3 }
 0x84f   :  { %986 = vrot.lane.b32.xlu1 %v984_v27, %s6656_s26 }
 0x88a   :  { %v1176_v42 = vpop.f32.mrb[12].mxu0 }
 0x88b   :  { %v5859_v44 = vpop.f32.mrb[13].mxu0  ;;  %v1182_v52 = vpack.c.bf16 %v1176_v42, %v1176_v42 }
 0x88c   :  { %v1179_v45 = vpop.f32.mrb[14].mxu0 }
 0x88d   :  { %v5860_v46 = vpop.f32.mrb[15].mxu0  ;;  %v1409_v45 = vstv %s5182_s6  ;;  %s5252_s6 = sld [smem:[#allocation4 + $0x83]] }
 0x88e   :  { %v1412_v46 = vstv %s5183_s2  ;;  %s5253_s2 = sld [smem:[#allocation4 + $0x84]] }
 0x8b1   :  { %v811_v16 = vpop.permute.xlu0 %810 }
 0x8b2   :  { %v7253_v28 = vadd.f32 %v811_v16, %v803_v15 }
 0x8b4   :  { %6483 = vtanh.f32 %v7253_v28 }
 0x8be   :  { %v6484_v34 = vpop.eup %6483 }
 0x8bf   :  { %816 = vrot.lane.b32.xlu0 %v6484_v34, %s6650_s23 }
 0x8c1   :  { %v987_v29 = vpop.permute.xlu1 %986 }
 0x8c2   :  { %v7259_v36 = vadd.f32 %v987_v29, %v979_v35 }
 0x8c4   :  { %6485 = vtanh.f32 %v7259_v36 }
 0x8ce   :  { %v6486_v37 = vpop.eup %6485 }
 0x8cf   :  { %992 = vrot.lane.b32.xlu1 %v6486_v37, %s6650_s23 }
 0x931   :  { %v817_v14 = vpop.permute.xlu0 %816 }
 0x932   :  { %v819_v38 = vmul.f32 %v817_v14, %v7161_v48 }
 0x934   :  { %v997_v39 = vpack.c.bf16 %v819_v38, %v819_v38 }
 0x936   :  { %999 = vrot.lane.b32.xlu0 %v997_v39, %s6656_s26 }
 0x941   :  { %v993_v40 = vpop.permute.xlu1 %992 }
 0x942   :  { %v995_v41 = vmul.f32 %v993_v40, %v7167_v3 }
 0x944   :  { %v996_v30 = vpack.c.bf16 %v995_v41, %v995_v41 }
 0x946   :  { %1045 = vrot.lane.b32.xlu1 %v996_v30, %s6656_s26 }
 0x9a8   :  { %v1000_v17 = vpop.permute.xlu0 %999 }
 0x9a9   :  { %5830 = vmatmul.mubr.msk.bf16.vlgmr.msra.gmra.mrb[40].mxu1 %vm251_vm10, %v1000_v17  ;;  %v1410_v17 = vsel %vm92_vm1, %v1409_v45, 0 }
 0x9aa   :  { %5834 = vmatpush3.bf16.msra.mxu1 %v7002_v26  ;;  %5837 = vmatprep.mubr.msk.bf16.mxu1 %vm6653_vm0, %v7088_v53 }
 0x9ab   :  { %5835 = vmatprep.subr.bf16.mxu1 %v7088_v53 }
 0x9ae   :  { %5836 = vmatpush3.bf16.msra.mxu1 %v7011_v33 }
 0x9af   :  { %5861 = vmatprep.subr.bf16.mxu1 %v7088_v53 }
 0x9b8   :  { %v1046_v48 = vpop.permute.xlu1 %1045 }
 0x9b9   :  { %5838 = vmatmul.mubr.msk.bf16.vlgmr.msra.gmra.mrb[44].mxu1 %vm251_vm10, %v1046_v48 }
 0x9ba   :  { %5862 = vmatpush3.bf16.msra.mxu1 %v7133_v0  ;;  %5865 = vmatprep.mubr.msk.bf16.mxu1 %vm6653_vm0, %v7088_v53 }
 0x9bb   :  { %5863 = vmatprep.subr.bf16.mxu1 %v7088_v53 }
 0x9be   :  { %5864 = vmatpush3.bf16.msra.mxu1 %v7282_v50 }
 0x9bf   :  { %5869 = vmatprep.subr.bf16.mxu1 %v7088_v53 }
 0x9c1   :  { %5866 = vmatmul.mubr.msk.bf16.vlgmr.msra.gmra.mrb[48].mxu1 %vm251_vm10, %v1046_v48  ;;  %v1415_v48 = vstv %s5184_s25  ;;  %s5217_s25 = sld [smem:[#allocation4 + $0x6]] }
 0x9c2   :  { %5870 = vmatpush3.bf16.msra.mxu1 %v7290_v51  ;;  %5871 = vmatprep.mubr.msk.bf16.mxu1 %vm6653_vm0, %v7088_v53 }
 0x9c3   :  { %5875 = vmatprep.subr.bf16.mxu1 %v7088_v53 }
 0x9c9   :  { %5872 = vmatmul.mubr.msk.bf16.vlgmr.msra.gmra.mrb[52].mxu1 %vm301_vm11, %v1182_v52  ;;  %v1418_v52 = vstv %s5185_s1  ;;  %s5258_s1 = sld [smem:[#allocation5 + $0x1]] }
 0x9ca   :  { %5876 = vmatpush3.bf16.msra.mxu1 %v6989_v20  ;;  %5879 = vmatprep.mubr.msk.bf16.mxu1 %vm6653_vm0, %v7088_v53 }
 0x9cb   :  { %5877 = vmatprep.subr.bf16.mxu1 %v7088_v53 }
 0x9ce   :  { %5878 = vmatpush3.bf16.msra.mxu1 %v6995_v25 }
 0x9cf   :  { %5883 = vmatprep.subr.bf16.mxu1 %v7088_v53  ;;  %p2548_p9 = scmp.ne.s32.totalorder %s5258_s1, 0  ;;  %s5289_s1 = sld [smem:[#allocation4 + $0x103]] }
 0xa7c   :  { %v1038_v3 = vpop.f32.mrb[40].mxu1 }
 0xa7d   :  { %v5831_v7 = vpop.f32.mrb[41].mxu1 }
 0xa7e   :  { %v1041_v18 = vpop.f32.mrb[42].mxu1  ;;  %v1421_v7 = vstv %s5186_s5  ;;  %s5218_s5 = sld [smem:[#allocation4 + $0x7]] }
 0xa7f   :  { %v5832_v23 = vpop.f32.mrb[43].mxu1 }
 0xa80   :  { %v1424_v23 = vstv %s5187_s27  ;;  %s5256_s27 = sld [smem:[#allocation4 + $0x87]] }
 0xa8c   :  { %v1084_v27 = vpop.f32.mrb[44].mxu1 }
 0xa8d   :  { %v1085_v31 = vadd.f32 %v1084_v27, %v1038_v3  ;;  %v5839_v54 = vpop.f32.mrb[45].mxu1  ;;  %v1413_v3 = vsel %vm96_vm2, %v1412_v46, %v1410_v17 }
 0xa8e   :  { %v1087_v55 = vpop.f32.mrb[46].mxu1  ;;  %v1416_v18 = vsel %vm100_vm3, %v1415_v48, %v1413_v3  ;;  %v7409_v48 = vld [vmem:[%s8435_s7] ss:$0 sm:$0xff]  ;;  %s5197_s7 = sld [smem:[#allocation3 + $0x280]] }
 0xa8f   :  { %v1090_v56 = vadd.f32 %v7042_v47, %v1085_v31  ;;  %v5840_v57 = vpop.f32.mrb[47].mxu1  ;;  %v1419_v27 = vsel %vm104_vm4, %v1418_v52, %v1416_v18  ;;  %v1427_v31 = vstv %s5188_s14  ;;  %v1430_v55 = vstv %s5189_s11  ;;  %s2549_s14 = scalar_select %p2548_p9, 1, 0 }
 0xa90   :  { %v1422_v54 = vsel %vm108_vm5, %v1421_v7, %v1419_v27  ;;  %s5292_s11 = sld [smem:[#allocation4 + $0x106]] }
 0xa91   :  { %v1091_v1 = vmul.f32 0.5, %v1090_v56 }
 0xa93   :  { %v1092_v58 = vsel %vm6932_vm14, %v1090_v56, %v1091_v1  ;;  %v1425_v56 = vsel %vm112_vm6, %v1424_v23, %v1422_v54 }
 0xa94   :  { %6487 = vtanh.f32 %v1092_v58  ;;  %v1217_v59 = vpop.f32.mrb[48].mxu1  ;;  %v1428_v57 = vsel %vm116_vm7, %v1427_v31, %v1425_v56 }
 0xa95   :  { %v5867_v19 = vpop.f32.mrb[49].mxu1  ;;  %v1431_v1 = vsel %vm120_vm8, %v1430_v55, %v1428_v57 }
 0xa96   :  { %v1220_v60 = vpop.f32.mrb[50].mxu1  ;;  %vm1432_vm12 = vcmp.eq.s32.totalorder %v6851_v22, %v1431_v1 }
 0xa97   :  { %v5868_v61 = vpop.f32.mrb[51].mxu1  ;;  %vm5191_vm13 = vmpackc.low %vm1432_vm12, %vm1432_vm12 }
 0xa98   :  { %5908 = vmatmul.mubr.msk.bf16.vlgmr.msra.gmra.mrb[16].mxu0 %vm5191_vm13, %v6655_v32 }
 0xa99   :  { %5942 = vmatpush3.bf16.msra.mxu0 %v7196_v5  ;;  %5957 = vmatprep.mubr.msk.bf16.mxu0 %vm6653_vm0, %v7088_v53 }
 0xa9a   :  { %5943 = vmatprep.subr.bf16.mxu0 %v7088_v53 }
 0xa9c   :  { %v1260_v62 = vpop.f32.mrb[52].mxu1 }
 0xa9d   :  { %v1261_v63 = vadd.f32 %v1260_v62, %v1217_v59  ;;  %v5873_v4 = vpop.f32.mrb[53].mxu1  ;;  %5944 = vmatpush3.bf16.msra.mxu0 %v7205_v6 }
 0xa9e   :  { %v6488_v21 = vpop.eup %6487  ;;  %v1263_v24 = vpop.f32.mrb[54].mxu1  ;;  %5945 = vmatprep.subr.bf16.mxu0 %v7088_v53 }
 0xa9f   :  { %v1266_v15 = vadd.f32 %v6927_v43, %v1261_v63  ;;  %v5874_v16 = vpop.f32.mrb[55].mxu1  ;;  %v1094_v34 = vmul.f32 0.5, %v6488_v21 }
 0xaa1   :  { %v1267_v35 = vmul.f32 0.5, %v1266_v15  ;;  %v1095_v29 = vadd.f32 0.5, %v1094_v34  ;;  %5946 = vmatpush3.bf16.msra.mxu0 %v7212_v8 }
 0xaa2   :  { %5947 = vmatprep.subr.bf16.mxu0 %v7088_v53 }
 0xaa3   :  { %v1268_v37 = vsel %vm6932_vm14, %v1266_v15, %v1267_v35  ;;  %v7311_v14 = vsel %vm6932_vm14, %v6488_v21, %v1095_v29 }
 0xaa4   :  { %6489 = vtanh.f32 %v1268_v37  ;;  %1099 = vrot.lane.b32.xlu0 %v7311_v14, %s6650_s23  ;;  %v1097_v5 = vmul.f32 %v7311_v14, %v7253_v28 }
 0xaa5   :  { %5948 = vmatpush3.bf16.msra.mxu0 %v7219_v9 }
 0xaa6   :  { %5949 = vmatprep.subr.bf16.mxu0 %v7088_v53 }
 0xaa9   :  { %5950 = vmatpush3.bf16.msra.mxu0 %v7226_v10 }
 0xaaa   :  { %5951 = vmatprep.subr.bf16.mxu0 %v7088_v53 }
 0xaad   :  { %5952 = vmatpush3.bf16.msra.mxu0 %v7233_v11 }
 0xaae   :  { %v6490_v38 = vpop.eup %6489  ;;  %5953 = vmatprep.subr.bf16.mxu0 %v7088_v53 }
 0xaaf   :  { %v1270_v39 = vmul.f32 0.5, %v6490_v38 }
 0xab1   :  { %v1271_v40 = vadd.f32 0.5, %v1270_v39  ;;  %5954 = vmatpush3.bf16.msra.mxu0 %v7240_v12 }
 0xab2   :  { %5955 = vmatprep.subr.bf16.mxu0 %v7088_v53 }
 0xab3   :  { %v7317_v43 = vsel %vm6932_vm14, %v6490_v38, %v1271_v40 }
 0xab4   :  { %1275 = vrot.lane.b32.xlu1 %v7317_v43, %s6650_s23  ;;  %v1273_v10 = vmul.f32 %v7317_v43, %v7259_v36 }
 0xab5   :  { %5956 = vmatpush3.bf16.msra.mxu0 %v7247_v13 }
 0xab6   :  { %5991 = vmatprep.subr.bf16.mxu0 %v7088_v53 }
 0xb16   :  { %v1100_v41 = vpop.permute.xlu0 %1099 }
 0xb17   :  { %v1102_v42 = vmul.f32 %v1100_v41, %v7311_v14 }
 0xb19   :  { %1104 = vrot.lane.b32.xlu0 %v1102_v42, %s6656_s26 }
 0xb26   :  { %v1276_v44 = vpop.permute.xlu1 %1275 }
 0xb27   :  { %v1278_v30 = vmul.f32 %v1276_v44, %v7317_v43 }
 0xb29   :  { %1280 = vrot.lane.b32.xlu1 %v1278_v30, %s6656_s26 }
 0xb6b   :  { %v1470_v61 = vpop.f32.mrb[16].mxu0 }
 0xb6c   :  { %v5909_v62 = vpop.f32.mrb[17].mxu0 }
 0xb6d   :  { %v1473_v63 = vpop.f32.mrb[18].mxu0  ;;  %v1721_v62 = vstv %s5203_s22  ;;  %s5249_s22 = sld [smem:[#allocation4 + $0x80]] }
 0xb6e   :  { %v5910_v4 = vpop.f32.mrb[19].mxu0  ;;  %v1724_v63 = vstv %s5204_s4  ;;  %s5250_s4 = sld [smem:[#allocation4 + $0x81]] }
 0xb8b   :  { %v1105_v6 = vpop.permute.xlu0 %1104 }
 0xb8c   :  { %v7363_v8 = vadd.f32 %v1105_v6, %v1097_v5 }
 0xb8e   :  { %6491 = vtanh.f32 %v7363_v8 }
 0xb98   :  { %v6492_v9 = vpop.eup %6491 }
 0xb99   :  { %1110 = vrot.lane.b32.xlu0 %v6492_v9, %s6650_s23  ;;  %v1703_v9 = vstv %s5197_s7  ;;  %s5212_s7 = sld [smem:[#allocation4 + $0x1]] }
 0xb9b   :  { %v1281_v11 = vpop.permute.xlu1 %1280 }
 0xb9c   :  { %v7369_v12 = vadd.f32 %v1281_v11, %v1273_v10  ;;  %v1706_v10 = vstv %s5198_s0  ;;  %v1704_v11 = vsel %vm92_vm1, %v1703_v9, 0  ;;  %s5328_s0 = sld [smem:[#allocation4 + $0x185]] }
 0xb9e   :  { %6493 = vtanh.f32 %v7369_v12 }
 0xba8   :  { %v6494_v13 = vpop.eup %6493 }
 0xba9   :  { %1286 = vrot.lane.b32.xlu1 %v6494_v13, %s6650_s23  ;;  %v1709_v13 = vstv %s5199_s30  ;;  %s5329_s30 = sld [smem:[#allocation4 + $0x186]] }
 0xc0b   :  { %v1111_v28 = vpop.permute.xlu0 %1110 }
 0xc0c   :  { %v1113_v58 = vmul.f32 %v1111_v28, %v7311_v14  ;;  %v1712_v28 = vstv %s5200_s20  ;;  %s5213_s20 = sld [smem:[#allocation4 + $0x2]] }
 0xc0e   :  { %v1291_v59 = vpack.c.bf16 %v1113_v58, %v1113_v58  ;;  %v1707_v58 = vsel %vm96_vm2, %v1706_v10, %v1704_v11 }
 0xc10   :  { %1293 = vrot.lane.b32.xlu0 %v1291_v59, %s6656_s26  ;;  %v1715_v59 = vstv %s5201_s3  ;;  %s5214_s3 = sld [smem:[#allocation4 + $0x3]] }
 0xc1b   :  { %v1287_v19 = vpop.permute.xlu1 %1286 }
 0xc1c   :  { %v1289_v60 = vmul.f32 %v1287_v19, %v7317_v43  ;;  %v1710_v19 = vsel %vm100_vm3, %v1709_v13, %v1707_v58 }
 0xc1e   :  { %v1290_v36 = vpack.c.bf16 %v1289_v60, %v1289_v60  ;;  %v1718_v60 = vstv %s5202_s21  ;;  %s5215_s21 = sld [smem:[#allocation4 + $0x4]] }
 0xc20   :  { %1339 = vrot.lane.b32.xlu1 %v1290_v36, %s6656_s26 }
 0xc82   :  { %v1294_v21 = vpop.permute.xlu0 %1293 }
 0xc83   :  { %5880 = vmatmul.mubr.msk.bf16.vlgmr.msra.gmra.mrb[56].mxu1 %vm251_vm10, %v1294_v21 }
 0xc84   :  { %5884 = vmatpush3.bf16.msra.mxu1 %v7002_v26  ;;  %5887 = vmatprep.mubr.msk.bf16.mxu1 %vm6653_vm0, %v7088_v53  ;;  %v1476_v26 = vpack.c.bf16 %v1470_v61, %v1470_v61  ;;  %v1713_v61 = vsel %vm104_vm4, %v1712_v28, %v1710_v19 }
 0xc85   :  { %5885 = vmatprep.subr.bf16.mxu1 %v7088_v53  ;;  %v1716_v36 = vsel %vm108_vm5, %v1715_v59, %v1713_v61 }
 0xc86   :  { %v1719_v4 = vsel %vm112_vm6, %v1718_v60, %v1716_v36 }
 0xc87   :  { %v1722_v21 = vsel %vm116_vm7, %v1721_v62, %v1719_v4 }
 0xc88   :  { %5886 = vmatpush3.bf16.msra.mxu1 %v7011_v33 }
 0xc89   :  { %5911 = vmatprep.subr.bf16.mxu1 %v7088_v53 }
 0xc92   :  { %v1340_v24 = vpop.permute.xlu1 %1339 }
 0xc93   :  { %5888 = vmatmul.mubr.msk.bf16.vlgmr.msra.gmra.mrb[60].mxu1 %vm251_vm10, %v1340_v24 }
 0xc94   :  { %5912 = vmatpush3.bf16.msra.mxu1 %v7133_v0  ;;  %5915 = vmatprep.mubr.msk.bf16.mxu1 %vm6653_vm0, %v7088_v53 }
 0xc95   :  { %5913 = vmatprep.subr.bf16.mxu1 %v7088_v53 }
 0xc98   :  { %5914 = vmatpush3.bf16.msra.mxu1 %v7282_v50 }
 0xc99   :  { %5919 = vmatprep.subr.bf16.mxu1 %v7088_v53 }
 0xc9b   :  { %5916 = vmatmul.mubr.msk.bf16.vlgmr.msra.gmra.mrb[64].mxu1 %vm251_vm10, %v1340_v24  ;;  %v1725_v24 = vsel %vm120_vm8, %v1724_v63, %v1722_v21 }
 0xc9c   :  { %5920 = vmatpush3.bf16.msra.mxu1 %v7290_v51  ;;  %5921 = vmatprep.mubr.msk.bf16.mxu1 %vm6653_vm0, %v7088_v53  ;;  %vm1726_vm15 = vcmp.eq.s32.totalorder %v6851_v22, %v1725_v24 }
 0xc9d   :  { %5925 = vmatprep.subr.bf16.mxu1 %v7088_v53  ;;  %vm5206_vm9 = vmpackc.low %vm1726_vm15, %vm1726_vm15  ;;  %vm2497_vm15 = vcmp.lt.s32.totalorder %v6851_v22, 12 }
 0xc9e   :  { %5958 = vmatmul.mubr.msk.bf16.vlgmr.msra.gmra.mrb[20].mxu0 %vm5206_vm9, %v6655_v32 }
 0xc9f   :  { %6007 = vmatprep.mubr.msk.bf16.mxu0 %vm6653_vm0, %v7088_v53 }
 0xca3   :  { %5922 = vmatmul.mubr.msk.bf16.vlgmr.msra.gmra.mrb[68].mxu1 %vm301_vm11, %v1476_v26 }
 0xca4   :  { %5926 = vmatpush3.bf16.msra.mxu1 %v6989_v20  ;;  %5929 = vmatprep.mubr.msk.bf16.mxu1 %vm6653_vm0, %v7088_v53 }
 0xca5   :  { %5927 = vmatprep.subr.bf16.mxu1 %v7088_v53 }
 0xca8   :  { %5928 = vmatpush3.bf16.msra.mxu1 %v6995_v25 }
 0xca9   :  { %5933 = vmatprep.subr.bf16.mxu1 %v7088_v53 }
 0xd56   :  { %v1332_v33 = vpop.f32.mrb[56].mxu1 }
 0xd57   :  { %v5881_v15 = vpop.f32.mrb[57].mxu1 }
 0xd58   :  { %v1335_v16 = vpop.f32.mrb[58].mxu1 }
 0xd59   :  { %v5882_v34 = vpop.f32.mrb[59].mxu1 }
 0xd66   :  { %v1378_v35 = vpop.f32.mrb[60].mxu1 }
 0xd67   :  { %v1379_v29 = vadd.f32 %v1378_v35, %v1332_v33  ;;  %v5889_v37 = vpop.f32.mrb[61].mxu1 }
 0xd68   :  { %v1381_v14 = vpop.f32.mrb[62].mxu1 }
 0xd69   :  { %v1384_v38 = vadd.f32 %v7042_v47, %v1379_v29  ;;  %v5890_v20 = vpop.f32.mrb[63].mxu1 }
 0xd6b   :  { %v1385_v39 = vmul.f32 0.5, %v1384_v38 }
 0xd6d   :  { %v1386_v40 = vsel %vm6932_vm14, %v1384_v38, %v1385_v39 }
 0xd6e   :  { %6495 = vtanh.f32 %v1386_v40  ;;  %v1511_v43 = vpop.f32.mrb[64].mxu1 }
 0xd6f   :  { %v5917_v25 = vpop.f32.mrb[65].mxu1 }
 0xd70   :  { %v1514_v41 = vpop.f32.mrb[66].mxu1 }
 0xd71   :  { %v5918_v42 = vpop.f32.mrb[67].mxu1  ;;  %v1764_v40 = vpop.f32.mrb[20].mxu0 }
 0xd76   :  { %v1554_v44 = vpop.f32.mrb[68].mxu1 }
 0xd77   :  { %v1555_v30 = vadd.f32 %v1554_v44, %v1511_v43  ;;  %v5923_v45 = vpop.f32.mrb[69].mxu1  ;;  %v5959_v43 = vpop.f32.mrb[21].mxu0  ;;  %v7458_v44 = vld [vmem:[%s8436_s8] sm:$0xff]  }
 0xd78   :  { %v6496_v46 = vpop.eup %6495  ;;  %v1557_v17 = vpop.f32.mrb[70].mxu1  ;;  %v2007_v43 = vstv %s5214_s3  ;;  %s5330_s3 = sld [smem:[#allocation4 + $0x187]] }
 0xd79   :  { %v1560_v47 = vadd.f32 %v7409_v48, %v1555_v30  ;;  %v5924_v52 = vpop.f32.mrb[71].mxu1  ;;  %v1388_v3 = vmul.f32 0.5, %v6496_v46  ;;  %v1767_v41 = vpop.f32.mrb[22].mxu0  ;;  %v7467_v30 = vld [vmem:[%s8436_s8 + $0x8] sm:$0xff]   ;;  %s5255_s8 = sld [smem:[#allocation4 + $0x86]] }
 0xd7b   :  { %v1561_v7 = vmul.f32 0.5, %v1560_v47  ;;  %v1389_v18 = vadd.f32 0.5, %v1388_v3 }
 0xd7d   :  { %v1562_v23 = vsel %vm6932_vm14, %v1560_v47, %v1561_v7  ;;  %v1390_v27 = vsel %vm6932_vm14, %v6496_v46, %v1389_v18  ;;  %v1770_v46 = vpack.c.bf16 %v1764_v40, %v1764_v40 }
 0xd7e   :  { %6497 = vtanh.f32 %v1562_v23  ;;  %1393 = vrot.lane.b32.xlu0 %v1390_v27, %s6650_s23  ;;  %v1391_v26 = vmul.f32 %v1390_v27, %v7363_v8 }
 0xd88   :  { %v6498_v31 = vpop.eup %6497 }
 0xd89   :  { %v1564_v54 = vmul.f32 0.5, %v6498_v31 }
 0xd8b   :  { %v1565_v55 = vadd.f32 0.5, %v1564_v54 }
 0xd8d   :  { %v1566_v56 = vsel %vm6932_vm14, %v6498_v31, %v1565_v55 }
 0xd8e   :  { %1569 = vrot.lane.b32.xlu1 %v1566_v56, %s6650_s23  ;;  %v1567_v34 = vmul.f32 %v1566_v56, %v7369_v12  ;;  %v5960_v12 = vpop.f32.mrb[23].mxu0 }
 0xd8f   :  { %v2010_v12 = vstv %s5215_s21 }
 0xdf0   :  { %v1394_v57 = vpop.permute.xlu0 %1393 }
 0xdf1   :  { %v1396_v1 = vmul.f32 %v1394_v57, %v1390_v27 }
 0xdf3   :  { %1398 = vrot.lane.b32.xlu0 %v1396_v1, %s6656_s26 }
 0xe00   :  { %v1570_v5 = vpop.permute.xlu1 %1569 }
 0xe01   :  { %v1572_v6 = vmul.f32 %v1570_v5, %v1566_v56 }
 0xe03   :  { %1574 = vrot.lane.b32.xlu1 %v1572_v6, %s6656_s26 }
 0xe65   :  { %v1399_v33 = vpop.permute.xlu0 %1398 }
 0xe66   :  { %v7443_v15 = vadd.f32 %v1399_v33, %v1391_v26 }
 0xe68   :  { %6499 = vtanh.f32 %v7443_v15 }
 0xe72   :  { %v6500_v16 = vpop.eup %6499 }
 0xe73   :  { %1404 = vrot.lane.b32.xlu0 %v6500_v16, %s6650_s23 }
 0xe75   :  { %v1575_v35 = vpop.permute.xlu1 %1574 }
 0xe76   :  { %v7448_v29 = vadd.f32 %v1575_v35, %v1567_v34  ;;  %v6365_v34 = vld [vmem:[%s8464_s28] sm:$0xff]   ;;  %v6366_v35 = vld [vmem:[%s8464_s28 + $0x8] sm:$0xff]  }
 0xe77   :  { %5992 = vmatpush3.bf16.msra.mxu0 %v6365_v34 }
 0xe78   :  { %6501 = vtanh.f32 %v7448_v29  ;;  %5993 = vmatprep.subr.bf16.mxu0 %v7088_v53 }
 0xe7b   :  { %5994 = vmatpush3.bf16.msra.mxu0 %v6366_v35 }
 0xe7c   :  { %5995 = vmatprep.subr.bf16.mxu0 %v7088_v53 }
 0xe82   :  { %v6502_v37 = vpop.eup %6501 }
 0xe83   :  { %1580 = vrot.lane.b32.xlu1 %v6502_v37, %s6650_s23  ;;  %v6367_v37 = vld [vmem:[%s8464_s28 + $0x10] sm:$0xff]  }
 0xe84   :  { %5996 = vmatpush3.bf16.msra.mxu0 %v6367_v37 }
 0xee5   :  { %v1405_v14 = vpop.permute.xlu0 %1404 }
 0xee6   :  { %v1407_v8 = vmul.f32 %v1405_v14, %v1390_v27  ;;  %v7497_v27 = vld [vmem:[%s8438_s10] ss:$0 sm:$0xff]  ;;  %v1998_v14 = vstv %s1997_s29  ;;  %s5293_s10 = sld [smem:[#allocation4 + $0x107]] }
 0xee8   :  { %v1585_v38 = vpack.c.bf16 %v1407_v8, %v1407_v8  ;;  %v1999_v8 = vsel %vm92_vm1, %v1998_v14, 0 }
 0xeea   :  { %1587 = vrot.lane.b32.xlu0 %v1585_v38, %s6656_s26  ;;  %v2001_v38 = vstv %s5212_s7  ;;  %s5327_s7 = sld [smem:[#allocation4 + $0x184]] }
 0xef5   :  { %v1581_v20 = vpop.permute.xlu1 %1580 }
 0xef6   :  { %v1583_v39 = vmul.f32 %v1581_v20, %v1566_v56  ;;  %v2002_v20 = vsel %vm96_vm2, %v2001_v38, %v1999_v8 }
 0xef8   :  { %v1584_v25 = vpack.c.bf16 %v1583_v39, %v1583_v39  ;;  %v2004_v39 = vstv %s5213_s20  ;;  %s5332_s20 = sld [smem:[#allocation5 + $0x3]] }
 0xef9   :  { %v2005_v40 = vsel %vm100_vm3, %v2004_v39, %v2002_v20  ;;  %v7625_v20 = vld [vmem:[%s8441_s13] ss:$0 sm:$0xff] }
 0xefa   :  { %1633 = vrot.lane.b32.xlu1 %v1584_v25, %s6656_s26  ;;  %v6368_v25 = vld [vmem:[%s8464_s28 + $0x18] sm:$0xff]   ;;  %v2008_v41 = vsel %vm104_vm4, %v2007_v43, %v2005_v40 }
 0xefe   :  { %p3590_p11 = scmp.ne.s32.totalorder %s5332_s20, 0  ;;  %s5362_s20 = sld [smem:[#allocation4 + $0x202]] }
 0xf00   :  { %s3591_s21 = scalar_select %p3590_p11, 1, 0 }
 0xf5c   :  { %v1588_v42 = vpop.permute.xlu0 %1587 }
 0xf5d   :  { %5930 = vmatmul.mubr.msk.bf16.vlgmr.msra.gmra.mrb[72].mxu1 %vm251_vm10, %v1588_v42  ;;  %v6369_v42 = vld [vmem:[%s8464_s28 + $0x20] sm:$0xff]  }
 0xf5e   :  { %5934 = vmatpush3.bf16.msra.mxu1 %v7458_v44  ;;  %5937 = vmatprep.mubr.msk.bf16.mxu1 %vm6653_vm0, %v7088_v53 }
 0xf5f   :  { %5935 = vmatprep.subr.bf16.mxu1 %v7088_v53 }
 0xf62   :  { %5936 = vmatpush3.bf16.msra.mxu1 %v7467_v30 }
 0xf63   :  { %5961 = vmatprep.subr.bf16.mxu1 %v7088_v53 }
 0xf6c   :  { %v1634_v45 = vpop.permute.xlu1 %1633 }
 0xf6d   :  { %5938 = vmatmul.mubr.msk.bf16.vlgmr.msra.gmra.mrb[76].mxu1 %vm251_vm10, %v1634_v45 }
 0xf6e   :  { %5962 = vmatpush3.bf16.msra.mxu1 %v7133_v0  ;;  %5965 = vmatprep.mubr.msk.bf16.mxu1 %vm6653_vm0, %v7088_v53  ;;  %v6578_v0 = vld [vmem:[%s8437_s9] sm:$0xff]  }
 0xf6f   :  { %5963 = vmatprep.subr.bf16.mxu1 %v7088_v53 }
 0xf72   :  { %5964 = vmatpush3.bf16.msra.mxu1 %v7282_v50  ;;  %v6579_v50 = vld [vmem:[%s8437_s9 + $0x8] sm:$0xff]   ;;  %s5295_s9 = sld [smem:[#allocation5 + $0x2]] }
 0xf73   :  { %5969 = vmatprep.subr.bf16.mxu1 %v7088_v53 }
 0xf75   :  { %5966 = vmatmul.mubr.msk.bf16.vlgmr.msra.gmra.mrb[80].mxu1 %vm251_vm10, %v1634_v45  ;;  %v2011_v45 = vsel %vm108_vm5, %v2010_v12, %v2008_v41 }
 0xf76   :  { %5970 = vmatpush3.bf16.msra.mxu1 %v7290_v51  ;;  %5971 = vmatprep.mubr.msk.bf16.mxu1 %vm6653_vm0, %v7088_v53 }
 0xf77   :  { %5975 = vmatprep.subr.bf16.mxu1 %v7088_v53 }
 0xf78   :  { %p3069_p10 = scmp.ne.s32.totalorder %s5295_s9, 0  ;;  %s5324_s9 = sld [smem:[#allocation4 + $0x181]] }
 0xf7a   :  { %s3070_s29 = scalar_select %p3069_p10, 1, 0 }
 0xf7d   :  { %5972 = vmatmul.mubr.msk.bf16.vlgmr.msra.gmra.mrb[84].mxu1 %vm301_vm11, %v1770_v46  ;;  %v2013_v46 = vstv %s5216_s24  ;;  %s5251_s24 = sld [smem:[#allocation4 + $0x82]] }
 0xf7e   :  { %5976 = vmatpush3.bf16.msra.mxu1 %v6578_v0  ;;  %5979 = vmatprep.mubr.msk.bf16.mxu1 %vm6653_vm0, %v7088_v53  ;;  %v6370_v0 = vld [vmem:[%s8464_s28 + $0x28] sm:$0xff]  }
 0xf7f   :  { %5977 = vmatprep.subr.bf16.mxu1 %v7088_v53 }
 0xf82   :  { %5978 = vmatpush3.bf16.msra.mxu1 %v6579_v50  ;;  %v2014_v50 = vsel %vm112_vm6, %v2013_v46, %v2011_v45 }
 0xf83   :  { %5983 = vmatprep.subr.bf16.mxu1 %v7088_v53  ;;  %v7544_v53 = vld [vmem:[%s8447_s19] sm:$0xff] }
 0xf84   :  { %5997 = vmatprep.subr.bf16.mxu0 %v7544_v53 }
 0xf85   :  { %5998 = vmatpush3.bf16.msra.mxu0 %v6368_v25 }
 0xf86   :  { %5999 = vmatprep.subr.bf16.mxu0 %v7544_v53 }
 0xf89   :  { %6000 = vmatpush3.bf16.msra.mxu0 %v6369_v42 }
 0xf8a   :  { %6001 = vmatprep.subr.bf16.mxu0 %v7544_v53 }
 0xf8d   :  { %6002 = vmatpush3.bf16.msra.mxu0 %v6370_v0 }
 0xf8e   :  { %6003 = vmatprep.subr.bf16.mxu0 %v7544_v53 }
0x1030   :  { %v1626_v51 = vpop.f32.mrb[72].mxu1 }
0x1031   :  { %v5931_v17 = vpop.f32.mrb[73].mxu1 }
0x1032   :  { %v1629_v47 = vpop.f32.mrb[74].mxu1 }
0x1033   :  { %v5932_v52 = vpop.f32.mrb[75].mxu1  ;;  %v2019_v47 = vstv %s5218_s5  ;;  %s8465_s5 = sld [smem:[#allocation14_spill]] }
0x1034   :  { %v6371_v52 = vld [vmem:[%s8464_s28 + $0x30] sm:$0xff]  }
0x1035   :  { %6004 = vmatpush3.bf16.msra.mxu0 %v6371_v52 }
0x1036   :  { %6005 = vmatprep.subr.bf16.mxu0 %v7544_v53 }
0x1040   :  { %v1672_v3 = vpop.f32.mrb[76].mxu1 }
0x1041   :  { %v1673_v7 = vadd.f32 %v1672_v3, %v1626_v51  ;;  %v5939_v18 = vpop.f32.mrb[77].mxu1  ;;  %v2016_v51 = vstv %s5217_s25  ;;  %s5254_s25 = sld [smem:[#allocation4 + $0x85]] }
0x1042   :  { %v1675_v23 = vpop.f32.mrb[78].mxu1  ;;  %v2017_v17 = vsel %vm116_vm7, %v2016_v51, %v2014_v50 }
0x1043   :  { %v1678_v31 = vadd.f32 %v7497_v27, %v1673_v7  ;;  %v5940_v54 = vpop.f32.mrb[79].mxu1  ;;  %v2020_v3 = vsel %vm120_vm8, %v2019_v47, %v2017_v17  ;;  %v6372_v7 = vld [vmem:[%s8464_s28 + $0x38] sm:$0xff]  }
0x1044   :  { %vm2021_vm12 = vcmp.eq.s32.totalorder %v6851_v22, %v2020_v3  ;;  %6006 = vmatpush3.bf16.msra.mxu0 %v6372_v7 }
0x1045   :  { %v1679_v55 = vmul.f32 0.5, %v1678_v31  ;;  %vm5228_vm13 = vmpackc.low %vm2021_vm12, %vm2021_vm12  ;;  %6041 = vmatprep.subr.bf16.mxu0 %v7544_v53 }
0x1047   :  { %v1680_v56 = vsel %vm6932_vm14, %v1678_v31, %v1679_v55  ;;  %6008 = vmatmul.mubr.msk.bf16.vlgmr.msra.gmra.mrb[24].mxu0 %vm5228_vm13, %v6655_v32 }
0x1048   :  { %6503 = vtanh.f32 %v1680_v56  ;;  %v1805_v57 = vpop.f32.mrb[80].mxu1  ;;  %6045 = vmatprep.mubr.msk.bf16.mxu0 %vm6653_vm0, %v7544_v53 }
0x1049   :  { %v5967_v1 = vpop.f32.mrb[81].mxu1 }
0x104a   :  { %v1808_v5 = vpop.f32.mrb[82].mxu1 }
0x104b   :  { %v5968_v6 = vpop.f32.mrb[83].mxu1 }
0x1050   :  { %v1848_v9 = vpop.f32.mrb[84].mxu1 }
0x1051   :  { %v1849_v10 = vadd.f32 %v1848_v9, %v1805_v57  ;;  %v5973_v11 = vpop.f32.mrb[85].mxu1 }
0x1052   :  { %v6504_v13 = vpop.eup %6503  ;;  %v1851_v28 = vpop.f32.mrb[86].mxu1 }
0x1053   :  { %v1854_v58 = vadd.f32 %v7409_v48, %v1849_v10  ;;  %v5974_v59 = vpop.f32.mrb[87].mxu1  ;;  %v1682_v19 = vmul.f32 0.5, %v6504_v13 }
0x1054   :  { %v6373_v59 = vld [vmem:[%s8440_s12] sm:$0xff]  }
0x1055   :  { %v1855_v60 = vmul.f32 0.5, %v1854_v58  ;;  %v1683_v61 = vadd.f32 0.5, %v1682_v19 }
0x1057   :  { %v1856_v62 = vsel %vm6932_vm14, %v1854_v58, %v1855_v60  ;;  %v7507_v36 = vsel %vm6932_vm14, %v6504_v13, %v1683_v61 }
0x1058   :  { %6505 = vtanh.f32 %v1856_v62  ;;  %1687 = vrot.lane.b32.xlu0 %v7507_v36, %s6650_s23  ;;  %v1685_v18 = vmul.f32 %v7507_v36, %v7443_v15 }
0x1062   :  { %v6506_v63 = vpop.eup %6505 }
0x1063   :  { %v1858_v4 = vmul.f32 0.5, %v6506_v63 }
0x1065   :  { %v1859_v21 = vadd.f32 0.5, %v1858_v4 }
0x1067   :  { %v7513_v48 = vsel %vm6932_vm14, %v6506_v63, %v1859_v21 }
0x1068   :  { %1863 = vrot.lane.b32.xlu1 %v7513_v48, %s6650_s23  ;;  %v1861_v55 = vmul.f32 %v7513_v48, %v7448_v29 }
0x10ca   :  { %v1688_v24 = vpop.permute.xlu0 %1687 }
0x10cb   :  { %v1690_v26 = vmul.f32 %v1688_v24, %v7507_v36 }
0x10cd   :  { %1692 = vrot.lane.b32.xlu0 %v1690_v26, %s6656_s26 }
0x10da   :  { %v1864_v33 = vpop.permute.xlu1 %1863 }
0x10db   :  { %v1866_v16 = vmul.f32 %v1864_v33, %v7513_v48 }
0x10dd   :  { %1868 = vrot.lane.b32.xlu1 %v1866_v16, %s6656_s26 }
0x111a   :  { %v2123_v10 = vpop.f32.mrb[24].mxu0 }
0x111b   :  { %v6009_v29 = vpop.f32.mrb[25].mxu0  ;;  %v2129_v60 = vpack.c.bf16 %v2123_v10, %v2123_v10 }
0x111c   :  { %v2126_v13 = vpop.f32.mrb[26].mxu0 }
0x111d   :  { %v6010_v28 = vpop.f32.mrb[27].mxu0 }
0x111e   :  { %v6378_v28 = vld [vmem:[%s8465_s5] sm:$0xff]  }
0x113f   :  { %v1693_v23 = vpop.permute.xlu0 %1692 }
0x1140   :  { %v7580_v31 = vadd.f32 %v1693_v23, %v1685_v18 }
0x1142   :  { %6507 = vtanh.f32 %v7580_v31 }
0x114c   :  { %v6508_v54 = vpop.eup %6507 }
0x114d   :  { %1698 = vrot.lane.b32.xlu0 %v6508_v54, %s6650_s23 }
0x114f   :  { %v1869_v56 = vpop.permute.xlu1 %1868 }
0x1150   :  { %v7586_v57 = vadd.f32 %v1869_v56, %v1861_v55 }
0x1152   :  { %6509 = vtanh.f32 %v7586_v57 }
0x115c   :  { %v6510_v32 = vpop.eup %6509 }
0x115d   :  { %1874 = vrot.lane.b32.xlu1 %v6510_v32, %s6650_s23 }
0x11bf   :  { %v1699_v15 = vpop.permute.xlu0 %1698 }
0x11c0   :  { %v1701_v1 = vmul.f32 %v1699_v15, %v7507_v36 }
0x11c2   :  { %v1879_v5 = vpack.c.bf16 %v1701_v1, %v1701_v1 }
0x11c4   :  { %1881 = vrot.lane.b32.xlu0 %v1879_v5, %s6656_s26  ;;  %v6376_v5 = vld [vmem:[%s8443_s15] sm:$0xff]  }
0x11cf   :  { %v1875_v6 = vpop.permute.xlu1 %1874 }
0x11d0   :  { %v1877_v9 = vmul.f32 %v1875_v6, %v7513_v48 }
0x11d2   :  { %v1878_v11 = vpack.c.bf16 %v1877_v9, %v1877_v9 }
0x11d4   :  { %1927 = vrot.lane.b32.xlu1 %v1878_v11, %s6656_s26 }
0x1236   :  { %v1882_v58 = vpop.permute.xlu0 %1881 }
0x1237   :  { %5980 = vmatmul.mubr.msk.bf16.vlgmr.msra.gmra.mrb[88].mxu1 %vm251_vm10, %v1882_v58 }
0x1238   :  { %5984 = vmatpush3.bf16.msra.mxu1 %v7458_v44  ;;  %5987 = vmatprep.mubr.msk.bf16.mxu1 %vm6653_vm0, %v7544_v53  ;;  %v6374_v44 = vld [vmem:[%s8440_s12 + $0x8] sm:$0xff]  }
0x1239   :  { %5985 = vmatprep.subr.bf16.mxu1 %v7544_v53 }
0x123c   :  { %5986 = vmatpush3.bf16.msra.mxu1 %v7467_v30  ;;  %v6375_v30 = vld [vmem:[#allocation6] sm:$0xff]  }
0x123d   :  { %6011 = vmatprep.subr.bf16.mxu1 %v7544_v53 }
0x1246   :  { %v1928_v19 = vpop.permute.xlu1 %1927 }
0x1247   :  { %5988 = vmatmul.mubr.msk.bf16.vlgmr.msra.gmra.mrb[92].mxu1 %vm251_vm10, %v1928_v19 }
0x1248   :  { %6012 = vmatpush3.bf16.msra.mxu1 %v6373_v59  ;;  %6015 = vmatprep.mubr.msk.bf16.mxu1 %vm6653_vm0, %v7544_v53  ;;  %v6379_v59 = vld [vmem:[%s8465_s5 + $0x8] sm:$0xff]  }
0x1249   :  { %6013 = vmatprep.subr.bf16.mxu1 %v7544_v53 }
0x124c   :  { %6014 = vmatpush3.bf16.msra.mxu1 %v6374_v44 }
0x124d   :  { %6019 = vmatprep.subr.bf16.mxu1 %v7544_v53 }
0x124f   :  { %6016 = vmatmul.mubr.msk.bf16.vlgmr.msra.gmra.mrb[96].mxu1 %vm251_vm10, %v1928_v19 }
0x1250   :  { %6020 = vmatpush3.bf16.msra.mxu1 %v6375_v30  ;;  %6021 = vmatprep.mubr.msk.bf16.mxu1 %vm6653_vm0, %v7544_v53 }
0x1251   :  { %6025 = vmatprep.subr.bf16.mxu1 %v7544_v53 }
0x1257   :  { %6022 = vmatmul.mubr.msk.bf16.vlgmr.msra.gmra.mrb[100].mxu1 %vm301_vm11, %v2129_v60 }
0x1258   :  { %6029 = vmatprep.mubr.msk.bf16.mxu1 %vm6653_vm0, %v7544_v53  ;;  %6026 = vmatpush3.bf16.msra.mxu1 %v6376_v5 }
0x1259   :  { %6027 = vmatprep.subr.bf16.mxu1 %v7544_v53 }
0x130a   :  { %v1920_v61 = vpop.f32.mrb[88].mxu1 }
0x130b   :  { %v5981_v62 = vpop.f32.mrb[89].mxu1 }
0x130c   :  { %v1923_v36 = vpop.f32.mrb[90].mxu1 }
0x130d   :  { %v5982_v63 = vpop.f32.mrb[91].mxu1  ;;  %v7672_v36 = vld [vmem:[%s8444_s16] ss:$0 sm:$0xff] }
0x131a   :  { %v1966_v4 = vpop.f32.mrb[92].mxu1 }
0x131b   :  { %v1967_v21 = vadd.f32 %v1966_v4, %v1920_v61  ;;  %v5989_v48 = vpop.f32.mrb[93].mxu1 }
0x131c   :  { %v1969_v24 = vpop.f32.mrb[94].mxu1 }
0x131d   :  { %v1972_v26 = vadd.f32 %v7497_v27, %v1967_v21  ;;  %v5990_v33 = vpop.f32.mrb[95].mxu1 }
0x131f   :  { %v1973_v16 = vmul.f32 0.5, %v1972_v26 }
0x1321   :  { %v1974_v34 = vsel %vm6932_vm14, %v1972_v26, %v1973_v16 }
0x1322   :  { %6511 = vtanh.f32 %v1974_v34  ;;  %v2182_v35 = vpop.f32.mrb[96].mxu1 }
0x1323   :  { %v6017_v37 = vpop.f32.mrb[97].mxu1 }
0x1324   :  { %v2185_v14 = vpop.f32.mrb[98].mxu1 }
0x1325   :  { %v6018_v8 = vpop.f32.mrb[99].mxu1 }
0x132a   :  { %v2231_v38 = vpop.f32.mrb[100].mxu1 }
0x132b   :  { %v2232_v39 = vadd.f32 %v2231_v38, %v2182_v35  ;;  %v6023_v40 = vpop.f32.mrb[101].mxu1 }
0x132c   :  { %v6512_v43 = vpop.eup %6511  ;;  %v2234_v27 = vpop.f32.mrb[102].mxu1 }
0x132d   :  { %v2244_v25 = vadd.f32 %v7625_v20, %v2232_v39  ;;  %v6024_v41 = vpop.f32.mrb[103].mxu1  ;;  %v1976_v12 = vmul.f32 0.5, %v6512_v43  ;;  %v6381_v27 = vld [vmem:[%s8445_s17 + $0x8] sm:$0xff]  }
0x132f   :  { %v2245_v42 = vmul.f32 0.5, %v2244_v25  ;;  %v1977_v45 = vadd.f32 0.5, %v1976_v12 }
0x1331   :  { %v2246_v46 = vsel %vm6932_vm14, %v2244_v25, %v2245_v42  ;;  %v1978_v0 = vsel %vm6932_vm14, %v6512_v43, %v1977_v45  ;;  %v6380_v43 = vld [vmem:[%s8445_s17] sm:$0xff]  }
0x1332   :  { %6513 = vtanh.f32 %v2246_v46  ;;  %1981 = vrot.lane.b32.xlu0 %v1978_v0, %s6650_s23  ;;  %v1979_v23 = vmul.f32 %v1978_v0, %v7580_v31  ;;  %v6377_v31 = vld [vmem:[%s8443_s15 + $0x8] sm:$0xff]   ;;  %6042 = vmatpush3.bf16.msra.mxu0 %v6380_v43  ;;  %v6382_v45 = vld [vmem:[%s8440_s12] sm:$0xff]  }
0x1333   :  { %6028 = vmatpush3.bf16.msra.mxu1 %v6377_v31  ;;  %6043 = vmatprep.subr.bf16.mxu0 %v7544_v53  ;;  %v6384_v31 = vld [vmem:[%s8464_s28] sm:$0xff]  }
0x1334   :  { %6033 = vmatprep.subr.bf16.mxu1 %v7544_v53 }
0x1336   :  { %6044 = vmatpush3.bf16.msra.mxu0 %v6381_v27  ;;  %v2550_v27 = vstv %s2549_s14  ;;  %s5291_s14 = sld [smem:[#allocation4 + $0x105]] }
0x1337   :  { %6069 = vmatprep.subr.bf16.mxu0 %v7544_v53 }
0x133c   :  { %v6514_v50 = vpop.eup %6513 }
0x133d   :  { %v2248_v51 = vmul.f32 0.5, %v6514_v50 }
0x133f   :  { %v2249_v17 = vadd.f32 0.5, %v2248_v51 }
0x1341   :  { %v2250_v47 = vsel %vm6932_vm14, %v6514_v50, %v2249_v17  ;;  %v7714_v50 = vld [vmem:[%s8446_s18] ss:$0 sm:$0xff] }
0x1342   :  { %2253 = vrot.lane.b32.xlu1 %v2250_v47, %s6650_s23  ;;  %v2251_v32 = vmul.f32 %v2250_v47, %v7586_v57 }
0x13a4   :  { %v1982_v52 = vpop.permute.xlu0 %1981 }
0x13a5   :  { %v1984_v3 = vmul.f32 %v1982_v52, %v1978_v0 }
0x13a7   :  { %1986 = vrot.lane.b32.xlu0 %v1984_v3, %s6656_s26 }
0x13b4   :  { %v2254_v7 = vpop.permute.xlu1 %2253 }
0x13b5   :  { %v2256_v18 = vmul.f32 %v2254_v7, %v2250_v47 }
0x13b7   :  { %2258 = vrot.lane.b32.xlu1 %v2256_v18, %s6656_s26 }
0x1419   :  { %v1987_v54 = vpop.permute.xlu0 %1986 }
0x141a   :  { %v1989_v55 = vadd.f32 %v1987_v54, %v1979_v23 }
0x141c   :  { %6515 = vtanh.f32 %v1989_v55 }
0x1426   :  { %v6516_v56 = vpop.eup %6515 }
0x1427   :  { %1992 = vrot.lane.b32.xlu0 %v6516_v56, %s6650_s23 }
0x1429   :  { %v2259_v15 = vpop.permute.xlu1 %2258 }
0x142a   :  { %v7641_v1 = vadd.f32 %v2259_v15, %v2251_v32 }
0x142c   :  { %6517 = vtanh.f32 %v7641_v1 }
0x1436   :  { %v6518_v57 = vpop.eup %6517 }
0x1437   :  { %2264 = vrot.lane.b32.xlu1 %v6518_v57, %s6650_s23  ;;  %v6385_v57 = vld [vmem:[%s8464_s28 + $0x8] sm:$0xff]  }
0x1499   :  { %v1993_v6 = vpop.permute.xlu0 %1992 }
0x149a   :  { %v1995_v9 = vmul.f32 %v1993_v6, %v1978_v0  ;;  %v6383_v0 = vld [vmem:[%s8440_s12 + $0x8] sm:$0xff]   ;;  %v6386_v6 = vld [vmem:[%s8464_s28 + $0x10] sm:$0xff]  }
0x149c   :  { %v2273_v10 = vpack.c.bf16 %v1995_v9, %v1995_v9  ;;  %v6387_v9 = vld [vmem:[%s8464_s28 + $0x18] sm:$0xff]  }
0x149e   :  { %2279 = vrot.lane.b32.xlu0 %v2273_v10, %s6656_s26  ;;  %v6388_v10 = vld [vmem:[%s8464_s28 + $0x20] sm:$0xff]  }
0x14a9   :  { %v2265_v11 = vpop.permute.xlu1 %2264 }
0x14aa   :  { %v2267_v29 = vmul.f32 %v2265_v11, %v2250_v47  ;;  %v6389_v11 = vld [vmem:[%s8464_s28 + $0x28] sm:$0xff]  }
0x14ac   :  { %v2268_v13 = vpack.c.bf16 %v2267_v29, %v2267_v29 }
0x14ae   :  { %2337 = vrot.lane.b32.xlu1 %v2268_v13, %s6656_s26 }
0x1510   :  { %v2280_v58 = vpop.permute.xlu0 %2279 }
0x1511   :  { %6030 = vmatmul.mubr.msk.bf16.vlgmr.msra.gmra.mrb[104].mxu1 %vm251_vm10, %v2280_v58 }
0x1512   :  { %6034 = vmatpush3.bf16.msra.mxu1 %v6378_v28  ;;  %6037 = vmatprep.mubr.msk.bf16.mxu1 %vm6653_vm0, %v7544_v53 }
0x1513   :  { %6035 = vmatprep.subr.bf16.mxu1 %v7544_v53 }
0x1516   :  { %6036 = vmatpush3.bf16.msra.mxu1 %v6379_v59  ;;  %v6390_v59 = vld [vmem:[%s8464_s28 + $0x30] sm:$0xff]  }
0x1517   :  { %6049 = vmatprep.subr.bf16.mxu1 %v7544_v53 }
0x1520   :  { %v2338_v19 = vpop.permute.xlu1 %2337 }
0x1521   :  { %6038 = vmatmul.mubr.msk.bf16.vlgmr.msra.gmra.mrb[108].mxu1 %vm251_vm10, %v2338_v19 }
0x1522   :  { %6065 = vmatprep.mubr.msk.bf16.mxu1 %vm6653_vm0, %v7544_v53  ;;  %6050 = vmatpush3.bf16.msra.mxu1 %v6384_v31 }
0x1523   :  { %6051 = vmatprep.subr.bf16.mxu1 %v7544_v53 }
0x1526   :  { %6052 = vmatpush3.bf16.msra.mxu1 %v6385_v57 }
0x1527   :  { %6053 = vmatprep.subr.bf16.mxu1 %v7544_v53 }
0x152a   :  { %6054 = vmatpush3.bf16.msra.mxu1 %v6386_v6 }
0x152b   :  { %6055 = vmatprep.subr.bf16.mxu1 %v7544_v53 }
0x152e   :  { %6056 = vmatpush3.bf16.msra.mxu1 %v6387_v9 }
0x152f   :  { %6057 = vmatprep.subr.bf16.mxu1 %v7544_v53 }
0x1532   :  { %6058 = vmatpush3.bf16.msra.mxu1 %v6388_v10 }
0x1533   :  { %6059 = vmatprep.subr.bf16.mxu1 %v7544_v53 }
0x1536   :  { %6060 = vmatpush3.bf16.msra.mxu1 %v6389_v11 }
0x1537   :  { %6061 = vmatprep.subr.bf16.mxu1 %v7544_v53 }
0x153a   :  { %6062 = vmatpush3.bf16.msra.mxu1 %v6390_v59 }
0x153b   :  { %6063 = vmatprep.subr.bf16.mxu1 %v7544_v53 }
0x15e4   :  { %v2330_v44 = vpop.f32.mrb[104].mxu1 }
0x15e5   :  { %v6031_v30 = vpop.f32.mrb[105].mxu1 }
0x15e6   :  { %v2333_v60 = vpop.f32.mrb[106].mxu1  ;;  %v2521_v30 = vstv %s5249_s22  ;;  %s5365_s22 = sld [smem:[#allocation4 + $0x205]] }
0x15e7   :  { %v6032_v61 = vpop.f32.mrb[107].mxu1  ;;  %v2522_v60 = vsel %vm92_vm1, %v2521_v30, 0  ;;  %v6396_v30 = vld [vmem:[%s8465_s5 + $0x8] sm:$0xff]  }
0x15e8   :  { %v2524_v61 = vstv %s5250_s4  ;;  %s5366_s4 = sld [smem:[#allocation4 + $0x206]] }
0x15f4   :  { %v2388_v62 = vpop.f32.mrb[108].mxu1 }
0x15f5   :  { %v2389_v63 = vadd.f32 %v2388_v62, %v2330_v44  ;;  %v6039_v4 = vpop.f32.mrb[109].mxu1  ;;  %v6392_v44 = vld [vmem:[#allocation6] sm:$0xff]   ;;  %v2525_v62 = vsel %vm96_vm2, %v2524_v61, %v2522_v60 }
0x15f6   :  { %v2391_v21 = vpop.f32.mrb[110].mxu1 }
0x15f7   :  { %v2401_v48 = vadd.f32 %v7672_v36, %v2389_v63  ;;  %v6040_v24 = vpop.f32.mrb[111].mxu1  ;;  %v2527_v63 = vstv %s5251_s24  ;;  %v2530_v21 = vstv %s5252_s6  ;;  %s5367_s24 = sld [smem:[#allocation4 + $0x207]] }
0x15f8   :  { %v2528_v4 = vsel %vm100_vm3, %v2527_v63, %v2525_v62  ;;  %v2533_v24 = vstv %s5253_s2  ;;  %s5286_s2 = sld [smem:[#allocation4 + $0x100]] }
0x15f9   :  { %v2402_v26 = vmul.f32 0.5, %v2401_v48 }
0x15fb   :  { %v2403_v33 = vsel %vm6932_vm14, %v2401_v48, %v2402_v26  ;;  %v2531_v48 = vsel %vm104_vm4, %v2530_v21, %v2528_v4 }
0x15fc   :  { %6519 = vtanh.f32 %v2403_v33  ;;  %v2534_v26 = vsel %vm108_vm5, %v2533_v24, %v2531_v48  ;;  %v2536_v33 = vstv %s5254_s25  ;;  %s5287_s25 = sld [smem:[#allocation4 + $0x101]] }
0x1606   :  { %v6520_v16 = vpop.eup %6519 }
0x1607   :  { %v2405_v34 = vmul.f32 0.5, %v6520_v16 }
0x1609   :  { %v2406_v35 = vadd.f32 0.5, %v2405_v34  ;;  %v2539_v34 = vstv %s5255_s8  ;;  %s5288_s8 = sld [smem:[#allocation4 + $0x102]] }
0x160b   :  { %v2407_v37 = vsel %vm6932_vm14, %v6520_v16, %v2406_v35  ;;  %v2537_v16 = vsel %vm112_vm6, %v2536_v33, %v2534_v26 }
0x160c   :  { %2410 = vrot.lane.b32.xlu0 %v2407_v37, %s6650_s23  ;;  %v2408_v38 = vmul.f32 %v2407_v37, %v1989_v55  ;;  %v2540_v35 = vsel %vm116_vm7, %v2539_v34, %v2537_v16 }
0x167e   :  { %v2411_v14 = vpop.permute.xlu0 %2410 }
0x167f   :  { %v2413_v8 = vmul.f32 %v2411_v14, %v2407_v37 }
0x1681   :  { %2415 = vrot.lane.b32.xlu1 %v2413_v8, %s6656_s26 }
0x16f3   :  { %v2416_v39 = vpop.permute.xlu1 %2415 }
0x16f4   :  { %v7681_v40 = vadd.f32 %v2416_v39, %v2408_v38 }
0x16f6   :  { %6521 = vtanh.f32 %v7681_v40 }
0x1700   :  { %v6522_v25 = vpop.eup %6521 }
0x1701   :  { %2421 = vrot.lane.b32.xlu0 %v6522_v25, %s6650_s23 }
0x1773   :  { %v2422_v41 = vpop.permute.xlu0 %2421 }
0x1774   :  { %v2424_v12 = vmul.f32 %v2422_v41, %v2407_v37  ;;  %v2542_v37 = vstv %s5256_s27  ;;  %s5290_s27 = sld [smem:[#allocation4 + $0x104]] }
0x1775   :  { %v2543_v8 = vsel %vm120_vm8, %v2542_v37, %v2540_v35 }
0x1776   :  { %v2425_v42 = vpack.c.bf16 %v2424_v12, %v2424_v12  ;;  %vm2544_vm13 = vcmp.eq.s32.totalorder %v6851_v22, %v2543_v8 }
0x1777   :  { %v5257_v41 = vsel %vm2544_vm13, 1.0, %v7544_v53 }
0x1778   :  { %2438 = vrot.lane.b32.xlu1 %v2425_v42, %s6656_s26 }
0x17ea   :  { %v7697_v46 = vpop.permute.xlu1 %2438 }
0x17eb   :  { %6046 = vmatmul.mubr.msk.bf16.vlgmr.msra.gmra.mrb[28].mxu0 %vm251_vm10, %v7697_v46 }
0x17ec   :  { %6070 = vmatpush3.bf16.msra.mxu0 %v6382_v45  ;;  %6073 = vmatprep.mubr.msk.bf16.mxu0 %vm6653_vm0, %v7544_v53 }
0x17ed   :  { %6071 = vmatprep.subr.bf16.mxu0 %v7544_v53 }
0x17f0   :  { %6072 = vmatpush3.bf16.msra.mxu0 %v6383_v0 }
0x17f1   :  { %6077 = vmatprep.subr.bf16.mxu0 %v7544_v53 }
0x17f3   :  { %6074 = vmatmul.mubr.msk.bf16.vlgmr.msra.gmra.mrb[32].mxu0 %vm251_vm10, %v2338_v19  ;;  %v6391_v19 = vld [vmem:[%s8464_s28 + $0x38] sm:$0xff]  }
0x17f4   :  { %6079 = vmatprep.mubr.msk.bf16.mxu0 %vm6653_vm0, %v7544_v53  ;;  %6064 = vmatpush3.bf16.msra.mxu1 %v6391_v19 }
0x17f5   :  { %6099 = vmatprep.subr.bf16.mxu1 %v7544_v53  ;;  %6078 = vmatpush3.bf16.msra.mxu0 %v6392_v44  ;;  %v6395_v44 = vld [vmem:[%s8465_s5] sm:$0xff]  }
0x17f6   :  { %6083 = vmatprep.subr.bf16.mxu0 %v7544_v53 }
0x18be   :  { %v2489_v51 = vpop.f32.mrb[28].mxu0 }
0x18bf   :  { %v2490_v17 = vadd.f32 %v7714_v50, %v2489_v51  ;;  %v6047_v47 = vpop.f32.mrb[29].mxu0  ;;  %v6393_v51 = vld [vmem:[%s8443_s15] sm:$0xff]  }
0x18c0   :  { %v2492_v52 = vpop.f32.mrb[30].mxu0 }
0x18c1   :  { %5247 = vst [vmem:[%s8447_s19 + $0x8] sm:$0xff] %v2490_v17  ;;  %v6048_v3 = vpop.f32.mrb[31].mxu0  ;;  %v2498_v7 = vsel %vm2497_vm15, %v2490_v17, -1e+30 }
0x18c2   :  { %2499 = vmax.xlane.f32.xlu0 %v2498_v7 }
0x18c6   :  { %v7723_v18 = vpop.f32.mrb[32].mxu0 }
0x18c7   :  { %v6075_v23 = vpop.f32.mrb[33].mxu0 }
0x18c8   :  { %v2714_v54 = vpop.f32.mrb[34].mxu0 }
0x18c9   :  { %v6076_v55 = vpop.f32.mrb[35].mxu0 }
0x194f   :  { %v2500_v56 = vpop.xlane.xlu0 %2499 }
0x1950   :  { %vm2501_vm9 = vcmp.ge.f32.partialorder %v2498_v7, %v2500_v56  ;;  %v6394_v7 = vld [vmem:[%s8443_s15 + $0x8] sm:$0xff]  }
0x1951   :  { %v2502_v32 = vsel %vm2501_vm9, %v6851_v22, 128  ;;  %vm2551_vm9 = vcmp.eq.s32.totalorder %v2550_v27, 1 }
0x1952   :  { %v2504_v15 = vshra.s32 %v2502_v32, 16  ;;  %v2503_v29 = vand.u32 65535, %v2502_v32 }
0x1954   :  { %v2506_v5 = vcvt.s32.f32 %v2504_v15  ;;  %v2505_v28 = vcvt.s32.f32 %v2503_v29 }
0x1956   :  { %2507 = vmin.xlane.f32.xlu1 %v2506_v5 }
0x19e3   :  { %v2508_v13 = vpop.xlane.xlu1 %2507 }
0x19e4   :  { %vm2509_vm12 = vcmp.eq.f32.partialorder %v2506_v5, %v2508_v13  ;;  %v2514_v14 = vcvt.f32.s32 %v2508_v13 }
0x19e5   :  { %v2510_v58 = vsel %vm2509_vm12, %v2505_v28, inf }
0x19e6   :  { %2511 = vmin.xlane.f32.xlu0 %v2510_v58  ;;  %v2515_v39 = vshll.u32 %v2514_v14, 16 }
0x1a73   :  { %v2512_v38 = vpop.xlane.xlu0 %2511 }
0x1a74   :  { %v2513_v43 = vcvt.f32.s32 %v2512_v38 }
0x1a76   :  { %v2516_v25 = vadd.s32 %v2515_v39, %v2513_v43 }
0x1a78   :  { %vm2517_vm12 = vcmp.eq.s32.totalorder %v6851_v22, %v2516_v25 }
0x1a79   :  { %v5248_v12 = vsel %vm2517_vm12, 1.0, %v7544_v53 }
0x1a7a   :  { %v2552_v42 = vsel %vm2551_vm9, %v5257_v41, %v5248_v12  ;;  %v6397_v41 = vld [vmem:[%s8445_s17] sm:$0xff]   ;;  %v6398_v12 = vld [vmem:[%s8445_s17 + $0x8] sm:$0xff]  }
0x1a7b   :  { %v2553_v45 = vpack.c.bf16 %v2552_v42, %v2552_v42 }
0x1a7d   :  { %6066 = vmatmul.mubr.bf16.vlgmr.msra.gmra.mrb[112].mxu1 %v2553_v45 }
0x1a7e   :  { %6103 = vmatprep.mubr.msk.bf16.mxu1 %vm6653_vm0, %v7544_v53  ;;  %6100 = vmatpush3.bf16.msra.mxu1 %v6397_v41 }
0x1a7f   :  { %6101 = vmatprep.subr.bf16.mxu1 %v7544_v53 }
0x1a82   :  { %6102 = vmatpush3.bf16.msra.mxu1 %v6398_v12  ;;  %v3071_v12 = vstv %s3070_s29  ;;  %s5326_s29 = sld [smem:[#allocation4 + $0x183]] }
0x1a83   :  { %6127 = vmatprep.subr.bf16.mxu1 %v7544_v53 }
0x1b50   :  { %v2652_v0 = vpop.f32.mrb[112].mxu1 }
0x1b51   :  { %v2658_v17 = vpack.c.bf16 %v2652_v0, %v2652_v0  ;;  %v6067_v47 = vpop.f32.mrb[113].mxu1 }
0x1b52   :  { %v2655_v52 = vpop.f32.mrb[114].mxu1  ;;  %v6400_v47 = vld [vmem:[%s8440_s12 + $0x8] sm:$0xff]  }
0x1b53   :  { %v6068_v3 = vpop.f32.mrb[115].mxu1  ;;  %6080 = vmatmul.mubr.msk.bf16.vlgmr.msra.gmra.mrb[36].mxu0 %vm301_vm11, %v2658_v17 }
0x1b54   :  { %6084 = vmatpush3.bf16.msra.mxu0 %v6393_v51  ;;  %6087 = vmatprep.mubr.msk.bf16.mxu0 %vm6653_vm0, %v7544_v53  ;;  %v6399_v51 = vld [vmem:[%s8440_s12] sm:$0xff]  }
0x1b55   :  { %6085 = vmatprep.subr.bf16.mxu0 %v7544_v53 }
0x1b58   :  { %6086 = vmatpush3.bf16.msra.mxu0 %v6394_v7 }
0x1b59   :  { %6091 = vmatprep.subr.bf16.mxu0 %v7544_v53 }
0x1b5b   :  { %6088 = vmatmul.mubr.msk.bf16.vlgmr.msra.gmra.mrb[40].mxu0 %vm251_vm10, %v7697_v46 }
0x1b5c   :  { %6095 = vmatprep.mubr.msk.bf16.mxu0 %vm6653_vm0, %v7544_v53  ;;  %6092 = vmatpush3.bf16.msra.mxu0 %v6395_v44 }
0x1b5d   :  { %6093 = vmatprep.subr.bf16.mxu0 %v7544_v53 }
0x1b60   :  { %6094 = vmatpush3.bf16.msra.mxu0 %v6396_v30  ;;  %v6407_v30 = vld [vmem:[%s8464_s28 + $0x30] sm:$0xff]  }
0x1b61   :  { %6107 = vmatprep.subr.bf16.mxu0 %v7544_v53 }
0x1c26   :  { %v2760_v23 = vpop.f32.mrb[36].mxu0 }
0x1c27   :  { %v2761_v54 = vadd.f32 %v2760_v23, %v7723_v18  ;;  %v6081_v55 = vpop.f32.mrb[37].mxu0 }
0x1c28   :  { %v2763_v56 = vpop.f32.mrb[38].mxu0 }
0x1c29   :  { %v2773_v32 = vadd.f32 %v7625_v20, %v2761_v54  ;;  %v6082_v15 = vpop.f32.mrb[39].mxu0 }
0x1c2b   :  { %v2774_v5 = vmul.f32 0.5, %v2773_v32 }
0x1c2d   :  { %v2775_v31 = vsel %vm6932_vm14, %v2773_v32, %v2774_v5 }
0x1c2e   :  { %6523 = vtanh.f32 %v2775_v31  ;;  %v2852_v57 = vpop.f32.mrb[40].mxu0 }
0x1c2f   :  { %v6089_v6 = vpop.f32.mrb[41].mxu0 }
0x1c30   :  { %v2855_v9 = vpop.f32.mrb[42].mxu0 }
0x1c31   :  { %v6090_v46 = vpop.f32.mrb[43].mxu0 }
0x1c32   :  { %v6401_v46 = vld [vmem:[%s8464_s28] sm:$0xff]  }
0x1c38   :  { %v6524_v10 = vpop.eup %6523 }
0x1c39   :  { %v2777_v11 = vmul.f32 0.5, %v6524_v10 }
0x1c3b   :  { %v2778_v29 = vadd.f32 0.5, %v2777_v11  ;;  %v6403_v11 = vld [vmem:[%s8464_s28 + $0x10] sm:$0xff]  }
0x1c3d   :  { %v2779_v18 = vsel %vm6932_vm14, %v6524_v10, %v2778_v29  ;;  %v6402_v10 = vld [vmem:[%s8464_s28 + $0x8] sm:$0xff]   ;;  %v6404_v29 = vld [vmem:[%s8464_s28 + $0x18] sm:$0xff]  }
0x1c3e   :  { %2782 = vrot.lane.b32.xlu0 %v2779_v18, %s6650_s23  ;;  %v2780_v58 = vmul.f32 %v2779_v18, %v7641_v1 }
0x1cb0   :  { %v2783_v13 = vpop.permute.xlu0 %2782 }
0x1cb1   :  { %v2785_v28 = vmul.f32 %v2783_v13, %v2779_v18  ;;  %v6406_v13 = vld [vmem:[%s8464_s28 + $0x28] sm:$0xff]  }
0x1cb3   :  { %2787 = vrot.lane.b32.xlu1 %v2785_v28, %s6656_s26 }
0x1d25   :  { %v2788_v59 = vpop.permute.xlu1 %2787 }
0x1d26   :  { %v7805_v19 = vadd.f32 %v2788_v59, %v2780_v58 }
0x1d28   :  { %6525 = vtanh.f32 %v7805_v19 }
0x1d32   :  { %v6526_v1 = vpop.eup %6525 }
0x1d33   :  { %2793 = vrot.lane.b32.xlu1 %v6526_v1, %s6650_s23  ;;  %v6408_v1 = vld [vmem:[%s8464_s28 + $0x38] sm:$0xff]  }
0x1da5   :  { %v2794_v60 = vpop.permute.xlu1 %2793 }
0x1da6   :  { %v2796_v61 = vmul.f32 %v2794_v60, %v2779_v18  ;;  %v6405_v18 = vld [vmem:[%s8464_s28 + $0x20] sm:$0xff]  }
0x1da7   :  { %v6409_v60 = vld [vmem:[#allocation6] sm:$0xff]  }
0x1da8   :  { %v2797_v62 = vpack.c.bf16 %v2796_v61, %v2796_v61  ;;  %v3042_v61 = vstv %s5286_s2 }
0x1daa   :  { %2859 = vrot.lane.b32.xlu0 %v2797_v62, %s6656_s26  ;;  %v3043_v62 = vsel %vm92_vm1, %v3042_v61, 0 }
0x1e1c   :  { %v2860_v63 = vpop.permute.xlu0 %2859 }
0x1e1d   :  { %6096 = vmatmul.mubr.msk.bf16.vlgmr.msra.gmra.mrb[44].mxu0 %vm251_vm10, %v2860_v63 }
0x1e1e   :  { %6123 = vmatprep.mubr.msk.bf16.mxu0 %vm6653_vm0, %v7544_v53  ;;  %6108 = vmatpush3.bf16.msra.mxu0 %v6401_v46 }
0x1e1f   :  { %6109 = vmatprep.subr.bf16.mxu0 %v7544_v53 }
0x1e22   :  { %6110 = vmatpush3.bf16.msra.mxu0 %v6402_v10 }
0x1e23   :  { %6111 = vmatprep.subr.bf16.mxu0 %v7544_v53 }
0x1e26   :  { %6112 = vmatpush3.bf16.msra.mxu0 %v6403_v11 }
0x1e27   :  { %6113 = vmatprep.subr.bf16.mxu0 %v7544_v53 }
0x1e2a   :  { %6114 = vmatpush3.bf16.msra.mxu0 %v6404_v29 }
0x1e2b   :  { %6115 = vmatprep.subr.bf16.mxu0 %v7544_v53 }
0x1e2e   :  { %6116 = vmatpush3.bf16.msra.mxu0 %v6405_v18 }
0x1e2f   :  { %6117 = vmatprep.subr.bf16.mxu0 %v7544_v53 }
0x1e32   :  { %6118 = vmatpush3.bf16.msra.mxu0 %v6406_v13 }
0x1e33   :  { %6119 = vmatprep.subr.bf16.mxu0 %v7544_v53 }
0x1e36   :  { %6120 = vmatpush3.bf16.msra.mxu0 %v6407_v30  ;;  %v6412_v30 = vld [vmem:[%s8465_s5] sm:$0xff]  }
0x1e37   :  { %6121 = vmatprep.subr.bf16.mxu0 %v7544_v53 }
0x1e3a   :  { %6122 = vmatpush3.bf16.msra.mxu0 %v6408_v1  ;;  %v6413_v1 = vld [vmem:[%s8465_s5 + $0x8] sm:$0xff]  }
0x1e3b   :  { %6157 = vmatprep.subr.bf16.mxu0 %v7544_v53 }
0x1ef0   :  { %v2910_v4 = vpop.f32.mrb[44].mxu0 }
0x1ef1   :  { %v2911_v21 = vadd.f32 %v2910_v4, %v2852_v57  ;;  %v6097_v48 = vpop.f32.mrb[45].mxu0 }
0x1ef2   :  { %v2913_v24 = vpop.f32.mrb[46].mxu0 }
0x1ef3   :  { %v2923_v26 = vadd.f32 %v7672_v36, %v2911_v21  ;;  %v6098_v33 = vpop.f32.mrb[47].mxu0  ;;  %v3048_v21 = vstv %s5288_s8  ;;  %v3051_v24 = vstv %s5289_s1 }
0x1ef4   :  { %v3054_v33 = vstv %s5290_s27 }
0x1ef5   :  { %v2924_v16 = vmul.f32 0.5, %v2923_v26 }
0x1ef7   :  { %v2925_v34 = vsel %vm6932_vm14, %v2923_v26, %v2924_v16 }
0x1ef8   :  { %6527 = vtanh.f32 %v2925_v34  ;;  %v3057_v34 = vstv %s5291_s14 }
0x1f02   :  { %v6528_v35 = vpop.eup %6527 }
0x1f03   :  { %v2927_v37 = vmul.f32 0.5, %v6528_v35 }
0x1f05   :  { %v2928_v14 = vadd.f32 0.5, %v2927_v37  ;;  %v3060_v37 = vstv %s5292_s11  ;;  %s5323_s11 = sld [smem:[#allocation4 + $0x180]] }
0x1f07   :  { %v2929_v8 = vsel %vm6932_vm14, %v6528_v35, %v2928_v14 }
0x1f08   :  { %2932 = vrot.lane.b32.xlu1 %v2929_v8, %s6650_s23  ;;  %v2930_v43 = vmul.f32 %v2929_v8, %v7681_v40 }
0x1f7a   :  { %v2933_v38 = vpop.permute.xlu1 %2932 }
0x1f7b   :  { %v2935_v39 = vmul.f32 %v2933_v38, %v2929_v8 }
0x1f7d   :  { %2937 = vrot.lane.b32.xlu0 %v2935_v39, %s6656_s26 }
0x1fef   :  { %v2938_v27 = vpop.permute.xlu0 %2937 }
0x1ff0   :  { %v7829_v25 = vadd.f32 %v2938_v27, %v2930_v43 }
0x1ff2   :  { %6529 = vtanh.f32 %v7829_v25 }
0x1ffc   :  { %v6530_v40 = vpop.eup %6529 }
0x1ffd   :  { %2943 = vrot.lane.b32.xlu1 %v6530_v40, %s6650_s23 }
0x206f   :  { %v2944_v42 = vpop.permute.xlu1 %2943 }
0x2070   :  { %v2946_v45 = vmul.f32 %v2944_v42, %v2929_v8  ;;  %v3063_v8 = vstv %s5293_s10  ;;  %s5325_s10 = sld [smem:[#allocation4 + $0x182]] }
0x2072   :  { %v2947_v0 = vpack.c.bf16 %v2946_v45, %v2946_v45 }
0x2074   :  { %2960 = vrot.lane.b32.xlu0 %v2947_v0, %s6656_s26 }
0x20e6   :  { %v7845_v17 = vpop.permute.xlu0 %2960 }
0x20e7   :  { %6104 = vmatmul.mubr.msk.bf16.vlgmr.msra.gmra.mrb[116].mxu1 %vm251_vm10, %v7845_v17 }
0x20e8   :  { %6128 = vmatpush3.bf16.msra.mxu1 %v6399_v51  ;;  %6131 = vmatprep.mubr.msk.bf16.mxu1 %vm6653_vm0, %v7544_v53 }
0x20e9   :  { %6129 = vmatprep.subr.bf16.mxu1 %v7544_v53 }
0x20ec   :  { %6130 = vmatpush3.bf16.msra.mxu1 %v6400_v47 }
0x20ed   :  { %6135 = vmatprep.subr.bf16.mxu1 %v7544_v53 }
0x20ef   :  { %6132 = vmatmul.mubr.msk.bf16.vlgmr.msra.gmra.mrb[120].mxu1 %vm251_vm10, %v2860_v63  ;;  %v3045_v63 = vstv %s5287_s25 }
0x20f0   :  { %6137 = vmatprep.mubr.msk.bf16.mxu1 %vm6653_vm0, %v7544_v53  ;;  %6136 = vmatpush3.bf16.msra.mxu1 %v6409_v60  ;;  %v3046_v4 = vsel %vm96_vm2, %v3045_v63, %v3043_v62  ;;  %v7959_v60 = vld [vmem:[%s8447_s19] sm:$0xff] }
0x20f1   :  { %6141 = vmatprep.subr.bf16.mxu1 %v7544_v53  ;;  %v3049_v48 = vsel %vm100_vm3, %v3048_v21, %v3046_v4 }
0x20f2   :  { %v3052_v26 = vsel %vm104_vm4, %v3051_v24, %v3049_v48 }
0x20f3   :  { %v3055_v16 = vsel %vm108_vm5, %v3054_v33, %v3052_v26 }
0x20f4   :  { %v3058_v35 = vsel %vm112_vm6, %v3057_v34, %v3055_v16 }
0x20f5   :  { %v3061_v14 = vsel %vm116_vm7, %v3060_v37, %v3058_v35 }
0x20f6   :  { %v3064_v39 = vsel %vm120_vm8, %v3063_v8, %v3061_v14 }
0x20f7   :  { %vm3065_vm12 = vcmp.eq.s32.totalorder %v6851_v22, %v3064_v39 }
0x20f8   :  { %v5294_v42 = vsel %vm3065_vm12, 1.0, %v7544_v53 }
0x21ba   :  { %v3011_v52 = vpop.f32.mrb[116].mxu1 }
0x21bb   :  { %v3012_v3 = vadd.f32 %v7714_v50, %v3011_v52  ;;  %v6105_v7 = vpop.f32.mrb[117].mxu1  ;;  %v6410_v52 = vld [vmem:[%s8443_s15] sm:$0xff]  }
0x21bc   :  { %v3014_v23 = vpop.f32.mrb[118].mxu1 }
0x21bd   :  { %5284 = vst [vmem:[%s8447_s19 + $0x10] sm:$0xff] %v3012_v3  ;;  %v6106_v54 = vpop.f32.mrb[119].mxu1  ;;  %v3019_v55 = vsel %vm2497_vm15, %v3012_v3, -1e+30 }
0x21be   :  { %3020 = vmax.xlane.f32.xlu1 %v3019_v55 }
0x21c2   :  { %v7865_v56 = vpop.f32.mrb[120].mxu1 }
0x21c3   :  { %v6133_v32 = vpop.f32.mrb[121].mxu1 }
0x21c4   :  { %v3235_v15 = vpop.f32.mrb[122].mxu1 }
0x21c5   :  { %v6134_v5 = vpop.f32.mrb[123].mxu1 }
0x224b   :  { %v3021_v31 = vpop.xlane.xlu1 %3020 }
0x224c   :  { %vm3022_vm13 = vcmp.ge.f32.partialorder %v3019_v55, %v3021_v31  ;;  %v6411_v55 = vld [vmem:[%s8443_s15 + $0x8] sm:$0xff]  }
0x224d   :  { %v3023_v57 = vsel %vm3022_vm13, %v6851_v22, 128  ;;  %vm3072_vm13 = vcmp.eq.s32.totalorder %v3071_v12, 1  ;;  %v6414_v12 = vld [vmem:[%s8445_s17] sm:$0xff]  }
0x224e   :  { %v3025_v6 = vshra.s32 %v3023_v57, 16  ;;  %v3024_v28 = vand.u32 65535, %v3023_v57 }
0x2250   :  { %v3027_v9 = vcvt.s32.f32 %v3025_v6  ;;  %v3026_v59 = vcvt.s32.f32 %v3024_v28 }
0x2252   :  { %3028 = vmin.xlane.f32.xlu0 %v3027_v9 }
0x22df   :  { %v3029_v58 = vpop.xlane.xlu0 %3028 }
0x22e0   :  { %vm3030_vm9 = vcmp.eq.f32.partialorder %v3027_v9, %v3029_v58  ;;  %v3035_v38 = vcvt.f32.s32 %v3029_v58 }
0x22e1   :  { %v3031_v44 = vsel %vm3030_vm9, %v3026_v59, inf }
0x22e2   :  { %3032 = vmin.xlane.f32.xlu0 %v3031_v44  ;;  %v3036_v27 = vshll.u32 %v3035_v38, 16 }
0x236f   :  { %v3033_v43 = vpop.xlane.xlu0 %3032 }
0x2370   :  { %v3034_v41 = vcvt.f32.s32 %v3033_v43 }
0x2372   :  { %v3037_v40 = vadd.s32 %v3036_v27, %v3034_v41 }
0x2374   :  { %vm3038_vm9 = vcmp.eq.s32.totalorder %v6851_v22, %v3037_v40  ;;  %v6415_v40 = vld [vmem:[%s8445_s17 + $0x8] sm:$0xff]  }
0x2375   :  { %v5285_v45 = vsel %vm3038_vm9, 1.0, %v7544_v53 }
0x2376   :  { %v3073_v0 = vsel %vm3072_vm13, %v5294_v42, %v5285_v45 }
0x2377   :  { %v3074_v51 = vpack.c.bf16 %v3073_v0, %v3073_v0 }
0x2379   :  { %6124 = vmatmul.mubr.bf16.vlgmr.msra.gmra.mrb[48].mxu0 %v3074_v51  ;;  %v6416_v51 = vld [vmem:[%s8440_s12] sm:$0xff]  }
0x237a   :  { %6161 = vmatprep.mubr.msk.bf16.mxu0 %vm6653_vm0, %v7544_v53  ;;  %6158 = vmatpush3.bf16.msra.mxu0 %v6414_v12 }
0x237b   :  { %6159 = vmatprep.subr.bf16.mxu0 %v7959_v60 }
0x237e   :  { %6160 = vmatpush3.bf16.msra.mxu0 %v6415_v40 }
0x237f   :  { %6185 = vmatprep.subr.bf16.mxu0 %v7959_v60 }
0x244c   :  { %v3173_v47 = vpop.f32.mrb[48].mxu0 }
0x244d   :  { %v3179_v3 = vpack.c.bf16 %v3173_v47, %v3173_v47  ;;  %v6125_v7 = vpop.f32.mrb[49].mxu0 }
0x244e   :  { %v3176_v23 = vpop.f32.mrb[50].mxu0 }
0x244f   :  { %v6126_v54 = vpop.f32.mrb[51].mxu0  ;;  %6138 = vmatmul.mubr.msk.bf16.vlgmr.msra.gmra.mrb[124].mxu1 %vm301_vm11, %v3179_v3 }
0x2450   :  { %6142 = vmatpush3.bf16.msra.mxu1 %v6410_v52  ;;  %6145 = vmatprep.mubr.msk.bf16.mxu1 %vm6653_vm0, %v7544_v53  ;;  %v6417_v52 = vld [vmem:[%s8440_s12 + $0x8] sm:$0xff]  }
0x2451   :  { %6143 = vmatprep.subr.bf16.mxu1 %v7544_v53 }
0x2454   :  { %6144 = vmatpush3.bf16.msra.mxu1 %v6411_v55 }
0x2455   :  { %6149 = vmatprep.subr.bf16.mxu1 %v7544_v53 }
0x2457   :  { %6146 = vmatmul.mubr.msk.bf16.vlgmr.msra.gmra.mrb[128].mxu1 %vm251_vm10, %v7845_v17 }
0x2458   :  { %6153 = vmatprep.mubr.msk.bf16.mxu1 %vm6653_vm0, %v7544_v53  ;;  %6150 = vmatpush3.bf16.msra.mxu1 %v6412_v30  ;;  %v6426_v30 = vld [vmem:[#allocation6] sm:$0xff]  }
0x2459   :  { %6151 = vmatprep.subr.bf16.mxu1 %v7959_v60 }
0x245c   :  { %6152 = vmatpush3.bf16.msra.mxu1 %v6413_v1  ;;  %v3563_v1 = vstv %s5323_s11 }
0x245d   :  { %6165 = vmatprep.subr.bf16.mxu1 %v7959_v60 }
0x2522   :  { %v3281_v32 = vpop.f32.mrb[124].mxu1 }
0x2523   :  { %v3282_v15 = vadd.f32 %v3281_v32, %v7865_v56  ;;  %v6139_v5 = vpop.f32.mrb[125].mxu1 }
0x2524   :  { %v3284_v31 = vpop.f32.mrb[126].mxu1 }
0x2525   :  { %v3294_v57 = vadd.f32 %v7625_v20, %v3282_v15  ;;  %v6140_v6 = vpop.f32.mrb[127].mxu1 }
0x2527   :  { %v3295_v9 = vmul.f32 0.5, %v3294_v57 }
0x2529   :  { %v3296_v46 = vsel %vm6932_vm14, %v3294_v57, %v3295_v9 }
0x252a   :  { %6531 = vtanh.f32 %v3296_v46  ;;  %v3373_v10 = vpop.f32.mrb[128].mxu1 }
0x252b   :  { %v6147_v11 = vpop.f32.mrb[129].mxu1 }
0x252c   :  { %v3376_v29 = vpop.f32.mrb[130].mxu1  ;;  %v6419_v11 = vld [vmem:[%s8464_s28 + $0x8] sm:$0xff]  }
0x252d   :  { %v6148_v17 = vpop.f32.mrb[131].mxu1  ;;  %v6420_v29 = vld [vmem:[%s8464_s28 + $0x10] sm:$0xff]  }
0x252e   :  { %v6421_v17 = vld [vmem:[%s8464_s28 + $0x18] sm:$0xff]  }
0x2534   :  { %v6532_v18 = vpop.eup %6531 }
0x2535   :  { %v3298_v13 = vmul.f32 0.5, %v6532_v18 }
0x2537   :  { %v3299_v53 = vadd.f32 0.5, %v3298_v13  ;;  %v6423_v13 = vld [vmem:[%s8464_s28 + $0x28] sm:$0xff]  }
0x2539   :  { %v3300_v56 = vsel %vm6932_vm14, %v6532_v18, %v3299_v53  ;;  %v6422_v18 = vld [vmem:[%s8464_s28 + $0x20] sm:$0xff]  }
0x253a   :  { %3303 = vrot.lane.b32.xlu1 %v3300_v56, %s6650_s23  ;;  %v3301_v58 = vmul.f32 %v3300_v56, %v7805_v19 }
0x25ac   :  { %v3304_v28 = vpop.permute.xlu1 %3303 }
0x25ad   :  { %v3306_v20 = vmul.f32 %v3304_v28, %v3300_v56 }
0x25af   :  { %3308 = vrot.lane.b32.xlu0 %v3306_v20, %s6656_s26 }
0x2621   :  { %v3309_v59 = vpop.permute.xlu0 %3308 }
0x2622   :  { %v7947_v44 = vadd.f32 %v3309_v59, %v3301_v58  ;;  %v6424_v58 = vld [vmem:[%s8464_s28 + $0x30] sm:$0xff]   ;;  %v6425_v59 = vld [vmem:[%s8464_s28 + $0x38] sm:$0xff]  }
0x2624   :  { %6533 = vtanh.f32 %v7947_v44 }
0x262e   :  { %v6534_v19 = vpop.eup %6533 }
0x262f   :  { %3314 = vrot.lane.b32.xlu1 %v6534_v19, %s6650_s23  ;;  %v3564_v19 = vsel %vm92_vm1, %v3563_v1, 0 }
0x26a1   :  { %v3315_v61 = vpop.permute.xlu1 %3314 }
0x26a2   :  { %v3317_v62 = vmul.f32 %v3315_v61, %v3300_v56  ;;  %v3566_v61 = vstv %s5324_s9 }
0x26a4   :  { %v3318_v63 = vpack.c.bf16 %v3317_v62, %v3317_v62  ;;  %v3567_v62 = vsel %vm96_vm2, %v3566_v61, %v3564_v19 }
0x26a6   :  { %3380 = vrot.lane.b32.xlu1 %v3318_v63, %s6656_s26  ;;  %v3569_v63 = vstv %s5325_s10  ;;  %s5397_s10 = sld [smem:[#allocation4 + $0x280]] }
0x2718   :  { %v3381_v4 = vpop.permute.xlu1 %3380 }
0x2719   :  { %6154 = vmatmul.mubr.msk.bf16.vlgmr.msra.gmra.mrb[132].mxu1 %vm251_vm10, %v3381_v4 }
0x271a   :  { %6181 = vmatprep.mubr.msk.bf16.mxu1 %vm6653_vm0, %v7959_v60 }
0x27ec   :  { %v3431_v21 = vpop.f32.mrb[132].mxu1 }
0x27ed   :  { %v3432_v48 = vadd.f32 %v3431_v21, %v3373_v10  ;;  %v6155_v24 = vpop.f32.mrb[133].mxu1  ;;  %v6418_v10 = vld [vmem:[%s8464_s28] sm:$0xff]   ;;  %v3572_v21 = vstv %s5326_s29  ;;  %s5398_s29 = sld [smem:[#allocation4 + $0x281]] }
0x27ee   :  { %v3434_v26 = vpop.f32.mrb[134].mxu1  ;;  %6166 = vmatpush3.bf16.msra.mxu1 %v6418_v10  ;;  %v3575_v24 = vstv %s5327_s7  ;;  %s5399_s7 = sld [smem:[#allocation4 + $0x282]] }
0x27ef   :  { %v3444_v33 = vadd.f32 %v7672_v36, %v3432_v48  ;;  %v6156_v16 = vpop.f32.mrb[135].mxu1  ;;  %6167 = vmatprep.subr.bf16.mxu1 %v7959_v60 }
0x27f1   :  { %v3445_v34 = vmul.f32 0.5, %v3444_v33 }
0x27f2   :  { %6168 = vmatpush3.bf16.msra.mxu1 %v6419_v11 }
0x27f3   :  { %v3446_v35 = vsel %vm6932_vm14, %v3444_v33, %v3445_v34  ;;  %6169 = vmatprep.subr.bf16.mxu1 %v7959_v60  ;;  %v3578_v33 = vstv %s5328_s0  ;;  %v3581_v34 = vstv %s5329_s30  ;;  %s5360_s0 = sld [smem:[#allocation4 + $0x200]]  ;;  %s5361_s30 = sld [smem:[#allocation4 + $0x201]] }
0x27f4   :  { %6535 = vtanh.f32 %v3446_v35 }
0x27f6   :  { %6170 = vmatpush3.bf16.msra.mxu1 %v6420_v29 }
0x27f7   :  { %6171 = vmatprep.subr.bf16.mxu1 %v7959_v60 }
0x27fa   :  { %6172 = vmatpush3.bf16.msra.mxu1 %v6421_v17 }
0x27fb   :  { %6173 = vmatprep.subr.bf16.mxu1 %v7959_v60 }
0x27fe   :  { %v6536_v37 = vpop.eup %6535  ;;  %6174 = vmatpush3.bf16.msra.mxu1 %v6422_v18 }
0x27ff   :  { %v3448_v14 = vmul.f32 0.5, %v6536_v37  ;;  %6175 = vmatprep.subr.bf16.mxu1 %v7959_v60 }
0x2801   :  { %v3449_v8 = vadd.f32 0.5, %v3448_v14 }
0x2802   :  { %6176 = vmatpush3.bf16.msra.mxu1 %v6423_v13 }
0x2803   :  { %v3450_v38 = vsel %vm6932_vm14, %v6536_v37, %v3449_v8  ;;  %6177 = vmatprep.subr.bf16.mxu1 %v7959_v60  ;;  %v3584_v37 = vstv %s5330_s3  ;;  %s5363_s3 = sld [smem:[#allocation4 + $0x203]] }
0x2804   :  { %3453 = vrot.lane.b32.xlu0 %v3450_v38, %s6650_s23  ;;  %v3451_v36 = vmul.f32 %v3450_v38, %v7829_v25 }
0x2806   :  { %6178 = vmatpush3.bf16.msra.mxu1 %v6424_v58  ;;  %v6429_v58 = vld [vmem:[%s8465_s5] sm:$0xff]  }
0x2807   :  { %6179 = vmatprep.subr.bf16.mxu1 %v7959_v60 }
0x280a   :  { %6180 = vmatpush3.bf16.msra.mxu1 %v6425_v59  ;;  %v6430_v59 = vld [vmem:[%s8465_s5 + $0x8] sm:$0xff]  }
0x280b   :  { %6215 = vmatprep.subr.bf16.mxu1 %v7959_v60 }
0x2876   :  { %v3454_v39 = vpop.permute.xlu0 %3453 }
0x2877   :  { %v3456_v43 = vmul.f32 %v3454_v39, %v3450_v38 }
0x2879   :  { %3458 = vrot.lane.b32.xlu1 %v3456_v43, %s6656_s26 }
0x28eb   :  { %v3459_v27 = vpop.permute.xlu1 %3458 }
0x28ec   :  { %v7976_v41 = vadd.f32 %v3459_v27, %v3451_v36  ;;  %v3592_v36 = vstv %s3591_s21  ;;  %s5364_s21 = sld [smem:[#allocation4 + $0x204]] }
0x28ee   :  { %6537 = vtanh.f32 %v7976_v41 }
0x28f8   :  { %v6538_v25 = vpop.eup %6537 }
0x28f9   :  { %3464 = vrot.lane.b32.xlu0 %v6538_v25, %s6650_s23 }
0x296b   :  { %v3465_v42 = vpop.permute.xlu0 %3464 }
0x296c   :  { %v3467_v45 = vmul.f32 %v3465_v42, %v3450_v38 }
0x296e   :  { %v3468_v0 = vpack.c.bf16 %v3467_v45, %v3467_v45 }
0x2970   :  { %3481 = vrot.lane.b32.xlu1 %v3468_v0, %s6656_s26  ;;  %v6427_v0 = vld [vmem:[%s8443_s15] sm:$0xff]  }
0x29e2   :  { %v7992_v47 = vpop.permute.xlu1 %3481 }
0x29e3   :  { %6162 = vmatmul.mubr.msk.bf16.vlgmr.msra.gmra.mrb[52].mxu0 %vm251_vm10, %v7992_v47 }
0x29e4   :  { %6186 = vmatpush3.bf16.msra.mxu0 %v6416_v51  ;;  %6189 = vmatprep.mubr.msk.bf16.mxu0 %vm6653_vm0, %v7959_v60 }
0x29e5   :  { %6187 = vmatprep.subr.bf16.mxu0 %v7959_v60 }
0x29e8   :  { %6188 = vmatpush3.bf16.msra.mxu0 %v6417_v52 }
0x29e9   :  { %6193 = vmatprep.subr.bf16.mxu0 %v7959_v60 }
0x29eb   :  { %6190 = vmatmul.mubr.msk.bf16.vlgmr.msra.gmra.mrb[56].mxu0 %vm251_vm10, %v3381_v4  ;;  %v3570_v4 = vsel %vm100_vm3, %v3569_v63, %v3567_v62  ;;  %v8118_v63 = vld [vmem:[%s8444_s16] ss:$0 sm:$0xff] }
0x29ec   :  { %6195 = vmatprep.mubr.msk.bf16.mxu0 %vm6653_vm0, %v7959_v60  ;;  %6194 = vmatpush3.bf16.msra.mxu0 %v6426_v30  ;;  %v3573_v48 = vsel %vm104_vm4, %v3572_v21, %v3570_v4 }
0x29ed   :  { %6199 = vmatprep.subr.bf16.mxu0 %v7959_v60  ;;  %v3576_v26 = vsel %vm108_vm5, %v3575_v24, %v3573_v48 }
0x29ee   :  { %v3579_v16 = vsel %vm112_vm6, %v3578_v33, %v3576_v26 }
0x29ef   :  { %v3582_v35 = vsel %vm116_vm7, %v3581_v34, %v3579_v16 }
0x29f0   :  { %v3585_v8 = vsel %vm120_vm8, %v3584_v37, %v3582_v35 }
0x29f1   :  { %vm3586_vm9 = vcmp.eq.s32.totalorder %v6851_v22, %v3585_v8 }
0x29f2   :  { %v5331_v12 = vsel %vm3586_vm9, 1.0, %v7959_v60 }
0x2ab6   :  { %v3532_v3 = vpop.f32.mrb[52].mxu0 }
0x2ab7   :  { %v3533_v7 = vadd.f32 %v7714_v50, %v3532_v3  ;;  %v6163_v23 = vpop.f32.mrb[53].mxu0 }
0x2ab8   :  { %v3535_v54 = vpop.f32.mrb[54].mxu0  ;;  %v6428_v23 = vld [vmem:[%s8443_s15 + $0x8] sm:$0xff]  }
0x2ab9   :  { %5321 = vst [vmem:[%s8447_s19 + $0x18] sm:$0xff] %v3533_v7  ;;  %v6164_v55 = vpop.f32.mrb[55].mxu0  ;;  %v3540_v32 = vsel %vm2497_vm15, %v3533_v7, -1e+30 }
0x2aba   :  { %3541 = vmax.xlane.f32.xlu0 %v3540_v32  ;;  %v8088_v55 = vld [vmem:[%s8441_s13] ss:$0 sm:$0xff] }
0x2abe   :  { %v8012_v15 = vpop.f32.mrb[56].mxu0 }
0x2abf   :  { %v6191_v5 = vpop.f32.mrb[57].mxu0 }
0x2ac0   :  { %v3756_v31 = vpop.f32.mrb[58].mxu0 }
0x2ac1   :  { %v6192_v57 = vpop.f32.mrb[59].mxu0 }
0x2b47   :  { %v3542_v6 = vpop.xlane.xlu0 %3541 }
0x2b48   :  { %vm3543_vm12 = vcmp.ge.f32.partialorder %v3540_v32, %v3542_v6 }
0x2b49   :  { %v3544_v50 = vsel %vm3543_vm12, %v6851_v22, 128  ;;  %vm3593_vm12 = vcmp.eq.s32.totalorder %v3592_v36, 1 }
0x2b4a   :  { %v3546_v9 = vshra.s32 %v3544_v50, 16  ;;  %v3545_v53 = vand.u32 65535, %v3544_v50 }
0x2b4c   :  { %v3548_v46 = vcvt.s32.f32 %v3546_v9  ;;  %v3547_v28 = vcvt.s32.f32 %v3545_v53 }
0x2b4e   :  { %3549 = vmin.xlane.f32.xlu1 %v3548_v46 }
0x2bdb   :  { %v3550_v56 = vpop.xlane.xlu1 %3549 }
0x2bdc   :  { %vm3551_vm13 = vcmp.eq.f32.partialorder %v3548_v46, %v3550_v56  ;;  %v3556_v14 = vcvt.f32.s32 %v3550_v56 }
0x2bdd   :  { %v3552_v20 = vsel %vm3551_vm13, %v3547_v28, inf }
0x2bde   :  { %3553 = vmin.xlane.f32.xlu0 %v3552_v20  ;;  %v3557_v39 = vshll.u32 %v3556_v14, 16 }
0x2c6b   :  { %v3554_v38 = vpop.xlane.xlu0 %3553 }
0x2c6c   :  { %v3555_v43 = vcvt.f32.s32 %v3554_v38 }
0x2c6e   :  { %v3558_v27 = vadd.s32 %v3557_v39, %v3555_v43 }
0x2c70   :  { %vm3559_vm13 = vcmp.eq.s32.totalorder %v6851_v22, %v3558_v27  ;;  %v6431_v27 = vld [vmem:[%s8445_s17] sm:$0xff]  }
0x2c71   :  { %v5322_v40 = vsel %vm3559_vm13, 1.0, %v7959_v60 }
0x2c72   :  { %v3594_v25 = vsel %vm3593_vm12, %v5331_v12, %v5322_v40  ;;  %v6432_v12 = vld [vmem:[%s8445_s17 + $0x8] sm:$0xff]  }
0x2c73   :  { %v3595_v42 = vpack.c.bf16 %v3594_v25, %v3594_v25 }
0x2c75   :  { %6182 = vmatmul.mubr.bf16.vlgmr.msra.gmra.mrb[136].mxu1 %v3595_v42 }
0x2c76   :  { %6219 = vmatprep.mubr.msk.bf16.mxu1 %vm6653_vm0, %v7959_v60  ;;  %6216 = vmatpush3.bf16.msra.mxu1 %v6431_v27 }
0x2c77   :  { %6217 = vmatprep.subr.bf16.mxu1 %v7959_v60 }
0x2c7a   :  { %6218 = vmatpush3.bf16.msra.mxu1 %v6432_v12 }
0x2c7b   :  { %6243 = vmatprep.subr.bf16.mxu1 %v7959_v60 }
0x2d48   :  { %v3694_v45 = vpop.f32.mrb[136].mxu1 }
0x2d49   :  { %v3700_v51 = vpack.c.bf16 %v3694_v45, %v3694_v45  ;;  %v6183_v52 = vpop.f32.mrb[137].mxu1  ;;  %v6433_v45 = vld [vmem:[%s8440_s12] sm:$0xff]  }
0x2d4a   :  { %v3697_v3 = vpop.f32.mrb[138].mxu1  ;;  %v8161_v52 = vld [vmem:[%s8446_s18] ss:$0 sm:$0xff]  ;;  %s5369_s18 = sld [smem:[#allocation5 + $0x4]] }
0x2d4b   :  { %v6184_v7 = vpop.f32.mrb[139].mxu1  ;;  %6196 = vmatmul.mubr.msk.bf16.vlgmr.msra.gmra.mrb[60].mxu0 %vm301_vm11, %v3700_v51  ;;  %v6434_v51 = vld [vmem:[%s8440_s12 + $0x8] sm:$0xff]  }
0x2d4c   :  { %6200 = vmatpush3.bf16.msra.mxu0 %v6427_v0  ;;  %6203 = vmatprep.mubr.msk.bf16.mxu0 %vm6653_vm0, %v7959_v60 }
0x2d4d   :  { %6201 = vmatprep.subr.bf16.mxu0 %v7959_v60 }
0x2d50   :  { %6202 = vmatpush3.bf16.msra.mxu0 %v6428_v23  ;;  %p4111_p12 = scmp.ne.s32.totalorder %s5369_s18, 0 }
0x2d51   :  { %6207 = vmatprep.subr.bf16.mxu0 %v7959_v60 }
0x2d52   :  { %s4112_s6 = scalar_select %p4111_p12, 1, 0 }
0x2d53   :  { %6204 = vmatmul.mubr.msk.bf16.vlgmr.msra.gmra.mrb[64].mxu0 %vm251_vm10, %v7992_v47 }
0x2d54   :  { %6211 = vmatprep.mubr.msk.bf16.mxu0 %vm6653_vm0, %v7959_v60  ;;  %6208 = vmatpush3.bf16.msra.mxu0 %v6429_v58  ;;  %v4113_v12 = vstv %s4112_s6 }
0x2d55   :  { %6209 = vmatprep.subr.bf16.mxu0 %v7959_v60 }
0x2d58   :  { %6210 = vmatpush3.bf16.msra.mxu0 %v6430_v59  ;;  %v6441_v59 = vld [vmem:[%s8464_s28 + $0x30] sm:$0xff]  }
0x2d59   :  { %6223 = vmatprep.subr.bf16.mxu0 %v7959_v60 }
0x2e1e   :  { %v3802_v54 = vpop.f32.mrb[60].mxu0 }
0x2e1f   :  { %v3803_v32 = vadd.f32 %v3802_v54, %v8012_v15  ;;  %v6197_v5 = vpop.f32.mrb[61].mxu0 }
0x2e20   :  { %v3805_v31 = vpop.f32.mrb[62].mxu0 }
0x2e21   :  { %v3815_v57 = vadd.f32 %v8088_v55, %v3803_v32  ;;  %v6198_v6 = vpop.f32.mrb[63].mxu0 }
0x2e23   :  { %v3816_v50 = vmul.f32 0.5, %v3815_v57 }
0x2e25   :  { %v3817_v47 = vsel %vm6932_vm14, %v3815_v57, %v3816_v50 }
0x2e26   :  { %6539 = vtanh.f32 %v3817_v47  ;;  %v3894_v9 = vpop.f32.mrb[64].mxu0 }
0x2e27   :  { %v6205_v46 = vpop.f32.mrb[65].mxu0 }
0x2e28   :  { %v3897_v10 = vpop.f32.mrb[66].mxu0 }
0x2e29   :  { %v6206_v11 = vpop.f32.mrb[67].mxu0 }
0x2e2a   :  { %v6435_v11 = vld [vmem:[%s8464_s28] sm:$0xff]  }
0x2e30   :  { %v6540_v29 = vpop.eup %6539 }
0x2e31   :  { %v3819_v17 = vmul.f32 0.5, %v6540_v29 }
0x2e33   :  { %v3820_v18 = vadd.f32 0.5, %v3819_v17  ;;  %v6437_v17 = vld [vmem:[%s8464_s28 + $0x10] sm:$0xff]  }
0x2e35   :  { %v3821_v15 = vsel %vm6932_vm14, %v6540_v29, %v3820_v18  ;;  %v6436_v29 = vld [vmem:[%s8464_s28 + $0x8] sm:$0xff]   ;;  %v6438_v18 = vld [vmem:[%s8464_s28 + $0x18] sm:$0xff]  }
0x2e36   :  { %3824 = vrot.lane.b32.xlu0 %v3821_v15, %s6650_s23  ;;  %v3822_v56 = vmul.f32 %v3821_v15, %v7947_v44 }
0x2ea8   :  { %v3825_v13 = vpop.permute.xlu0 %3824 }
0x2ea9   :  { %v3827_v53 = vmul.f32 %v3825_v13, %v3821_v15  ;;  %v6440_v13 = vld [vmem:[%s8464_s28 + $0x28] sm:$0xff]  }
0x2eab   :  { %3829 = vrot.lane.b32.xlu1 %v3827_v53, %s6656_s26 }
0x2f1d   :  { %v3830_v28 = vpop.permute.xlu1 %3829 }
0x2f1e   :  { %v8099_v20 = vadd.f32 %v3830_v28, %v3822_v56 }
0x2f20   :  { %6541 = vtanh.f32 %v8099_v20 }
0x2f2a   :  { %v6542_v44 = vpop.eup %6541 }
0x2f2b   :  { %3835 = vrot.lane.b32.xlu1 %v6542_v44, %s6650_s23  ;;  %v6442_v44 = vld [vmem:[%s8464_s28 + $0x38] sm:$0xff]  }
0x2f9d   :  { %v3836_v30 = vpop.permute.xlu1 %3835 }
0x2f9e   :  { %v3838_v1 = vmul.f32 %v3836_v30, %v3821_v15  ;;  %v6439_v15 = vld [vmem:[%s8464_s28 + $0x20] sm:$0xff]  }
0x2f9f   :  { %v6443_v30 = vld [vmem:[#allocation6] sm:$0xff]  }
0x2fa0   :  { %v3839_v19 = vpack.c.bf16 %v3838_v1, %v3838_v1  ;;  %v4084_v1 = vstv %s5360_s0  ;;  %s5400_s0 = sld [smem:[#allocation4 + $0x283]] }
0x2fa2   :  { %3901 = vrot.lane.b32.xlu0 %v3839_v19, %s6656_s26  ;;  %v4085_v19 = vsel %vm92_vm1, %v4084_v1, 0  ;;  %v6447_v1 = vld [vmem:[%s8465_s5 + $0x8] sm:$0xff]  }
0x3014   :  { %v3902_v61 = vpop.permute.xlu0 %3901 }
0x3015   :  { %6212 = vmatmul.mubr.msk.bf16.vlgmr.msra.gmra.mrb[68].mxu0 %vm251_vm10, %v3902_v61 }
0x3016   :  { %6239 = vmatprep.mubr.msk.bf16.mxu0 %vm6653_vm0, %v7959_v60  ;;  %6224 = vmatpush3.bf16.msra.mxu0 %v6435_v11 }
0x3017   :  { %6225 = vmatprep.subr.bf16.mxu0 %v7959_v60 }
0x301a   :  { %6226 = vmatpush3.bf16.msra.mxu0 %v6436_v29 }
0x301b   :  { %6227 = vmatprep.subr.bf16.mxu0 %v7959_v60 }
0x301e   :  { %6228 = vmatpush3.bf16.msra.mxu0 %v6437_v17 }
0x301f   :  { %6229 = vmatprep.subr.bf16.mxu0 %v7959_v60 }
0x3022   :  { %6230 = vmatpush3.bf16.msra.mxu0 %v6438_v18 }
0x3023   :  { %6231 = vmatprep.subr.bf16.mxu0 %v7959_v60 }
0x3026   :  { %6232 = vmatpush3.bf16.msra.mxu0 %v6439_v15 }
0x3027   :  { %6233 = vmatprep.subr.bf16.mxu0 %v7959_v60 }
0x302a   :  { %6234 = vmatpush3.bf16.msra.mxu0 %v6440_v13 }
0x302b   :  { %6235 = vmatprep.subr.bf16.mxu0 %v7959_v60 }
0x302e   :  { %6236 = vmatpush3.bf16.msra.mxu0 %v6441_v59 }
0x302f   :  { %6237 = vmatprep.subr.bf16.mxu0 %v7959_v60 }
0x3032   :  { %6238 = vmatpush3.bf16.msra.mxu0 %v6442_v44 }
0x3033   :  { %6273 = vmatprep.subr.bf16.mxu0 %v7959_v60 }
0x30e8   :  { %v3952_v62 = vpop.f32.mrb[68].mxu0 }
0x30e9   :  { %v3953_v4 = vadd.f32 %v3952_v62, %v3894_v9  ;;  %v6213_v21 = vpop.f32.mrb[69].mxu0 }
0x30ea   :  { %v3955_v48 = vpop.f32.mrb[70].mxu0 }
0x30eb   :  { %v3965_v24 = vadd.f32 %v8118_v63, %v3953_v4  ;;  %v6214_v26 = vpop.f32.mrb[71].mxu0  ;;  %v4090_v4 = vstv %s5362_s20  ;;  %v4093_v48 = vstv %s5363_s3  ;;  %s5403_s20 = sld [smem:[#allocation4 + $0x286]]  ;;  %s5406_s3 = sld [smem:[#allocation5 + $0x5]] }
0x30ec   :  { %v4096_v26 = vstv %s5364_s21 }
0x30ed   :  { %v3966_v33 = vmul.f32 0.5, %v3965_v24 }
0x30ef   :  { %v3967_v16 = vsel %vm6932_vm14, %v3965_v24, %v3966_v33 }
0x30f0   :  { %6543 = vtanh.f32 %v3967_v16  ;;  %v4099_v16 = vstv %s5365_s22 }
0x30f1   :  { %p4632_p13 = scmp.ne.s32.totalorder %s5406_s3, 0 }
0x30f3   :  { %s4633_s21 = scalar_select %p4632_p13, 1, 0 }
0x30fa   :  { %v6544_v34 = vpop.eup %6543 }
0x30fb   :  { %v3969_v35 = vmul.f32 0.5, %v6544_v34 }
0x30fd   :  { %v3970_v37 = vadd.f32 0.5, %v3969_v35  ;;  %v4102_v35 = vstv %s5366_s4 }
0x30ff   :  { %v3971_v14 = vsel %vm6932_vm14, %v6544_v34, %v3970_v37 }
0x3100   :  { %3974 = vrot.lane.b32.xlu1 %v3971_v14, %s6650_s23  ;;  %v3972_v39 = vmul.f32 %v3971_v14, %v7976_v41 }
0x3172   :  { %v3975_v8 = vpop.permute.xlu1 %3974 }
0x3173   :  { %v3977_v38 = vmul.f32 %v3975_v8, %v3971_v14 }
0x3175   :  { %3979 = vrot.lane.b32.xlu0 %v3977_v38, %s6656_s26 }
0x31e7   :  { %v3980_v43 = vpop.permute.xlu0 %3979 }
0x31e8   :  { %v8128_v36 = vadd.f32 %v3980_v43, %v3972_v39 }
0x31ea   :  { %6545 = vtanh.f32 %v8128_v36 }
0x31f4   :  { %v6546_v41 = vpop.eup %6545 }
0x31f5   :  { %3985 = vrot.lane.b32.xlu1 %v6546_v41, %s6650_s23 }
0x3267   :  { %v3986_v40 = vpop.permute.xlu1 %3985 }
0x3268   :  { %v3988_v25 = vmul.f32 %v3986_v40, %v3971_v14  ;;  %v4105_v14 = vstv %s5367_s24 }
0x326a   :  { %v3989_v42 = vpack.c.bf16 %v3988_v25, %v3988_v25 }
0x326c   :  { %4002 = vrot.lane.b32.xlu0 %v3989_v42, %s6656_s26 }
0x32de   :  { %v8144_v0 = vpop.permute.xlu0 %4002 }
0x32df   :  { %6220 = vmatmul.mubr.msk.bf16.vlgmr.msra.gmra.mrb[140].mxu1 %vm251_vm10, %v8144_v0 }
0x32e0   :  { %6244 = vmatpush3.bf16.msra.mxu1 %v6433_v45  ;;  %6247 = vmatprep.mubr.msk.bf16.mxu1 %vm6653_vm0, %v7959_v60 }
0x32e1   :  { %6245 = vmatprep.subr.bf16.mxu1 %v7959_v60 }
0x32e4   :  { %6246 = vmatpush3.bf16.msra.mxu1 %v6434_v51 }
0x32e5   :  { %6251 = vmatprep.subr.bf16.mxu1 %v7959_v60 }
0x32e7   :  { %6248 = vmatmul.mubr.msk.bf16.vlgmr.msra.gmra.mrb[144].mxu1 %vm251_vm10, %v3902_v61  ;;  %v4087_v61 = vstv %s5361_s30  ;;  %s5401_s30 = sld [smem:[#allocation4 + $0x284]] }
0x32e8   :  { %6253 = vmatprep.mubr.msk.bf16.mxu1 %vm6653_vm0, %v7959_v60  ;;  %6252 = vmatpush3.bf16.msra.mxu1 %v6443_v30  ;;  %v4088_v62 = vsel %vm96_vm2, %v4087_v61, %v4085_v19  ;;  %v6446_v30 = vld [vmem:[%s8465_s5] sm:$0xff]  }
0x32e9   :  { %6257 = vmatprep.subr.bf16.mxu1 %v7959_v60  ;;  %v4091_v21 = vsel %vm100_vm3, %v4090_v4, %v4088_v62 }
0x32ea   :  { %v4094_v24 = vsel %vm104_vm4, %v4093_v48, %v4091_v21 }
0x32eb   :  { %v4097_v33 = vsel %vm108_vm5, %v4096_v26, %v4094_v24 }
0x32ec   :  { %v4100_v34 = vsel %vm112_vm6, %v4099_v16, %v4097_v33 }
0x32ed   :  { %v4103_v37 = vsel %vm116_vm7, %v4102_v35, %v4100_v34 }
0x32ee   :  { %v4106_v38 = vsel %vm120_vm8, %v4105_v14, %v4103_v37 }
0x32ef   :  { %vm4107_vm13 = vcmp.eq.s32.totalorder %v6851_v22, %v4106_v38 }
0x32f0   :  { %v5368_v40 = vsel %vm4107_vm13, 1.0, %v7959_v60 }
0x33b2   :  { %v4053_v3 = vpop.f32.mrb[140].mxu1 }
0x33b3   :  { %v4054_v7 = vadd.f32 %v8161_v52, %v4053_v3  ;;  %v6221_v23 = vpop.f32.mrb[141].mxu1  ;;  %v6444_v3 = vld [vmem:[%s8443_s15] sm:$0xff]  }
0x33b4   :  { %v4056_v54 = vpop.f32.mrb[142].mxu1 }
0x33b5   :  { %5358 = vst [vmem:[%s8447_s19 + $0x20] sm:$0xff] %v4054_v7  ;;  %v6222_v32 = vpop.f32.mrb[143].mxu1  ;;  %v4061_v5 = vsel %vm2497_vm15, %v4054_v7, -1e+30 }
0x33b6   :  { %4062 = vmax.xlane.f32.xlu1 %v4061_v5 }
0x33ba   :  { %v8169_v31 = vpop.f32.mrb[144].mxu1 }
0x33bb   :  { %v6249_v57 = vpop.f32.mrb[145].mxu1 }
0x33bc   :  { %v4277_v6 = vpop.f32.mrb[146].mxu1 }
0x33bd   :  { %v6250_v50 = vpop.f32.mrb[147].mxu1 }
0x3443   :  { %v4063_v47 = vpop.xlane.xlu1 %4062 }
0x3444   :  { %vm4064_vm9 = vcmp.ge.f32.partialorder %v4061_v5, %v4063_v47  ;;  %v6445_v5 = vld [vmem:[%s8443_s15 + $0x8] sm:$0xff]  }
0x3445   :  { %v4065_v9 = vsel %vm4064_vm9, %v6851_v22, 128  ;;  %vm4114_vm9 = vcmp.eq.s32.totalorder %v4113_v12, 1 }
0x3446   :  { %v4067_v46 = vshra.s32 %v4065_v9, 16  ;;  %v4066_v53 = vand.u32 65535, %v4065_v9 }
0x3448   :  { %v4069_v10 = vcvt.s32.f32 %v4067_v46  ;;  %v4068_v28 = vcvt.s32.f32 %v4066_v53 }
0x344a   :  { %4070 = vmin.xlane.f32.xlu0 %v4069_v10 }
0x34d7   :  { %v4071_v56 = vpop.xlane.xlu0 %4070 }
0x34d8   :  { %vm4072_vm12 = vcmp.eq.f32.partialorder %v4069_v10, %v4071_v56  ;;  %v4077_v8 = vcvt.f32.s32 %v4071_v56 }
0x34d9   :  { %v4073_v58 = vsel %vm4072_vm12, %v4068_v28, inf }
0x34da   :  { %4074 = vmin.xlane.f32.xlu0 %v4073_v58  ;;  %v4078_v43 = vshll.u32 %v4077_v8, 16 }
0x3567   :  { %v4075_v39 = vpop.xlane.xlu0 %4074 }
0x3568   :  { %v4076_v27 = vcvt.f32.s32 %v4075_v39 }
0x356a   :  { %v4079_v41 = vadd.s32 %v4078_v43, %v4076_v27 }
0x356c   :  { %vm4080_vm12 = vcmp.eq.s32.totalorder %v6851_v22, %v4079_v41 }
0x356d   :  { %v5359_v25 = vsel %vm4080_vm12, 1.0, %v7959_v60 }
0x356e   :  { %v4115_v42 = vsel %vm4114_vm9, %v5368_v40, %v5359_v25  ;;  %v6448_v40 = vld [vmem:[%s8445_s17] sm:$0xff]   ;;  %v6449_v25 = vld [vmem:[%s8445_s17 + $0x8] sm:$0xff]  }
0x356f   :  { %v4116_v45 = vpack.c.bf16 %v4115_v42, %v4115_v42 }
0x3571   :  { %6240 = vmatmul.mubr.bf16.vlgmr.msra.gmra.mrb[72].mxu0 %v4116_v45 }
0x3572   :  { %6277 = vmatprep.mubr.msk.bf16.mxu0 %vm6653_vm0, %v7959_v60  ;;  %6274 = vmatpush3.bf16.msra.mxu0 %v6448_v40  ;;  %v4634_v40 = vstv %s4633_s21 }
0x3573   :  { %6275 = vmatprep.subr.bf16.mxu0 %v7959_v60 }
0x3576   :  { %6276 = vmatpush3.bf16.msra.mxu0 %v6449_v25 }
0x3577   :  { %6301 = vmatprep.subr.bf16.mxu0 %v7959_v60 }
0x3644   :  { %v4215_v51 = vpop.f32.mrb[72].mxu0 }
0x3645   :  { %v4221_v7 = vpack.c.bf16 %v4215_v51, %v4215_v51  ;;  %v6241_v23 = vpop.f32.mrb[73].mxu0 }
0x3646   :  { %v4218_v54 = vpop.f32.mrb[74].mxu0  ;;  %v6451_v23 = vld [vmem:[%s8440_s12 + $0x8] sm:$0xff]  }
0x3647   :  { %v6242_v32 = vpop.f32.mrb[75].mxu0  ;;  %6254 = vmatmul.mubr.msk.bf16.vlgmr.msra.gmra.mrb[148].mxu1 %vm301_vm11, %v4221_v7 }
0x3648   :  { %6258 = vmatpush3.bf16.msra.mxu1 %v6444_v3  ;;  %6261 = vmatprep.mubr.msk.bf16.mxu1 %vm6653_vm0, %v7959_v60  ;;  %v6450_v3 = vld [vmem:[%s8440_s12] sm:$0xff]   ;;  %s5404_s12 = sld [smem:[#allocation4 + $0x287]] }
0x3649   :  { %6259 = vmatprep.subr.bf16.mxu1 %v7959_v60 }
0x364c   :  { %6260 = vmatpush3.bf16.msra.mxu1 %v6445_v5 }
0x364d   :  { %6265 = vmatprep.subr.bf16.mxu1 %v7959_v60 }
0x364f   :  { %6262 = vmatmul.mubr.msk.bf16.vlgmr.msra.gmra.mrb[152].mxu1 %vm251_vm10, %v8144_v0 }
0x3650   :  { %6269 = vmatprep.mubr.msk.bf16.mxu1 %vm6653_vm0, %v7959_v60  ;;  %6266 = vmatpush3.bf16.msra.mxu1 %v6446_v30 }
0x3651   :  { %6267 = vmatprep.subr.bf16.mxu1 %v7959_v60 }
0x3654   :  { %6268 = vmatpush3.bf16.msra.mxu1 %v6447_v1  ;;  %v6458_v1 = vld [vmem:[%s8464_s28 + $0x30] sm:$0xff]  }
0x3655   :  { %6281 = vmatprep.subr.bf16.mxu1 %v7959_v60 }
0x371a   :  { %v4323_v57 = vpop.f32.mrb[148].mxu1 }
0x371b   :  { %v4324_v6 = vadd.f32 %v4323_v57, %v8169_v31  ;;  %v6255_v50 = vpop.f32.mrb[149].mxu1 }
0x371c   :  { %v4326_v47 = vpop.f32.mrb[150].mxu1 }
0x371d   :  { %v4336_v9 = vadd.f32 %v8088_v55, %v4324_v6  ;;  %v6256_v46 = vpop.f32.mrb[151].mxu1 }
0x371f   :  { %v4337_v10 = vmul.f32 0.5, %v4336_v9 }
0x3721   :  { %v4338_v11 = vsel %vm6932_vm14, %v4336_v9, %v4337_v10 }
0x3722   :  { %6547 = vtanh.f32 %v4338_v11  ;;  %v4415_v29 = vpop.f32.mrb[152].mxu1 }
0x3723   :  { %v6263_v17 = vpop.f32.mrb[153].mxu1 }
0x3724   :  { %v4418_v18 = vpop.f32.mrb[154].mxu1 }
0x3725   :  { %v6264_v0 = vpop.f32.mrb[155].mxu1 }
0x3726   :  { %v6452_v0 = vld [vmem:[%s8464_s28] sm:$0xff]  }
0x372c   :  { %v6548_v15 = vpop.eup %6547 }
0x372d   :  { %v4340_v13 = vmul.f32 0.5, %v6548_v15 }
0x372f   :  { %v4341_v53 = vadd.f32 0.5, %v4340_v13  ;;  %v6454_v13 = vld [vmem:[%s8464_s28 + $0x10] sm:$0xff]  }
0x3731   :  { %v4342_v31 = vsel %vm6932_vm14, %v6548_v15, %v4341_v53  ;;  %v6453_v15 = vld [vmem:[%s8464_s28 + $0x8] sm:$0xff]   ;;  %v6455_v53 = vld [vmem:[%s8464_s28 + $0x18] sm:$0xff]  }
0x3732   :  { %4345 = vrot.lane.b32.xlu1 %v4342_v31, %s6650_s23  ;;  %v4343_v58 = vmul.f32 %v4342_v31, %v8099_v20 }
0x37a4   :  { %v4346_v56 = vpop.permute.xlu1 %4345 }
0x37a5   :  { %v4348_v28 = vmul.f32 %v4346_v56, %v4342_v31  ;;  %v6457_v56 = vld [vmem:[%s8464_s28 + $0x28] sm:$0xff]  }
0x37a7   :  { %4350 = vrot.lane.b32.xlu0 %v4348_v28, %s6656_s26 }
0x3819   :  { %v4351_v59 = vpop.permute.xlu0 %4350 }
0x381a   :  { %v8251_v44 = vadd.f32 %v4351_v59, %v4343_v58 }
0x381c   :  { %6549 = vtanh.f32 %v8251_v44 }
0x3826   :  { %v6550_v20 = vpop.eup %6549 }
0x3827   :  { %4356 = vrot.lane.b32.xlu1 %v6550_v20, %s6650_s23  ;;  %v6459_v20 = vld [vmem:[%s8464_s28 + $0x38] sm:$0xff]  }
0x3899   :  { %v4357_v19 = vpop.permute.xlu1 %4356 }
0x389a   :  { %v4359_v61 = vmul.f32 %v4357_v19, %v4342_v31  ;;  %v6456_v31 = vld [vmem:[%s8464_s28 + $0x20] sm:$0xff]   ;;  %s5402_s28 = sld [smem:[#allocation4 + $0x285]] }
0x389b   :  { %v6460_v19 = vld [vmem:[#allocation6] sm:$0xff]  }
0x389c   :  { %v4360_v62 = vpack.c.bf16 %v4359_v61, %v4359_v61  ;;  %v4605_v61 = vstv %s5397_s10 }
0x389e   :  { %4422 = vrot.lane.b32.xlu1 %v4360_v62, %s6656_s26  ;;  %v4606_v62 = vsel %vm92_vm1, %v4605_v61, 0 }
0x3910   :  { %v4423_v4 = vpop.permute.xlu1 %4422 }
0x3911   :  { %6270 = vmatmul.mubr.msk.bf16.vlgmr.msra.gmra.mrb[156].mxu1 %vm251_vm10, %v4423_v4 }
0x3912   :  { %6297 = vmatprep.mubr.msk.bf16.mxu1 %vm6653_vm0, %v7959_v60  ;;  %6282 = vmatpush3.bf16.msra.mxu1 %v6452_v0 }
0x3913   :  { %6283 = vmatprep.subr.bf16.mxu1 %v7959_v60 }
0x3916   :  { %6284 = vmatpush3.bf16.msra.mxu1 %v6453_v15 }
0x3917   :  { %6285 = vmatprep.subr.bf16.mxu1 %v7959_v60 }
0x391a   :  { %6286 = vmatpush3.bf16.msra.mxu1 %v6454_v13 }
0x391b   :  { %6287 = vmatprep.subr.bf16.mxu1 %v7959_v60 }
0x391e   :  { %6288 = vmatpush3.bf16.msra.mxu1 %v6455_v53 }
0x391f   :  { %6289 = vmatprep.subr.bf16.mxu1 %v7959_v60 }
0x3922   :  { %6290 = vmatpush3.bf16.msra.mxu1 %v6456_v31 }
0x3923   :  { %6291 = vmatprep.subr.bf16.mxu1 %v7959_v60 }
0x3926   :  { %6292 = vmatpush3.bf16.msra.mxu1 %v6457_v56 }
0x3927   :  { %6293 = vmatprep.subr.bf16.mxu1 %v7959_v60 }
0x392a   :  { %6294 = vmatpush3.bf16.msra.mxu1 %v6458_v1  ;;  %v6464_v1 = vld [vmem:[%s8465_s5 + $0x8] sm:$0xff]  }
0x392b   :  { %6295 = vmatprep.subr.bf16.mxu1 %v7959_v60 }
0x392e   :  { %6296 = vmatpush3.bf16.msra.mxu1 %v6459_v20 }
0x392f   :  { %6331 = vmatprep.subr.bf16.mxu1 %v7959_v60 }
0x39e4   :  { %v4473_v21 = vpop.f32.mrb[156].mxu1 }
0x39e5   :  { %v4474_v48 = vadd.f32 %v4473_v21, %v4415_v29  ;;  %v6271_v24 = vpop.f32.mrb[157].mxu1 }
0x39e6   :  { %v4476_v26 = vpop.f32.mrb[158].mxu1 }
0x39e7   :  { %v4486_v33 = vadd.f32 %v8118_v63, %v4474_v48  ;;  %v6272_v16 = vpop.f32.mrb[159].mxu1  ;;  %v4611_v48 = vstv %s5399_s7  ;;  %v4614_v26 = vstv %s5400_s0 }
0x39e9   :  { %v4487_v34 = vmul.f32 0.5, %v4486_v33 }
0x39eb   :  { %v4488_v35 = vsel %vm6932_vm14, %v4486_v33, %v4487_v34  ;;  %v4617_v33 = vstv %s5401_s30  ;;  %v4620_v34 = vstv %s5402_s28 }
0x39ec   :  { %6551 = vtanh.f32 %v4488_v35 }
0x39f6   :  { %v6552_v37 = vpop.eup %6551 }
0x39f7   :  { %v4490_v14 = vmul.f32 0.5, %v6552_v37 }
0x39f9   :  { %v4491_v8 = vadd.f32 0.5, %v4490_v14 }
0x39fb   :  { %v4492_v38 = vsel %vm6932_vm14, %v6552_v37, %v4491_v8  ;;  %v4623_v37 = vstv %s5403_s20  ;;  %v4626_v8 = vstv %s5404_s12 }
0x39fc   :  { %4495 = vrot.lane.b32.xlu0 %v4492_v38, %s6650_s23  ;;  %v4493_v27 = vmul.f32 %v4492_v38, %v8128_v36 }
0x3a6e   :  { %v4496_v39 = vpop.permute.xlu0 %4495 }
0x3a6f   :  { %v4498_v43 = vmul.f32 %v4496_v39, %v4492_v38 }
0x3a71   :  { %4500 = vrot.lane.b32.xlu1 %v4498_v43, %s6656_s26 }
0x3ae3   :  { %v4501_v12 = vpop.permute.xlu1 %4500 }
0x3ae4   :  { %v8275_v41 = vadd.f32 %v4501_v12, %v4493_v27 }
0x3ae6   :  { %6553 = vtanh.f32 %v8275_v41 }
0x3af0   :  { %v6554_v36 = vpop.eup %6553 }
0x3af1   :  { %4506 = vrot.lane.b32.xlu0 %v6554_v36, %s6650_s23  ;;  %v8367_v36 = vld [vmem:[%s8447_s19] sm:$0xff] }
0x3b63   :  { %v4507_v42 = vpop.permute.xlu0 %4506 }
0x3b64   :  { %v4509_v45 = vmul.f32 %v4507_v42, %v4492_v38 }
0x3b66   :  { %v4510_v51 = vpack.c.bf16 %v4509_v45, %v4509_v45 }
0x3b68   :  { %4523 = vrot.lane.b32.xlu1 %v4510_v51, %s6656_s26 }
0x3bda   :  { %v8291_v7 = vpop.permute.xlu1 %4523 }
0x3bdb   :  { %6278 = vmatmul.mubr.msk.bf16.vlgmr.msra.gmra.mrb[76].mxu0 %vm251_vm10, %v8291_v7 }
0x3bdc   :  { %6302 = vmatpush3.bf16.msra.mxu0 %v6450_v3  ;;  %6305 = vmatprep.mubr.msk.bf16.mxu0 %vm6653_vm0, %v7959_v60 }
0x3bdd   :  { %6303 = vmatprep.subr.bf16.mxu0 %v7959_v60 }
0x3be0   :  { %6304 = vmatpush3.bf16.msra.mxu0 %v6451_v23  ;;  %v6461_v23 = vld [vmem:[%s8443_s15] sm:$0xff]  }
0x3be1   :  { %6309 = vmatprep.subr.bf16.mxu0 %v7959_v60 }
0x3be3   :  { %6306 = vmatmul.mubr.msk.bf16.vlgmr.msra.gmra.mrb[80].mxu0 %vm251_vm10, %v4423_v4  ;;  %v4608_v4 = vstv %s5398_s29 }
0x3be4   :  { %6311 = vmatprep.mubr.msk.bf16.mxu0 %vm6653_vm0, %v7959_v60  ;;  %6310 = vmatpush3.bf16.msra.mxu0 %v6460_v19  ;;  %v4609_v21 = vsel %vm96_vm2, %v4608_v4, %v4606_v62  ;;  %vm4635_vm2 = vcmp.eq.s32.totalorder %v4634_v40, 1 }
0x3be5   :  { %6315 = vmatprep.subr.bf16.mxu0 %v7959_v60  ;;  %v4612_v24 = vsel %vm100_vm3, %v4611_v48, %v4609_v21 }
0x3be6   :  { %v4615_v60 = vsel %vm104_vm4, %v4614_v26, %v4612_v24 }
0x3be7   :  { %v4618_v16 = vsel %vm108_vm5, %v4617_v33, %v4615_v60 }
0x3be8   :  { %v4621_v35 = vsel %vm112_vm6, %v4620_v34, %v4618_v16 }
0x3be9   :  { %v4624_v14 = vsel %vm116_vm7, %v4623_v37, %v4621_v35 }
0x3bea   :  { %v4627_v39 = vsel %vm120_vm8, %v4626_v8, %v4624_v14 }
0x3beb   :  { %vm4628_vm1 = vcmp.eq.s32.totalorder %v6851_v22, %v4627_v39 }
0x3bec   :  { %v5405_v42 = vsel %vm4628_vm1, 1.0, %v8367_v36 }
0x3cae   :  { %v4574_v54 = vpop.f32.mrb[76].mxu0 }
0x3caf   :  { %v4575_v32 = vadd.f32 %v8161_v52, %v4574_v54  ;;  %v6279_v5 = vpop.f32.mrb[77].mxu0 }
0x3cb0   :  { %v4577_v57 = vpop.f32.mrb[78].mxu0 }
0x3cb1   :  { %5395 = vst [vmem:[%s8447_s19 + $0x28] sm:$0xff] %v4575_v32  ;;  %v6280_v6 = vpop.f32.mrb[79].mxu0  ;;  %v4582_v50 = vsel %vm2497_vm15, %v4575_v32, -1e+30 }
0x3cb2   :  { %4583 = vmax.xlane.f32.xlu0 %v4582_v50 }
0x3cb6   :  { %v8311_v47 = vpop.f32.mrb[80].mxu0 }
0x3cb7   :  { %v6307_v9 = vpop.f32.mrb[81].mxu0 }
0x3cb8   :  { %v4798_v46 = vpop.f32.mrb[82].mxu0 }
0x3cb9   :  { %v6308_v10 = vpop.f32.mrb[83].mxu0 }
0x3d3f   :  { %v4584_v11 = vpop.xlane.xlu0 %4583 }
0x3d40   :  { %vm4585_vm13 = vcmp.ge.f32.partialorder %v4582_v50, %v4584_v11 }
0x3d41   :  { %v4586_v29 = vsel %vm4585_vm13, %v6851_v22, 128 }
0x3d42   :  { %v4588_v17 = vshra.s32 %v4586_v29, 16  ;;  %v4587_v28 = vand.u32 65535, %v4586_v29 }
0x3d44   :  { %v4590_v18 = vcvt.s32.f32 %v4588_v17  ;;  %v4589_v58 = vcvt.s32.f32 %v4587_v28 }
0x3d46   :  { %4591 = vmin.xlane.f32.xlu1 %v4590_v18 }
0x3dd3   :  { %v4592_v59 = vpop.xlane.xlu1 %4591 }
0x3dd4   :  { %vm4593_vm15 = vcmp.eq.f32.partialorder %v4590_v18, %v4592_v59  ;;  %v4598_v38 = vcvt.f32.s32 %v4592_v59 }
0x3dd5   :  { %v4594_v30 = vsel %vm4593_vm15, %v4589_v58, inf }
0x3dd6   :  { %4595 = vmin.xlane.f32.xlu0 %v4594_v30  ;;  %v4599_v27 = vshll.u32 %v4598_v38, 16  ;;  %v6463_v30 = vld [vmem:[%s8465_s5] sm:$0xff]  }
0x3e63   :  { %v4596_v43 = vpop.xlane.xlu0 %4595 }
0x3e64   :  { %v4597_v12 = vcvt.f32.s32 %v4596_v43 }
0x3e66   :  { %v4600_v25 = vadd.s32 %v4599_v27, %v4597_v12  ;;  %v6465_v27 = vld [vmem:[%s8445_s17] sm:$0xff]  }
0x3e68   :  { %vm4601_vm3 = vcmp.eq.s32.totalorder %v6851_v22, %v4600_v25  ;;  %v6462_v22 = vld [vmem:[%s8443_s15 + $0x8] sm:$0xff]  }
0x3e69   :  { %v5396_v2 = vsel %vm4601_vm3, 1.0, %v8367_v36 }
0x3e6a   :  { %v4636_v45 = vsel %vm4635_vm2, %v5405_v42, %v5396_v2 }
0x3e6b   :  { %v4637_v51 = vpack.c.bf16 %v4636_v45, %v4636_v45 }
0x3e6d   :  { %6298 = vmatmul.mubr.bf16.vlgmr.msra.gmra.mrb[160].mxu1 %v4637_v51 }
0x3e6e   :  { %6335 = vmatprep.mubr.msk.bf16.mxu1 %vm6653_vm0, %v8367_v36  ;;  %6332 = vmatpush3.bf16.msra.mxu1 %v6465_v27 }
0x3e6f   :  { %6333 = vmatprep.subr.bf16.mxu1 %v8367_v36 }
0x3e72   :  { %6334 = vmatpush3.bf16.msra.mxu1 %v6466_v49 }
0x3f40   :  { %v4736_v3 = vpop.f32.mrb[160].mxu1 }
0x3f41   :  { %v4742_v54 = vpack.c.bf16 %v4736_v3, %v4736_v3  ;;  %v6299_v32 = vpop.f32.mrb[161].mxu1 }
0x3f42   :  { %v4739_v5 = vpop.f32.mrb[162].mxu1 }
0x3f43   :  { %v6300_v57 = vpop.f32.mrb[163].mxu1  ;;  %6312 = vmatmul.mubr.msk.bf16.vlgmr.msra.gmra.mrb[84].mxu0 %vm301_vm11, %v4742_v54 }
0x3f44   :  { %6316 = vmatpush3.bf16.msra.mxu0 %v6461_v23  ;;  %6319 = vmatprep.mubr.msk.bf16.mxu0 %vm6653_vm0, %v8367_v36 }
0x3f45   :  { %6317 = vmatprep.subr.bf16.mxu0 %v8367_v36 }
0x3f48   :  { %6318 = vmatpush3.bf16.msra.mxu0 %v6462_v22 }
0x3f49   :  { %6323 = vmatprep.subr.bf16.mxu0 %v8367_v36 }
0x3f4b   :  { %6320 = vmatmul.mubr.msk.bf16.vlgmr.msra.gmra.mrb[88].mxu0 %vm251_vm10, %v8291_v7 }
0x3f4c   :  { %6327 = vmatprep.mubr.msk.bf16.mxu0 %vm6653_vm0, %v8367_v36  ;;  %6324 = vmatpush3.bf16.msra.mxu0 %v6463_v30 }
0x3f4d   :  { %6325 = vmatprep.subr.bf16.mxu0 %v8367_v36 }
0x3f50   :  { %6326 = vmatpush3.bf16.msra.mxu0 %v6464_v1 }
0x4016   :  { %v4844_v6 = vpop.f32.mrb[84].mxu0 }
0x4017   :  { %v4845_v50 = vadd.f32 %v4844_v6, %v8311_v47  ;;  %v6313_v9 = vpop.f32.mrb[85].mxu0 }
0x4018   :  { %v4847_v46 = vpop.f32.mrb[86].mxu0 }
0x4019   :  { %v4857_v10 = vadd.f32 %v8088_v55, %v4845_v50  ;;  %v6314_v11 = vpop.f32.mrb[87].mxu0 }
0x401b   :  { %v4858_v29 = vmul.f32 0.5, %v4857_v10 }
0x401d   :  { %v4859_v17 = vsel %vm6932_vm14, %v4857_v10, %v4858_v29 }
0x401e   :  { %6555 = vtanh.f32 %v4859_v17  ;;  %v4936_v18 = vpop.f32.mrb[88].mxu0 }
0x401f   :  { %v6321_v0 = vpop.f32.mrb[89].mxu0 }
0x4020   :  { %v4939_v15 = vpop.f32.mrb[90].mxu0 }
0x4021   :  { %v6322_v7 = vpop.f32.mrb[91].mxu0 }
0x4028   :  { %v6556_v13 = vpop.eup %6555 }
0x4029   :  { %v4861_v53 = vmul.f32 0.5, %v6556_v13 }
0x402b   :  { %v4862_v31 = vadd.f32 0.5, %v4861_v53 }
0x402d   :  { %v4863_v47 = vsel %vm6932_vm14, %v6556_v13, %v4862_v31 }
0x402e   :  { %4866 = vrot.lane.b32.xlu0 %v4863_v47, %s6650_s23  ;;  %v4864_v28 = vmul.f32 %v4863_v47, %v8251_v44 }
0x40a0   :  { %v4867_v56 = vpop.permute.xlu0 %4866 }
0x40a1   :  { %v4869_v55 = vmul.f32 %v4867_v56, %v4863_v47 }
0x40a3   :  { %4871 = vrot.lane.b32.xlu1 %v4869_v55, %s6656_s26 }
0x4115   :  { %v4872_v58 = vpop.permute.xlu1 %4871 }
0x4116   :  { %v4874_v59 = vadd.f32 %v4872_v58, %v4864_v28 }
0x4118   :  { %6557 = vtanh.f32 %v4874_v59 }
0x4122   :  { %v6558_v20 = vpop.eup %6557 }
0x4123   :  { %4877 = vrot.lane.b32.xlu1 %v6558_v20, %s6650_s23 }
0x4195   :  { %v4878_v19 = vpop.permute.xlu1 %4877 }
0x4196   :  { %v4880_v44 = vmul.f32 %v4878_v19, %v4863_v47 }
0x4198   :  { %v4881_v61 = vpack.c.bf16 %v4880_v44, %v4880_v44 }
0x419a   :  { %4943 = vrot.lane.b32.xlu0 %v4881_v61, %s6656_s26 }
0x420c   :  { %v4944_v62 = vpop.permute.xlu0 %4943 }
0x420d   :  { %6328 = vmatmul.mubr.msk.bf16.vlgmr.msra.gmra.mrb[92].mxu0 %vm251_vm10, %v4944_v62 }
0x42e0   :  { %v4994_v4 = vpop.f32.mrb[92].mxu0 }
0x42e1   :  { %v4995_v21 = vadd.f32 %v4994_v4, %v4936_v18  ;;  %v6329_v48 = vpop.f32.mrb[93].mxu0 }
0x42e2   :  { %v4997_v24 = vpop.f32.mrb[94].mxu0 }
0x42e3   :  { %v5007_v26 = vadd.f32 %v8118_v63, %v4995_v21  ;;  %v6330_v60 = vpop.f32.mrb[95].mxu0 }
0x42e5   :  { %v5008_v33 = vmul.f32 0.5, %v5007_v26 }
0x42e7   :  { %v5009_v16 = vsel %vm6932_vm14, %v5007_v26, %v5008_v33 }
0x42e8   :  { %6559 = vtanh.f32 %v5009_v16 }
0x42f2   :  { %v6560_v34 = vpop.eup %6559 }
0x42f3   :  { %v5011_v35 = vmul.f32 0.5, %v6560_v34 }
0x42f5   :  { %v5012_v37 = vadd.f32 0.5, %v5011_v35 }
0x42f7   :  { %v5013_v14 = vsel %vm6932_vm14, %v6560_v34, %v5012_v37 }
0x42f8   :  { %5016 = vrot.lane.b32.xlu1 %v5013_v14, %s6650_s23  ;;  %v5014_v63 = vmul.f32 %v5013_v14, %v8275_v41 }
0x436a   :  { %v5017_v8 = vpop.permute.xlu1 %5016 }
0x436b   :  { %v5019_v38 = vmul.f32 %v5017_v8, %v5013_v14 }
0x436d   :  { %5021 = vrot.lane.b32.xlu0 %v5019_v38, %s6656_s26 }
0x43df   :  { %v5022_v39 = vpop.permute.xlu0 %5021 }
0x43e0   :  { %v5024_v43 = vadd.f32 %v5022_v39, %v5014_v63 }
0x43e2   :  { %6561 = vtanh.f32 %v5024_v43 }
0x43ec   :  { %v6562_v12 = vpop.eup %6561 }
0x43ed   :  { %5027 = vrot.lane.b32.xlu1 %v6562_v12, %s6650_s23 }
0x445f   :  { %v5028_v40 = vpop.permute.xlu1 %5027 }
0x4460   :  { %v5030_v41 = vmul.f32 %v5028_v40, %v5013_v14 }
0x4462   :  { %v5031_v25 = vpack.c.bf16 %v5030_v41, %v5030_v41 }
0x4464   :  { %5044 = vrot.lane.b32.xlu0 %v5031_v25, %s6656_s26 }
0x44d6   :  { %v5045_v42 = vpop.permute.xlu0 %5044 }
0x44d7   :  { %6336 = vmatmul.mubr.msk.bf16.vlgmr.msra.gmra.mrb[164].mxu1 %vm251_vm10, %v5045_v42 }
0x45aa   :  { %v5095_v2 = vpop.f32.mrb[164].mxu1 }
0x45ab   :  { %v5096_v45 = vadd.f32 %v8161_v52, %v5095_v2  ;;  %v6337_v51 = vpop.f32.mrb[165].mxu1 }
0x45ac   :  { %v5098_v3 = vpop.f32.mrb[166].mxu1 }
0x45ad   :  { %5432 = vst [vmem:[%s8447_s19 + $0x30] sm:$0xff] %v5096_v45  ;;  %v6338_v36 = vpop.f32.mrb[167].mxu1 }
0x45ae   :  { %5107 = vsyncpa [#allocation7], 1 }

</bundles_post_ra>
